<compile_context>
chip_gen: v5e
topology: v5e:2x2
jax: 0.10.0
libtpu: 0.0.40
codegen_flags: <defaults>
</compile_context>

<pallas_src>
import math

import jax
import jax.numpy as jnp
from jax import lax
from jax.experimental import pallas as pl
from jax.experimental.pallas import tpu as pltpu  # noqa: F401  (kept for clarity)

# ----------------------------- small config (consistent with the module) -----
D_MODEL = 32          # d_model (must be divisible by nhead=8)
NHEAD = 8
HEAD_DIM = D_MODEL // NHEAD
DIM_FF = 64           # dim_feedforward (small)
NUM_IMG_TEXT_LAYERS = 6
NUM_FEATURE_LEVELS = 4  # level_embed rows (module default); we feed 2 levels below
TEXT_HIDDEN = 48      # stand-in for roberta hidden_size
NUM_QUERIES = 8
TEXT_LEN = 6
BS = 2


# ----------------------------- shared helpers --------------------------------
def _dotT(a, b):
    # (M, K) x (N, K) -> (M, N)  ==  a @ b.T, contracting last dims
    return lax.dot_general(a, b, (((1,), (1,)), ((), ())),
                           preferred_element_type=jnp.float32)


def _ln(x, g, b, eps):
    mu = jnp.mean(x, axis=-1, keepdims=True)
    var = jnp.mean((x - mu) ** 2, axis=-1, keepdims=True)
    return (x - mu) * lax.rsqrt(var + eps) * g + b


# ----------------------------- the fused Pallas kernel ------------------------
def fused_img_text_kernel(x_ref, addmask_ref, headmask_ref, seg_ref, rep_ref,
                          w_attn_ref, w_ffn_ref, b_attn_ref, b1_ref, o_ref):
    """All 6 ImageTextTransformerLayer's (forward_post, pos=None), both batch items,
    in one kernel invocation.  All weights + activations stay VMEM-resident.

    x_ref:        (bs*Lp, E)        batch-folded tokens; pad rows fully masked as keys
    addmask_ref:  (bs*Lp, H*bs*Lp)  additive mask (key padding + cross-batch), col = h*32+row
    headmask_ref: (H*bs*Lp, E)      1 where column's head owns the E-dim slot, else 0
    seg_ref:      (H*bs*Lp, H)      segment-ones matrix (per-head softmax denominators)
    rep_ref:      (H, E)            head -> E replication matrix (broadcast 1/denominator)
    w_attn_ref:   (NL, 4E, E)       [Wq*scale; Wk; Wv; Wo]  (PyTorch weight layouts)
    w_ffn_ref:    (NL, 2FF, E)      [W1; W2^T]
    b_attn_ref:   (NL, 16, E)       rows: bq*scale, bk, bv, bo, b2, g1, beta1, g2, beta2
    b1_ref:       (NL, 1, FF)       linear1 bias
    o_ref:        (NL, bs*Lp, E)    every layer's output (return_intermediate semantics)
    """
    n_layers = w_attn_ref.shape[0]
    E = x_ref.shape[1]
    FF = b1_ref.shape[-1]

    x = x_ref[...]                    # (32, 32), carried across layers in VMEM/vregs
    amask = addmask_ref[...]          # hoisted constants (loaded once, reused 6x)
    hm = headmask_ref[...]
    seg = seg_ref[...]
    rep = rep_ref[...]

    for l in range(n_layers):
        w = w_attn_ref[l]             # (128, 32); sublane slices below are free
        wf = w_ffn_ref[l]             # (128, 32)
        bv = b_attn_ref[l]            # (16, 32)
        bq, bk, bvv = bv[0:1], bv[1:2], bv[2:3]
        bo, b2 = bv[3:4], bv[4:5]
        g1, be1, g2, be2 = bv[5:6], bv[6:7], bv[7:8], bv[8:9]

        # ---- Q/K/V projections (scale already folded into Wq / bq) ----
        q = _dotT(x, w[0:E]) + bq                         # (32, 32)
        k = _dotT(x, w[E:2 * E]) + bk                     # (32, 32)
        v = _dotT(x, w[2 * E:3 * E]) + bvv                # (32, 32)

        # ---- fold heads (and both batch items) onto the lane axis ----
        # column index = h*32 + (b*16 + key); rows of kt/vt carry only head h's dims.
        kt = jnp.concatenate([k] * NHEAD, axis=0) * hm    # (256, 32)
        vt = jnp.concatenate([v] * NHEAD, axis=0) * hm    # (256, 32)

        # one lane-dense score matmul for all heads & both batches, contraction E=32
        s = _dotT(q, kt) + amask                          # (32, 256)
        # per-row GLOBAL max: per-segment softmax is shift-invariant, so this equals
        # per-head softmax exactly (masked cols are -1e9 and underflow to 0).
        s = s - jnp.max(s, axis=-1, keepdims=True)
        p = jnp.exp(s)                                    # (32, 256)

        # per-(row, head) denominators via block-ones matmul (MXU), tiny reciprocal,
        # then replicate back over each head's 4 output dims with another tiny matmul.
        den = jnp.dot(p, seg, preferred_element_type=jnp.float32)      # (32, 8)
        inv = pl.reciprocal(den, approx=True)                          # EUP slot
        inv_e = jnp.dot(inv, rep, preferred_element_type=jnp.float32)  # (32, 32)

        # P @ Vt: output columns are already the concatenated heads
        attn = jnp.dot(p, vt, preferred_element_type=jnp.float32) * inv_e   # (32, 32)
        attn = _dotT(attn, w[3 * E:4 * E]) + bo           # dense out-projection (Wo^T)

        # residual + norm1 (dropout1 -> identity, eval mode)
        y = _ln(x + attn, g1, be1, 1e-5)
        # FFN: linear1 -> relu -> linear2 (dropouts -> identity)
        f = jnp.maximum(_dotT(y, wf[0:FF]) + b1_ref[l], 0.0)            # (32, 64)
        f = jnp.dot(f, wf[FF:2 * FF], preferred_element_type=jnp.float32) + b2
        # residual + norm2
        x = _ln(y + f, g2, be2, 1e-5)
        o_ref[l] = x                                       # return_intermediate=True


# ----------------------------- pallas_call wrapper -----------------------------
def _full_spec(a):
    return pl.BlockSpec(a.shape, lambda i, nd=a.ndim: (0,) * nd)


def _attention_constants(bs, Lp, key_pad_mask_padded):
    """Block-structure constants, built once in the wrapper (hoisted out of kernel)."""
    L2 = bs * Lp                              # 32 folded rows
    C = NHEAD * L2                            # 256 score columns
    key_valid = (~key_pad_mask_padded).astype(jnp.float32).reshape(L2)     # (32,)
    batch_id = jnp.arange(L2) // Lp
    same_batch = (batch_id[:, None] == batch_id[None, :]).astype(jnp.float32)
    allowed = same_batch * key_valid[None, :]                              # (32, 32)
    addmask32 = jnp.where(allowed > 0, 0.0, -1e9).astype(jnp.float32)
    addmask = jnp.tile(addmask32, (1, NHEAD))                              # (32, 256)

    c_head = jnp.arange(C) // L2                                           # column -> head
    d_head = jnp.arange(D_MODEL) // HEAD_DIM                               # dim    -> head
    headmask = (c_head[:, None] == d_head[None, :]).astype(jnp.float32)    # (256, 32)
    seg = (c_head[:, None] == jnp.arange(NHEAD)[None, :]).astype(jnp.float32)  # (256, 8)
    rep = (jnp.arange(NHEAD)[:, None] == d_head[None, :]).astype(jnp.float32)  # (8, 32)
    return addmask, headmask, seg, rep


def img_text_stack(hs_cat_lbe, key_pad_mask_bl, params):
    """hs_cat_lbe: (L, bs, E) sequence-first; key_pad_mask_bl: (bs, L) bool (True=pad).
    Returns (NUM_IMG_TEXT_LAYERS, bs, L, E): every layer's output."""
    L, bs, E = hs_cat_lbe.shape
    Lp = ((L + 7) // 8) * 8     # pad seq so per-batch row blocks are sublane-aligned
    x = jnp.transpose(hs_cat_lbe, (1, 0, 2))                              # (bs, L, E)
    x = jnp.pad(x, ((0, 0), (0, Lp - L), (0, 0))).reshape(bs * Lp, E).astype(jnp.float32)
    padmask = jnp.pad(key_pad_mask_bl, ((0, 0), (0, Lp - L)), constant_values=True)
    addmask, headmask, seg, rep = _attention_constants(bs, Lp, padmask)

    args = (x, addmask, headmask, seg, rep,
            params['w_attn'], params['w_ffn'], params['b_attn'], params['b1'])
    out = pl.pallas_call(
        fused_img_text_kernel,
        grid=(1,),
        in_specs=[_full_spec(a) for a in args],
        out_specs=pl.BlockSpec((NUM_IMG_TEXT_LAYERS, bs * Lp, E), lambda i: (0, 0, 0)),
        out_shape=jax.ShapeDtypeStruct((NUM_IMG_TEXT_LAYERS, bs * Lp, E), jnp.float32),
        cost_estimate=pl.CostEstimate(flops=11_000_000, transcendentals=52_000,
                                      bytes_accessed=320_000),
    )(*args)
    # drop pad rows, back to (num_layers, bs, L, E)
    return out.reshape(NUM_IMG_TEXT_LAYERS, bs, Lp, E)[:, :, :L, :]


# ----------------------------- plain-JAX glue ---------------------------------
def feature_resizer(x, params):
    # FeatureResizer: Linear(text_hidden -> d_model) + LayerNorm(eps=1e-12); dropout=id.
    # Tiny (S*bs, 48)@(48, 32): cheaper as plain jnp than a pallas_call launch.
    y = x @ params['resizer_w'].T + params['resizer_b']
    return _ln(y, params['resizer_g'], params['resizer_beta'], 1e-12)


def get_valid_ratio(mask):
    _, H, W = mask.shape
    valid_H = jnp.sum(~mask[:, :, 0], axis=1)
    valid_W = jnp.sum(~mask[:, 0, :], axis=1)
    return jnp.stack([valid_W / W, valid_H / H], axis=-1).astype(jnp.float32)


def deformable_transformer_forward(params, srcs, masks, pos_embeds, query_embed,
                                   text_last_hidden, text_attention_mask):
    # ================= Phase 1: encode_and_save=True =================
    # TODO(synk): RobertaTokenizerFast / RobertaModel (HF text encoder) have no Pallas
    # equivalent; `text_last_hidden` stands in for encoded_text.last_hidden_state.
    text_memory = jnp.transpose(text_last_hidden, (1, 0, 2))      # (S, bs, hidden)
    text_memory_resized = feature_resizer(text_memory, params)    # (S, bs, d_model)

    src_flatten, mask_flatten, lvl_pos_flat, spatial_shapes = [], [], [], []
    for lvl, (src, mask, pos) in enumerate(zip(srcs, masks, pos_embeds)):
        bs, c, h, w = src.shape
        spatial_shapes.append((h, w))
        src_flatten.append(jnp.transpose(src.reshape(bs, c, h * w), (0, 2, 1)))
        mask_flatten.append(mask.reshape(bs, h * w))
        pos_f = jnp.transpose(pos.reshape(bs, c, h * w), (0, 2, 1))
        lvl_pos_flat.append(pos_f + params['level_embed'][lvl][None, None, :])
    src_flatten = jnp.concatenate(src_flatten, axis=1)
    mask_flatten = jnp.concatenate(mask_flatten, axis=1)
    lvl_pos_flat = jnp.concatenate(lvl_pos_flat, axis=1)
    spatial_shapes_arr = jnp.asarray(spatial_shapes, dtype=jnp.int32)
    level_start_index = jnp.concatenate(
        [jnp.zeros((1,), jnp.int32),
         jnp.cumsum(jnp.prod(spatial_shapes_arr, axis=1))[:-1]])
    valid_ratios = jnp.stack([get_valid_ratio(m) for m in masks], axis=1)

    # TODO(synk): DeformableTransformerEncoder is built on MSDeformAttn (custom
    # deformable-sampling op, not provided); img_memory is the flattened src unchanged.
    img_memory = src_flatten
    del mask_flatten, lvl_pos_flat, level_start_index, valid_ratios  # (memory_cache fields)

    # ================= Phase 2: encode_and_save=False =================
    bs, _, c = img_memory.shape
    q_emb, tgt = query_embed[:, :c], query_embed[:, c:]
    q_emb = jnp.broadcast_to(q_emb[None], (bs,) + q_emb.shape)
    tgt = jnp.broadcast_to(tgt[None], (bs,) + tgt.shape)
    # reference_points: tiny (bs*nq, c)@(c, 2) + sigmoid — plain jnp (launch > math).
    ref_pts = jax.nn.sigmoid(q_emb @ params['ref_w'].T + params['ref_b'])  # (bs, nq, 2)
    init_reference_out = ref_pts

    # TODO(synk): DeformableTransformerDecoder uses MSDeformAttn (not provided);
    # decoder output is stood in by `tgt`, inter_references by the initial ref points.
    hs = tgt                                    # (bs, num_q, c)
    inter_references = ref_pts

    n_text = text_memory_resized.shape[0]
    hs_mask = jnp.zeros((bs, hs.shape[1]), dtype=bool)
    hs_cat = jnp.concatenate([jnp.transpose(hs, (1, 0, 2)), text_memory_resized], axis=0)
    hs_mask = jnp.concatenate([hs_mask, text_attention_mask], axis=1)   # (bs, L)

    # img_text_attn: 6 layers x 2 batch items in ONE fused Pallas call
    layer_outs = img_text_stack(hs_cat, hs_mask, params)   # (6, bs, L, E)

    hs_stack = layer_outs[:, :, :NUM_QUERIES, :]                        # (6, bs, nq, E)
    text_dec = jnp.transpose(
        layer_outs[:, :, NUM_QUERIES:NUM_QUERIES + n_text, :], (0, 2, 1, 3))  # (6, S, bs, E)
    inter_refs_out = jnp.broadcast_to(
        inter_references[None], (NUM_IMG_TEXT_LAYERS,) + inter_references.shape)
    return hs_stack, init_reference_out, inter_refs_out, text_dec


# ----------------------------- deterministic parameter init -------------------
def init_params(key):
    keys = iter(jax.random.split(key, 256))

    def xavier(shape):
        a = math.sqrt(6.0 / (shape[-1] + shape[0]))
        return jax.random.uniform(next(keys), shape, jnp.float32, -a, a)

    scale = 1.0 / math.sqrt(HEAD_DIM)
    p = {}
    p['level_embed'] = jax.random.normal(next(keys), (NUM_FEATURE_LEVELS, D_MODEL),
                                         jnp.float32)
    # FeatureResizer(hidden -> d_model) + LayerNorm(eps=1e-12)
    p['resizer_w'] = xavier((D_MODEL, TEXT_HIDDEN))
    p['resizer_b'] = jnp.zeros((D_MODEL,), jnp.float32)
    p['resizer_g'] = jnp.ones((D_MODEL,), jnp.float32)
    p['resizer_beta'] = jnp.zeros((D_MODEL,), jnp.float32)
    # reference_points: Linear(d_model, 2), bias=0
    p['ref_w'] = xavier((2, D_MODEL))
    p['ref_b'] = jnp.zeros((2,), jnp.float32)

    # ---- packed per-layer slabs for the fused img_text kernel ----
    w_attn, w_ffn, b_attn, b1s = [], [], [], []
    for _ in range(NUM_IMG_TEXT_LAYERS):
        in_proj = xavier((3 * D_MODEL, D_MODEL))                      # [Wq; Wk; Wv]
        wo = xavier((D_MODEL, D_MODEL))                               # out_proj.weight
        w1 = xavier((DIM_FF, D_MODEL))                                # linear1.weight
        w2 = xavier((D_MODEL, DIM_FF))                                # linear2.weight
        # 1/sqrt(head_dim) folded into Wq (and bq, zero here) at packing time.
        w_attn.append(jnp.concatenate(
            [in_proj[:D_MODEL] * scale, in_proj[D_MODEL:], wo], axis=0))   # (128, 32)
        w_ffn.append(jnp.concatenate([w1, w2.T], axis=0))                  # (128, 32)
        b = jnp.zeros((16, D_MODEL), jnp.float32)
        # rows: 0 bq*scale, 1 bk, 2 bv, 3 bo, 4 b2, 5 g1, 6 beta1, 7 g2, 8 beta2
        b = b.at[5].set(1.0).at[7].set(1.0)
        b_attn.append(b)
        b1s.append(jnp.zeros((1, DIM_FF), jnp.float32))
    p['w_attn'] = jnp.stack(w_attn)        # (6, 128, 32)
    p['w_ffn'] = jnp.stack(w_ffn)          # (6, 128, 32)
    p['b_attn'] = jnp.stack(b_attn)        # (6, 16, 32)
    p['b1'] = jnp.stack(b1s)               # (6, 1, 64)
    return p


# ----------------------------- demo -------------------------------------------
if __name__ == "__main__":
    key = jax.random.PRNGKey(0)
    k_param, k_s0, k_s1, k_p0, k_p1, k_q, k_t = jax.random.split(key, 7)
    params = init_params(k_param)

    # two feature levels, NCHW like PyTorch
    srcs = [jax.random.normal(k_s0, (BS, D_MODEL, 8, 8), jnp.float32),
            jax.random.normal(k_s1, (BS, D_MODEL, 4, 4), jnp.float32)]
    pos_embeds = [jax.random.normal(k_p0, (BS, D_MODEL, 8, 8), jnp.float32),
                  jax.random.normal(k_p1, (BS, D_MODEL, 4, 4), jnp.float32)]
    # padding masks (True = padded); batch item 1 has one padded row/col per level
    masks = []
    for h, w in [(8, 8), (4, 4)]:
        m = jnp.zeros((BS, h, w), dtype=bool)
        m = m.at[1, h - 1, :].set(True).at[1, :, w - 1].set(True)
        masks.append(m)

    query_embed = jax.random.normal(k_q, (NUM_QUERIES, 2 * D_MODEL), jnp.float32)
    text_last_hidden = jax.random.normal(k_t, (BS, TEXT_LEN, TEXT_HIDDEN), jnp.float32)
    text_attention_mask = jnp.zeros((BS, TEXT_LEN), dtype=bool).at[1, TEXT_LEN - 1].set(True)

    fwd = jax.jit(deformable_transformer_forward)
    out = fwd(params, srcs, masks, pos_embeds, query_embed,
              text_last_hidden, text_attention_mask)
    jax.block_until_ready(out)
    hs, init_ref, inter_refs, text_dec = out
    assert hs.shape == (NUM_IMG_TEXT_LAYERS, BS, NUM_QUERIES, D_MODEL)
    assert init_ref.shape == (BS, NUM_QUERIES, 2)
    assert inter_refs.shape == (NUM_IMG_TEXT_LAYERS, BS, NUM_QUERIES, 2)
    assert text_dec.shape == (NUM_IMG_TEXT_LAYERS, TEXT_LEN, BS, D_MODEL)
    assert bool(jnp.all(jnp.isfinite(hs))) and bool(jnp.all(jnp.isfinite(text_dec)))
    print("KERNEL_OK")
</pallas_src>

<mosaic_0001>
module attributes {stable_mosaic.version = 11 : i64} {
  func.func @fused_img_text_kernel(%arg0: i32, %arg1: memref<32x32xf32, #tpu.memory_space<vmem>>, %arg2: memref<32x256xf32, #tpu.memory_space<vmem>>, %arg3: memref<256x32xf32, #tpu.memory_space<vmem>>, %arg4: memref<256x8xf32, #tpu.memory_space<vmem>>, %arg5: memref<8x32xf32, #tpu.memory_space<vmem>>, %arg6: memref<6x128x32xf32, #tpu.memory_space<vmem>>, %arg7: memref<6x128x32xf32, #tpu.memory_space<vmem>>, %arg8: memref<6x16x32xf32, #tpu.memory_space<vmem>>, %arg9: memref<6x1x64xf32, #tpu.memory_space<vmem>>, %arg10: memref<6x32x32xf32, #tpu.memory_space<vmem>>) attributes {dimension_semantics = [#tpu.dimension_semantics<arbitrary>], iteration_bounds = array<i64: 1>, scalar_prefetch = 0 : i64, scratch_operands = 0 : i64, tpu.core_type = #tpu.core_type<tc>, window_params = [{pipeline_mode = #tpu.pipeline_mode<synchronous>, transform_indices = @transform_0, window_bounds = array<i64: 32, 32>}, {pipeline_mode = #tpu.pipeline_mode<synchronous>, transform_indices = @transform_1, window_bounds = array<i64: 32, 256>}, {pipeline_mode = #tpu.pipeline_mode<synchronous>, transform_indices = @transform_2, window_bounds = array<i64: 256, 32>}, {pipeline_mode = #tpu.pipeline_mode<synchronous>, transform_indices = @transform_3, window_bounds = array<i64: 256, 8>}, {pipeline_mode = #tpu.pipeline_mode<synchronous>, transform_indices = @transform_4, window_bounds = array<i64: 8, 32>}, {pipeline_mode = #tpu.pipeline_mode<synchronous>, transform_indices = @transform_5, window_bounds = array<i64: 6, 128, 32>}, {pipeline_mode = #tpu.pipeline_mode<synchronous>, transform_indices = @transform_6, window_bounds = array<i64: 6, 128, 32>}, {pipeline_mode = #tpu.pipeline_mode<synchronous>, transform_indices = @transform_7, window_bounds = array<i64: 6, 16, 32>}, {pipeline_mode = #tpu.pipeline_mode<synchronous>, transform_indices = @transform_8, window_bounds = array<i64: 6, 1, 64>}, {pipeline_mode = #tpu.pipeline_mode<synchronous>, transform_indices = @transform_9, window_bounds = array<i64: 6, 32, 32>}]} {
    %c0 = arith.constant 0 : index
    %c0_0 = arith.constant 0 : index
    %0 = vector.load %arg1[%c0, %c0_0] : memref<32x32xf32, #tpu.memory_space<vmem>>, vector<32x32xf32>
    %c0_1 = arith.constant 0 : index
    %c0_2 = arith.constant 0 : index
    %1 = vector.load %arg2[%c0_1, %c0_2] : memref<32x256xf32, #tpu.memory_space<vmem>>, vector<32x256xf32>
    %c0_3 = arith.constant 0 : index
    %c0_4 = arith.constant 0 : index
    %2 = vector.load %arg3[%c0_3, %c0_4] : memref<256x32xf32, #tpu.memory_space<vmem>>, vector<256x32xf32>
    %c0_5 = arith.constant 0 : index
    %c0_6 = arith.constant 0 : index
    %3 = vector.load %arg4[%c0_5, %c0_6] : memref<256x8xf32, #tpu.memory_space<vmem>>, vector<256x8xf32>
    %c0_7 = arith.constant 0 : index
    %c0_8 = arith.constant 0 : index
    %4 = vector.load %arg5[%c0_7, %c0_8] : memref<8x32xf32, #tpu.memory_space<vmem>>, vector<8x32xf32>
    %c0_9 = arith.constant 0 : index
    %c0_10 = arith.constant 0 : index
    %c0_11 = arith.constant 0 : index
    %5 = vector.load %arg6[%c0_9, %c0_10, %c0_11] : memref<6x128x32xf32, #tpu.memory_space<vmem>>, vector<1x128x32xf32>
    %6 = vector.shape_cast %5 : vector<1x128x32xf32> to vector<128x32xf32>
    %c0_12 = arith.constant 0 : index
    %c0_13 = arith.constant 0 : index
    %c0_14 = arith.constant 0 : index
    %7 = vector.load %arg7[%c0_12, %c0_13, %c0_14] : memref<6x128x32xf32, #tpu.memory_space<vmem>>, vector<1x128x32xf32>
    %8 = vector.shape_cast %7 : vector<1x128x32xf32> to vector<128x32xf32>
    %c0_15 = arith.constant 0 : index
    %c0_16 = arith.constant 0 : index
    %c0_17 = arith.constant 0 : index
    %9 = vector.load %arg8[%c0_15, %c0_16, %c0_17] : memref<6x16x32xf32, #tpu.memory_space<vmem>>, vector<1x16x32xf32>
    %10 = vector.shape_cast %9 : vector<1x16x32xf32> to vector<16x32xf32>
    %11 = vector.extract_strided_slice %10 {offsets = [0, 0], sizes = [1, 32], strides = [1, 1]} : vector<16x32xf32> to vector<1x32xf32>
    %12 = vector.extract_strided_slice %10 {offsets = [1, 0], sizes = [1, 32], strides = [1, 1]} : vector<16x32xf32> to vector<1x32xf32>
    %13 = vector.extract_strided_slice %10 {offsets = [2, 0], sizes = [1, 32], strides = [1, 1]} : vector<16x32xf32> to vector<1x32xf32>
    %14 = vector.extract_strided_slice %10 {offsets = [3, 0], sizes = [1, 32], strides = [1, 1]} : vector<16x32xf32> to vector<1x32xf32>
    %15 = vector.extract_strided_slice %10 {offsets = [4, 0], sizes = [1, 32], strides = [1, 1]} : vector<16x32xf32> to vector<1x32xf32>
    %16 = vector.extract_strided_slice %10 {offsets = [5, 0], sizes = [1, 32], strides = [1, 1]} : vector<16x32xf32> to vector<1x32xf32>
    %17 = vector.extract_strided_slice %10 {offsets = [6, 0], sizes = [1, 32], strides = [1, 1]} : vector<16x32xf32> to vector<1x32xf32>
    %18 = vector.extract_strided_slice %10 {offsets = [7, 0], sizes = [1, 32], strides = [1, 1]} : vector<16x32xf32> to vector<1x32xf32>
    %19 = vector.extract_strided_slice %10 {offsets = [8, 0], sizes = [1, 32], strides = [1, 1]} : vector<16x32xf32> to vector<1x32xf32>
    %20 = vector.extract_strided_slice %6 {offsets = [0, 0], sizes = [32, 32], strides = [1, 1]} : vector<128x32xf32> to vector<32x32xf32>
    %cst = arith.constant dense<0.000000e+00> : vector<32x32xf32>
    %21 = tpu.matmul %0, %20, %cst {dimension_numbers = #tpu.dot_dimension_numbers<[1], [1], [0], [0], [0, 0, 1, 0], [], []>} : vector<32x32xf32>, vector<32x32xf32>, vector<32x32xf32> -> vector<32x32xf32>
    %22 = vector.broadcast %11 : vector<1x32xf32> to vector<32x32xf32>
    %23 = arith.addf %21, %22 : vector<32x32xf32>
    %24 = vector.extract_strided_slice %6 {offsets = [32, 0], sizes = [32, 32], strides = [1, 1]} : vector<128x32xf32> to vector<32x32xf32>
    %cst_18 = arith.constant dense<0.000000e+00> : vector<32x32xf32>
    %25 = tpu.matmul %0, %24, %cst_18 {dimension_numbers = #tpu.dot_dimension_numbers<[1], [1], [0], [0], [0, 0, 1, 0], [], []>} : vector<32x32xf32>, vector<32x32xf32>, vector<32x32xf32> -> vector<32x32xf32>
    %26 = vector.broadcast %12 : vector<1x32xf32> to vector<32x32xf32>
    %27 = arith.addf %25, %26 : vector<32x32xf32>
    %28 = vector.extract_strided_slice %6 {offsets = [64, 0], sizes = [32, 32], strides = [1, 1]} : vector<128x32xf32> to vector<32x32xf32>
    %cst_19 = arith.constant dense<0.000000e+00> : vector<32x32xf32>
    %29 = tpu.matmul %0, %28, %cst_19 {dimension_numbers = #tpu.dot_dimension_numbers<[1], [1], [0], [0], [0, 0, 1, 0], [], []>} : vector<32x32xf32>, vector<32x32xf32>, vector<32x32xf32> -> vector<32x32xf32>
    %30 = vector.broadcast %13 : vector<1x32xf32> to vector<32x32xf32>
    %31 = arith.addf %29, %30 : vector<32x32xf32>
    %32 = tpu.concatenate %27, %27, %27, %27, %27, %27, %27, %27 in 0 : vector<32x32xf32>, vector<32x32xf32>, vector<32x32xf32>, vector<32x32xf32>, vector<32x32xf32>, vector<32x32xf32>, vector<32x32xf32>, vector<32x32xf32> -> vector<256x32xf32>
    %33 = arith.mulf %32, %2 : vector<256x32xf32>
    %34 = tpu.concatenate %31, %31, %31, %31, %31, %31, %31, %31 in 0 : vector<32x32xf32>, vector<32x32xf32>, vector<32x32xf32>, vector<32x32xf32>, vector<32x32xf32>, vector<32x32xf32>, vector<32x32xf32>, vector<32x32xf32> -> vector<256x32xf32>
    %35 = arith.mulf %34, %2 : vector<256x32xf32>
    %cst_20 = arith.constant dense<0.000000e+00> : vector<32x256xf32>
    %36 = tpu.matmul %23, %33, %cst_20 {dimension_numbers = #tpu.dot_dimension_numbers<[1], [1], [0], [0], [0, 0, 1, 0], [], []>} : vector<32x32xf32>, vector<256x32xf32>, vector<32x256xf32> -> vector<32x256xf32>
    %37 = arith.addf %36, %1 : vector<32x256xf32>
    %cst_21 = arith.constant dense<0xFF800000> : vector<32xf32>
    %38 = vector.multi_reduction <maximumf>, %37, %cst_21 [1] : vector<32x256xf32> to vector<32xf32>
    %39 = vector.shape_cast %38 : vector<32xf32> to vector<32x1xf32>
    %40 = vector.broadcast %39 : vector<32x1xf32> to vector<32x256xf32>
    %41 = arith.subf %37, %40 : vector<32x256xf32>
    %42 = math.exp %41 : vector<32x256xf32>
    %cst_22 = arith.constant dense<0.000000e+00> : vector<32x8xf32>
    %43 = tpu.matmul %42, %3, %cst_22 {dimension_numbers = #tpu.dot_dimension_numbers<[1], [0], [0], [1], [0, 0, 1, 1], [], []>} : vector<32x256xf32>, vector<256x8xf32>, vector<32x8xf32> -> vector<32x8xf32>
    %44 = tpu.reciprocal %43 {approx = true} : vector<32x8xf32> -> vector<32x8xf32>
    %cst_23 = arith.constant dense<0.000000e+00> : vector<32x32xf32>
    %45 = tpu.matmul %44, %4, %cst_23 {dimension_numbers = #tpu.dot_dimension_numbers<[1], [0], [0], [1], [0, 0, 1, 1], [], []>} : vector<32x8xf32>, vector<8x32xf32>, vector<32x32xf32> -> vector<32x32xf32>
    %cst_24 = arith.constant dense<0.000000e+00> : vector<32x32xf32>
    %46 = tpu.matmul %42, %35, %cst_24 {dimension_numbers = #tpu.dot_dimension_numbers<[1], [0], [0], [1], [0, 0, 1, 1], [], []>} : vector<32x256xf32>, vector<256x32xf32>, vector<32x32xf32> -> vector<32x32xf32>
    %47 = arith.mulf %46, %45 : vector<32x32xf32>
    %48 = vector.extract_strided_slice %6 {offsets = [96, 0], sizes = [32, 32], strides = [1, 1]} : vector<128x32xf32> to vector<32x32xf32>
    %cst_25 = arith.constant dense<0.000000e+00> : vector<32x32xf32>
    %49 = tpu.matmul %47, %48, %cst_25 {dimension_numbers = #tpu.dot_dimension_numbers<[1], [1], [0], [0], [0, 0, 1, 0], [], []>} : vector<32x32xf32>, vector<32x32xf32>, vector<32x32xf32> -> vector<32x32xf32>
    %50 = vector.broadcast %14 : vector<1x32xf32> to vector<32x32xf32>
    %51 = arith.addf %49, %50 : vector<32x32xf32>
    %52 = arith.addf %0, %51 : vector<32x32xf32>
    %cst_26 = arith.constant dense<0.000000e+00> : vector<32xf32>
    %53 = vector.multi_reduction <add>, %52, %cst_26 [1] : vector<32x32xf32> to vector<32xf32>
    %54 = vector.shape_cast %53 : vector<32xf32> to vector<32x1xf32>
    %cst_27 = arith.constant 3.200000e+01 : f32
    %55 = vector.broadcast %cst_27 : f32 to vector<32x1xf32>
    %56 = arith.divf %54, %55 : vector<32x1xf32>
    %57 = vector.broadcast %56 : vector<32x1xf32> to vector<32x32xf32>
    %58 = arith.subf %52, %57 : vector<32x32xf32>
    %59 = arith.mulf %58, %58 : vector<32x32xf32>
    %cst_28 = arith.constant dense<0.000000e+00> : vector<32xf32>
    %60 = vector.multi_reduction <add>, %59, %cst_28 [1] : vector<32x32xf32> to vector<32xf32>
    %61 = vector.shape_cast %60 : vector<32xf32> to vector<32x1xf32>
    %cst_29 = arith.constant 3.200000e+01 : f32
    %62 = vector.broadcast %cst_29 : f32 to vector<32x1xf32>
    %63 = arith.divf %61, %62 : vector<32x1xf32>
    %64 = vector.broadcast %56 : vector<32x1xf32> to vector<32x32xf32>
    %65 = arith.subf %52, %64 : vector<32x32xf32>
    %cst_30 = arith.constant 9.99999974E-6 : f32
    %66 = vector.broadcast %cst_30 : f32 to vector<32x1xf32>
    %67 = arith.addf %63, %66 : vector<32x1xf32>
    %68 = math.rsqrt %67 : vector<32x1xf32>
    %69 = vector.broadcast %68 : vector<32x1xf32> to vector<32x32xf32>
    %70 = arith.mulf %65, %69 : vector<32x32xf32>
    %71 = vector.broadcast %16 : vector<1x32xf32> to vector<32x32xf32>
    %72 = arith.mulf %70, %71 : vector<32x32xf32>
    %73 = vector.broadcast %17 : vector<1x32xf32> to vector<32x32xf32>
    %74 = arith.addf %72, %73 : vector<32x32xf32>
    %75 = vector.extract_strided_slice %8 {offsets = [0, 0], sizes = [64, 32], strides = [1, 1]} : vector<128x32xf32> to vector<64x32xf32>
    %cst_31 = arith.constant dense<0.000000e+00> : vector<32x64xf32>
    %76 = tpu.matmul %74, %75, %cst_31 {dimension_numbers = #tpu.dot_dimension_numbers<[1], [1], [0], [0], [0, 0, 1, 0], [], []>} : vector<32x32xf32>, vector<64x32xf32>, vector<32x64xf32> -> vector<32x64xf32>
    %c0_32 = arith.constant 0 : index
    %c0_33 = arith.constant 0 : index
    %c0_34 = arith.constant 0 : index
    %77 = vector.load %arg9[%c0_32, %c0_33, %c0_34] : memref<6x1x64xf32, #tpu.memory_space<vmem>>, vector<1x1x64xf32>
    %78 = vector.shape_cast %77 : vector<1x1x64xf32> to vector<1x64xf32>
    %79 = vector.broadcast %78 : vector<1x64xf32> to vector<32x64xf32>
    %80 = arith.addf %76, %79 : vector<32x64xf32>
    %cst_35 = arith.constant 0.000000e+00 : f32
    %81 = vector.broadcast %cst_35 : f32 to vector<32x64xf32>
    %82 = arith.maximumf %80, %81 : vector<32x64xf32>
    %83 = vector.extract_strided_slice %8 {offsets = [64, 0], sizes = [64, 32], strides = [1, 1]} : vector<128x32xf32> to vector<64x32xf32>
    %cst_36 = arith.constant dense<0.000000e+00> : vector<32x32xf32>
    %84 = tpu.matmul %82, %83, %cst_36 {dimension_numbers = #tpu.dot_dimension_numbers<[1], [0], [0], [1], [0, 0, 1, 1], [], []>} : vector<32x64xf32>, vector<64x32xf32>, vector<32x32xf32> -> vector<32x32xf32>
    %85 = vector.broadcast %15 : vector<1x32xf32> to vector<32x32xf32>
    %86 = arith.addf %84, %85 : vector<32x32xf32>
    %87 = arith.addf %74, %86 : vector<32x32xf32>
    %cst_37 = arith.constant dense<0.000000e+00> : vector<32xf32>
    %88 = vector.multi_reduction <add>, %87, %cst_37 [1] : vector<32x32xf32> to vector<32xf32>
    %89 = vector.shape_cast %88 : vector<32xf32> to vector<32x1xf32>
    %cst_38 = arith.constant 3.200000e+01 : f32
    %90 = vector.broadcast %cst_38 : f32 to vector<32x1xf32>
    %91 = arith.divf %89, %90 : vector<32x1xf32>
    %92 = vector.broadcast %91 : vector<32x1xf32> to vector<32x32xf32>
    %93 = arith.subf %87, %92 : vector<32x32xf32>
    %94 = arith.mulf %93, %93 : vector<32x32xf32>
    %cst_39 = arith.constant dense<0.000000e+00> : vector<32xf32>
    %95 = vector.multi_reduction <add>, %94, %cst_39 [1] : vector<32x32xf32> to vector<32xf32>
    %96 = vector.shape_cast %95 : vector<32xf32> to vector<32x1xf32>
    %cst_40 = arith.constant 3.200000e+01 : f32
    %97 = vector.broadcast %cst_40 : f32 to vector<32x1xf32>
    %98 = arith.divf %96, %97 : vector<32x1xf32>
    %99 = vector.broadcast %91 : vector<32x1xf32> to vector<32x32xf32>
    %100 = arith.subf %87, %99 : vector<32x32xf32>
    %cst_41 = arith.constant 9.99999974E-6 : f32
    %101 = vector.broadcast %cst_41 : f32 to vector<32x1xf32>
    %102 = arith.addf %98, %101 : vector<32x1xf32>
    %103 = math.rsqrt %102 : vector<32x1xf32>
    %104 = vector.broadcast %103 : vector<32x1xf32> to vector<32x32xf32>
    %105 = arith.mulf %100, %104 : vector<32x32xf32>
    %106 = vector.broadcast %18 : vector<1x32xf32> to vector<32x32xf32>
    %107 = arith.mulf %105, %106 : vector<32x32xf32>
    %108 = vector.broadcast %19 : vector<1x32xf32> to vector<32x32xf32>
    %109 = arith.addf %107, %108 : vector<32x32xf32>
    %c0_42 = arith.constant 0 : index
    %c0_43 = arith.constant 0 : index
    %c0_44 = arith.constant 0 : index
    %110 = vector.load %arg10[%c0_42, %c0_43, %c0_44] : memref<6x32x32xf32, #tpu.memory_space<vmem>>, vector<1x32x32xf32>
    %111 = vector.shape_cast %110 : vector<1x32x32xf32> to vector<32x32xf32>
    %112 = vector.shape_cast %109 : vector<32x32xf32> to vector<1x32x32xf32>
    tpu.vector_store %arg10[%c0_42, %c0_43, %c0_44], %112 {strides = array<i32>} : memref<6x32x32xf32, #tpu.memory_space<vmem>>, vector<1x32x32xf32>,
    %c1 = arith.constant 1 : index
    %c0_45 = arith.constant 0 : index
    %c0_46 = arith.constant 0 : index
    %113 = vector.load %arg6[%c1, %c0_45, %c0_46] : memref<6x128x32xf32, #tpu.memory_space<vmem>>, vector<1x128x32xf32>
    %114 = vector.shape_cast %113 : vector<1x128x32xf32> to vector<128x32xf32>
    %c1_47 = arith.constant 1 : index
    %c0_48 = arith.constant 0 : index
    %c0_49 = arith.constant 0 : index
    %115 = vector.load %arg7[%c1_47, %c0_48, %c0_49] : memref<6x128x32xf32, #tpu.memory_space<vmem>>, vector<1x128x32xf32>
    %116 = vector.shape_cast %115 : vector<1x128x32xf32> to vector<128x32xf32>
    %c1_50 = arith.constant 1 : index
    %c0_51 = arith.constant 0 : index
    %c0_52 = arith.constant 0 : index
    %117 = vector.load %arg8[%c1_50, %c0_51, %c0_52] : memref<6x16x32xf32, #tpu.memory_space<vmem>>, vector<1x16x32xf32>
    %118 = vector.shape_cast %117 : vector<1x16x32xf32> to vector<16x32xf32>
    %119 = vector.extract_strided_slice %118 {offsets = [0, 0], sizes = [1, 32], strides = [1, 1]} : vector<16x32xf32> to vector<1x32xf32>
    %120 = vector.extract_strided_slice %118 {offsets = [1, 0], sizes = [1, 32], strides = [1, 1]} : vector<16x32xf32> to vector<1x32xf32>
    %121 = vector.extract_strided_slice %118 {offsets = [2, 0], sizes = [1, 32], strides = [1, 1]} : vector<16x32xf32> to vector<1x32xf32>
    %122 = vector.extract_strided_slice %118 {offsets = [3, 0], sizes = [1, 32], strides = [1, 1]} : vector<16x32xf32> to vector<1x32xf32>
    %123 = vector.extract_strided_slice %118 {offsets = [4, 0], sizes = [1, 32], strides = [1, 1]} : vector<16x32xf32> to vector<1x32xf32>
    %124 = vector.extract_strided_slice %118 {offsets = [5, 0], sizes = [1, 32], strides = [1, 1]} : vector<16x32xf32> to vector<1x32xf32>
    %125 = vector.extract_strided_slice %118 {offsets = [6, 0], sizes = [1, 32], strides = [1, 1]} : vector<16x32xf32> to vector<1x32xf32>
    %126 = vector.extract_strided_slice %118 {offsets = [7, 0], sizes = [1, 32], strides = [1, 1]} : vector<16x32xf32> to vector<1x32xf32>
    %127 = vector.extract_strided_slice %118 {offsets = [8, 0], sizes = [1, 32], strides = [1, 1]} : vector<16x32xf32> to vector<1x32xf32>
    %128 = vector.extract_strided_slice %114 {offsets = [0, 0], sizes = [32, 32], strides = [1, 1]} : vector<128x32xf32> to vector<32x32xf32>
    %cst_53 = arith.constant dense<0.000000e+00> : vector<32x32xf32>
    %129 = tpu.matmul %109, %128, %cst_53 {dimension_numbers = #tpu.dot_dimension_numbers<[1], [1], [0], [0], [0, 0, 1, 0], [], []>} : vector<32x32xf32>, vector<32x32xf32>, vector<32x32xf32> -> vector<32x32xf32>
    %130 = vector.broadcast %119 : vector<1x32xf32> to vector<32x32xf32>
    %131 = arith.addf %129, %130 : vector<32x32xf32>
    %132 = vector.extract_strided_slice %114 {offsets = [32, 0], sizes = [32, 32], strides = [1, 1]} : vector<128x32xf32> to vector<32x32xf32>
    %cst_54 = arith.constant dense<0.000000e+00> : vector<32x32xf32>
    %133 = tpu.matmul %109, %132, %cst_54 {dimension_numbers = #tpu.dot_dimension_numbers<[1], [1], [0], [0], [0, 0, 1, 0], [], []>} : vector<32x32xf32>, vector<32x32xf32>, vector<32x32xf32> -> vector<32x32xf32>
    %134 = vector.broadcast %120 : vector<1x32xf32> to vector<32x32xf32>
    %135 = arith.addf %133, %134 : vector<32x32xf32>
    %136 = vector.extract_strided_slice %114 {offsets = [64, 0], sizes = [32, 32], strides = [1, 1]} : vector<128x32xf32> to vector<32x32xf32>
    %cst_55 = arith.constant dense<0.000000e+00> : vector<32x32xf32>
    %137 = tpu.matmul %109, %136, %cst_55 {dimension_numbers = #tpu.dot_dimension_numbers<[1], [1], [0], [0], [0, 0, 1, 0], [], []>} : vector<32x32xf32>, vector<32x32xf32>, vector<32x32xf32> -> vector<32x32xf32>
    %138 = vector.broadcast %121 : vector<1x32xf32> to vector<32x32xf32>
    %139 = arith.addf %137, %138 : vector<32x32xf32>
    %140 = tpu.concatenate %135, %135, %135, %135, %135, %135, %135, %135 in 0 : vector<32x32xf32>, vector<32x32xf32>, vector<32x32xf32>, vector<32x32xf32>, vector<32x32xf32>, vector<32x32xf32>, vector<32x32xf32>, vector<32x32xf32> -> vector<256x32xf32>
    %141 = arith.mulf %140, %2 : vector<256x32xf32>
    %142 = tpu.concatenate %139, %139, %139, %139, %139, %139, %139, %139 in 0 : vector<32x32xf32>, vector<32x32xf32>, vector<32x32xf32>, vector<32x32xf32>, vector<32x32xf32>, vector<32x32xf32>, vector<32x32xf32>, vector<32x32xf32> -> vector<256x32xf32>
    %143 = arith.mulf %142, %2 : vector<256x32xf32>
    %cst_56 = arith.constant dense<0.000000e+00> : vector<32x256xf32>
    %144 = tpu.matmul %131, %141, %cst_56 {dimension_numbers = #tpu.dot_dimension_numbers<[1], [1], [0], [0], [0, 0, 1, 0], [], []>} : vector<32x32xf32>, vector<256x32xf32>, vector<32x256xf32> -> vector<32x256xf32>
    %145 = arith.addf %144, %1 : vector<32x256xf32>
    %cst_57 = arith.constant dense<0xFF800000> : vector<32xf32>
    %146 = vector.multi_reduction <maximumf>, %145, %cst_57 [1] : vector<32x256xf32> to vector<32xf32>
    %147 = vector.shape_cast %146 : vector<32xf32> to vector<32x1xf32>
    %148 = vector.broadcast %147 : vector<32x1xf32> to vector<32x256xf32>
    %149 = arith.subf %145, %148 : vector<32x256xf32>
    %150 = math.exp %149 : vector<32x256xf32>
    %cst_58 = arith.constant dense<0.000000e+00> : vector<32x8xf32>
    %151 = tpu.matmul %150, %3, %cst_58 {dimension_numbers = #tpu.dot_dimension_numbers<[1], [0], [0], [1], [0, 0, 1, 1], [], []>} : vector<32x256xf32>, vector<256x8xf32>, vector<32x8xf32> -> vector<32x8xf32>
    %152 = tpu.reciprocal %151 {approx = true} : vector<32x8xf32> -> vector<32x8xf32>
    %cst_59 = arith.constant dense<0.000000e+00> : vector<32x32xf32>
    %153 = tpu.matmul %152, %4, %cst_59 {dimension_numbers = #tpu.dot_dimension_numbers<[1], [0], [0], [1], [0, 0, 1, 1], [], []>} : vector<32x8xf32>, vector<8x32xf32>, vector<32x32xf32> -> vector<32x32xf32>
    %cst_60 = arith.constant dense<0.000000e+00> : vector<32x32xf32>
    %154 = tpu.matmul %150, %143, %cst_60 {dimension_numbers = #tpu.dot_dimension_numbers<[1], [0], [0], [1], [0, 0, 1, 1], [], []>} : vector<32x256xf32>, vector<256x32xf32>, vector<32x32xf32> -> vector<32x32xf32>
    %155 = arith.mulf %154, %153 : vector<32x32xf32>
    %156 = vector.extract_strided_slice %114 {offsets = [96, 0], sizes = [32, 32], strides = [1, 1]} : vector<128x32xf32> to vector<32x32xf32>
    %cst_61 = arith.constant dense<0.000000e+00> : vector<32x32xf32>
    %157 = tpu.matmul %155, %156, %cst_61 {dimension_numbers = #tpu.dot_dimension_numbers<[1], [1], [0], [0], [0, 0, 1, 0], [], []>} : vector<32x32xf32>, vector<32x32xf32>, vector<32x32xf32> -> vector<32x32xf32>
    %158 = vector.broadcast %122 : vector<1x32xf32> to vector<32x32xf32>
    %159 = arith.addf %157, %158 : vector<32x32xf32>
    %160 = arith.addf %109, %159 : vector<32x32xf32>
    %cst_62 = arith.constant dense<0.000000e+00> : vector<32xf32>
    %161 = vector.multi_reduction <add>, %160, %cst_62 [1] : vector<32x32xf32> to vector<32xf32>
    %162 = vector.shape_cast %161 : vector<32xf32> to vector<32x1xf32>
    %cst_63 = arith.constant 3.200000e+01 : f32
    %163 = vector.broadcast %cst_63 : f32 to vector<32x1xf32>
    %164 = arith.divf %162, %163 : vector<32x1xf32>
    %165 = vector.broadcast %164 : vector<32x1xf32> to vector<32x32xf32>
    %166 = arith.subf %160, %165 : vector<32x32xf32>
    %167 = arith.mulf %166, %166 : vector<32x32xf32>
    %cst_64 = arith.constant dense<0.000000e+00> : vector<32xf32>
    %168 = vector.multi_reduction <add>, %167, %cst_64 [1] : vector<32x32xf32> to vector<32xf32>
    %169 = vector.shape_cast %168 : vector<32xf32> to vector<32x1xf32>
    %cst_65 = arith.constant 3.200000e+01 : f32
    %170 = vector.broadcast %cst_65 : f32 to vector<32x1xf32>
    %171 = arith.divf %169, %170 : vector<32x1xf32>
    %172 = vector.broadcast %164 : vector<32x1xf32> to vector<32x32xf32>
    %173 = arith.subf %160, %172 : vector<32x32xf32>
    %cst_66 = arith.constant 9.99999974E-6 : f32
    %174 = vector.broadcast %cst_66 : f32 to vector<32x1xf32>
    %175 = arith.addf %171, %174 : vector<32x1xf32>
    %176 = math.rsqrt %175 : vector<32x1xf32>
    %177 = vector.broadcast %176 : vector<32x1xf32> to vector<32x32xf32>
    %178 = arith.mulf %173, %177 : vector<32x32xf32>
    %179 = vector.broadcast %124 : vector<1x32xf32> to vector<32x32xf32>
    %180 = arith.mulf %178, %179 : vector<32x32xf32>
    %181 = vector.broadcast %125 : vector<1x32xf32> to vector<32x32xf32>
    %182 = arith.addf %180, %181 : vector<32x32xf32>
    %183 = vector.extract_strided_slice %116 {offsets = [0, 0], sizes = [64, 32], strides = [1, 1]} : vector<128x32xf32> to vector<64x32xf32>
    %cst_67 = arith.constant dense<0.000000e+00> : vector<32x64xf32>
    %184 = tpu.matmul %182, %183, %cst_67 {dimension_numbers = #tpu.dot_dimension_numbers<[1], [1], [0], [0], [0, 0, 1, 0], [], []>} : vector<32x32xf32>, vector<64x32xf32>, vector<32x64xf32> -> vector<32x64xf32>
    %c1_68 = arith.constant 1 : index
    %c0_69 = arith.constant 0 : index
    %c0_70 = arith.constant 0 : index
    %185 = vector.load %arg9[%c1_68, %c0_69, %c0_70] : memref<6x1x64xf32, #tpu.memory_space<vmem>>, vector<1x1x64xf32>
    %186 = vector.shape_cast %185 : vector<1x1x64xf32> to vector<1x64xf32>
    %187 = vector.broadcast %186 : vector<1x64xf32> to vector<32x64xf32>
    %188 = arith.addf %184, %187 : vector<32x64xf32>
    %cst_71 = arith.constant 0.000000e+00 : f32
    %189 = vector.broadcast %cst_71 : f32 to vector<32x64xf32>
    %190 = arith.maximumf %188, %189 : vector<32x64xf32>
    %191 = vector.extract_strided_slice %116 {offsets = [64, 0], sizes = [64, 32], strides = [1, 1]} : vector<128x32xf32> to vector<64x32xf32>
    %cst_72 = arith.constant dense<0.000000e+00> : vector<32x32xf32>
    %192 = tpu.matmul %190, %191, %cst_72 {dimension_numbers = #tpu.dot_dimension_numbers<[1], [0], [0], [1], [0, 0, 1, 1], [], []>} : vector<32x64xf32>, vector<64x32xf32>, vector<32x32xf32> -> vector<32x32xf32>
    %193 = vector.broadcast %123 : vector<1x32xf32> to vector<32x32xf32>
    %194 = arith.addf %192, %193 : vector<32x32xf32>
    %195 = arith.addf %182, %194 : vector<32x32xf32>
    %cst_73 = arith.constant dense<0.000000e+00> : vector<32xf32>
    %196 = vector.multi_reduction <add>, %195, %cst_73 [1] : vector<32x32xf32> to vector<32xf32>
    %197 = vector.shape_cast %196 : vector<32xf32> to vector<32x1xf32>
    %cst_74 = arith.constant 3.200000e+01 : f32
    %198 = vector.broadcast %cst_74 : f32 to vector<32x1xf32>
    %199 = arith.divf %197, %198 : vector<32x1xf32>
    %200 = vector.broadcast %199 : vector<32x1xf32> to vector<32x32xf32>
    %201 = arith.subf %195, %200 : vector<32x32xf32>
    %202 = arith.mulf %201, %201 : vector<32x32xf32>
    %cst_75 = arith.constant dense<0.000000e+00> : vector<32xf32>
    %203 = vector.multi_reduction <add>, %202, %cst_75 [1] : vector<32x32xf32> to vector<32xf32>
    %204 = vector.shape_cast %203 : vector<32xf32> to vector<32x1xf32>
    %cst_76 = arith.constant 3.200000e+01 : f32
    %205 = vector.broadcast %cst_76 : f32 to vector<32x1xf32>
    %206 = arith.divf %204, %205 : vector<32x1xf32>
    %207 = vector.broadcast %199 : vector<32x1xf32> to vector<32x32xf32>
    %208 = arith.subf %195, %207 : vector<32x32xf32>
    %cst_77 = arith.constant 9.99999974E-6 : f32
    %209 = vector.broadcast %cst_77 : f32 to vector<32x1xf32>
    %210 = arith.addf %206, %209 : vector<32x1xf32>
    %211 = math.rsqrt %210 : vector<32x1xf32>
    %212 = vector.broadcast %211 : vector<32x1xf32> to vector<32x32xf32>
    %213 = arith.mulf %208, %212 : vector<32x32xf32>
    %214 = vector.broadcast %126 : vector<1x32xf32> to vector<32x32xf32>
    %215 = arith.mulf %213, %214 : vector<32x32xf32>
    %216 = vector.broadcast %127 : vector<1x32xf32> to vector<32x32xf32>
    %217 = arith.addf %215, %216 : vector<32x32xf32>
    %c1_78 = arith.constant 1 : index
    %c0_79 = arith.constant 0 : index
    %c0_80 = arith.constant 0 : index
    %218 = vector.load %arg10[%c1_78, %c0_79, %c0_80] : memref<6x32x32xf32, #tpu.memory_space<vmem>>, vector<1x32x32xf32>
    %219 = vector.shape_cast %218 : vector<1x32x32xf32> to vector<32x32xf32>
    %220 = vector.shape_cast %217 : vector<32x32xf32> to vector<1x32x32xf32>
    tpu.vector_store %arg10[%c1_78, %c0_79, %c0_80], %220 {strides = array<i32>} : memref<6x32x32xf32, #tpu.memory_space<vmem>>, vector<1x32x32xf32>,
    %c2 = arith.constant 2 : index
    %c0_81 = arith.constant 0 : index
    %c0_82 = arith.constant 0 : index
    %221 = vector.load %arg6[%c2, %c0_81, %c0_82] : memref<6x128x32xf32, #tpu.memory_space<vmem>>, vector<1x128x32xf32>
    %222 = vector.shape_cast %221 : vector<1x128x32xf32> to vector<128x32xf32>
    %c2_83 = arith.constant 2 : index
    %c0_84 = arith.constant 0 : index
    %c0_85 = arith.constant 0 : index
    %223 = vector.load %arg7[%c2_83, %c0_84, %c0_85] : memref<6x128x32xf32, #tpu.memory_space<vmem>>, vector<1x128x32xf32>
    %224 = vector.shape_cast %223 : vector<1x128x32xf32> to vector<128x32xf32>
    %c2_86 = arith.constant 2 : index
    %c0_87 = arith.constant 0 : index
    %c0_88 = arith.constant 0 : index
    %225 = vector.load %arg8[%c2_86, %c0_87, %c0_88] : memref<6x16x32xf32, #tpu.memory_space<vmem>>, vector<1x16x32xf32>
    %226 = vector.shape_cast %225 : vector<1x16x32xf32> to vector<16x32xf32>
    %227 = vector.extract_strided_slice %226 {offsets = [0, 0], sizes = [1, 32], strides = [1, 1]} : vector<16x32xf32> to vector<1x32xf32>
    %228 = vector.extract_strided_slice %226 {offsets = [1, 0], sizes = [1, 32], strides = [1, 1]} : vector<16x32xf32> to vector<1x32xf32>
    %229 = vector.extract_strided_slice %226 {offsets = [2, 0], sizes = [1, 32], strides = [1, 1]} : vector<16x32xf32> to vector<1x32xf32>
    %230 = vector.extract_strided_slice %226 {offsets = [3, 0], sizes = [1, 32], strides = [1, 1]} : vector<16x32xf32> to vector<1x32xf32>
    %231 = vector.extract_strided_slice %226 {offsets = [4, 0], sizes = [1, 32], strides = [1, 1]} : vector<16x32xf32> to vector<1x32xf32>
    %232 = vector.extract_strided_slice %226 {offsets = [5, 0], sizes = [1, 32], strides = [1, 1]} : vector<16x32xf32> to vector<1x32xf32>
    %233 = vector.extract_strided_slice %226 {offsets = [6, 0], sizes = [1, 32], strides = [1, 1]} : vector<16x32xf32> to vector<1x32xf32>
    %234 = vector.extract_strided_slice %226 {offsets = [7, 0], sizes = [1, 32], strides = [1, 1]} : vector<16x32xf32> to vector<1x32xf32>
    %235 = vector.extract_strided_slice %226 {offsets = [8, 0], sizes = [1, 32], strides = [1, 1]} : vector<16x32xf32> to vector<1x32xf32>
    %236 = vector.extract_strided_slice %222 {offsets = [0, 0], sizes = [32, 32], strides = [1, 1]} : vector<128x32xf32> to vector<32x32xf32>
    %cst_89 = arith.constant dense<0.000000e+00> : vector<32x32xf32>
    %237 = tpu.matmul %217, %236, %cst_89 {dimension_numbers = #tpu.dot_dimension_numbers<[1], [1], [0], [0], [0, 0, 1, 0], [], []>} : vector<32x32xf32>, vector<32x32xf32>, vector<32x32xf32> -> vector<32x32xf32>
    %238 = vector.broadcast %227 : vector<1x32xf32> to vector<32x32xf32>
    %239 = arith.addf %237, %238 : vector<32x32xf32>
    %240 = vector.extract_strided_slice %222 {offsets = [32, 0], sizes = [32, 32], strides = [1, 1]} : vector<128x32xf32> to vector<32x32xf32>
    %cst_90 = arith.constant dense<0.000000e+00> : vector<32x32xf32>
    %241 = tpu.matmul %217, %240, %cst_90 {dimension_numbers = #tpu.dot_dimension_numbers<[1], [1], [0], [0], [0, 0, 1, 0], [], []>} : vector<32x32xf32>, vector<32x32xf32>, vector<32x32xf32> -> vector<32x32xf32>
    %242 = vector.broadcast %228 : vector<1x32xf32> to vector<32x32xf32>
    %243 = arith.addf %241, %242 : vector<32x32xf32>
    %244 = vector.extract_strided_slice %222 {offsets = [64, 0], sizes = [32, 32], strides = [1, 1]} : vector<128x32xf32> to vector<32x32xf32>
    %cst_91 = arith.constant dense<0.000000e+00> : vector<32x32xf32>
    %245 = tpu.matmul %217, %244, %cst_91 {dimension_numbers = #tpu.dot_dimension_numbers<[1], [1], [0], [0], [0, 0, 1, 0], [], []>} : vector<32x32xf32>, vector<32x32xf32>, vector<32x32xf32> -> vector<32x32xf32>
    %246 = vector.broadcast %229 : vector<1x32xf32> to vector<32x32xf32>
    %247 = arith.addf %245, %246 : vector<32x32xf32>
    %248 = tpu.concatenate %243, %243, %243, %243, %243, %243, %243, %243 in 0 : vector<32x32xf32>, vector<32x32xf32>, vector<32x32xf32>, vector<32x32xf32>, vector<32x32xf32>, vector<32x32xf32>, vector<32x32xf32>, vector<32x32xf32> -> vector<256x32xf32>
    %249 = arith.mulf %248, %2 : vector<256x32xf32>
    %250 = tpu.concatenate %247, %247, %247, %247, %247, %247, %247, %247 in 0 : vector<32x32xf32>, vector<32x32xf32>, vector<32x32xf32>, vector<32x32xf32>, vector<32x32xf32>, vector<32x32xf32>, vector<32x32xf32>, vector<32x32xf32> -> vector<256x32xf32>
    %251 = arith.mulf %250, %2 : vector<256x32xf32>
    %cst_92 = arith.constant dense<0.000000e+00> : vector<32x256xf32>
    %252 = tpu.matmul %239, %249, %cst_92 {dimension_numbers = #tpu.dot_dimension_numbers<[1], [1], [0], [0], [0, 0, 1, 0], [], []>} : vector<32x32xf32>, vector<256x32xf32>, vector<32x256xf32> -> vector<32x256xf32>
    %253 = arith.addf %252, %1 : vector<32x256xf32>
    %cst_93 = arith.constant dense<0xFF800000> : vector<32xf32>
    %254 = vector.multi_reduction <maximumf>, %253, %cst_93 [1] : vector<32x256xf32> to vector<32xf32>
    %255 = vector.shape_cast %254 : vector<32xf32> to vector<32x1xf32>
    %256 = vector.broadcast %255 : vector<32x1xf32> to vector<32x256xf32>
    %257 = arith.subf %253, %256 : vector<32x256xf32>
    %258 = math.exp %257 : vector<32x256xf32>
    %cst_94 = arith.constant dense<0.000000e+00> : vector<32x8xf32>
    %259 = tpu.matmul %258, %3, %cst_94 {dimension_numbers = #tpu.dot_dimension_numbers<[1], [0], [0], [1], [0, 0, 1, 1], [], []>} : vector<32x256xf32>, vector<256x8xf32>, vector<32x8xf32> -> vector<32x8xf32>
    %260 = tpu.reciprocal %259 {approx = true} : vector<32x8xf32> -> vector<32x8xf32>
    %cst_95 = arith.constant dense<0.000000e+00> : vector<32x32xf32>
    %261 = tpu.matmul %260, %4, %cst_95 {dimension_numbers = #tpu.dot_dimension_numbers<[1], [0], [0], [1], [0, 0, 1, 1], [], []>} : vector<32x8xf32>, vector<8x32xf32>, vector<32x32xf32> -> vector<32x32xf32>
    %cst_96 = arith.constant dense<0.000000e+00> : vector<32x32xf32>
    %262 = tpu.matmul %258, %251, %cst_96 {dimension_numbers = #tpu.dot_dimension_numbers<[1], [0], [0], [1], [0, 0, 1, 1], [], []>} : vector<32x256xf32>, vector<256x32xf32>, vector<32x32xf32> -> vector<32x32xf32>
    %263 = arith.mulf %262, %261 : vector<32x32xf32>
    %264 = vector.extract_strided_slice %222 {offsets = [96, 0], sizes = [32, 32], strides = [1, 1]} : vector<128x32xf32> to vector<32x32xf32>
    %cst_97 = arith.constant dense<0.000000e+00> : vector<32x32xf32>
    %265 = tpu.matmul %263, %264, %cst_97 {dimension_numbers = #tpu.dot_dimension_numbers<[1], [1], [0], [0], [0, 0, 1, 0], [], []>} : vector<32x32xf32>, vector<32x32xf32>, vector<32x32xf32> -> vector<32x32xf32>
    %266 = vector.broadcast %230 : vector<1x32xf32> to vector<32x32xf32>
    %267 = arith.addf %265, %266 : vector<32x32xf32>
    %268 = arith.addf %217, %267 : vector<32x32xf32>
    %cst_98 = arith.constant dense<0.000000e+00> : vector<32xf32>
    %269 = vector.multi_reduction <add>, %268, %cst_98 [1] : vector<32x32xf32> to vector<32xf32>
    %270 = vector.shape_cast %269 : vector<32xf32> to vector<32x1xf32>
    %cst_99 = arith.constant 3.200000e+01 : f32
    %271 = vector.broadcast %cst_99 : f32 to vector<32x1xf32>
    %272 = arith.divf %270, %271 : vector<32x1xf32>
    %273 = vector.broadcast %272 : vector<32x1xf32> to vector<32x32xf32>
    %274 = arith.subf %268, %273 : vector<32x32xf32>
    %275 = arith.mulf %274, %274 : vector<32x32xf32>
    %cst_100 = arith.constant dense<0.000000e+00> : vector<32xf32>
    %276 = vector.multi_reduction <add>, %275, %cst_100 [1] : vector<32x32xf32> to vector<32xf32>
    %277 = vector.shape_cast %276 : vector<32xf32> to vector<32x1xf32>
    %cst_101 = arith.constant 3.200000e+01 : f32
    %278 = vector.broadcast %cst_101 : f32 to vector<32x1xf32>
    %279 = arith.divf %277, %278 : vector<32x1xf32>
    %280 = vector.broadcast %272 : vector<32x1xf32> to vector<32x32xf32>
    %281 = arith.subf %268, %280 : vector<32x32xf32>
    %cst_102 = arith.constant 9.99999974E-6 : f32
    %282 = vector.broadcast %cst_102 : f32 to vector<32x1xf32>
    %283 = arith.addf %279, %282 : vector<32x1xf32>
    %284 = math.rsqrt %283 : vector<32x1xf32>
    %285 = vector.broadcast %284 : vector<32x1xf32> to vector<32x32xf32>
    %286 = arith.mulf %281, %285 : vector<32x32xf32>
    %287 = vector.broadcast %232 : vector<1x32xf32> to vector<32x32xf32>
    %288 = arith.mulf %286, %287 : vector<32x32xf32>
    %289 = vector.broadcast %233 : vector<1x32xf32> to vector<32x32xf32>
    %290 = arith.addf %288, %289 : vector<32x32xf32>
    %291 = vector.extract_strided_slice %224 {offsets = [0, 0], sizes = [64, 32], strides = [1, 1]} : vector<128x32xf32> to vector<64x32xf32>
    %cst_103 = arith.constant dense<0.000000e+00> : vector<32x64xf32>
    %292 = tpu.matmul %290, %291, %cst_103 {dimension_numbers = #tpu.dot_dimension_numbers<[1], [1], [0], [0], [0, 0, 1, 0], [], []>} : vector<32x32xf32>, vector<64x32xf32>, vector<32x64xf32> -> vector<32x64xf32>
    %c2_104 = arith.constant 2 : index
    %c0_105 = arith.constant 0 : index
    %c0_106 = arith.constant 0 : index
    %293 = vector.load %arg9[%c2_104, %c0_105, %c0_106] : memref<6x1x64xf32, #tpu.memory_space<vmem>>, vector<1x1x64xf32>
    %294 = vector.shape_cast %293 : vector<1x1x64xf32> to vector<1x64xf32>
    %295 = vector.broadcast %294 : vector<1x64xf32> to vector<32x64xf32>
    %296 = arith.addf %292, %295 : vector<32x64xf32>
    %cst_107 = arith.constant 0.000000e+00 : f32
    %297 = vector.broadcast %cst_107 : f32 to vector<32x64xf32>
    %298 = arith.maximumf %296, %297 : vector<32x64xf32>
    %299 = vector.extract_strided_slice %224 {offsets = [64, 0], sizes = [64, 32], strides = [1, 1]} : vector<128x32xf32> to vector<64x32xf32>
    %cst_108 = arith.constant dense<0.000000e+00> : vector<32x32xf32>
    %300 = tpu.matmul %298, %299, %cst_108 {dimension_numbers = #tpu.dot_dimension_numbers<[1], [0], [0], [1], [0, 0, 1, 1], [], []>} : vector<32x64xf32>, vector<64x32xf32>, vector<32x32xf32> -> vector<32x32xf32>
    %301 = vector.broadcast %231 : vector<1x32xf32> to vector<32x32xf32>
    %302 = arith.addf %300, %301 : vector<32x32xf32>
    %303 = arith.addf %290, %302 : vector<32x32xf32>
    %cst_109 = arith.constant dense<0.000000e+00> : vector<32xf32>
    %304 = vector.multi_reduction <add>, %303, %cst_109 [1] : vector<32x32xf32> to vector<32xf32>
    %305 = vector.shape_cast %304 : vector<32xf32> to vector<32x1xf32>
    %cst_110 = arith.constant 3.200000e+01 : f32
    %306 = vector.broadcast %cst_110 : f32 to vector<32x1xf32>
    %307 = arith.divf %305, %306 : vector<32x1xf32>
    %308 = vector.broadcast %307 : vector<32x1xf32> to vector<32x32xf32>
    %309 = arith.subf %303, %308 : vector<32x32xf32>
    %310 = arith.mulf %309, %309 : vector<32x32xf32>
    %cst_111 = arith.constant dense<0.000000e+00> : vector<32xf32>
    %311 = vector.multi_reduction <add>, %310, %cst_111 [1] : vector<32x32xf32> to vector<32xf32>
    %312 = vector.shape_cast %311 : vector<32xf32> to vector<32x1xf32>
    %cst_112 = arith.constant 3.200000e+01 : f32
    %313 = vector.broadcast %cst_112 : f32 to vector<32x1xf32>
    %314 = arith.divf %312, %313 : vector<32x1xf32>
    %315 = vector.broadcast %307 : vector<32x1xf32> to vector<32x32xf32>
    %316 = arith.subf %303, %315 : vector<32x32xf32>
    %cst_113 = arith.constant 9.99999974E-6 : f32
    %317 = vector.broadcast %cst_113 : f32 to vector<32x1xf32>
    %318 = arith.addf %314, %317 : vector<32x1xf32>
    %319 = math.rsqrt %318 : vector<32x1xf32>
    %320 = vector.broadcast %319 : vector<32x1xf32> to vector<32x32xf32>
    %321 = arith.mulf %316, %320 : vector<32x32xf32>
    %322 = vector.broadcast %234 : vector<1x32xf32> to vector<32x32xf32>
    %323 = arith.mulf %321, %322 : vector<32x32xf32>
    %324 = vector.broadcast %235 : vector<1x32xf32> to vector<32x32xf32>
    %325 = arith.addf %323, %324 : vector<32x32xf32>
    %c2_114 = arith.constant 2 : index
    %c0_115 = arith.constant 0 : index
    %c0_116 = arith.constant 0 : index
    %326 = vector.load %arg10[%c2_114, %c0_115, %c0_116] : memref<6x32x32xf32, #tpu.memory_space<vmem>>, vector<1x32x32xf32>
    %327 = vector.shape_cast %326 : vector<1x32x32xf32> to vector<32x32xf32>
    %328 = vector.shape_cast %325 : vector<32x32xf32> to vector<1x32x32xf32>
    tpu.vector_store %arg10[%c2_114, %c0_115, %c0_116], %328 {strides = array<i32>} : memref<6x32x32xf32, #tpu.memory_space<vmem>>, vector<1x32x32xf32>,
    %c3 = arith.constant 3 : index
    %c0_117 = arith.constant 0 : index
    %c0_118 = arith.constant 0 : index
    %329 = vector.load %arg6[%c3, %c0_117, %c0_118] : memref<6x128x32xf32, #tpu.memory_space<vmem>>, vector<1x128x32xf32>
    %330 = vector.shape_cast %329 : vector<1x128x32xf32> to vector<128x32xf32>
    %c3_119 = arith.constant 3 : index
    %c0_120 = arith.constant 0 : index
    %c0_121 = arith.constant 0 : index
    %331 = vector.load %arg7[%c3_119, %c0_120, %c0_121] : memref<6x128x32xf32, #tpu.memory_space<vmem>>, vector<1x128x32xf32>
    %332 = vector.shape_cast %331 : vector<1x128x32xf32> to vector<128x32xf32>
    %c3_122 = arith.constant 3 : index
    %c0_123 = arith.constant 0 : index
    %c0_124 = arith.constant 0 : index
    %333 = vector.load %arg8[%c3_122, %c0_123, %c0_124] : memref<6x16x32xf32, #tpu.memory_space<vmem>>, vector<1x16x32xf32>
    %334 = vector.shape_cast %333 : vector<1x16x32xf32> to vector<16x32xf32>
    %335 = vector.extract_strided_slice %334 {offsets = [0, 0], sizes = [1, 32], strides = [1, 1]} : vector<16x32xf32> to vector<1x32xf32>
    %336 = vector.extract_strided_slice %334 {offsets = [1, 0], sizes = [1, 32], strides = [1, 1]} : vector<16x32xf32> to vector<1x32xf32>
    %337 = vector.extract_strided_slice %334 {offsets = [2, 0], sizes = [1, 32], strides = [1, 1]} : vector<16x32xf32> to vector<1x32xf32>
    %338 = vector.extract_strided_slice %334 {offsets = [3, 0], sizes = [1, 32], strides = [1, 1]} : vector<16x32xf32> to vector<1x32xf32>
    %339 = vector.extract_strided_slice %334 {offsets = [4, 0], sizes = [1, 32], strides = [1, 1]} : vector<16x32xf32> to vector<1x32xf32>
    %340 = vector.extract_strided_slice %334 {offsets = [5, 0], sizes = [1, 32], strides = [1, 1]} : vector<16x32xf32> to vector<1x32xf32>
    %341 = vector.extract_strided_slice %334 {offsets = [6, 0], sizes = [1, 32], strides = [1, 1]} : vector<16x32xf32> to vector<1x32xf32>
    %342 = vector.extract_strided_slice %334 {offsets = [7, 0], sizes = [1, 32], strides = [1, 1]} : vector<16x32xf32> to vector<1x32xf32>
    %343 = vector.extract_strided_slice %334 {offsets = [8, 0], sizes = [1, 32], strides = [1, 1]} : vector<16x32xf32> to vector<1x32xf32>
    %344 = vector.extract_strided_slice %330 {offsets = [0, 0], sizes = [32, 32], strides = [1, 1]} : vector<128x32xf32> to vector<32x32xf32>
    %cst_125 = arith.constant dense<0.000000e+00> : vector<32x32xf32>
    %345 = tpu.matmul %325, %344, %cst_125 {dimension_numbers = #tpu.dot_dimension_numbers<[1], [1], [0], [0], [0, 0, 1, 0], [], []>} : vector<32x32xf32>, vector<32x32xf32>, vector<32x32xf32> -> vector<32x32xf32>
    %346 = vector.broadcast %335 : vector<1x32xf32> to vector<32x32xf32>
    %347 = arith.addf %345, %346 : vector<32x32xf32>
    %348 = vector.extract_strided_slice %330 {offsets = [32, 0], sizes = [32, 32], strides = [1, 1]} : vector<128x32xf32> to vector<32x32xf32>
    %cst_126 = arith.constant dense<0.000000e+00> : vector<32x32xf32>
    %349 = tpu.matmul %325, %348, %cst_126 {dimension_numbers = #tpu.dot_dimension_numbers<[1], [1], [0], [0], [0, 0, 1, 0], [], []>} : vector<32x32xf32>, vector<32x32xf32>, vector<32x32xf32> -> vector<32x32xf32>
    %350 = vector.broadcast %336 : vector<1x32xf32> to vector<32x32xf32>
    %351 = arith.addf %349, %350 : vector<32x32xf32>
    %352 = vector.extract_strided_slice %330 {offsets = [64, 0], sizes = [32, 32], strides = [1, 1]} : vector<128x32xf32> to vector<32x32xf32>
    %cst_127 = arith.constant dense<0.000000e+00> : vector<32x32xf32>
    %353 = tpu.matmul %325, %352, %cst_127 {dimension_numbers = #tpu.dot_dimension_numbers<[1], [1], [0], [0], [0, 0, 1, 0], [], []>} : vector<32x32xf32>, vector<32x32xf32>, vector<32x32xf32> -> vector<32x32xf32>
    %354 = vector.broadcast %337 : vector<1x32xf32> to vector<32x32xf32>
    %355 = arith.addf %353, %354 : vector<32x32xf32>
    %356 = tpu.concatenate %351, %351, %351, %351, %351, %351, %351, %351 in 0 : vector<32x32xf32>, vector<32x32xf32>, vector<32x32xf32>, vector<32x32xf32>, vector<32x32xf32>, vector<32x32xf32>, vector<32x32xf32>, vector<32x32xf32> -> vector<256x32xf32>
    %357 = arith.mulf %356, %2 : vector<256x32xf32>
    %358 = tpu.concatenate %355, %355, %355, %355, %355, %355, %355, %355 in 0 : vector<32x32xf32>, vector<32x32xf32>, vector<32x32xf32>, vector<32x32xf32>, vector<32x32xf32>, vector<32x32xf32>, vector<32x32xf32>, vector<32x32xf32> -> vector<256x32xf32>
    %359 = arith.mulf %358, %2 : vector<256x32xf32>
    %cst_128 = arith.constant dense<0.000000e+00> : vector<32x256xf32>
    %360 = tpu.matmul %347, %357, %cst_128 {dimension_numbers = #tpu.dot_dimension_numbers<[1], [1], [0], [0], [0, 0, 1, 0], [], []>} : vector<32x32xf32>, vector<256x32xf32>, vector<32x256xf32> -> vector<32x256xf32>
    %361 = arith.addf %360, %1 : vector<32x256xf32>
    %cst_129 = arith.constant dense<0xFF800000> : vector<32xf32>
    %362 = vector.multi_reduction <maximumf>, %361, %cst_129 [1] : vector<32x256xf32> to vector<32xf32>
    %363 = vector.shape_cast %362 : vector<32xf32> to vector<32x1xf32>
    %364 = vector.broadcast %363 : vector<32x1xf32> to vector<32x256xf32>
    %365 = arith.subf %361, %364 : vector<32x256xf32>
    %366 = math.exp %365 : vector<32x256xf32>
    %cst_130 = arith.constant dense<0.000000e+00> : vector<32x8xf32>
    %367 = tpu.matmul %366, %3, %cst_130 {dimension_numbers = #tpu.dot_dimension_numbers<[1], [0], [0], [1], [0, 0, 1, 1], [], []>} : vector<32x256xf32>, vector<256x8xf32>, vector<32x8xf32> -> vector<32x8xf32>
    %368 = tpu.reciprocal %367 {approx = true} : vector<32x8xf32> -> vector<32x8xf32>
    %cst_131 = arith.constant dense<0.000000e+00> : vector<32x32xf32>
    %369 = tpu.matmul %368, %4, %cst_131 {dimension_numbers = #tpu.dot_dimension_numbers<[1], [0], [0], [1], [0, 0, 1, 1], [], []>} : vector<32x8xf32>, vector<8x32xf32>, vector<32x32xf32> -> vector<32x32xf32>
    %cst_132 = arith.constant dense<0.000000e+00> : vector<32x32xf32>
    %370 = tpu.matmul %366, %359, %cst_132 {dimension_numbers = #tpu.dot_dimension_numbers<[1], [0], [0], [1], [0, 0, 1, 1], [], []>} : vector<32x256xf32>, vector<256x32xf32>, vector<32x32xf32> -> vector<32x32xf32>
    %371 = arith.mulf %370, %369 : vector<32x32xf32>
    %372 = vector.extract_strided_slice %330 {offsets = [96, 0], sizes = [32, 32], strides = [1, 1]} : vector<128x32xf32> to vector<32x32xf32>
    %cst_133 = arith.constant dense<0.000000e+00> : vector<32x32xf32>
    %373 = tpu.matmul %371, %372, %cst_133 {dimension_numbers = #tpu.dot_dimension_numbers<[1], [1], [0], [0], [0, 0, 1, 0], [], []>} : vector<32x32xf32>, vector<32x32xf32>, vector<32x32xf32> -> vector<32x32xf32>
    %374 = vector.broadcast %338 : vector<1x32xf32> to vector<32x32xf32>
    %375 = arith.addf %373, %374 : vector<32x32xf32>
    %376 = arith.addf %325, %375 : vector<32x32xf32>
    %cst_134 = arith.constant dense<0.000000e+00> : vector<32xf32>
    %377 = vector.multi_reduction <add>, %376, %cst_134 [1] : vector<32x32xf32> to vector<32xf32>
    %378 = vector.shape_cast %377 : vector<32xf32> to vector<32x1xf32>
    %cst_135 = arith.constant 3.200000e+01 : f32
    %379 = vector.broadcast %cst_135 : f32 to vector<32x1xf32>
    %380 = arith.divf %378, %379 : vector<32x1xf32>
    %381 = vector.broadcast %380 : vector<32x1xf32> to vector<32x32xf32>
    %382 = arith.subf %376, %381 : vector<32x32xf32>
    %383 = arith.mulf %382, %382 : vector<32x32xf32>
    %cst_136 = arith.constant dense<0.000000e+00> : vector<32xf32>
    %384 = vector.multi_reduction <add>, %383, %cst_136 [1] : vector<32x32xf32> to vector<32xf32>
    %385 = vector.shape_cast %384 : vector<32xf32> to vector<32x1xf32>
    %cst_137 = arith.constant 3.200000e+01 : f32
    %386 = vector.broadcast %cst_137 : f32 to vector<32x1xf32>
    %387 = arith.divf %385, %386 : vector<32x1xf32>
    %388 = vector.broadcast %380 : vector<32x1xf32> to vector<32x32xf32>
    %389 = arith.subf %376, %388 : vector<32x32xf32>
    %cst_138 = arith.constant 9.99999974E-6 : f32
    %390 = vector.broadcast %cst_138 : f32 to vector<32x1xf32>
    %391 = arith.addf %387, %390 : vector<32x1xf32>
    %392 = math.rsqrt %391 : vector<32x1xf32>
    %393 = vector.broadcast %392 : vector<32x1xf32> to vector<32x32xf32>
    %394 = arith.mulf %389, %393 : vector<32x32xf32>
    %395 = vector.broadcast %340 : vector<1x32xf32> to vector<32x32xf32>
    %396 = arith.mulf %394, %395 : vector<32x32xf32>
    %397 = vector.broadcast %341 : vector<1x32xf32> to vector<32x32xf32>
    %398 = arith.addf %396, %397 : vector<32x32xf32>
    %399 = vector.extract_strided_slice %332 {offsets = [0, 0], sizes = [64, 32], strides = [1, 1]} : vector<128x32xf32> to vector<64x32xf32>
    %cst_139 = arith.constant dense<0.000000e+00> : vector<32x64xf32>
    %400 = tpu.matmul %398, %399, %cst_139 {dimension_numbers = #tpu.dot_dimension_numbers<[1], [1], [0], [0], [0, 0, 1, 0], [], []>} : vector<32x32xf32>, vector<64x32xf32>, vector<32x64xf32> -> vector<32x64xf32>
    %c3_140 = arith.constant 3 : index
    %c0_141 = arith.constant 0 : index
    %c0_142 = arith.constant 0 : index
    %401 = vector.load %arg9[%c3_140, %c0_141, %c0_142] : memref<6x1x64xf32, #tpu.memory_space<vmem>>, vector<1x1x64xf32>
    %402 = vector.shape_cast %401 : vector<1x1x64xf32> to vector<1x64xf32>
    %403 = vector.broadcast %402 : vector<1x64xf32> to vector<32x64xf32>
    %404 = arith.addf %400, %403 : vector<32x64xf32>
    %cst_143 = arith.constant 0.000000e+00 : f32
    %405 = vector.broadcast %cst_143 : f32 to vector<32x64xf32>
    %406 = arith.maximumf %404, %405 : vector<32x64xf32>
    %407 = vector.extract_strided_slice %332 {offsets = [64, 0], sizes = [64, 32], strides = [1, 1]} : vector<128x32xf32> to vector<64x32xf32>
    %cst_144 = arith.constant dense<0.000000e+00> : vector<32x32xf32>
    %408 = tpu.matmul %406, %407, %cst_144 {dimension_numbers = #tpu.dot_dimension_numbers<[1], [0], [0], [1], [0, 0, 1, 1], [], []>} : vector<32x64xf32>, vector<64x32xf32>, vector<32x32xf32> -> vector<32x32xf32>
    %409 = vector.broadcast %339 : vector<1x32xf32> to vector<32x32xf32>
    %410 = arith.addf %408, %409 : vector<32x32xf32>
    %411 = arith.addf %398, %410 : vector<32x32xf32>
    %cst_145 = arith.constant dense<0.000000e+00> : vector<32xf32>
    %412 = vector.multi_reduction <add>, %411, %cst_145 [1] : vector<32x32xf32> to vector<32xf32>
    %413 = vector.shape_cast %412 : vector<32xf32> to vector<32x1xf32>
    %cst_146 = arith.constant 3.200000e+01 : f32
    %414 = vector.broadcast %cst_146 : f32 to vector<32x1xf32>
    %415 = arith.divf %413, %414 : vector<32x1xf32>
    %416 = vector.broadcast %415 : vector<32x1xf32> to vector<32x32xf32>
    %417 = arith.subf %411, %416 : vector<32x32xf32>
    %418 = arith.mulf %417, %417 : vector<32x32xf32>
    %cst_147 = arith.constant dense<0.000000e+00> : vector<32xf32>
    %419 = vector.multi_reduction <add>, %418, %cst_147 [1] : vector<32x32xf32> to vector<32xf32>
    %420 = vector.shape_cast %419 : vector<32xf32> to vector<32x1xf32>
    %cst_148 = arith.constant 3.200000e+01 : f32
    %421 = vector.broadcast %cst_148 : f32 to vector<32x1xf32>
    %422 = arith.divf %420, %421 : vector<32x1xf32>
    %423 = vector.broadcast %415 : vector<32x1xf32> to vector<32x32xf32>
    %424 = arith.subf %411, %423 : vector<32x32xf32>
    %cst_149 = arith.constant 9.99999974E-6 : f32
    %425 = vector.broadcast %cst_149 : f32 to vector<32x1xf32>
    %426 = arith.addf %422, %425 : vector<32x1xf32>
    %427 = math.rsqrt %426 : vector<32x1xf32>
    %428 = vector.broadcast %427 : vector<32x1xf32> to vector<32x32xf32>
    %429 = arith.mulf %424, %428 : vector<32x32xf32>
    %430 = vector.broadcast %342 : vector<1x32xf32> to vector<32x32xf32>
    %431 = arith.mulf %429, %430 : vector<32x32xf32>
    %432 = vector.broadcast %343 : vector<1x32xf32> to vector<32x32xf32>
    %433 = arith.addf %431, %432 : vector<32x32xf32>
    %c3_150 = arith.constant 3 : index
    %c0_151 = arith.constant 0 : index
    %c0_152 = arith.constant 0 : index
    %434 = vector.load %arg10[%c3_150, %c0_151, %c0_152] : memref<6x32x32xf32, #tpu.memory_space<vmem>>, vector<1x32x32xf32>
    %435 = vector.shape_cast %434 : vector<1x32x32xf32> to vector<32x32xf32>
    %436 = vector.shape_cast %433 : vector<32x32xf32> to vector<1x32x32xf32>
    tpu.vector_store %arg10[%c3_150, %c0_151, %c0_152], %436 {strides = array<i32>} : memref<6x32x32xf32, #tpu.memory_space<vmem>>, vector<1x32x32xf32>,
    %c4 = arith.constant 4 : index
    %c0_153 = arith.constant 0 : index
    %c0_154 = arith.constant 0 : index
    %437 = vector.load %arg6[%c4, %c0_153, %c0_154] : memref<6x128x32xf32, #tpu.memory_space<vmem>>, vector<1x128x32xf32>
    %438 = vector.shape_cast %437 : vector<1x128x32xf32> to vector<128x32xf32>
    %c4_155 = arith.constant 4 : index
    %c0_156 = arith.constant 0 : index
    %c0_157 = arith.constant 0 : index
    %439 = vector.load %arg7[%c4_155, %c0_156, %c0_157] : memref<6x128x32xf32, #tpu.memory_space<vmem>>, vector<1x128x32xf32>
    %440 = vector.shape_cast %439 : vector<1x128x32xf32> to vector<128x32xf32>
    %c4_158 = arith.constant 4 : index
    %c0_159 = arith.constant 0 : index
    %c0_160 = arith.constant 0 : index
    %441 = vector.load %arg8[%c4_158, %c0_159, %c0_160] : memref<6x16x32xf32, #tpu.memory_space<vmem>>, vector<1x16x32xf32>
    %442 = vector.shape_cast %441 : vector<1x16x32xf32> to vector<16x32xf32>
    %443 = vector.extract_strided_slice %442 {offsets = [0, 0], sizes = [1, 32], strides = [1, 1]} : vector<16x32xf32> to vector<1x32xf32>
    %444 = vector.extract_strided_slice %442 {offsets = [1, 0], sizes = [1, 32], strides = [1, 1]} : vector<16x32xf32> to vector<1x32xf32>
    %445 = vector.extract_strided_slice %442 {offsets = [2, 0], sizes = [1, 32], strides = [1, 1]} : vector<16x32xf32> to vector<1x32xf32>
    %446 = vector.extract_strided_slice %442 {offsets = [3, 0], sizes = [1, 32], strides = [1, 1]} : vector<16x32xf32> to vector<1x32xf32>
    %447 = vector.extract_strided_slice %442 {offsets = [4, 0], sizes = [1, 32], strides = [1, 1]} : vector<16x32xf32> to vector<1x32xf32>
    %448 = vector.extract_strided_slice %442 {offsets = [5, 0], sizes = [1, 32], strides = [1, 1]} : vector<16x32xf32> to vector<1x32xf32>
    %449 = vector.extract_strided_slice %442 {offsets = [6, 0], sizes = [1, 32], strides = [1, 1]} : vector<16x32xf32> to vector<1x32xf32>
    %450 = vector.extract_strided_slice %442 {offsets = [7, 0], sizes = [1, 32], strides = [1, 1]} : vector<16x32xf32> to vector<1x32xf32>
    %451 = vector.extract_strided_slice %442 {offsets = [8, 0], sizes = [1, 32], strides = [1, 1]} : vector<16x32xf32> to vector<1x32xf32>
    %452 = vector.extract_strided_slice %438 {offsets = [0, 0], sizes = [32, 32], strides = [1, 1]} : vector<128x32xf32> to vector<32x32xf32>
    %cst_161 = arith.constant dense<0.000000e+00> : vector<32x32xf32>
    %453 = tpu.matmul %433, %452, %cst_161 {dimension_numbers = #tpu.dot_dimension_numbers<[1], [1], [0], [0], [0, 0, 1, 0], [], []>} : vector<32x32xf32>, vector<32x32xf32>, vector<32x32xf32> -> vector<32x32xf32>
    %454 = vector.broadcast %443 : vector<1x32xf32> to vector<32x32xf32>
    %455 = arith.addf %453, %454 : vector<32x32xf32>
    %456 = vector.extract_strided_slice %438 {offsets = [32, 0], sizes = [32, 32], strides = [1, 1]} : vector<128x32xf32> to vector<32x32xf32>
    %cst_162 = arith.constant dense<0.000000e+00> : vector<32x32xf32>
    %457 = tpu.matmul %433, %456, %cst_162 {dimension_numbers = #tpu.dot_dimension_numbers<[1], [1], [0], [0], [0, 0, 1, 0], [], []>} : vector<32x32xf32>, vector<32x32xf32>, vector<32x32xf32> -> vector<32x32xf32>
    %458 = vector.broadcast %444 : vector<1x32xf32> to vector<32x32xf32>
    %459 = arith.addf %457, %458 : vector<32x32xf32>
    %460 = vector.extract_strided_slice %438 {offsets = [64, 0], sizes = [32, 32], strides = [1, 1]} : vector<128x32xf32> to vector<32x32xf32>
    %cst_163 = arith.constant dense<0.000000e+00> : vector<32x32xf32>
    %461 = tpu.matmul %433, %460, %cst_163 {dimension_numbers = #tpu.dot_dimension_numbers<[1], [1], [0], [0], [0, 0, 1, 0], [], []>} : vector<32x32xf32>, vector<32x32xf32>, vector<32x32xf32> -> vector<32x32xf32>
    %462 = vector.broadcast %445 : vector<1x32xf32> to vector<32x32xf32>
    %463 = arith.addf %461, %462 : vector<32x32xf32>
    %464 = tpu.concatenate %459, %459, %459, %459, %459, %459, %459, %459 in 0 : vector<32x32xf32>, vector<32x32xf32>, vector<32x32xf32>, vector<32x32xf32>, vector<32x32xf32>, vector<32x32xf32>, vector<32x32xf32>, vector<32x32xf32> -> vector<256x32xf32>
    %465 = arith.mulf %464, %2 : vector<256x32xf32>
    %466 = tpu.concatenate %463, %463, %463, %463, %463, %463, %463, %463 in 0 : vector<32x32xf32>, vector<32x32xf32>, vector<32x32xf32>, vector<32x32xf32>, vector<32x32xf32>, vector<32x32xf32>, vector<32x32xf32>, vector<32x32xf32> -> vector<256x32xf32>
    %467 = arith.mulf %466, %2 : vector<256x32xf32>
    %cst_164 = arith.constant dense<0.000000e+00> : vector<32x256xf32>
    %468 = tpu.matmul %455, %465, %cst_164 {dimension_numbers = #tpu.dot_dimension_numbers<[1], [1], [0], [0], [0, 0, 1, 0], [], []>} : vector<32x32xf32>, vector<256x32xf32>, vector<32x256xf32> -> vector<32x256xf32>
    %469 = arith.addf %468, %1 : vector<32x256xf32>
    %cst_165 = arith.constant dense<0xFF800000> : vector<32xf32>
    %470 = vector.multi_reduction <maximumf>, %469, %cst_165 [1] : vector<32x256xf32> to vector<32xf32>
    %471 = vector.shape_cast %470 : vector<32xf32> to vector<32x1xf32>
    %472 = vector.broadcast %471 : vector<32x1xf32> to vector<32x256xf32>
    %473 = arith.subf %469, %472 : vector<32x256xf32>
    %474 = math.exp %473 : vector<32x256xf32>
    %cst_166 = arith.constant dense<0.000000e+00> : vector<32x8xf32>
    %475 = tpu.matmul %474, %3, %cst_166 {dimension_numbers = #tpu.dot_dimension_numbers<[1], [0], [0], [1], [0, 0, 1, 1], [], []>} : vector<32x256xf32>, vector<256x8xf32>, vector<32x8xf32> -> vector<32x8xf32>
    %476 = tpu.reciprocal %475 {approx = true} : vector<32x8xf32> -> vector<32x8xf32>
    %cst_167 = arith.constant dense<0.000000e+00> : vector<32x32xf32>
    %477 = tpu.matmul %476, %4, %cst_167 {dimension_numbers = #tpu.dot_dimension_numbers<[1], [0], [0], [1], [0, 0, 1, 1], [], []>} : vector<32x8xf32>, vector<8x32xf32>, vector<32x32xf32> -> vector<32x32xf32>
    %cst_168 = arith.constant dense<0.000000e+00> : vector<32x32xf32>
    %478 = tpu.matmul %474, %467, %cst_168 {dimension_numbers = #tpu.dot_dimension_numbers<[1], [0], [0], [1], [0, 0, 1, 1], [], []>} : vector<32x256xf32>, vector<256x32xf32>, vector<32x32xf32> -> vector<32x32xf32>
    %479 = arith.mulf %478, %477 : vector<32x32xf32>
    %480 = vector.extract_strided_slice %438 {offsets = [96, 0], sizes = [32, 32], strides = [1, 1]} : vector<128x32xf32> to vector<32x32xf32>
    %cst_169 = arith.constant dense<0.000000e+00> : vector<32x32xf32>
    %481 = tpu.matmul %479, %480, %cst_169 {dimension_numbers = #tpu.dot_dimension_numbers<[1], [1], [0], [0], [0, 0, 1, 0], [], []>} : vector<32x32xf32>, vector<32x32xf32>, vector<32x32xf32> -> vector<32x32xf32>
    %482 = vector.broadcast %446 : vector<1x32xf32> to vector<32x32xf32>
    %483 = arith.addf %481, %482 : vector<32x32xf32>
    %484 = arith.addf %433, %483 : vector<32x32xf32>
    %cst_170 = arith.constant dense<0.000000e+00> : vector<32xf32>
    %485 = vector.multi_reduction <add>, %484, %cst_170 [1] : vector<32x32xf32> to vector<32xf32>
    %486 = vector.shape_cast %485 : vector<32xf32> to vector<32x1xf32>
    %cst_171 = arith.constant 3.200000e+01 : f32
    %487 = vector.broadcast %cst_171 : f32 to vector<32x1xf32>
    %488 = arith.divf %486, %487 : vector<32x1xf32>
    %489 = vector.broadcast %488 : vector<32x1xf32> to vector<32x32xf32>
    %490 = arith.subf %484, %489 : vector<32x32xf32>
    %491 = arith.mulf %490, %490 : vector<32x32xf32>
    %cst_172 = arith.constant dense<0.000000e+00> : vector<32xf32>
    %492 = vector.multi_reduction <add>, %491, %cst_172 [1] : vector<32x32xf32> to vector<32xf32>
    %493 = vector.shape_cast %492 : vector<32xf32> to vector<32x1xf32>
    %cst_173 = arith.constant 3.200000e+01 : f32
    %494 = vector.broadcast %cst_173 : f32 to vector<32x1xf32>
    %495 = arith.divf %493, %494 : vector<32x1xf32>
    %496 = vector.broadcast %488 : vector<32x1xf32> to vector<32x32xf32>
    %497 = arith.subf %484, %496 : vector<32x32xf32>
    %cst_174 = arith.constant 9.99999974E-6 : f32
    %498 = vector.broadcast %cst_174 : f32 to vector<32x1xf32>
    %499 = arith.addf %495, %498 : vector<32x1xf32>
    %500 = math.rsqrt %499 : vector<32x1xf32>
    %501 = vector.broadcast %500 : vector<32x1xf32> to vector<32x32xf32>
    %502 = arith.mulf %497, %501 : vector<32x32xf32>
    %503 = vector.broadcast %448 : vector<1x32xf32> to vector<32x32xf32>
    %504 = arith.mulf %502, %503 : vector<32x32xf32>
    %505 = vector.broadcast %449 : vector<1x32xf32> to vector<32x32xf32>
    %506 = arith.addf %504, %505 : vector<32x32xf32>
    %507 = vector.extract_strided_slice %440 {offsets = [0, 0], sizes = [64, 32], strides = [1, 1]} : vector<128x32xf32> to vector<64x32xf32>
    %cst_175 = arith.constant dense<0.000000e+00> : vector<32x64xf32>
    %508 = tpu.matmul %506, %507, %cst_175 {dimension_numbers = #tpu.dot_dimension_numbers<[1], [1], [0], [0], [0, 0, 1, 0], [], []>} : vector<32x32xf32>, vector<64x32xf32>, vector<32x64xf32> -> vector<32x64xf32>
    %c4_176 = arith.constant 4 : index
    %c0_177 = arith.constant 0 : index
    %c0_178 = arith.constant 0 : index
    %509 = vector.load %arg9[%c4_176, %c0_177, %c0_178] : memref<6x1x64xf32, #tpu.memory_space<vmem>>, vector<1x1x64xf32>
    %510 = vector.shape_cast %509 : vector<1x1x64xf32> to vector<1x64xf32>
    %511 = vector.broadcast %510 : vector<1x64xf32> to vector<32x64xf32>
    %512 = arith.addf %508, %511 : vector<32x64xf32>
    %cst_179 = arith.constant 0.000000e+00 : f32
    %513 = vector.broadcast %cst_179 : f32 to vector<32x64xf32>
    %514 = arith.maximumf %512, %513 : vector<32x64xf32>
    %515 = vector.extract_strided_slice %440 {offsets = [64, 0], sizes = [64, 32], strides = [1, 1]} : vector<128x32xf32> to vector<64x32xf32>
    %cst_180 = arith.constant dense<0.000000e+00> : vector<32x32xf32>
    %516 = tpu.matmul %514, %515, %cst_180 {dimension_numbers = #tpu.dot_dimension_numbers<[1], [0], [0], [1], [0, 0, 1, 1], [], []>} : vector<32x64xf32>, vector<64x32xf32>, vector<32x32xf32> -> vector<32x32xf32>
    %517 = vector.broadcast %447 : vector<1x32xf32> to vector<32x32xf32>
    %518 = arith.addf %516, %517 : vector<32x32xf32>
    %519 = arith.addf %506, %518 : vector<32x32xf32>
    %cst_181 = arith.constant dense<0.000000e+00> : vector<32xf32>
    %520 = vector.multi_reduction <add>, %519, %cst_181 [1] : vector<32x32xf32> to vector<32xf32>
    %521 = vector.shape_cast %520 : vector<32xf32> to vector<32x1xf32>
    %cst_182 = arith.constant 3.200000e+01 : f32
    %522 = vector.broadcast %cst_182 : f32 to vector<32x1xf32>
    %523 = arith.divf %521, %522 : vector<32x1xf32>
    %524 = vector.broadcast %523 : vector<32x1xf32> to vector<32x32xf32>
    %525 = arith.subf %519, %524 : vector<32x32xf32>
    %526 = arith.mulf %525, %525 : vector<32x32xf32>
    %cst_183 = arith.constant dense<0.000000e+00> : vector<32xf32>
    %527 = vector.multi_reduction <add>, %526, %cst_183 [1] : vector<32x32xf32> to vector<32xf32>
    %528 = vector.shape_cast %527 : vector<32xf32> to vector<32x1xf32>
    %cst_184 = arith.constant 3.200000e+01 : f32
    %529 = vector.broadcast %cst_184 : f32 to vector<32x1xf32>
    %530 = arith.divf %528, %529 : vector<32x1xf32>
    %531 = vector.broadcast %523 : vector<32x1xf32> to vector<32x32xf32>
    %532 = arith.subf %519, %531 : vector<32x32xf32>
    %cst_185 = arith.constant 9.99999974E-6 : f32
    %533 = vector.broadcast %cst_185 : f32 to vector<32x1xf32>
    %534 = arith.addf %530, %533 : vector<32x1xf32>
    %535 = math.rsqrt %534 : vector<32x1xf32>
    %536 = vector.broadcast %535 : vector<32x1xf32> to vector<32x32xf32>
    %537 = arith.mulf %532, %536 : vector<32x32xf32>
    %538 = vector.broadcast %450 : vector<1x32xf32> to vector<32x32xf32>
    %539 = arith.mulf %537, %538 : vector<32x32xf32>
    %540 = vector.broadcast %451 : vector<1x32xf32> to vector<32x32xf32>
    %541 = arith.addf %539, %540 : vector<32x32xf32>
    %c4_186 = arith.constant 4 : index
    %c0_187 = arith.constant 0 : index
    %c0_188 = arith.constant 0 : index
    %542 = vector.load %arg10[%c4_186, %c0_187, %c0_188] : memref<6x32x32xf32, #tpu.memory_space<vmem>>, vector<1x32x32xf32>
    %543 = vector.shape_cast %542 : vector<1x32x32xf32> to vector<32x32xf32>
    %544 = vector.shape_cast %541 : vector<32x32xf32> to vector<1x32x32xf32>
    tpu.vector_store %arg10[%c4_186, %c0_187, %c0_188], %544 {strides = array<i32>} : memref<6x32x32xf32, #tpu.memory_space<vmem>>, vector<1x32x32xf32>,
    %c5 = arith.constant 5 : index
    %c0_189 = arith.constant 0 : index
    %c0_190 = arith.constant 0 : index
    %545 = vector.load %arg6[%c5, %c0_189, %c0_190] : memref<6x128x32xf32, #tpu.memory_space<vmem>>, vector<1x128x32xf32>
    %546 = vector.shape_cast %545 : vector<1x128x32xf32> to vector<128x32xf32>
    %c5_191 = arith.constant 5 : index
    %c0_192 = arith.constant 0 : index
    %c0_193 = arith.constant 0 : index
    %547 = vector.load %arg7[%c5_191, %c0_192, %c0_193] : memref<6x128x32xf32, #tpu.memory_space<vmem>>, vector<1x128x32xf32>
    %548 = vector.shape_cast %547 : vector<1x128x32xf32> to vector<128x32xf32>
    %c5_194 = arith.constant 5 : index
    %c0_195 = arith.constant 0 : index
    %c0_196 = arith.constant 0 : index
    %549 = vector.load %arg8[%c5_194, %c0_195, %c0_196] : memref<6x16x32xf32, #tpu.memory_space<vmem>>, vector<1x16x32xf32>
    %550 = vector.shape_cast %549 : vector<1x16x32xf32> to vector<16x32xf32>
    %551 = vector.extract_strided_slice %550 {offsets = [0, 0], sizes = [1, 32], strides = [1, 1]} : vector<16x32xf32> to vector<1x32xf32>
    %552 = vector.extract_strided_slice %550 {offsets = [1, 0], sizes = [1, 32], strides = [1, 1]} : vector<16x32xf32> to vector<1x32xf32>
    %553 = vector.extract_strided_slice %550 {offsets = [2, 0], sizes = [1, 32], strides = [1, 1]} : vector<16x32xf32> to vector<1x32xf32>
    %554 = vector.extract_strided_slice %550 {offsets = [3, 0], sizes = [1, 32], strides = [1, 1]} : vector<16x32xf32> to vector<1x32xf32>
    %555 = vector.extract_strided_slice %550 {offsets = [4, 0], sizes = [1, 32], strides = [1, 1]} : vector<16x32xf32> to vector<1x32xf32>
    %556 = vector.extract_strided_slice %550 {offsets = [5, 0], sizes = [1, 32], strides = [1, 1]} : vector<16x32xf32> to vector<1x32xf32>
    %557 = vector.extract_strided_slice %550 {offsets = [6, 0], sizes = [1, 32], strides = [1, 1]} : vector<16x32xf32> to vector<1x32xf32>
    %558 = vector.extract_strided_slice %550 {offsets = [7, 0], sizes = [1, 32], strides = [1, 1]} : vector<16x32xf32> to vector<1x32xf32>
    %559 = vector.extract_strided_slice %550 {offsets = [8, 0], sizes = [1, 32], strides = [1, 1]} : vector<16x32xf32> to vector<1x32xf32>
    %560 = vector.extract_strided_slice %546 {offsets = [0, 0], sizes = [32, 32], strides = [1, 1]} : vector<128x32xf32> to vector<32x32xf32>
    %cst_197 = arith.constant dense<0.000000e+00> : vector<32x32xf32>
    %561 = tpu.matmul %541, %560, %cst_197 {dimension_numbers = #tpu.dot_dimension_numbers<[1], [1], [0], [0], [0, 0, 1, 0], [], []>} : vector<32x32xf32>, vector<32x32xf32>, vector<32x32xf32> -> vector<32x32xf32>
    %562 = vector.broadcast %551 : vector<1x32xf32> to vector<32x32xf32>
    %563 = arith.addf %561, %562 : vector<32x32xf32>
    %564 = vector.extract_strided_slice %546 {offsets = [32, 0], sizes = [32, 32], strides = [1, 1]} : vector<128x32xf32> to vector<32x32xf32>
    %cst_198 = arith.constant dense<0.000000e+00> : vector<32x32xf32>
    %565 = tpu.matmul %541, %564, %cst_198 {dimension_numbers = #tpu.dot_dimension_numbers<[1], [1], [0], [0], [0, 0, 1, 0], [], []>} : vector<32x32xf32>, vector<32x32xf32>, vector<32x32xf32> -> vector<32x32xf32>
    %566 = vector.broadcast %552 : vector<1x32xf32> to vector<32x32xf32>
    %567 = arith.addf %565, %566 : vector<32x32xf32>
    %568 = vector.extract_strided_slice %546 {offsets = [64, 0], sizes = [32, 32], strides = [1, 1]} : vector<128x32xf32> to vector<32x32xf32>
    %cst_199 = arith.constant dense<0.000000e+00> : vector<32x32xf32>
    %569 = tpu.matmul %541, %568, %cst_199 {dimension_numbers = #tpu.dot_dimension_numbers<[1], [1], [0], [0], [0, 0, 1, 0], [], []>} : vector<32x32xf32>, vector<32x32xf32>, vector<32x32xf32> -> vector<32x32xf32>
    %570 = vector.broadcast %553 : vector<1x32xf32> to vector<32x32xf32>
    %571 = arith.addf %569, %570 : vector<32x32xf32>
    %572 = tpu.concatenate %567, %567, %567, %567, %567, %567, %567, %567 in 0 : vector<32x32xf32>, vector<32x32xf32>, vector<32x32xf32>, vector<32x32xf32>, vector<32x32xf32>, vector<32x32xf32>, vector<32x32xf32>, vector<32x32xf32> -> vector<256x32xf32>
    %573 = arith.mulf %572, %2 : vector<256x32xf32>
    %574 = tpu.concatenate %571, %571, %571, %571, %571, %571, %571, %571 in 0 : vector<32x32xf32>, vector<32x32xf32>, vector<32x32xf32>, vector<32x32xf32>, vector<32x32xf32>, vector<32x32xf32>, vector<32x32xf32>, vector<32x32xf32> -> vector<256x32xf32>
    %575 = arith.mulf %574, %2 : vector<256x32xf32>
    %cst_200 = arith.constant dense<0.000000e+00> : vector<32x256xf32>
    %576 = tpu.matmul %563, %573, %cst_200 {dimension_numbers = #tpu.dot_dimension_numbers<[1], [1], [0], [0], [0, 0, 1, 0], [], []>} : vector<32x32xf32>, vector<256x32xf32>, vector<32x256xf32> -> vector<32x256xf32>
    %577 = arith.addf %576, %1 : vector<32x256xf32>
    %cst_201 = arith.constant dense<0xFF800000> : vector<32xf32>
    %578 = vector.multi_reduction <maximumf>, %577, %cst_201 [1] : vector<32x256xf32> to vector<32xf32>
    %579 = vector.shape_cast %578 : vector<32xf32> to vector<32x1xf32>
    %580 = vector.broadcast %579 : vector<32x1xf32> to vector<32x256xf32>
    %581 = arith.subf %577, %580 : vector<32x256xf32>
    %582 = math.exp %581 : vector<32x256xf32>
    %cst_202 = arith.constant dense<0.000000e+00> : vector<32x8xf32>
    %583 = tpu.matmul %582, %3, %cst_202 {dimension_numbers = #tpu.dot_dimension_numbers<[1], [0], [0], [1], [0, 0, 1, 1], [], []>} : vector<32x256xf32>, vector<256x8xf32>, vector<32x8xf32> -> vector<32x8xf32>
    %584 = tpu.reciprocal %583 {approx = true} : vector<32x8xf32> -> vector<32x8xf32>
    %cst_203 = arith.constant dense<0.000000e+00> : vector<32x32xf32>
    %585 = tpu.matmul %584, %4, %cst_203 {dimension_numbers = #tpu.dot_dimension_numbers<[1], [0], [0], [1], [0, 0, 1, 1], [], []>} : vector<32x8xf32>, vector<8x32xf32>, vector<32x32xf32> -> vector<32x32xf32>
    %cst_204 = arith.constant dense<0.000000e+00> : vector<32x32xf32>
    %586 = tpu.matmul %582, %575, %cst_204 {dimension_numbers = #tpu.dot_dimension_numbers<[1], [0], [0], [1], [0, 0, 1, 1], [], []>} : vector<32x256xf32>, vector<256x32xf32>, vector<32x32xf32> -> vector<32x32xf32>
    %587 = arith.mulf %586, %585 : vector<32x32xf32>
    %588 = vector.extract_strided_slice %546 {offsets = [96, 0], sizes = [32, 32], strides = [1, 1]} : vector<128x32xf32> to vector<32x32xf32>
    %cst_205 = arith.constant dense<0.000000e+00> : vector<32x32xf32>
    %589 = tpu.matmul %587, %588, %cst_205 {dimension_numbers = #tpu.dot_dimension_numbers<[1], [1], [0], [0], [0, 0, 1, 0], [], []>} : vector<32x32xf32>, vector<32x32xf32>, vector<32x32xf32> -> vector<32x32xf32>
    %590 = vector.broadcast %554 : vector<1x32xf32> to vector<32x32xf32>
    %591 = arith.addf %589, %590 : vector<32x32xf32>
    %592 = arith.addf %541, %591 : vector<32x32xf32>
    %cst_206 = arith.constant dense<0.000000e+00> : vector<32xf32>
    %593 = vector.multi_reduction <add>, %592, %cst_206 [1] : vector<32x32xf32> to vector<32xf32>
    %594 = vector.shape_cast %593 : vector<32xf32> to vector<32x1xf32>
    %cst_207 = arith.constant 3.200000e+01 : f32
    %595 = vector.broadcast %cst_207 : f32 to vector<32x1xf32>
    %596 = arith.divf %594, %595 : vector<32x1xf32>
    %597 = vector.broadcast %596 : vector<32x1xf32> to vector<32x32xf32>
    %598 = arith.subf %592, %597 : vector<32x32xf32>
    %599 = arith.mulf %598, %598 : vector<32x32xf32>
    %cst_208 = arith.constant dense<0.000000e+00> : vector<32xf32>
    %600 = vector.multi_reduction <add>, %599, %cst_208 [1] : vector<32x32xf32> to vector<32xf32>
    %601 = vector.shape_cast %600 : vector<32xf32> to vector<32x1xf32>
    %cst_209 = arith.constant 3.200000e+01 : f32
    %602 = vector.broadcast %cst_209 : f32 to vector<32x1xf32>
    %603 = arith.divf %601, %602 : vector<32x1xf32>
    %604 = vector.broadcast %596 : vector<32x1xf32> to vector<32x32xf32>
    %605 = arith.subf %592, %604 : vector<32x32xf32>
    %cst_210 = arith.constant 9.99999974E-6 : f32
    %606 = vector.broadcast %cst_210 : f32 to vector<32x1xf32>
    %607 = arith.addf %603, %606 : vector<32x1xf32>
    %608 = math.rsqrt %607 : vector<32x1xf32>
    %609 = vector.broadcast %608 : vector<32x1xf32> to vector<32x32xf32>
    %610 = arith.mulf %605, %609 : vector<32x32xf32>
    %611 = vector.broadcast %556 : vector<1x32xf32> to vector<32x32xf32>
    %612 = arith.mulf %610, %611 : vector<32x32xf32>
    %613 = vector.broadcast %557 : vector<1x32xf32> to vector<32x32xf32>
    %614 = arith.addf %612, %613 : vector<32x32xf32>
    %615 = vector.extract_strided_slice %548 {offsets = [0, 0], sizes = [64, 32], strides = [1, 1]} : vector<128x32xf32> to vector<64x32xf32>
    %cst_211 = arith.constant dense<0.000000e+00> : vector<32x64xf32>
    %616 = tpu.matmul %614, %615, %cst_211 {dimension_numbers = #tpu.dot_dimension_numbers<[1], [1], [0], [0], [0, 0, 1, 0], [], []>} : vector<32x32xf32>, vector<64x32xf32>, vector<32x64xf32> -> vector<32x64xf32>
    %c5_212 = arith.constant 5 : index
    %c0_213 = arith.constant 0 : index
    %c0_214 = arith.constant 0 : index
    %617 = vector.load %arg9[%c5_212, %c0_213, %c0_214] : memref<6x1x64xf32, #tpu.memory_space<vmem>>, vector<1x1x64xf32>
    %618 = vector.shape_cast %617 : vector<1x1x64xf32> to vector<1x64xf32>
    %619 = vector.broadcast %618 : vector<1x64xf32> to vector<32x64xf32>
    %620 = arith.addf %616, %619 : vector<32x64xf32>
    %cst_215 = arith.constant 0.000000e+00 : f32
    %621 = vector.broadcast %cst_215 : f32 to vector<32x64xf32>
    %622 = arith.maximumf %620, %621 : vector<32x64xf32>
    %623 = vector.extract_strided_slice %548 {offsets = [64, 0], sizes = [64, 32], strides = [1, 1]} : vector<128x32xf32> to vector<64x32xf32>
    %cst_216 = arith.constant dense<0.000000e+00> : vector<32x32xf32>
    %624 = tpu.matmul %622, %623, %cst_216 {dimension_numbers = #tpu.dot_dimension_numbers<[1], [0], [0], [1], [0, 0, 1, 1], [], []>} : vector<32x64xf32>, vector<64x32xf32>, vector<32x32xf32> -> vector<32x32xf32>
    %625 = vector.broadcast %555 : vector<1x32xf32> to vector<32x32xf32>
    %626 = arith.addf %624, %625 : vector<32x32xf32>
    %627 = arith.addf %614, %626 : vector<32x32xf32>
    %cst_217 = arith.constant dense<0.000000e+00> : vector<32xf32>
    %628 = vector.multi_reduction <add>, %627, %cst_217 [1] : vector<32x32xf32> to vector<32xf32>
    %629 = vector.shape_cast %628 : vector<32xf32> to vector<32x1xf32>
    %cst_218 = arith.constant 3.200000e+01 : f32
    %630 = vector.broadcast %cst_218 : f32 to vector<32x1xf32>
    %631 = arith.divf %629, %630 : vector<32x1xf32>
    %632 = vector.broadcast %631 : vector<32x1xf32> to vector<32x32xf32>
    %633 = arith.subf %627, %632 : vector<32x32xf32>
    %634 = arith.mulf %633, %633 : vector<32x32xf32>
    %cst_219 = arith.constant dense<0.000000e+00> : vector<32xf32>
    %635 = vector.multi_reduction <add>, %634, %cst_219 [1] : vector<32x32xf32> to vector<32xf32>
    %636 = vector.shape_cast %635 : vector<32xf32> to vector<32x1xf32>
    %cst_220 = arith.constant 3.200000e+01 : f32
    %637 = vector.broadcast %cst_220 : f32 to vector<32x1xf32>
    %638 = arith.divf %636, %637 : vector<32x1xf32>
    %639 = vector.broadcast %631 : vector<32x1xf32> to vector<32x32xf32>
    %640 = arith.subf %627, %639 : vector<32x32xf32>
    %cst_221 = arith.constant 9.99999974E-6 : f32
    %641 = vector.broadcast %cst_221 : f32 to vector<32x1xf32>
    %642 = arith.addf %638, %641 : vector<32x1xf32>
    %643 = math.rsqrt %642 : vector<32x1xf32>
    %644 = vector.broadcast %643 : vector<32x1xf32> to vector<32x32xf32>
    %645 = arith.mulf %640, %644 : vector<32x32xf32>
    %646 = vector.broadcast %558 : vector<1x32xf32> to vector<32x32xf32>
    %647 = arith.mulf %645, %646 : vector<32x32xf32>
    %648 = vector.broadcast %559 : vector<1x32xf32> to vector<32x32xf32>
    %649 = arith.addf %647, %648 : vector<32x32xf32>
    %c5_222 = arith.constant 5 : index
    %c0_223 = arith.constant 0 : index
    %c0_224 = arith.constant 0 : index
    %650 = vector.load %arg10[%c5_222, %c0_223, %c0_224] : memref<6x32x32xf32, #tpu.memory_space<vmem>>, vector<1x32x32xf32>
    %651 = vector.shape_cast %650 : vector<1x32x32xf32> to vector<32x32xf32>
    %652 = vector.shape_cast %649 : vector<32x32xf32> to vector<1x32x32xf32>
    tpu.vector_store %arg10[%c5_222, %c0_223, %c0_224], %652 {strides = array<i32>} : memref<6x32x32xf32, #tpu.memory_space<vmem>>, vector<1x32x32xf32>,
    return
  }
  func.func @transform_0(%arg0: i32) -> (i32, i32) {
    %c0_i32 = arith.constant 0 : i32
    %c0_i32_0 = arith.constant 0 : i32
    %c0_i32_1 = arith.constant 0 : i32
    return %c0_i32, %c0_i32_0 : i32, i32
  }
  func.func @transform_1(%arg0: i32) -> (i32, i32) {
    %c0_i32 = arith.constant 0 : i32
    %c0_i32_0 = arith.constant 0 : i32
    %c0_i32_1 = arith.constant 0 : i32
    return %c0_i32, %c0_i32_0 : i32, i32
  }
  func.func @transform_2(%arg0: i32) -> (i32, i32) {
    %c0_i32 = arith.constant 0 : i32
    %c0_i32_0 = arith.constant 0 : i32
    %c0_i32_1 = arith.constant 0 : i32
    return %c0_i32, %c0_i32_0 : i32, i32
  }
  func.func @transform_3(%arg0: i32) -> (i32, i32) {
    %c0_i32 = arith.constant 0 : i32
    %c0_i32_0 = arith.constant 0 : i32
    %c0_i32_1 = arith.constant 0 : i32
    return %c0_i32, %c0_i32_0 : i32, i32
  }
  func.func @transform_4(%arg0: i32) -> (i32, i32) {
    %c0_i32 = arith.constant 0 : i32
    %c0_i32_0 = arith.constant 0 : i32
    %c0_i32_1 = arith.constant 0 : i32
    return %c0_i32, %c0_i32_0 : i32, i32
  }
  func.func @transform_5(%arg0: i32) -> (i32, i32, i32) {
    %c0_i32 = arith.constant 0 : i32
    %c0_i32_0 = arith.constant 0 : i32
    %c0_i32_1 = arith.constant 0 : i32
    %c0_i32_2 = arith.constant 0 : i32
    return %c0_i32, %c0_i32_0, %c0_i32_1 : i32, i32, i32
  }
  func.func @transform_6(%arg0: i32) -> (i32, i32, i32) {
    %c0_i32 = arith.constant 0 : i32
    %c0_i32_0 = arith.constant 0 : i32
    %c0_i32_1 = arith.constant 0 : i32
    %c0_i32_2 = arith.constant 0 : i32
    return %c0_i32, %c0_i32_0, %c0_i32_1 : i32, i32, i32
  }
  func.func @transform_7(%arg0: i32) -> (i32, i32, i32) {
    %c0_i32 = arith.constant 0 : i32
    %c0_i32_0 = arith.constant 0 : i32
    %c0_i32_1 = arith.constant 0 : i32
    %c0_i32_2 = arith.constant 0 : i32
    return %c0_i32, %c0_i32_0, %c0_i32_1 : i32, i32, i32
  }
  func.func @transform_8(%arg0: i32) -> (i32, i32, i32) {
    %c0_i32 = arith.constant 0 : i32
    %c0_i32_0 = arith.constant 0 : i32
    %c0_i32_1 = arith.constant 0 : i32
    %c0_i32_2 = arith.constant 0 : i32
    return %c0_i32, %c0_i32_0, %c0_i32_1 : i32, i32, i32
  }
  func.func @transform_9(%arg0: i32) -> (i32, i32, i32) {
    %c0_i32 = arith.constant 0 : i32
    %c0_i32_0 = arith.constant 0 : i32
    %c0_i32_1 = arith.constant 0 : i32
    %c0_i32_2 = arith.constant 0 : i32
    return %c0_i32, %c0_i32_0, %c0_i32_1 : i32, i32, i32
  }
}

</mosaic_0001>

<bundles_post_ra>
// kernel: tile.9
= control target key start
LH: loop header
LB: loop body
LE: loop exit
PB: predicated region body
PF: predicated region fallthrough
CT: control target
= control target key end

     0   :  { %vm92_vm0 = vcmask 1047556   ;;  %s459_s14 = smov 96   ;;  %s460_s22 = smov 64   ;;  %vm3_vm1 = vcmask 261120   ;;  %vm96_vm2 = vcmask 1048320   ;;  %vm183_vm3 = vcmask 785920   ;;  %s896_s0 = inlined_call_operand.vmem [shape: f32[32,8,32], index: 0, kind: input, shape index: {}]   ;;  %s897_s1 = inlined_call_operand.vmem [shape: f32[32,256], index: 1, kind: output, shape index: {}]  }
   0x1   :  { %v392_v0 = vld [vmem:[%s896_s0 + $0x7] ss:$8 sm:$0xf]   ;;  %v387_v3 = vld [vmem:[%s896_s0 + $0x3] ss:$8 sm:$0xf]  }
   0x2   :  { %v393_v1 = vld [vmem:[%s896_s0 + $0x7] ss:$8 sm:$0xf0]   ;;  %v388_v4 = vld [vmem:[%s896_s0 + $0x3] ss:$8 sm:$0xf0]  }
   0x3   :  { %v114_v2 = vsel %vm92_vm0, %v393_v1, %v392_v0  ;;  %v93_v5 = vsel %vm92_vm0, %v388_v4, %v387_v3  ;;  %v395_v6 = vld [vmem:[%s896_s0 + $0x87] ss:$8 sm:$0xf]   ;;  %v389_v8 = vld [vmem:[%s896_s0 + $0x83] ss:$8 sm:$0xf]  }
   0x4   :  { %115 = vrot.lane.b32.xlu1 %v114_v2, %s459_s14  ;;  %94 = vrot.lane.b32.xlu0 %v93_v5, %s459_s14  ;;  %v396_v7 = vld [vmem:[%s896_s0 + $0x87] ss:$8 sm:$0xf0]   ;;  %v390_v9 = vld [vmem:[%s896_s0 + $0x83] ss:$8 sm:$0xf0]  }
   0x5   :  { %v398_v10 = vld [vmem:[%s896_s0 + $0x43] ss:$8 sm:$0xf]   ;;  %v125_v12 = vsel %vm92_vm0, %v396_v7, %v395_v6  ;;  %v103_v14 = vsel %vm92_vm0, %v390_v9, %v389_v8  ;;  %v407_v17 = vld [vmem:[%s896_s0 + $0xc7] ss:$8 sm:$0xf]  }
   0x6   :  { %v399_v11 = vld [vmem:[%s896_s0 + $0x43] ss:$8 sm:$0xf0]   ;;  %v408_v18 = vld [vmem:[%s896_s0 + $0xc7] ss:$8 sm:$0xf0]  }
   0x7   :  { %v136_v13 = vsel %vm92_vm0, %v399_v11, %v398_v10  ;;  %v401_v15 = vld [vmem:[%s896_s0 + $0xc3] ss:$8 sm:$0xf]   ;;  %v404_v19 = vld [vmem:[%s896_s0 + $0x47] ss:$8 sm:$0xf]   ;;  %v169_v22 = vsel %vm92_vm0, %v408_v18, %v407_v17 }
   0x8   :  { %137 = vrot.lane.b32.xlu2 %v136_v13, %s459_s14  ;;  %v402_v16 = vld [vmem:[%s896_s0 + $0xc3] ss:$8 sm:$0xf0]   ;;  %v405_v20 = vld [vmem:[%s896_s0 + $0x47] ss:$8 sm:$0xf0]  }
   0x9   :  { %v147_v21 = vsel %vm92_vm0, %v402_v16, %v401_v15  ;;  %v158_v23 = vsel %vm92_vm0, %v405_v20, %v404_v19  ;;  %v410_v24 = vld [vmem:[%s896_s0 + $0x2] ss:$8 sm:$0xf]   ;;  %v415_v26 = vld [vmem:[%s896_s0 + $0x6] ss:$8 sm:$0xf]  }
   0xa   :  { %v411_v25 = vld [vmem:[%s896_s0 + $0x2] ss:$8 sm:$0xf0]   ;;  %v416_v27 = vld [vmem:[%s896_s0 + $0x6] ss:$8 sm:$0xf0]  }
   0xb   :  { %v412_v28 = vld [vmem:[%s896_s0 + $0x82] ss:$8 sm:$0xf]   ;;  %v180_v30 = vsel %vm92_vm0, %v411_v25, %v410_v24  ;;  %v201_v31 = vsel %vm92_vm0, %v416_v27, %v415_v26  ;;  %v418_v33 = vld [vmem:[%s896_s0 + $0x86] ss:$8 sm:$0xf]  }
   0xc   :  { %126 = vrot.lane.b32.xlu1 %v125_v12, %s459_s14  ;;  %104 = vrot.lane.b32.xlu0 %v103_v14, %s459_s14  ;;  %v413_v29 = vld [vmem:[%s896_s0 + $0x82] ss:$8 sm:$0xf0]   ;;  %v419_v34 = vld [vmem:[%s896_s0 + $0x86] ss:$8 sm:$0xf0]  }
   0xd   :  { %v190_v32 = vsel %vm92_vm0, %v413_v29, %v412_v28  ;;  %v424_v35 = vld [vmem:[%s896_s0 + $0xc2] ss:$8 sm:$0xf]   ;;  %v212_v39 = vsel %vm92_vm0, %v419_v34, %v418_v33  ;;  %v427_v42 = vld [vmem:[%s896_s0 + $0x46] ss:$8 sm:$0xf]  }
   0xe   :  { %v425_v36 = vld [vmem:[%s896_s0 + $0xc2] ss:$8 sm:$0xf0]   ;;  %v428_v43 = vld [vmem:[%s896_s0 + $0x46] ss:$8 sm:$0xf0]  }
   0xf   :  { %v421_v37 = vld [vmem:[%s896_s0 + $0x42] ss:$8 sm:$0xf]   ;;  %v234_v40 = vsel %vm92_vm0, %v425_v36, %v424_v35  ;;  %v433_v44 = vld [vmem:[%s896_s0 + $0x1] ss:$8 sm:$0xf]   ;;  %v245_v48 = vsel %vm92_vm0, %v428_v43, %v427_v42 }
  0x10   :  { %148 = vrot.lane.b32.xlu2 %v147_v21, %s459_s14  ;;  %v422_v38 = vld [vmem:[%s896_s0 + $0x42] ss:$8 sm:$0xf0]   ;;  %v434_v45 = vld [vmem:[%s896_s0 + $0x1] ss:$8 sm:$0xf0]  }
  0x11   :  { %v223_v41 = vsel %vm92_vm0, %v422_v38, %v421_v37  ;;  %v430_v46 = vld [vmem:[%s896_s0 + $0xc6] ss:$8 sm:$0xf]   ;;  %v267_v49 = vsel %vm92_vm0, %v434_v45, %v433_v44  ;;  %s461_s18 = smov 32   ;;  %v2_v8 = vld [vmem:[%s896_s0] ss:$4 sm:$0xff]  }
  0x12   :  { %v431_v47 = vld [vmem:[%s896_s0 + $0xc6] ss:$8 sm:$0xf0]   ;;  %v435_v51 = vld [vmem:[%s896_s0 + $0x81] ss:$8 sm:$0xf]  }
  0x13   :  { %v256_v50 = vsel %vm92_vm0, %v431_v47, %v430_v46  ;;  %v436_v52 = vld [vmem:[%s896_s0 + $0x81] ss:$8 sm:$0xf0]   ;;  %v441_v53 = vld [vmem:[%s896_s0 + $0x85] ss:$8 sm:$0xf]  }
  0x14   :  { %170 = vrot.lane.b32.xlu1 %v169_v22, %s459_s14  ;;  %159 = vrot.lane.b32.xlu0 %v158_v23, %s459_s14  ;;  %v442_v54 = vld [vmem:[%s896_s0 + $0x85] ss:$8 sm:$0xf0]   ;;  %v277_v57 = vsel %vm92_vm0, %v436_v52, %v435_v51  ;;  %v444_v60 = vld [vmem:[%s896_s0 + $0x41] ss:$8 sm:$0xf]  }
  0x15   :  { %v438_v55 = vld [vmem:[%s896_s0 + $0x5] ss:$8 sm:$0xf]   ;;  %v299_v58 = vsel %vm92_vm0, %v442_v54, %v441_v53  ;;  %v445_v61 = vld [vmem:[%s896_s0 + $0x41] ss:$8 sm:$0xf0]  }
  0x16   :  { %v439_v56 = vld [vmem:[%s896_s0 + $0x5] ss:$8 sm:$0xf0]   ;;  %v447_v0 = vld [vmem:[%s896_s0 + $0xc1] ss:$8 sm:$0xf]   ;;  %v310_v2 = vsel %vm92_vm0, %v445_v61, %v444_v60 }
  0x17   :  { %v288_v59 = vsel %vm92_vm0, %v439_v56, %v438_v55  ;;  %v450_v62 = vld [vmem:[%s896_s0 + $0x45] ss:$8 sm:$0xf]   ;;  %v448_v1 = vld [vmem:[%s896_s0 + $0xc1] ss:$8 sm:$0xf0]  }
  0x18   :  { %181 = vrot.lane.b32.xlu2 %v180_v30, %s460_s22  ;;  %v451_v63 = vld [vmem:[%s896_s0 + $0x45] ss:$8 sm:$0xf0]   ;;  %v321_v4 = vsel %vm92_vm0, %v448_v1, %v447_v0  ;;  %4 = vst.msk [vmem:[%s897_s1] ss:$8 sm:$0x3] %vm3_vm1, %v2_v8  }
  0x19   :  { %v332_v3 = vsel %vm92_vm0, %v451_v63, %v450_v62  ;;  %v453_v5 = vld [vmem:[%s896_s0 + $0xc5] ss:$8 sm:$0xf]   ;;  %349 = vst.msk [vmem:[%s897_s1 - $0xf] ss:$8 sm:$0xc] %vm3_vm1, %v2_v8  }
  0x1a   :  { %v454_v6 = vld [vmem:[%s896_s0 + $0xc5] ss:$8 sm:$0xf0]   ;;  %v352_v9 = vld [vmem:[%s896_s0 + $0x20] ss:$4 sm:$0xff]   ;;  %vm270_vm4 = vcmask 523520  }
  0x1b   :  { %v343_v7 = vsel %vm92_vm0, %v454_v6, %v453_v5  ;;  %350 = vst.msk [vmem:[%s897_s1 - $0x1e] ss:$8 sm:$0x30] %vm3_vm1, %v2_v8   ;;  %v367_v10 = vld [vmem:[%s896_s0 + $0x80] ss:$4 sm:$0xff]  }
  0x1c   :  { %202 = vrot.lane.b32.xlu1 %v201_v31, %s460_s22  ;;  %191 = vrot.lane.b32.xlu0 %v190_v32, %s460_s22  ;;  %351 = vst.msk [vmem:[%s897_s1 - $0x2d] ss:$8 sm:$0xc0] %vm3_vm1, %v2_v8   ;;  %v372_v11 = vld [vmem:[%s896_s0 + $0xa0] ss:$4 sm:$0xff]  }
  0x1d   :  { %353 = vst.msk [vmem:[%s897_s1 + $0x4] ss:$8 sm:$0x3] %vm3_vm1, %v352_v9   ;;  %v357_v13 = vld [vmem:[%s896_s0 + $0x40] ss:$4 sm:$0xff]  }
  0x1e   :  { %354 = vst.msk [vmem:[%s897_s1 - $0xb] ss:$8 sm:$0xc] %vm3_vm1, %v352_v9   ;;  %v362_v14 = vld [vmem:[%s896_s0 + $0x60] ss:$4 sm:$0xff]  }
  0x1f   :  { %355 = vst.msk [vmem:[%s897_s1 - $0x1a] ss:$8 sm:$0x30] %vm3_vm1, %v352_v9   ;;  %v377_v16 = vld [vmem:[%s896_s0 + $0xc0] ss:$4 sm:$0xff]  }
  0x20   :  { %213 = vrot.lane.b32.xlu2 %v212_v39, %s460_s22  ;;  %356 = vst.msk [vmem:[%s897_s1 - $0x29] ss:$8 sm:$0xc0] %vm3_vm1, %v352_v9   ;;  %v382_v17 = vld [vmem:[%s896_s0 + $0xe0] ss:$4 sm:$0xff]  }
  0x21   :  { %368 = vst.msk [vmem:[%s897_s1 + $0x20] ss:$8 sm:$0x3] %vm3_vm1, %v367_v10  }
  0x22   :  { %369 = vst.msk [vmem:[%s897_s1 + $0x11] ss:$8 sm:$0xc] %vm3_vm1, %v367_v10  }
  0x23   :  { %370 = vst.msk [vmem:[%s897_s1 + $0x2] ss:$8 sm:$0x30] %vm3_vm1, %v367_v10  }
  0x24   :  { %235 = vrot.lane.b32.xlu1 %v234_v40, %s460_s22  ;;  %224 = vrot.lane.b32.xlu0 %v223_v41, %s460_s22  ;;  %371 = vst.msk [vmem:[%s897_s1 - $0xd] ss:$8 sm:$0xc0] %vm3_vm1, %v367_v10  }
  0x25   :  { %373 = vst.msk [vmem:[%s897_s1 + $0x24] ss:$8 sm:$0x3] %vm3_vm1, %v372_v11  }
  0x26   :  { %374 = vst.msk [vmem:[%s897_s1 + $0x15] ss:$8 sm:$0xc] %vm3_vm1, %v372_v11  }
  0x27   :  { %375 = vst.msk [vmem:[%s897_s1 + $0x6] ss:$8 sm:$0x30] %vm3_vm1, %v372_v11  }
  0x28   :  { %246 = vrot.lane.b32.xlu2 %v245_v48, %s460_s22  ;;  %376 = vst.msk [vmem:[%s897_s1 - $0x9] ss:$8 sm:$0xc0] %vm3_vm1, %v372_v11  }
  0x29   :  { %358 = vst.msk [vmem:[%s897_s1 + $0x10] ss:$8 sm:$0x3] %vm3_vm1, %v357_v13  }
  0x2a   :  { %359 = vst.msk [vmem:[%s897_s1 + $0x1] ss:$8 sm:$0xc] %vm3_vm1, %v357_v13  }
  0x2b   :  { %360 = vst.msk [vmem:[%s897_s1 - $0xe] ss:$8 sm:$0x30] %vm3_vm1, %v357_v13  }
  0x2c   :  { %268 = vrot.lane.b32.xlu1 %v267_v49, %s461_s18  ;;  %257 = vrot.lane.b32.xlu0 %v256_v50, %s460_s22  ;;  %361 = vst.msk [vmem:[%s897_s1 - $0x1d] ss:$8 sm:$0xc0] %vm3_vm1, %v357_v13  }
  0x2d   :  { %363 = vst.msk [vmem:[%s897_s1 + $0x14] ss:$8 sm:$0x3] %vm3_vm1, %v362_v14  }
  0x2e   :  { %364 = vst.msk [vmem:[%s897_s1 + $0x5] ss:$8 sm:$0xc] %vm3_vm1, %v362_v14  }
  0x2f   :  { %365 = vst.msk [vmem:[%s897_s1 - $0xa] ss:$8 sm:$0x30] %vm3_vm1, %v362_v14  }
  0x30   :  { %278 = vrot.lane.b32.xlu2 %v277_v57, %s461_s18  ;;  %366 = vst.msk [vmem:[%s897_s1 - $0x19] ss:$8 sm:$0xc0] %vm3_vm1, %v362_v14  }
  0x31   :  { %378 = vst.msk [vmem:[%s897_s1 + $0x30] ss:$8 sm:$0x3] %vm3_vm1, %v377_v16  }
  0x32   :  { %379 = vst.msk [vmem:[%s897_s1 + $0x21] ss:$8 sm:$0xc] %vm3_vm1, %v377_v16  }
  0x33   :  { %380 = vst.msk [vmem:[%s897_s1 + $0x12] ss:$8 sm:$0x30] %vm3_vm1, %v377_v16  }
  0x34   :  { %300 = vrot.lane.b32.xlu1 %v299_v58, %s461_s18  ;;  %289 = vrot.lane.b32.xlu0 %v288_v59, %s461_s18  ;;  %381 = vst.msk [vmem:[%s897_s1 + $0x3] ss:$8 sm:$0xc0] %vm3_vm1, %v377_v16  }
  0x35   :  { %383 = vst.msk [vmem:[%s897_s1 + $0x34] ss:$8 sm:$0x3] %vm3_vm1, %v382_v17  }
  0x36   :  { %384 = vst.msk [vmem:[%s897_s1 + $0x25] ss:$8 sm:$0xc] %vm3_vm1, %v382_v17  }
  0x37   :  { %385 = vst.msk [vmem:[%s897_s1 + $0x16] ss:$8 sm:$0x30] %vm3_vm1, %v382_v17  }
  0x38   :  { %311 = vrot.lane.b32.xlu2 %v310_v2, %s461_s18  ;;  %386 = vst.msk [vmem:[%s897_s1 + $0x7] ss:$8 sm:$0xc0] %vm3_vm1, %v382_v17  }
  0x3c   :  { %333 = vrot.lane.b32.xlu1 %v332_v3, %s461_s18  ;;  %322 = vrot.lane.b32.xlu0 %v321_v4, %s461_s18 }
  0x40   :  { %344 = vrot.lane.b32.xlu2 %v343_v7, %s461_s18 }
  0x62   :  { %v138_v12 = vpop.permute.xlu2 %137  }
  0x63   :  { %400 = vst.msk [vmem:[%s897_s1 + $0x10] sm:$0xff] %vm96_vm2, %v138_v12  }
  0x6a   :  { %v149_v15 = vpop.permute.xlu2 %148  }
  0x6b   :  { %403 = vst.msk [vmem:[%s897_s1 + $0x30] sm:$0xff] %vm96_vm2, %v149_v15  }
  0x72   :  { %v182_v18 = vpop.permute.xlu2 %181  }
  0x76   :  { %v116_v19 = vpop.permute.xlu1 %115   ;;  %v95_v20 = vpop.permute.xlu0 %94  }
  0x77   :  { %394 = vst.msk [vmem:[%s897_s1 + $0x8] sm:$0xff] %vm96_vm2, %v116_v19  }
  0x78   :  { %97 = vst.msk [vmem:[%s897_s1] sm:$0xff] %vm96_vm2, %v95_v20  }
  0x79   :  { %184 = vst.msk [vmem:[%s897_s1] sm:$0xff] %vm183_vm3, %v182_v18  }
  0x7a   :  { %v214_v21 = vpop.permute.xlu2 %213  }
  0x7e   :  { %v127_v22 = vpop.permute.xlu1 %126   ;;  %v105_v23 = vpop.permute.xlu0 %104  }
  0x7f   :  { %397 = vst.msk [vmem:[%s897_s1 + $0x28] sm:$0xff] %vm96_vm2, %v127_v22  }
  0x80   :  { %420 = vst.msk [vmem:[%s897_s1 + $0x28] sm:$0xff] %vm183_vm3, %v214_v21  }
  0x81   :  { %391 = vst.msk [vmem:[%s897_s1 + $0x20] sm:$0xff] %vm96_vm2, %v105_v23  }
  0x82   :  { %v247_v24 = vpop.permute.xlu2 %246  }
  0x86   :  { %v171_v25 = vpop.permute.xlu1 %170   ;;  %v160_v26 = vpop.permute.xlu0 %159  }
  0x87   :  { %409 = vst.msk [vmem:[%s897_s1 + $0x38] sm:$0xff] %vm96_vm2, %v171_v25  }
  0x88   :  { %406 = vst.msk [vmem:[%s897_s1 + $0x18] sm:$0xff] %vm96_vm2, %v160_v26  }
  0x89   :  { %429 = vst.msk [vmem:[%s897_s1 + $0x18] sm:$0xff] %vm183_vm3, %v247_v24  }
  0x8a   :  { %v279_v27 = vpop.permute.xlu2 %278  }
  0x8e   :  { %v203_v28 = vpop.permute.xlu1 %202   ;;  %v192_v29 = vpop.permute.xlu0 %191  }
  0x8f   :  { %417 = vst.msk [vmem:[%s897_s1 + $0x8] sm:$0xff] %vm183_vm3, %v203_v28  }
  0x90   :  { %414 = vst.msk [vmem:[%s897_s1 + $0x20] sm:$0xff] %vm183_vm3, %v192_v29  }
  0x91   :  { %437 = vst.msk [vmem:[%s897_s1 + $0x20] sm:$0xff] %vm270_vm4, %v279_v27  }
  0x92   :  { %v312_v30 = vpop.permute.xlu2 %311  }
  0x96   :  { %v236_v31 = vpop.permute.xlu1 %235   ;;  %v225_v32 = vpop.permute.xlu0 %224  }
  0x97   :  { %426 = vst.msk [vmem:[%s897_s1 + $0x30] sm:$0xff] %vm183_vm3, %v236_v31  }
  0x98   :  { %423 = vst.msk [vmem:[%s897_s1 + $0x10] sm:$0xff] %vm183_vm3, %v225_v32  }
  0x99   :  { %446 = vst.msk [vmem:[%s897_s1 + $0x10] sm:$0xff] %vm270_vm4, %v312_v30  }
  0x9a   :  { %v345_v33 = vpop.permute.xlu2 %344  }
  0x9e   :  { %v269_v34 = vpop.permute.xlu1 %268   ;;  %v258_v35 = vpop.permute.xlu0 %257  }
  0x9f   :  { %271 = vst.msk [vmem:[%s897_s1] sm:$0xff] %vm270_vm4, %v269_v34  }
  0xa0   :  { %432 = vst.msk [vmem:[%s897_s1 + $0x38] sm:$0xff] %vm183_vm3, %v258_v35  }
  0xa1   :  { %455 = vst.msk [vmem:[%s897_s1 + $0x38] sm:$0xff] %vm270_vm4, %v345_v33  }
  0xa6   :  { %v301_v36 = vpop.permute.xlu1 %300   ;;  %v290_v37 = vpop.permute.xlu0 %289  }
  0xa7   :  { %443 = vst.msk [vmem:[%s897_s1 + $0x28] sm:$0xff] %vm270_vm4, %v301_v36  }
  0xa8   :  { %440 = vst.msk [vmem:[%s897_s1 + $0x8] sm:$0xff] %vm270_vm4, %v290_v37  }
  0xae   :  { %v334_v38 = vpop.permute.xlu1 %333   ;;  %v323_v39 = vpop.permute.xlu0 %322  }
  0xaf   :  { %452 = vst.msk [vmem:[%s897_s1 + $0x18] sm:$0xff] %vm270_vm4, %v334_v38  }
  0xb0   :  { %449 = vst.msk [vmem:[%s897_s1 + $0x30] sm:$0xff] %vm270_vm4, %v323_v39  }

// kernel: deformable_transformer_forward.1
= control target key start
LH: loop header
LB: loop body
LE: loop exit
PB: predicated region body
PF: predicated region fallthrough
CT: control target
= control target key end

     0   :  { %vm144_vm0 = vcmask 261120   ;;  %vm610_vm1 = vcmask 64512   ;;  %vm951_vm15 = vcmask 523264   ;;  %s11732_s5 = inlined_call_operand.vmem [shape: f32[6,128,32], index: 5, kind: input, shape index: {}]   ;;  %s11733_s0 = inlined_call_operand.vmem [shape: f32[32,32], index: 0, kind: input, shape index: {}]   ;;  %s11734_s7 = inlined_call_operand.vmem [shape: f32[6,16,32], index: 7, kind: input, shape index: {}]   ;;  %s11735_s2 = inlined_call_operand.vmem [shape: f32[256,32], index: 2, kind: input, shape index: {}]   ;;  %s11736_s1 = inlined_call_operand.vmem [shape: f32[32,256], index: 1, kind: input, shape index: {}]   ;;  %s11737_s3 = inlined_call_operand.vmem [shape: f32[256,8], index: 3, kind: input, shape index: {}]   ;;  %s11738_s4 = inlined_call_operand.vmem [shape: f32[8,32], index: 4, kind: input, shape index: {}]   ;;  %s11739_s6 = inlined_call_operand.vmem [shape: f32[6,128,32], index: 6, kind: input, shape index: {}]   ;;  %s11740_s8 = inlined_call_operand.vmem [shape: f32[6,1,64], index: 8, kind: input, shape index: {}]   ;;  %s11741_s9 = inlined_call_operand.vmem [shape: f32[6,32,32], index: 9, kind: output, shape index: {}]  }
   0x1   :  { %v116_v0 = vld [vmem:[%s11732_s5 + $0x38] sm:$0xff]  ;;  %v115_v1 = vld [vmem:[%s11732_s5 + $0x30] sm:$0xff]  ;;  %v114_v2 = vld [vmem:[%s11732_s5 + $0x28] sm:$0xff] }
   0x2   :  { %6036 = vmatpush.xpose.msk.msra.mxu1 %vm144_vm0, %v116_v0  ;;  %v112_v3 = vld [vmem:[%s11732_s5 + $0x18] sm:$0xff]  ;;  %v113_v4 = vld [vmem:[%s11732_s5 + $0x20] sm:$0xff]  ;;  %v111_v5 = vld [vmem:[%s11732_s5 + $0x10] sm:$0xff] }
   0x3   :  { %6028 = vmatpush.xpose.msk.msra.mxu0 %vm144_vm0, %v112_v3  ;;  %v7464_v6 = vld [vmem:[%s11733_s0] sm:$0xff]  ;;  %v110_v7 = vld [vmem:[%s11732_s5 + $0x8] sm:$0xff]  ;;  %v7489_v10 = vld [vmem:[%s11733_s0 + $0x10] sm:$0xff] }
   0x4   :  { %v109_v8 = vld [vmem:[%s11732_s5] sm:$0xff]  ;;  %v7479_v9 = vld [vmem:[%s11733_s0 + $0x8] sm:$0xff]  ;;  %v7498_v11 = vld [vmem:[%s11733_s0 + $0x18] sm:$0xff] }
   0x5   :  { %v7509_v15 = vld [vmem:[%s11734_s7] sm:$0xff]  ;;  %v7515_v18 = vld [vmem:[%s11735_s2 + $0x78] sm:$0xff]  ;;  %v7533_v24 = vld [vmem:[%s11735_s2 + $0x70] sm:$0xff] }
   0x6   :  { %6037 = vmatpush.xpose.msk.msra.mxu1 %vm144_vm0, %v115_v1  ;;  %v198_v16 = vperm.slane %v7509_v15, 1  ;;  %v7520_v19 = vld [vmem:[%s11735_s2 + $0xf8] sm:$0xff]  ;;  %v7538_v25 = vld [vmem:[%s11735_s2 + $0xf0] sm:$0xff]  ;;  %v7551_v29 = vld [vmem:[%s11735_s2 + $0x68] sm:$0xff] }
   0x7   :  { %6029 = vmatpush.xpose.msk.msra.mxu0 %vm144_vm0, %v111_v5  ;;  %v7556_v30 = vld [vmem:[%s11735_s2 + $0xe8] sm:$0xff]  ;;  %v7569_v34 = vld [vmem:[%s11735_s2 + $0x60] sm:$0xff]  ;;  %v7585_v38 = vld [vmem:[%s11735_s2 + $0x58] sm:$0xff] }
   0x8   :  { %v7574_v35 = vld [vmem:[%s11735_s2 + $0xe0] sm:$0xff]  ;;  %v7590_v39 = vld [vmem:[%s11735_s2 + $0xd8] sm:$0xff]  ;;  %v7601_v42 = vld [vmem:[%s11735_s2 + $0x50] sm:$0xff] }
   0x9   :  { %v7606_v43 = vld [vmem:[%s11735_s2 + $0xd0] sm:$0xff]  ;;  %v7617_v46 = vld [vmem:[%s11735_s2 + $0x48] sm:$0xff]  ;;  %v7633_v50 = vld [vmem:[%s11735_s2 + $0x40] sm:$0xff] }
   0xa   :  { %6038 = vmatpush.xpose.msk.msra.mxu1 %vm144_vm0, %v114_v2  ;;  %v7622_v47 = vld [vmem:[%s11735_s2 + $0xc8] sm:$0xff]  ;;  %v7638_v51 = vld [vmem:[%s11735_s2 + $0xc0] sm:$0xff]  ;;  %v7649_v54 = vld [vmem:[%s11735_s2 + $0x38] sm:$0xff] }
   0xb   :  { %6030 = vmatpush.xpose.msk.msra.mxu0 %vm144_vm0, %v110_v7  ;;  %v7654_v55 = vld [vmem:[%s11735_s2 + $0xb8] sm:$0xff]  ;;  %v7665_v58 = vld [vmem:[%s11735_s2 + $0x30] sm:$0xff]  ;;  %v7681_v62 = vld [vmem:[%s11735_s2 + $0x28] sm:$0xff] }
   0xc   :  { %v7670_v59 = vld [vmem:[%s11735_s2 + $0xb0] sm:$0xff]  ;;  %v7686_v63 = vld [vmem:[%s11735_s2 + $0xa8] sm:$0xff]  ;;  %v7697_v2 = vld [vmem:[%s11735_s2 + $0x20] sm:$0xff] }
   0xd   :  { %v7702_v3 = vld [vmem:[%s11735_s2 + $0xa0] sm:$0xff]  ;;  %v7713_v7 = vld [vmem:[%s11735_s2 + $0x18] sm:$0xff] }
   0xe   :  { %6039 = vmatpush.xpose.msk.msra.mxu1 %vm144_vm0, %v113_v4 }
   0xf   :  { %6031 = vmatpush.xpose.msk.msra.mxu0 %vm144_vm0, %v109_v8  ;;  %v7718_v8 = vld [vmem:[%s11735_s2 + $0x98] sm:$0xff] }
  0x11   :  { %6040 = vmatmul.msk.f32.vlgmr.msra.gmra.mxu1 %vm144_vm0, %v7464_v6 }
  0x12   :  { %6032 = vmatmul.msk.f32.vlgmr.msra.gmra.mxu0 %vm144_vm0, %v7464_v6 }
  0x19   :  { %6041 = vmatmul.msk.f32.gmra.mxu1 %vm144_vm0, %v7479_v9 }
  0x1a   :  { %6033 = vmatmul.msk.f32.gmra.mxu0 %vm144_vm0, %v7479_v9 }
  0x21   :  { %6042 = vmatmul.msk.f32.gmra.mxu1 %vm144_vm0, %v7489_v10 }
  0x22   :  { %6034 = vmatmul.msk.f32.gmra.mxu0 %vm144_vm0, %v7489_v10 }
  0x29   :  { %6043 = vmatmul.msk.f32.gmra.mxu1 %vm144_vm0, %v7498_v11 }
  0x2a   :  { %6035 = vmatmul.msk.f32.gmra.mxu0 %vm144_vm0, %v7498_v11 }
  0x8e   :  { %v228_v12 = vpop.f32.mrf.mxu1 }
  0x8f   :  { %v7560_v31 = vadd.f32 %v228_v12, %v198_v16 }
  0x91   :  { %v294_v36 = vmul.f32 %v7560_v31, %v7569_v34  ;;  %v310_v37 = vmul.f32 %v7560_v31, %v7574_v35  ;;  %v290_v52 = vmul.f32 %v7560_v31, %v7633_v50  ;;  %v306_v53 = vmul.f32 %v7560_v31, %v7638_v51 }
  0x92   :  { %v286_v4 = vmul.f32 %v7560_v31, %v7697_v2  ;;  %v302_v5 = vmul.f32 %v7560_v31, %v7702_v3 }
  0x96   :  { %v231_v13 = vpop.f32.mrf.mxu1 }
  0x97   :  { %v7542_v26 = vadd.f32 %v231_v13, %v198_v16 }
  0x99   :  { %v295_v32 = vmul.f32 %v7542_v26, %v7551_v29  ;;  %v311_v33 = vmul.f32 %v7542_v26, %v7556_v30  ;;  %v291_v48 = vmul.f32 %v7542_v26, %v7617_v46  ;;  %v307_v49 = vmul.f32 %v7542_v26, %v7622_v47 }
  0x9a   :  { %v287_v0 = vmul.f32 %v7542_v26, %v7681_v62  ;;  %v303_v1 = vmul.f32 %v7542_v26, %v7686_v63 }
  0x9e   :  { %v234_v14 = vpop.f32.mrf.mxu1 }
  0x9f   :  { %v7524_v21 = vadd.f32 %v234_v14, %v198_v16  ;;  %v7729_v14 = vld [vmem:[%s11735_s2 + $0x10] sm:$0xff] }
  0xa1   :  { %v296_v27 = vmul.f32 %v7524_v21, %v7533_v24  ;;  %v312_v28 = vmul.f32 %v7524_v21, %v7538_v25  ;;  %v292_v44 = vmul.f32 %v7524_v21, %v7601_v42  ;;  %v308_v45 = vmul.f32 %v7524_v21, %v7606_v43 }
  0xa2   :  { %v288_v60 = vmul.f32 %v7524_v21, %v7665_v58  ;;  %v304_v61 = vmul.f32 %v7524_v21, %v7670_v59 }
  0xa6   :  { %v237_v17 = vpop.f32.mrf.mxu1 }
  0xa7   :  { %v7522_v20 = vadd.f32 %v237_v17, %v198_v16  ;;  %v7734_v16 = vld [vmem:[%s11735_s2 + $0x90] sm:$0xff]  ;;  %v284_v17 = vmul.f32 %v7524_v21, %v7729_v14 }
  0xa9   :  { %v297_v22 = vmul.f32 %v7522_v20, %v7515_v18  ;;  %v313_v23 = vmul.f32 %v7522_v20, %v7520_v19  ;;  %v293_v40 = vmul.f32 %v7522_v20, %v7585_v38  ;;  %v309_v41 = vmul.f32 %v7522_v20, %v7590_v39 }
  0xaa   :  { %v289_v56 = vmul.f32 %v7522_v20, %v7649_v54  ;;  %v305_v57 = vmul.f32 %v7522_v20, %v7654_v55  ;;  %v285_v12 = vmul.f32 %v7522_v20, %v7713_v7  ;;  %v301_v13 = vmul.f32 %v7522_v20, %v7718_v8 }
  0xab   :  { %6052 = vmatpush.xpose.msk.msra.mxu3 %vm144_vm0, %v297_v22  ;;  %6072 = vmatpush.xpose.msk.msrb.mxu0 %vm144_vm0, %v313_v23  ;;  %v300_v20 = vmul.f32 %v7524_v21, %v7734_v16  ;;  %v186_v22 = vpop.f32.mrf.mxu0  ;;  %v7745_v23 = vld [vmem:[%s11735_s2 + $0x8] sm:$0xff] }
  0xaf   :  { %6053 = vmatpush.xpose.msk.msra.mxu3 %vm144_vm0, %v296_v27  ;;  %6073 = vmatpush.xpose.msk.msrb.mxu0 %vm144_vm0, %v312_v28  ;;  %v7750_v27 = vld [vmem:[%s11735_s2 + $0x88] sm:$0xff]  ;;  %v283_v28 = vmul.f32 %v7542_v26, %v7745_v23 }
  0xb0   :  { %v299_v21 = vmul.f32 %v7542_v26, %v7750_v27 }
  0xb3   :  { %6054 = vmatpush.xpose.msk.msra.mxu3 %vm144_vm0, %v295_v32  ;;  %6074 = vmatpush.xpose.msk.msrb.mxu0 %vm144_vm0, %v311_v33  ;;  %v143_v32 = vperm.slane %v7509_v15, 0  ;;  %v7762_v33 = vld [vmem:[%s11735_s2] sm:$0xff] }
  0xb4   :  { %v282_v26 = vmul.f32 %v7560_v31, %v7762_v33 }
  0xb7   :  { %6055 = vmatpush.xpose.msk.msra.mxu3 %vm144_vm0, %v294_v36  ;;  %6075 = vmatpush.xpose.msk.msrb.mxu0 %vm144_vm0, %v310_v37  ;;  %v7767_v36 = vld [vmem:[%s11735_s2 + $0x80] sm:$0xff]  ;;  %v120_v37 = vld [vmem:[%s11732_s5 + $0x58] sm:$0xff] }
  0xb8   :  { %6044 = vmatpush.xpose.msk.msra.mxu2 %vm144_vm0, %v120_v37 }
  0xbb   :  { %6056 = vmatpush.xpose.msk.msra.mxu3 %vm144_vm0, %v293_v40  ;;  %6076 = vmatpush.xpose.msk.msrb.mxu0 %vm144_vm0, %v309_v41  ;;  %v298_v40 = vmul.f32 %v7560_v31, %v7767_v36  ;;  %v119_v41 = vld [vmem:[%s11732_s5 + $0x50] sm:$0xff]  ;;  %v117_v31 = vld [vmem:[%s11732_s5 + $0x40] sm:$0xff] }
  0xbc   :  { %6045 = vmatpush.xpose.msk.msra.mxu2 %vm144_vm0, %v119_v41 }
  0xbf   :  { %6057 = vmatpush.xpose.msk.msra.mxu3 %vm144_vm0, %v292_v44  ;;  %6077 = vmatpush.xpose.msk.msrb.mxu0 %vm144_vm0, %v308_v45  ;;  %v187_v44 = vadd.f32 %v186_v22, %v143_v32  ;;  %v189_v45 = vpop.f32.mrf.mxu0  ;;  %v39_v22 = vld [vmem:[%s11736_s1 + $0x18] sm:$0xff] }
  0xc3   :  { %6058 = vmatpush.xpose.msk.msra.mxu3 %vm144_vm0, %v291_v48  ;;  %6078 = vmatpush.xpose.msk.msrb.mxu0 %vm144_vm0, %v307_v49  ;;  %v118_v48 = vld [vmem:[%s11732_s5 + $0x48] sm:$0xff]  ;;  %v190_v49 = vadd.f32 %v189_v45, %v143_v32 }
  0xc4   :  { %6046 = vmatpush.xpose.msk.msra.mxu2 %vm144_vm0, %v118_v48  ;;  %v104_v48 = vld [vmem:[%s11737_s3 + $0xe0] sm:$0xff] }
  0xc7   :  { %6059 = vmatpush.xpose.msk.msra.mxu3 %vm144_vm0, %v290_v52  ;;  %6079 = vmatpush.xpose.msk.msrb.mxu0 %vm144_vm0, %v306_v53  ;;  %v192_v52 = vpop.f32.mrf.mxu0 }
  0xc8   :  { %6047 = vmatpush.xpose.msk.msra.mxu2 %vm144_vm0, %v117_v31  ;;  %v193_v53 = vadd.f32 %v192_v52, %v143_v32  ;;  %v88_v31 = vld [vmem:[%s11737_s3 + $0x60] sm:$0xff] }
  0xcb   :  { %6060 = vmatpush.xpose.msk.msra.mxu3 %vm144_vm0, %v289_v56  ;;  %6080 = vmatpush.xpose.msk.msrb.mxu0 %vm144_vm0, %v305_v57 }
  0xcc   :  { %6048 = vmatmul.msk.f32.vlgmr.msra.gmra.mxu2 %vm144_vm0, %v7464_v6 }
  0xcf   :  { %6061 = vmatpush.xpose.msk.msra.mxu3 %vm144_vm0, %v288_v60  ;;  %6081 = vmatpush.xpose.msk.msrb.mxu0 %vm144_vm0, %v304_v61  ;;  %v195_v56 = vpop.f32.mrf.mxu0  ;;  %v37_v61 = vld [vmem:[%s11736_s1 + $0x8] sm:$0xff] }
  0xd0   :  { %v196_v57 = vadd.f32 %v195_v56, %v143_v32  ;;  %v90_v32 = vld [vmem:[%s11737_s3 + $0x70] sm:$0xff]  ;;  %v87_v56 = vld [vmem:[%s11737_s3 + $0x58] sm:$0xff] }
  0xd3   :  { %6062 = vmatpush.xpose.msk.msra.mxu3 %vm144_vm0, %v287_v0  ;;  %6082 = vmatpush.xpose.msk.msrb.mxu0 %vm144_vm0, %v303_v1  ;;  %v36_v0 = vld [vmem:[%s11736_s1] sm:$0xff] }
  0xd4   :  { %6049 = vmatmul.msk.f32.gmra.mxu2 %vm144_vm0, %v7479_v9 }
  0xd7   :  { %6063 = vmatpush.xpose.msk.msra.mxu3 %vm144_vm0, %v286_v4  ;;  %6083 = vmatpush.xpose.msk.msrb.mxu0 %vm144_vm0, %v302_v5 }
  0xdb   :  { %6064 = vmatpush.xpose.msk.msra.mxu3 %vm144_vm0, %v285_v12  ;;  %6084 = vmatpush.xpose.msk.msrb.mxu0 %vm144_vm0, %v301_v13  ;;  %v107_v13 = vld [vmem:[%s11737_s3 + $0xf8] sm:$0xff] }
  0xdc   :  { %6050 = vmatmul.msk.f32.gmra.mxu2 %vm144_vm0, %v7489_v10 }
  0xdd   :  { %577 = vmatpush.msrb.mxu2 %v107_v13  ;;  %v7881_v13 = vld [vmem:[%s11737_s3 + $0x48] sm:$0xff] }
  0xdf   :  { %6065 = vmatpush.xpose.msk.msra.mxu3 %vm144_vm0, %v284_v17  ;;  %6085 = vmatpush.xpose.msk.msrb.mxu0 %vm144_vm0, %v300_v20  ;;  %v91_v17 = vld [vmem:[%s11737_s3 + $0x78] sm:$0xff] }
  0xe0   :  { %548 = vmatpush.msrb.mxu1 %v91_v17 }
  0xe2   :  { %549 = vmatpush.msrb.mxu1 %v90_v32 }
  0xe3   :  { %6066 = vmatpush.xpose.msk.msra.mxu3 %vm144_vm0, %v283_v28  ;;  %6086 = vmatpush.xpose.msk.msrb.mxu0 %vm144_vm0, %v299_v21  ;;  %v38_v28 = vld [vmem:[%s11736_s1 + $0x10] sm:$0xff] }
  0xe4   :  { %6051 = vmatmul.msk.f32.gmra.mxu2 %vm144_vm0, %v7498_v11  ;;  %v106_v21 = vld [vmem:[%s11737_s3 + $0xf0] sm:$0xff] }
  0xe5   :  { %578 = vmatpush.msrb.mxu2 %v106_v21  ;;  %v7896_v21 = vld [vmem:[%s11737_s3 + $0x40] sm:$0xff] }
  0xe7   :  { %6067 = vmatpush.xpose.msk.msra.mxu3 %vm144_vm0, %v282_v26  ;;  %6087 = vmatpush.xpose.msk.msrb.mxu0 %vm144_vm0, %v298_v40  ;;  %v105_v26 = vld [vmem:[%s11737_s3 + $0xe8] sm:$0xff] }
  0xe8   :  { %v89_v40 = vld [vmem:[%s11737_s3 + $0x68] sm:$0xff]  ;;  %579 = vmatpush.msrb.mxu2 %v105_v26  ;;  %v7910_v26 = vld [vmem:[%s11737_s3 + $0x38] sm:$0xff] }
  0xe9   :  { %550 = vmatpush.msrb.mxu1 %v89_v40  ;;  %v43_v40 = vld [vmem:[%s11736_s1 + $0x38] sm:$0xff] }
  0xea   :  { %6068 = vmatmul.msk.f32.vlgmr.msra.gmra.mxu3 %vm144_vm0, %v187_v44  ;;  %6088 = vmatmul.msk.f32.vlgmr.msrb.gmra.mxu0 %vm144_vm0, %v187_v44 }
  0xeb   :  { %580 = vmatpush.msrb.mxu2 %v104_v48  ;;  %551 = vmatpush.msrb.mxu1 %v88_v31  ;;  %v42_v31 = vld [vmem:[%s11736_s1 + $0x30] sm:$0xff] }
  0xed   :  { %552 = vmatpush.msrb.mxu1 %v87_v56  ;;  %v7935_v56 = vld [vmem:[%s11737_s3 + $0xa8] sm:$0xff] }
  0xf2   :  { %6069 = vmatmul.msk.f32.gmra.mxu3 %vm144_vm0, %v190_v49  ;;  %6089 = vmatmul.msk.f32.gmra.mxu0 %vm144_vm0, %v190_v49 }
  0xfa   :  { %6070 = vmatmul.msk.f32.gmra.mxu3 %vm144_vm0, %v193_v53  ;;  %6090 = vmatmul.msk.f32.gmra.mxu0 %vm144_vm0, %v193_v53  ;;  %v103_v53 = vld [vmem:[%s11737_s3 + $0xd8] sm:$0xff] }
  0xfb   :  { %581 = vmatpush.msrb.mxu2 %v103_v53 }
 0x102   :  { %6071 = vmatmul.msk.f32.gmra.mxu3 %vm144_vm0, %v196_v57  ;;  %6091 = vmatmul.msk.f32.gmra.mxu0 %vm144_vm0, %v196_v57  ;;  %v41_v57 = vld [vmem:[%s11736_s1 + $0x28] sm:$0xff] }
 0x14f   :  { %v270_v45 = vpop.f32.mrf.mxu2 }
 0x167   :  { %v500_v60 = vpop.f32.mrf.mxu0 }
 0x168   :  { %v7815_v4 = vadd.f32 %v500_v60, %v37_v61  ;;  %v40_v60 = vld [vmem:[%s11736_s1 + $0x20] sm:$0xff]  ;;  %v102_v61 = vld [vmem:[%s11737_s3 + $0xd0] sm:$0xff] }
 0x169   :  { %582 = vmatpush.msrb.mxu2 %v102_v61 }
 0x16d   :  { %v471_v1 = vpop.f32.mrf.mxu3 }
 0x16e   :  { %v7817_v5 = vadd.f32 %v471_v1, %v36_v0  ;;  %v86_v0 = vld [vmem:[%s11737_s3 + $0x50] sm:$0xff] }
 0x16f   :  { %v503_v12 = vpop.f32.mrf.mxu0  ;;  %553 = vmatpush.msrb.mxu1 %v86_v0 }
 0x170   :  { %v512_v20 = vmax.f32 %v7817_v5, %v7815_v4  ;;  %v7845_v41 = vadd.f32 %v503_v12, %v39_v22  ;;  %v101_v12 = vld [vmem:[%s11737_s3 + $0xc8] sm:$0xff]  ;;  %v273_v22 = vpop.f32.mrf.mxu2 }
 0x171   :  { %583 = vmatpush.msrb.mxu2 %v101_v12  ;;  %554 = vmatpush.msrb.mxu1 %v7881_v13 }
 0x172   :  { %513 = vmax.xlane.f32.xlu0 %v512_v20 }
 0x173   :  { %555 = vmatpush.msrb.mxu1 %v7896_v21 }
 0x175   :  { %v474_v37 = vpop.f32.mrf.mxu3  ;;  %556 = vmatpush.msrb.mxu1 %v7910_v26 }
 0x176   :  { %v7847_v44 = vadd.f32 %v474_v37, %v38_v28  ;;  %v7891_v28 = vld [vmem:[%s11737_s3 + $0xc0] sm:$0xff]  ;;  %v7905_v37 = vld [vmem:[%s11737_s3 + $0xb8] sm:$0xff] }
 0x177   :  { %v506_v52 = vpop.f32.mrf.mxu0  ;;  %584 = vmatpush.msrb.mxu2 %v7891_v28 }
 0x178   :  { %v515_v49 = vmax.f32 %v7847_v44, %v7845_v41  ;;  %v7883_v17 = vadd.f32 %v506_v52, %v41_v57  ;;  %v7928_v52 = vld [vmem:[%s11737_s3 + $0x30] sm:$0xff]  ;;  %v276_v61 = vpop.f32.mrf.mxu2 }
 0x179   :  { %585 = vmatpush.msrb.mxu2 %v7905_v37  ;;  %11745 = vst [vmem:[#allocation3_spill] sm:$0xff] %v7928_v52  ;;  %557 = vmatpush.msrb.mxu1 %v7928_v52 }
 0x17a   :  { %516 = vmax.xlane.f32.xlu0 %v515_v49  ;;  %v7923_v49 = vld [vmem:[%s11737_s3 + $0xb0] sm:$0xff] }
 0x17b   :  { %11744 = vst [vmem:[#allocation2_spill] sm:$0xff] %v7923_v49  ;;  %586 = vmatpush.msrb.mxu2 %v7923_v49 }
 0x17d   :  { %v477_v1 = vpop.f32.mrf.mxu3  ;;  %587 = vmatpush.msrb.mxu2 %v7935_v56 }
 0x17e   :  { %v7885_v20 = vadd.f32 %v477_v1, %v40_v60  ;;  %v240_v1 = vperm.slane %v7509_v15, 2 }
 0x17f   :  { %v509_v48 = vpop.f32.mrf.mxu0 }
 0x180   :  { %v518_v32 = vmax.f32 %v7885_v20, %v7883_v17  ;;  %v7937_v57 = vadd.f32 %v509_v48, %v43_v40  ;;  %v7945_v12 = vadd.f32 %v276_v61, %v240_v1  ;;  %v7947_v49 = vadd.f32 %v273_v22, %v240_v1 }
 0x181   :  { %v7951_v40 = vadd.f32 %v270_v45, %v240_v1 }
 0x182   :  { %519 = vmax.xlane.f32.xlu1 %v518_v32  ;;  %v279_v32 = vpop.f32.mrf.mxu2  ;;  %v340_v45 = vmul.f32 %v7945_v12, %v7606_v43  ;;  %v7978_v43 = vld [vmem:[%s11737_s3 + $0x28] sm:$0xff] }
 0x183   :  { %v7949_v52 = vadd.f32 %v279_v32, %v240_v1  ;;  %v342_v61 = vmul.f32 %v7951_v40, %v7574_v35  ;;  %v336_v35 = vmul.f32 %v7945_v12, %v7670_v59  ;;  %558 = vmatpush.msrb.mxu1 %v7978_v43  ;;  %v332_v1 = vmul.f32 %v7945_v12, %v7734_v16  ;;  %v8024_v32 = vld [vmem:[%s11737_s3 + $0x88] sm:$0xff] }
 0x184   :  { %v330_v16 = vmul.f32 %v7951_v40, %v7767_v36  ;;  %v328_v36 = vmul.f32 %v7945_v12, %v7533_v24  ;;  %v323_v24 = vmul.f32 %v7947_v49, %v7617_v46  ;;  %v318_v46 = vmul.f32 %v7951_v40, %v7697_v2 }
 0x185   :  { %v480_v53 = vpop.f32.mrf.mxu3  ;;  %v345_v48 = vmul.f32 %v7949_v52, %v7520_v19  ;;  %v341_v22 = vmul.f32 %v7949_v52, %v7590_v39  ;;  %v339_v19 = vmul.f32 %v7947_v49, %v7622_v47  ;;  %v335_v39 = vmul.f32 %v7947_v49, %v7686_v63  ;;  %v8000_v63 = vld [vmem:[%s11737_s3 + $0x98] sm:$0xff] }
 0x186   :  { %v7939_v60 = vadd.f32 %v480_v53, %v42_v31  ;;  %v344_v31 = vmul.f32 %v7945_v12, %v7538_v25  ;;  %v343_v53 = vmul.f32 %v7947_v49, %v7556_v30  ;;  %v338_v25 = vmul.f32 %v7951_v40, %v7638_v51  ;;  %v7986_v51 = vld [vmem:[%s11737_s3 + $0xa0] sm:$0xff] }
 0x187   :  { %681 = vmatpush.msrb.mxu3 %v345_v48  ;;  %v337_v30 = vmul.f32 %v7949_v52, %v7654_v55  ;;  %v334_v47 = vmul.f32 %v7951_v40, %v7702_v3  ;;  %v7991_v55 = vld [vmem:[%s11737_s3 + $0x20] sm:$0xff]  ;;  %588 = vmatpush.msrb.mxu2 %v7986_v51  ;;  %v333_v59 = vmul.f32 %v7949_v52, %v7718_v8  ;;  %v8005_v3 = vld [vmem:[%s11737_s3 + $0x18] sm:$0xff]  ;;  %v8017_v8 = vld [vmem:[%s11737_s3 + $0x10] sm:$0xff] }
 0x188   :  { %v521_v0 = vmax.f32 %v7939_v60, %v7937_v57  ;;  %559 = vmatpush.msrb.mxu1 %v7991_v55  ;;  %v331_v48 = vmul.f32 %v7947_v49, %v7750_v27  ;;  %v8047_v27 = vld [vmem:[%s11737_s3] sm:$0xff] }
 0x189   :  { %682 = vmatpush.msrb.mxu3 %v344_v31  ;;  %589 = vmatpush.msrb.mxu2 %v8000_v63  ;;  %v8033_v31 = vld [vmem:[%s11737_s3 + $0x8] sm:$0xff] }
 0x18a   :  { %522 = vmax.xlane.f32.xlu1 %v521_v0  ;;  %560 = vmatpush.msrb.mxu1 %v8005_v3  ;;  %v8012_v0 = vld [vmem:[%s11737_s3 + $0x90] sm:$0xff] }
 0x18b   :  { %683 = vmatpush.msrb.mxu3 %v343_v53  ;;  %590 = vmatpush.msrb.mxu2 %v8012_v0  ;;  %v8042_v53 = vld [vmem:[%s11737_s3 + $0x80] sm:$0xff] }
 0x18c   :  { %561 = vmatpush.msrb.mxu1 %v8017_v8 }
 0x18d   :  { %684 = vmatpush.msrb.mxu3 %v342_v61  ;;  %591 = vmatpush.msrb.mxu2 %v8024_v32  ;;  %v329_v61 = vmul.f32 %v7949_v52, %v7515_v18  ;;  %v324_v18 = vmul.f32 %v7945_v12, %v7601_v42 }
 0x18e   :  { %562 = vmatpush.msrb.mxu1 %v8033_v31 }
 0x18f   :  { %685 = vmatpush.msrb.mxu3 %v341_v22  ;;  %592 = vmatpush.msrb.mxu2 %v8042_v53  ;;  %v327_v22 = vmul.f32 %v7947_v49, %v7551_v29  ;;  %v322_v29 = vmul.f32 %v7951_v40, %v7633_v50 }
 0x190   :  { %563 = vmatpush.msrb.mxu1 %v8047_v27 }
 0x191   :  { %686 = vmatpush.msrb.mxu3 %v340_v45  ;;  %652 = vmatpush.msra.mxu2 %v329_v61  ;;  %v326_v45 = vmul.f32 %v7951_v40, %v7569_v34  ;;  %v321_v34 = vmul.f32 %v7949_v52, %v7649_v54  ;;  %v317_v54 = vmul.f32 %v7949_v52, %v7713_v7 }
 0x193   :  { %687 = vmatpush.msrb.mxu3 %v339_v19  ;;  %653 = vmatpush.msra.mxu2 %v328_v36  ;;  %v325_v19 = vmul.f32 %v7949_v52, %v7585_v38  ;;  %v320_v38 = vmul.f32 %v7945_v12, %v7665_v58  ;;  %v316_v58 = vmul.f32 %v7945_v12, %v7729_v14 }
 0x195   :  { %688 = vmatpush.msrb.mxu3 %v338_v25  ;;  %654 = vmatpush.msra.mxu2 %v327_v22  ;;  %v319_v25 = vmul.f32 %v7947_v49, %v7681_v62  ;;  %v315_v62 = vmul.f32 %v7947_v49, %v7745_v23 }
 0x197   :  { %689 = vmatpush.msrb.mxu3 %v337_v30  ;;  %655 = vmatpush.msra.mxu2 %v326_v45 }
 0x199   :  { %690 = vmatpush.msrb.mxu3 %v336_v35  ;;  %656 = vmatpush.msra.mxu2 %v325_v19 }
 0x19b   :  { %691 = vmatpush.msrb.mxu3 %v335_v39  ;;  %657 = vmatpush.msra.mxu2 %v324_v18 }
 0x19d   :  { %692 = vmatpush.msrb.mxu3 %v334_v47  ;;  %658 = vmatpush.msra.mxu2 %v323_v24 }
 0x19f   :  { %693 = vmatpush.msrb.mxu3 %v333_v59  ;;  %659 = vmatpush.msra.mxu2 %v322_v29 }
 0x1a1   :  { %694 = vmatpush.msrb.mxu3 %v332_v1  ;;  %660 = vmatpush.msra.mxu2 %v321_v34 }
 0x1a3   :  { %695 = vmatpush.msrb.mxu3 %v331_v48  ;;  %661 = vmatpush.msra.mxu2 %v320_v38 }
 0x1a5   :  { %696 = vmatpush.msrb.mxu3 %v330_v16  ;;  %662 = vmatpush.msra.mxu2 %v319_v25 }
 0x1a7   :  { %663 = vmatpush.msra.mxu2 %v318_v46 }
 0x1a9   :  { %664 = vmatpush.msra.mxu2 %v317_v54 }
 0x1ab   :  { %665 = vmatpush.msra.mxu2 %v316_v58  ;;  %v124_v58 = vld [vmem:[%s11732_s5 + $0x78] sm:$0xff] }
 0x1ac   :  { %6096 = vmatpush.xpose.msk.msra.mxu0 %vm144_vm0, %v124_v58 }
 0x1ad   :  { %666 = vmatpush.msra.mxu2 %v315_v62  ;;  %v123_v62 = vld [vmem:[%s11732_s5 + $0x70] sm:$0xff] }
 0x1b0   :  { %6097 = vmatpush.xpose.msk.msra.mxu0 %vm144_vm0, %v123_v62 }
 0x1e5   :  { %v514_v42 = vpop.xlane.xlu0 %513 }
 0x1e6   :  { %v524_v30 = vsub.f32 %v7817_v5, %v514_v42  ;;  %v525_v50 = vsub.f32 %v7815_v4, %v514_v42  ;;  %v314_v4 = vmul.f32 %v7951_v40, %v7762_v33 }
 0x1e8   :  { %v532_v35 = vmul.f32 1.442695, %v524_v30  ;;  %v534_v39 = vmul.f32 1.442695, %v525_v50  ;;  %667 = vmatpush.msra.mxu2 %v314_v4 }
 0x1ea   :  { %6794 = vpow2.f32 %v532_v35 }
 0x1eb   :  { %6796 = vpow2.f32 %v534_v39 }
 0x1ed   :  { %v517_v2 = vpop.xlane.xlu0 %516 }
 0x1ee   :  { %v526_v5 = vsub.f32 %v7847_v44, %v517_v2  ;;  %v527_v47 = vsub.f32 %v7845_v41, %v517_v2  ;;  %v122_v2 = vld [vmem:[%s11732_s5 + $0x68] sm:$0xff] }
 0x1ef   :  { %6098 = vmatpush.xpose.msk.msra.mxu0 %vm144_vm0, %v122_v2 }
 0x1f0   :  { %v6795_v7 = vpop.eup %6794  ;;  %v536_v52 = vmul.f32 1.442695, %v526_v5  ;;  %v538_v59 = vmul.f32 1.442695, %v527_v47  ;;  %v121_v5 = vld [vmem:[%s11732_s5 + $0x60] sm:$0xff] }
 0x1f1   :  { %v6797_v1 = vpop.eup %6796  ;;  %564 = vmatmul.f32.vlgmr.msrb.gmra.mxu1 %v6795_v7 }
 0x1f2   :  { %6798 = vpow2.f32 %v536_v52  ;;  %593 = vmatmul.f32.vlgmr.msrb.gmra.mxu2 %v6797_v1  ;;  %697 = vmatmul.f32.vlgmr.msrb.gmra.mxu3 %v6797_v1 }
 0x1f3   :  { %6800 = vpow2.f32 %v538_v59  ;;  %6775 = vmatpush.xpose.msk.msrb.mxu2 %vm144_vm0, %v124_v58  ;;  %6099 = vmatpush.xpose.msk.msra.mxu0 %vm144_vm0, %v121_v5 }
 0x1f5   :  { %v520_v14 = vpop.xlane.xlu1 %519 }
 0x1f6   :  { %v528_v23 = vsub.f32 %v7885_v20, %v520_v14  ;;  %v529_v33 = vsub.f32 %v7883_v17, %v520_v14 }
 0x1f7   :  { %6776 = vmatpush.xpose.msk.msrb.mxu2 %vm144_vm0, %v123_v62 }
 0x1f8   :  { %v6799_v49 = vpop.eup %6798  ;;  %v540_v44 = vmul.f32 1.442695, %v528_v23  ;;  %v542_v12 = vmul.f32 1.442695, %v529_v33 }
 0x1f9   :  { %v6801_v41 = vpop.eup %6800  ;;  %567 = vmatmul.f32.gmra.mxu1 %v6799_v49 }
 0x1fa   :  { %6802 = vpow2.f32 %v540_v44  ;;  %596 = vmatmul.f32.gmra.mxu2 %v6801_v41  ;;  %700 = vmatmul.f32.gmra.mxu3 %v6801_v41 }
 0x1fb   :  { %6804 = vpow2.f32 %v542_v12  ;;  %6777 = vmatpush.xpose.msk.msrb.mxu2 %vm144_vm0, %v122_v2 }
 0x1fd   :  { %v523_v40 = vpop.xlane.xlu1 %522 }
 0x1fe   :  { %v530_v48 = vsub.f32 %v7939_v60, %v523_v40  ;;  %v531_v16 = vsub.f32 %v7937_v57, %v523_v40  ;;  %v8094_v60 = vld [vmem:[%s11738_s4] sm:$0xff] }
 0x1ff   :  { %638 = vmatpush.msra.mxu1 %v8094_v60  ;;  %6778 = vmatpush.xpose.msk.msrb.mxu2 %vm144_vm0, %v121_v5 }
 0x200   :  { %v6803_v61 = vpop.eup %6802  ;;  %v544_v36 = vmul.f32 1.442695, %v530_v48  ;;  %v546_v22 = vmul.f32 1.442695, %v531_v16 }
 0x201   :  { %v6805_v20 = vpop.eup %6804  ;;  %570 = vmatmul.f32.gmra.mxu1 %v6803_v61 }
 0x202   :  { %6806 = vpow2.f32 %v544_v36  ;;  %599 = vmatmul.f32.gmra.mxu2 %v6805_v20  ;;  %703 = vmatmul.f32.gmra.mxu3 %v6805_v20 }
 0x203   :  { %6808 = vpow2.f32 %v546_v22 }
 0x208   :  { %v6807_v17 = vpop.eup %6806 }
 0x209   :  { %v6809_v45 = vpop.eup %6808  ;;  %573 = vmatmul.f32.gmra.mxu1 %v6807_v17 }
 0x20a   :  { %602 = vmatmul.f32.gmra.mxu2 %v6809_v45  ;;  %706 = vmatmul.f32.gmra.mxu3 %v6809_v45  ;;  %v714_v45 = vperm.slane %v7509_v15, 3 }
 0x212   :  { %668 = vmatmul.f32.vlgmr.msra.gmra.mxu2 %v6795_v7 }
 0x21a   :  { %671 = vmatmul.f32.gmra.mxu2 %v6799_v49 }
 0x222   :  { %674 = vmatmul.f32.gmra.mxu2 %v6803_v61 }
 0x22a   :  { %677 = vmatmul.f32.gmra.mxu2 %v6807_v17 }
 0x26e   :  { %v565_v57 = vpop.f32.mrf.mxu1 }
 0x275   :  { %v594_v19 = vpop.f32.mrf.mxu2  ;;  %v698_v7 = vpop.f32.mrf.mxu3 }
 0x276   :  { %v595_v18 = vadd.f32 %v594_v19, %v565_v57  ;;  %v568_v24 = vpop.f32.mrf.mxu1 }
 0x278   :  { %6810 = vrcp.f32 %v595_v18 }
 0x27d   :  { %v597_v29 = vpop.f32.mrf.mxu2  ;;  %v701_v23 = vpop.f32.mrf.mxu3 }
 0x27e   :  { %v6811_v34 = vpop.eup %6810  ;;  %v598_v38 = vadd.f32 %v597_v29, %v568_v24  ;;  %v571_v25 = vpop.f32.mrf.mxu1 }
 0x27f   :  { %6092 = vmatmul.msk.f32.vlgmr.msra.gmra.mxu1 %vm610_vm1, %v6811_v34 }
 0x280   :  { %6812 = vrcp.f32 %v598_v38 }
 0x285   :  { %v600_v42 = vpop.f32.mrf.mxu2  ;;  %v704_v41 = vpop.f32.mrf.mxu3 }
 0x286   :  { %v6813_v46 = vpop.eup %6812  ;;  %v601_v30 = vadd.f32 %v600_v42, %v571_v25  ;;  %v574_v50 = vpop.f32.mrf.mxu1 }
 0x287   :  { %6093 = vmatmul.msk.f32.gmra.mxu1 %vm610_vm1, %v6813_v46 }
 0x288   :  { %6814 = vrcp.f32 %v601_v30 }
 0x28d   :  { %v603_v35 = vpop.f32.mrf.mxu2  ;;  %v707_v36 = vpop.f32.mrf.mxu3 }
 0x28e   :  { %v6815_v39 = vpop.eup %6814  ;;  %v604_v54 = vadd.f32 %v603_v35, %v574_v50 }
 0x28f   :  { %6094 = vmatmul.msk.f32.gmra.mxu1 %vm610_vm1, %v6815_v39 }
 0x290   :  { %6816 = vrcp.f32 %v604_v54  ;;  %v7387_v54 = vmov 32.0  }
 0x291   :  { %6818 = vrcp.f32 %v7387_v54 }
 0x295   :  { %v669_v47 = vpop.f32.mrf.mxu2 }
 0x296   :  { %v6817_v4 = vpop.eup %6816  ;;  %v699_v52 = vadd.f32 %v698_v7, %v669_v47 }
 0x297   :  { %6095 = vmatmul.msk.f32.gmra.mxu1 %vm610_vm1, %v6817_v4 }
 0x29d   :  { %v672_v59 = vpop.f32.mrf.mxu2 }
 0x29e   :  { %v702_v33 = vadd.f32 %v701_v23, %v672_v59 }
 0x2a5   :  { %v675_v12 = vpop.f32.mrf.mxu2 }
 0x2a6   :  { %v705_v40 = vadd.f32 %v704_v41, %v675_v12 }
 0x2ad   :  { %v678_v61 = vpop.f32.mrf.mxu2 }
 0x2ae   :  { %v708_v22 = vadd.f32 %v707_v36, %v678_v61 }
 0x2fc   :  { %v640_v1 = vpop.f32.mrf.mxu1 }
 0x2fd   :  { %v710_v14 = vmul.f32 %v699_v52, %v640_v1  ;;  %v132_v52 = vld [vmem:[%s11739_s6 + $0x38] sm:$0xff] }
 0x2fe   :  { %6104 = vmatpush.xpose.msk.msrb.mxu1 %vm144_vm0, %v132_v52 }
 0x2ff   :  { %6100 = vmatmul.msk.f32.vlgmr.msra.gmra.mxu0 %vm144_vm0, %v710_v14 }
 0x304   :  { %v643_v49 = vpop.f32.mrf.mxu1 }
 0x305   :  { %v711_v44 = vmul.f32 %v702_v33, %v643_v49 }
 0x307   :  { %6101 = vmatmul.msk.f32.gmra.mxu0 %vm144_vm0, %v711_v44 }
 0x30c   :  { %v646_v48 = vpop.f32.mrf.mxu1 }
 0x30d   :  { %v712_v16 = vmul.f32 %v705_v40, %v646_v48 }
 0x30f   :  { %6102 = vmatmul.msk.f32.vlgmr.msrb.gmra.mxu2 %vm144_vm0, %v712_v16 }
 0x314   :  { %v649_v20 = vpop.f32.mrf.mxu1 }
 0x315   :  { %v713_v17 = vmul.f32 %v708_v22, %v649_v20 }
 0x317   :  { %6103 = vmatmul.msk.f32.gmra.mxu2 %vm144_vm0, %v713_v17  ;;  %v131_v17 = vld [vmem:[%s11739_s6 + $0x30] sm:$0xff] }
 0x318   :  { %6105 = vmatpush.xpose.msk.msrb.mxu1 %vm144_vm0, %v131_v17  ;;  %v137_v17 = vld [vmem:[%s11739_s6 + $0x60] sm:$0xff] }
 0x37c   :  { %v756_v57 = vpop.f32.mrf.mxu0 }
 0x37d   :  { %v757_v19 = vadd.f32 %v756_v57, %v714_v45  ;;  %v129_v57 = vld [vmem:[%s11739_s6 + $0x20] sm:$0xff] }
 0x37f   :  { %v768_v18 = vadd.f32 %v757_v19, %v7464_v6  ;;  %v128_v19 = vld [vmem:[%s11739_s6 + $0x18] sm:$0xff] }
 0x381   :  { %v772_v24 = vsel %vm144_vm0, %v768_v18, 0.0 }
 0x382   :  { %773 = vadd.xlane.f32.xlu2 %v772_v24  ;;  %v126_v24 = vld [vmem:[%s11739_s6 + $0x8] sm:$0xff] }
 0x384   :  { %v759_v29 = vpop.f32.mrf.mxu0 }
 0x385   :  { %v760_v34 = vadd.f32 %v759_v29, %v714_v45  ;;  %v125_v29 = vld [vmem:[%s11739_s6] sm:$0xff] }
 0x387   :  { %v769_v38 = vadd.f32 %v760_v34, %v7479_v9  ;;  %v6819_v9 = vpop.eup %6818 }
 0x388   :  { %v785_v58 = vmul.f32 32.0, %v6819_v9  ;;  %vm789_vm2 = vweird.f32 %v6819_v9 }
 0x389   :  { %v775_v25 = vsel %vm144_vm0, %v769_v38, 0.0 }
 0x38a   :  { %776 = vadd.xlane.f32.xlu2 %v775_v25  ;;  %v786_v62 = vsub.f32 1.0, %v785_v58 }
 0x38c   :  { %v787_v2 = vmul.f32 %v6819_v9, %v786_v62  ;;  %v8197_v62 = vld [vmem:[%s11734_s7] sm:$0xff] }
 0x38e   :  { %v788_v4 = vadd.f32 %v6819_v9, %v787_v2  ;;  %v8200_v2 = vperm.slane %v8197_v62, 5 }
 0x390   :  { %v8134_v5 = vsel %vm789_vm2, %v6819_v9, %v788_v4 }
 0x392   :  { %v762_v42 = vpop.f32.mrf.mxu2 }
 0x393   :  { %v763_v46 = vadd.f32 %v762_v42, %v714_v45 }
 0x395   :  { %v770_v30 = vadd.f32 %v763_v46, %v7489_v10 }
 0x397   :  { %v778_v15 = vsel %vm144_vm0, %v770_v30, 0.0 }
 0x398   :  { %779 = vadd.xlane.f32.xlu0 %v778_v15 }
 0x39a   :  { %v765_v50 = vpop.f32.mrf.mxu2 }
 0x39b   :  { %v766_v35 = vadd.f32 %v765_v50, %v714_v45  ;;  %v130_v45 = vld [vmem:[%s11739_s6 + $0x28] sm:$0xff] }
 0x39c   :  { %6106 = vmatpush.xpose.msk.msrb.mxu1 %vm144_vm0, %v130_v45 }
 0x39d   :  { %v771_v6 = vadd.f32 %v766_v35, %v7498_v11 }
 0x39f   :  { %v781_v39 = vsel %vm144_vm0, %v771_v6, 0.0 }
 0x3a0   :  { %782 = vadd.xlane.f32.xlu1 %v781_v39  ;;  %6107 = vmatpush.xpose.msk.msrb.mxu1 %vm144_vm0, %v129_v57 }
 0x3a4   :  { %6108 = vmatpush.xpose.msk.msrb.mxu1 %vm144_vm0, %v128_v19 }
 0x3f5   :  { %v774_v10 = vpop.xlane.xlu2 %773 }
 0x3f6   :  { %v791_v47 = vmul.f32 %v8134_v5, %v774_v10 }
 0x3f8   :  { %v8137_v7 = vsub.f32 %v768_v18, %v791_v47  ;;  %v127_v18 = vld [vmem:[%s11739_s6 + $0x10] sm:$0xff] }
 0x3f9   :  { %6109 = vmatpush.xpose.msk.msrb.mxu1 %vm144_vm0, %v127_v18  ;;  %v136_v18 = vld [vmem:[%s11739_s6 + $0x58] sm:$0xff] }
 0x3fa   :  { %v799_v11 = vmul.f32 %v8137_v7, %v8137_v7 }
 0x3fc   :  { %v803_v59 = vsel %vm144_vm0, %v799_v11, 0.0 }
 0x3fd   :  { %804 = vadd.xlane.f32.xlu2 %v803_v59  ;;  %v777_v1 = vpop.xlane.xlu2 %776  ;;  %6110 = vmatpush.xpose.msk.msrb.mxu1 %vm144_vm0, %v126_v24  ;;  %v872_v59 = vperm.slane %v8197_v62, 6 }
 0x3fe   :  { %v792_v14 = vmul.f32 %v8134_v5, %v777_v1 }
 0x400   :  { %v8147_v23 = vsub.f32 %v769_v38, %v792_v14 }
 0x401   :  { %6111 = vmatpush.xpose.msk.msrb.mxu1 %vm144_vm0, %v125_v29 }
 0x402   :  { %v800_v33 = vmul.f32 %v8147_v23, %v8147_v23 }
 0x404   :  { %v806_v49 = vsel %vm144_vm0, %v800_v33, 0.0 }
 0x405   :  { %807 = vadd.xlane.f32.xlu0 %v806_v49 }
 0x40b   :  { %v780_v44 = vpop.xlane.xlu0 %779 }
 0x40c   :  { %v793_v12 = vmul.f32 %v8134_v5, %v780_v44 }
 0x40e   :  { %v8153_v41 = vsub.f32 %v770_v30, %v793_v12  ;;  %v140_v12 = vld [vmem:[%s11739_s6 + $0x78] sm:$0xff] }
 0x40f   :  { %972 = vmatpush.msra.mxu2 %v140_v12 }
 0x410   :  { %v801_v40 = vmul.f32 %v8153_v41, %v8153_v41 }
 0x412   :  { %v809_v48 = vsel %vm144_vm0, %v801_v40, 0.0 }
 0x413   :  { %810 = vadd.xlane.f32.xlu1 %v809_v48  ;;  %v783_v16 = vpop.xlane.xlu1 %782  ;;  %v138_v48 = vld [vmem:[%s11739_s6 + $0x68] sm:$0xff] }
 0x414   :  { %v794_v61 = vmul.f32 %v8134_v5, %v783_v16 }
 0x416   :  { %v8159_v36 = vsub.f32 %v771_v6, %v794_v61 }
 0x418   :  { %v802_v22 = vmul.f32 %v8159_v36, %v8159_v36 }
 0x41a   :  { %v812_v20 = vsel %vm144_vm0, %v802_v22, 0.0 }
 0x41b   :  { %813 = vadd.xlane.f32.xlu2 %v812_v20 }
 0x470   :  { %v805_v34 = vpop.xlane.xlu2 %804 }
 0x471   :  { %v815_v38 = vmul.f32 %v805_v34, %v8134_v5 }
 0x473   :  { %v819_v25 = vadd.f32 1e-05, %v815_v38 }
 0x475   :  { %6820 = vrsqrt.f32 %v819_v25  ;;  %vm829_vm4 = vweird.f32 %v819_v25 }
 0x478   :  { %v808_v42 = vpop.xlane.xlu0 %807 }
 0x479   :  { %v816_v46 = vmul.f32 %v808_v42, %v8134_v5 }
 0x47b   :  { %v6821_v30 = vpop.eup %6820  ;;  %v820_v15 = vadd.f32 1e-05, %v816_v46 }
 0x47c   :  { %v824_v50 = vmul.f32 %v6821_v30, %v819_v25  ;;  %vm830_vm3 = vweird.f32 %v6821_v30 }
 0x47d   :  { %6822 = vrsqrt.f32 %v820_v15  ;;  %vm831_vm5 = vmor %vm829_vm4, %vm830_vm3  ;;  %vm839_vm7 = vweird.f32 %v820_v15 }
 0x47e   :  { %v825_v35 = vmul.f32 %v6821_v30, %v824_v50 }
 0x480   :  { %v826_v6 = vmul.f32 0.5, %v825_v35 }
 0x482   :  { %v827_v39 = vsub.f32 1.5, %v826_v6 }
 0x483   :  { %v6823_v54 = vpop.eup %6822 }
 0x484   :  { %v828_v9 = vmul.f32 %v6821_v30, %v827_v39  ;;  %v834_v58 = vmul.f32 %v6823_v54, %v820_v15  ;;  %vm840_vm6 = vweird.f32 %v6823_v54 }
 0x485   :  { %vm841_vm8 = vmor %vm839_vm7, %vm840_vm6 }
 0x486   :  { %v832_v4 = vsel %vm831_vm5, %v6821_v30, %v828_v9  ;;  %v835_v10 = vmul.f32 %v6823_v54, %v834_v58  ;;  %v811_v47 = vpop.xlane.xlu1 %810 }
 0x487   :  { %v863_v11 = vmul.f32 %v832_v4, %v8137_v7  ;;  %v817_v52 = vmul.f32 %v811_v47, %v8134_v5  ;;  %v139_v7 = vld [vmem:[%s11739_s6 + $0x70] sm:$0xff] }
 0x488   :  { %v836_v1 = vmul.f32 0.5, %v835_v10  ;;  %973 = vmatpush.msra.mxu2 %v139_v7 }
 0x489   :  { %v868_v14 = vmul.f32 %v8200_v2, %v863_v11  ;;  %v821_v33 = vadd.f32 1e-05, %v817_v52  ;;  %v134_v11 = vld [vmem:[%s11739_s6 + $0x48] sm:$0xff]  ;;  %v133_v52 = vld [vmem:[%s11739_s6 + $0x40] sm:$0xff] }
 0x48a   :  { %v837_v49 = vsub.f32 1.5, %v836_v1  ;;  %974 = vmatpush.msra.mxu2 %v138_v48 }
 0x48b   :  { %6824 = vrsqrt.f32 %v821_v33  ;;  %v8206_v44 = vadd.f32 %v872_v59, %v868_v14  ;;  %vm849_vm10 = vweird.f32 %v821_v33 }
 0x48c   :  { %v838_v40 = vmul.f32 %v6823_v54, %v837_v49  ;;  %975 = vmatpush.msra.mxu2 %v137_v17 }
 0x48d   :  { %6112 = vmatmul.msk.f32.vlgmr.msrb.gmra.mxu1 %vm144_vm0, %v8206_v44 }
 0x48e   :  { %v842_v16 = vsel %vm841_vm8, %v6823_v54, %v838_v40  ;;  %v814_v61 = vpop.xlane.xlu2 %813  ;;  %976 = vmatpush.msra.mxu2 %v136_v18 }
 0x48f   :  { %v818_v22 = vmul.f32 %v814_v61, %v8134_v5  ;;  %v864_v20 = vmul.f32 %v842_v16, %v8147_v23 }
 0x491   :  { %v6825_v45 = vpop.eup %6824  ;;  %v822_v57 = vadd.f32 1e-05, %v818_v22  ;;  %v869_v19 = vmul.f32 %v8200_v2, %v864_v20  ;;  %v950_v22 = vperm.slane %v8197_v62, 4 }
 0x492   :  { %v844_v24 = vmul.f32 %v6825_v45, %v821_v33  ;;  %vm850_vm9 = vweird.f32 %v6825_v45 }
 0x493   :  { %6826 = vrsqrt.f32 %v822_v57  ;;  %v874_v29 = vadd.f32 %v872_v59, %v869_v19  ;;  %vm851_vm11 = vmor %vm849_vm10, %vm850_vm9  ;;  %vm859_vm13 = vweird.f32 %v822_v57 }
 0x494   :  { %v845_v34 = vmul.f32 %v6825_v45, %v844_v24 }
 0x495   :  { %6113 = vmatmul.msk.f32.gmra.mxu1 %vm144_vm0, %v874_v29 }
 0x496   :  { %v846_v23 = vmul.f32 0.5, %v845_v34 }
 0x498   :  { %v847_v38 = vsub.f32 1.5, %v846_v23 }
 0x499   :  { %v6827_v25 = vpop.eup %6826 }
 0x49a   :  { %v848_v42 = vmul.f32 %v6825_v45, %v847_v38  ;;  %v854_v46 = vmul.f32 %v6827_v25, %v822_v57  ;;  %vm860_vm12 = vweird.f32 %v6827_v25 }
 0x49b   :  { %vm861_vm14 = vmor %vm859_vm13, %vm860_vm12 }
 0x49c   :  { %v852_v30 = vsel %vm851_vm11, %v6825_v45, %v848_v42  ;;  %v855_v15 = vmul.f32 %v6827_v25, %v854_v46 }
 0x49d   :  { %v865_v50 = vmul.f32 %v852_v30, %v8153_v41  ;;  %v135_v41 = vld [vmem:[%s11739_s6 + $0x50] sm:$0xff] }
 0x49e   :  { %v856_v35 = vmul.f32 0.5, %v855_v15  ;;  %977 = vmatpush.msra.mxu2 %v135_v41 }
 0x49f   :  { %v870_v6 = vmul.f32 %v8200_v2, %v865_v50 }
 0x4a0   :  { %v857_v39 = vsub.f32 1.5, %v856_v35  ;;  %978 = vmatpush.msra.mxu2 %v134_v11 }
 0x4a1   :  { %v875_v54 = vadd.f32 %v872_v59, %v870_v6 }
 0x4a2   :  { %v858_v9 = vmul.f32 %v6827_v25, %v857_v39  ;;  %979 = vmatpush.msra.mxu2 %v133_v52 }
 0x4a3   :  { %6114 = vmatmul.msk.f32.gmra.mxu1 %vm144_vm0, %v875_v54 }
 0x4a4   :  { %v862_v58 = vsel %vm861_vm14, %v6827_v25, %v858_v9 }
 0x4a5   :  { %v866_v4 = vmul.f32 %v862_v58, %v8159_v36  ;;  %v6788_v36 = vld [vmem:[%s11740_s8] ss:$0 sm:$0xff] }
 0x4a7   :  { %v871_v10 = vmul.f32 %v8200_v2, %v866_v4 }
 0x4a9   :  { %v876_v47 = vadd.f32 %v872_v59, %v871_v10 }
 0x4ab   :  { %6115 = vmatmul.msk.f32.gmra.mxu1 %vm144_vm0, %v876_v47 }
 0x50a   :  { %v934_v2 = vpop.f32.mrf.mxu1 }
 0x50b   :  { %v935_v59 = vadd.f32 %v6788_v36, %v934_v2 }
 0x50d   :  { %v946_v1 = vmax.f32 %v935_v59, 0.0 }
 0x50f   :  { %6116 = vmatmul.msk.f32.vlgmr.msra.gmra.mxu2 %vm951_vm15, %v946_v1 }
 0x512   :  { %v937_v14 = vpop.f32.mrf.mxu1 }
 0x513   :  { %v938_v33 = vadd.f32 %v6788_v36, %v937_v14 }
 0x515   :  { %v947_v49 = vmax.f32 %v938_v33, 0.0 }
 0x517   :  { %6117 = vmatmul.msk.f32.gmra.mxu2 %vm951_vm15, %v947_v49  ;;  %v6123_v49 = vld [vmem:[%s11732_s5 + $0x98] sm:$0xff] }
 0x518   :  { %6154 = vmatpush.xpose.msk.msra.mxu3 %vm144_vm0, %v6123_v49 }
 0x520   :  { %v940_v12 = vpop.f32.mrf.mxu1 }
 0x521   :  { %v941_v7 = vadd.f32 %v6788_v36, %v940_v12  ;;  %v6127_v12 = vld [vmem:[%s11732_s5 + $0xb8] sm:$0xff] }
 0x522   :  { %6162 = vmatpush.xpose.msk.msrb.mxu0 %vm144_vm0, %v6127_v12 }
 0x523   :  { %v948_v40 = vmax.f32 %v941_v7, 0.0  ;;  %v6131_v7 = vld [vmem:[%s11732_s5 + $0xd8] sm:$0xff] }
 0x524   :  { %6170 = vmatpush.xpose.msk.msra.mxu1 %vm144_vm0, %v6131_v7 }
 0x525   :  { %6118 = vmatmul.msk.f32.gmra.mxu2 %vm951_vm15, %v948_v40  ;;  %v6122_v40 = vld [vmem:[%s11732_s5 + $0x90] sm:$0xff] }
 0x526   :  { %6155 = vmatpush.xpose.msk.msra.mxu3 %vm144_vm0, %v6122_v40 }
 0x528   :  { %v943_v48 = vpop.f32.mrf.mxu1 }
 0x529   :  { %v944_v16 = vadd.f32 %v6788_v36, %v943_v48  ;;  %v6126_v48 = vld [vmem:[%s11732_s5 + $0xb0] sm:$0xff] }
 0x52a   :  { %6163 = vmatpush.xpose.msk.msrb.mxu0 %vm144_vm0, %v6126_v48 }
 0x52b   :  { %v949_v61 = vmax.f32 %v944_v16, 0.0  ;;  %v6130_v16 = vld [vmem:[%s11732_s5 + $0xd0] sm:$0xff] }
 0x52c   :  { %6171 = vmatpush.xpose.msk.msra.mxu1 %vm144_vm0, %v6130_v16 }
 0x52d   :  { %6119 = vmatmul.msk.f32.gmra.mxu2 %vm951_vm15, %v949_v61  ;;  %v6121_v61 = vld [vmem:[%s11732_s5 + $0x88] sm:$0xff] }
 0x52e   :  { %6156 = vmatpush.xpose.msk.msra.mxu3 %vm144_vm0, %v6121_v61 }
 0x592   :  { %v981_v20 = vpop.f32.mrf.mxu2 }
 0x593   :  { %v982_v17 = vadd.f32 %v981_v20, %v950_v22  ;;  %v6129_v20 = vld [vmem:[%s11732_s5 + $0xc8] sm:$0xff] }
 0x594   :  { %6172 = vmatpush.xpose.msk.msra.mxu1 %vm144_vm0, %v6129_v20 }
 0x595   :  { %v993_v45 = vadd.f32 %v982_v17, %v8206_v44  ;;  %v6120_v17 = vld [vmem:[%s11732_s5 + $0x80] sm:$0xff] }
 0x596   :  { %6157 = vmatpush.xpose.msk.msra.mxu3 %vm144_vm0, %v6120_v17 }
 0x597   :  { %v997_v57 = vsel %vm144_vm0, %v993_v45, 0.0 }
 0x598   :  { %998 = vadd.xlane.f32.xlu0 %v997_v57  ;;  %v6128_v57 = vld [vmem:[%s11732_s5 + $0xc0] sm:$0xff] }
 0x599   :  { %6173 = vmatpush.xpose.msk.msra.mxu1 %vm144_vm0, %v6128_v57 }
 0x59a   :  { %v984_v19 = vpop.f32.mrf.mxu2 }
 0x59b   :  { %v985_v18 = vadd.f32 %v984_v19, %v950_v22  ;;  %v7037_v19 = vld [vmem:[%s11737_s3 + $0x78] sm:$0xff] }
 0x59d   :  { %v994_v24 = vadd.f32 %v985_v18, %v874_v29  ;;  %v7038_v18 = vld [vmem:[%s11737_s3 + $0xf8] sm:$0xff] }
 0x59e   :  { %1569 = vmatpush.msrb.mxu1 %v7038_v18 }
 0x59f   :  { %v1000_v34 = vsel %vm144_vm0, %v994_v24, 0.0 }
 0x5a0   :  { %1001 = vadd.xlane.f32.xlu1 %v1000_v34  ;;  %v7040_v34 = vld [vmem:[%s11737_s3 + $0xf0] sm:$0xff] }
 0x5a1   :  { %1570 = vmatpush.msrb.mxu1 %v7040_v34 }
 0x5a8   :  { %v987_v23 = vpop.f32.mrf.mxu2 }
 0x5a9   :  { %v988_v38 = vadd.f32 %v987_v23, %v950_v22  ;;  %v7041_v23 = vld [vmem:[%s11737_s3 + $0x68] sm:$0xff] }
 0x5ab   :  { %v995_v25 = vadd.f32 %v988_v38, %v875_v54 }
 0x5ad   :  { %v1003_v42 = vsel %vm144_vm0, %v995_v25, 0.0 }
 0x5ae   :  { %1004 = vadd.xlane.f32.xlu2 %v1003_v42 }
 0x5b0   :  { %v990_v46 = vpop.f32.mrf.mxu2 }
 0x5b1   :  { %v991_v30 = vadd.f32 %v990_v46, %v950_v22  ;;  %v6125_v22 = vld [vmem:[%s11732_s5 + $0xa8] sm:$0xff]  ;;  %v7043_v46 = vld [vmem:[%s11737_s3 + $0x60] sm:$0xff] }
 0x5b2   :  { %6164 = vmatpush.xpose.msk.msrb.mxu0 %vm144_vm0, %v6125_v22 }
 0x5b3   :  { %v996_v15 = vadd.f32 %v991_v30, %v876_v47  ;;  %v7044_v30 = vld [vmem:[%s11737_s3 + $0xe0] sm:$0xff] }
 0x5b5   :  { %v1006_v44 = vsel %vm144_vm0, %v996_v15, 0.0 }
 0x5b6   :  { %1007 = vadd.xlane.f32.xlu0 %v1006_v44  ;;  %v7045_v44 = vld [vmem:[%s11737_s3 + $0x58] sm:$0xff] }
 0x60b   :  { %v999_v50 = vpop.xlane.xlu0 %998 }
 0x60c   :  { %v1009_v35 = vmul.f32 %v999_v50, %v8134_v5  ;;  %v7046_v50 = vld [vmem:[%s11737_s3 + $0xd8] sm:$0xff] }
 0x60e   :  { %v8258_v6 = vsub.f32 %v993_v45, %v1009_v35  ;;  %v6124_v45 = vld [vmem:[%s11732_s5 + $0xa0] sm:$0xff]  ;;  %v7047_v35 = vld [vmem:[%s11737_s3 + $0x50] sm:$0xff] }
 0x60f   :  { %6165 = vmatpush.xpose.msk.msrb.mxu0 %vm144_vm0, %v6124_v45 }
 0x610   :  { %v1017_v29 = vmul.f32 %v8258_v6, %v8258_v6 }
 0x612   :  { %v1021_v39 = vsel %vm144_vm0, %v1017_v29, 0.0  ;;  %v7048_v29 = vld [vmem:[%s11737_s3 + $0xd0] sm:$0xff] }
 0x613   :  { %1022 = vadd.xlane.f32.xlu1 %v1021_v39  ;;  %v1002_v54 = vpop.xlane.xlu1 %1001  ;;  %1540 = vmatpush.msra.mxu0 %v7037_v19 }
 0x614   :  { %v1010_v9 = vmul.f32 %v1002_v54, %v8134_v5  ;;  %v7049_v54 = vld [vmem:[%s11737_s3 + $0xc8] sm:$0xff] }
 0x616   :  { %v8264_v58 = vsub.f32 %v994_v24, %v1010_v9  ;;  %v7039_v24 = vld [vmem:[%s11737_s3 + $0x70] sm:$0xff] }
 0x617   :  { %1541 = vmatpush.msra.mxu0 %v7039_v24 }
 0x618   :  { %v1018_v4 = vmul.f32 %v8264_v58, %v8264_v58 }
 0x619   :  { %1542 = vmatpush.msra.mxu0 %v7041_v23 }
 0x61a   :  { %v1024_v10 = vsel %vm144_vm0, %v1018_v4, 0.0 }
 0x61b   :  { %1025 = vadd.xlane.f32.xlu2 %v1024_v10  ;;  %1543 = vmatpush.msra.mxu0 %v7043_v46 }
 0x61d   :  { %1544 = vmatpush.msra.mxu0 %v7045_v44 }
 0x61f   :  { %1545 = vmatpush.msra.mxu0 %v7047_v35  ;;  %v8461_v35 = vld [vmem:[%s11734_s7 + $0x10] sm:$0xff] }
 0x621   :  { %v1005_v47 = vpop.xlane.xlu2 %1004  ;;  %1546 = vmatpush.msra.mxu0 %v7881_v13  ;;  %v11746_v13 = vld [vmem:[#allocation3_spill] sm:$0xff] }
 0x622   :  { %v1011_v41 = vmul.f32 %v1005_v47, %v8134_v5 }
 0x623   :  { %1547 = vmatpush.msra.mxu0 %v7896_v21 }
 0x624   :  { %v8270_v11 = vsub.f32 %v995_v25, %v1011_v41  ;;  %v7042_v25 = vld [vmem:[%s11737_s3 + $0xe8] sm:$0xff] }
 0x625   :  { %1571 = vmatpush.msrb.mxu1 %v7042_v25  ;;  %1548 = vmatpush.msra.mxu0 %v7910_v26 }
 0x626   :  { %v1019_v52 = vmul.f32 %v8270_v11, %v8270_v11 }
 0x627   :  { %1572 = vmatpush.msrb.mxu1 %v7044_v30  ;;  %1549 = vmatpush.msra.mxu0 %v11746_v13 }
 0x628   :  { %v1027_v36 = vsel %vm144_vm0, %v1019_v52, 0.0  ;;  %v11747_v52 = vld [vmem:[#allocation2_spill] sm:$0xff] }
 0x629   :  { %v1008_v2 = vpop.xlane.xlu0 %1007  ;;  %1028 = vadd.xlane.f32.xlu0 %v1027_v36  ;;  %1573 = vmatpush.msrb.mxu1 %v7046_v50 }
 0x62a   :  { %v1012_v59 = vmul.f32 %v1008_v2, %v8134_v5  ;;  %1550 = vmatpush.msra.mxu0 %v7978_v43  ;;  %v142_v2 = vld [vmem:[%s11734_s7 + $0x8] sm:$0xff] }
 0x62b   :  { %1574 = vmatpush.msrb.mxu1 %v7048_v29  ;;  %v1190_v29 = vperm.slane %v8461_v35, 1 }
 0x62c   :  { %v8276_v1 = vsub.f32 %v996_v15, %v1012_v59  ;;  %1551 = vmatpush.msra.mxu0 %v7991_v55 }
 0x62d   :  { %1575 = vmatpush.msrb.mxu1 %v7049_v54 }
 0x62e   :  { %v1020_v14 = vmul.f32 %v8276_v1, %v8276_v1  ;;  %1552 = vmatpush.msra.mxu0 %v8005_v3 }
 0x62f   :  { %1576 = vmatpush.msrb.mxu1 %v7891_v28 }
 0x630   :  { %v1030_v33 = vsel %vm144_vm0, %v1020_v14, 0.0  ;;  %1553 = vmatpush.msra.mxu0 %v8017_v8  ;;  %v1090_v14 = vperm.slane %v142_v2, 0  ;;  %v7052_v2 = vld [vmem:[%s11735_s2 + $0x70] sm:$0xff] }
 0x631   :  { %1031 = vadd.xlane.f32.xlu1 %v1030_v33  ;;  %1577 = vmatpush.msrb.mxu1 %v7905_v37 }
 0x632   :  { %1554 = vmatpush.msra.mxu0 %v8033_v31 }
 0x633   :  { %1578 = vmatpush.msrb.mxu1 %v11747_v52 }
 0x634   :  { %1555 = vmatpush.msra.mxu0 %v8047_v27 }
 0x635   :  { %1579 = vmatpush.msrb.mxu1 %v7935_v56  ;;  %v8387_v56 = vperm.slane %v8197_v62, 7 }
 0x637   :  { %1580 = vmatpush.msrb.mxu1 %v7986_v51 }
 0x639   :  { %1581 = vmatpush.msrb.mxu1 %v8000_v63 }
 0x63b   :  { %1582 = vmatpush.msrb.mxu1 %v8012_v0 }
 0x63d   :  { %1583 = vmatpush.msrb.mxu1 %v8024_v32 }
 0x63f   :  { %1584 = vmatpush.msrb.mxu1 %v8042_v53 }
 0x686   :  { %v1023_v38 = vpop.xlane.xlu1 %1022 }
 0x687   :  { %v1033_v42 = vmul.f32 %v1023_v38, %v8134_v5 }
 0x689   :  { %v1037_v15 = vadd.f32 1e-05, %v1033_v42 }
 0x68b   :  { %6828 = vrsqrt.f32 %v1037_v15  ;;  %vm1047_vm3 = vweird.f32 %v1037_v15 }
 0x68e   :  { %v1026_v39 = vpop.xlane.xlu2 %1025 }
 0x68f   :  { %v1034_v9 = vmul.f32 %v1026_v39, %v8134_v5  ;;  %v1232_v39 = vperm.slane %v8461_v35, 2 }
 0x691   :  { %v6829_v4 = vpop.eup %6828  ;;  %v1038_v10 = vadd.f32 1e-05, %v1034_v9 }
 0x692   :  { %v1042_v47 = vmul.f32 %v6829_v4, %v1037_v15  ;;  %vm1048_vm2 = vweird.f32 %v6829_v4 }
 0x693   :  { %6830 = vrsqrt.f32 %v1038_v10  ;;  %vm1049_vm4 = vmor %vm1047_vm3, %vm1048_vm2  ;;  %vm1057_vm6 = vweird.f32 %v1038_v10 }
 0x694   :  { %v1043_v41 = vmul.f32 %v6829_v4, %v1042_v47 }
 0x696   :  { %v1044_v36 = vmul.f32 0.5, %v1043_v41  ;;  %v7050_v41 = vld [vmem:[%s11735_s2 + $0x78] sm:$0xff] }
 0x698   :  { %v1045_v28 = vsub.f32 1.5, %v1044_v36  ;;  %v8480_v36 = vld [vmem:[%s11735_s2 + $0xf8] sm:$0xff] }
 0x699   :  { %v6831_v21 = vpop.eup %6830 }
 0x69a   :  { %v1046_v37 = vmul.f32 %v6829_v4, %v1045_v28  ;;  %v1052_v26 = vmul.f32 %v6831_v21, %v1038_v10  ;;  %vm1058_vm5 = vweird.f32 %v6831_v21 }
 0x69b   :  { %vm1059_vm7 = vmor %vm1057_vm6, %vm1058_vm5 }
 0x69c   :  { %v1050_v43 = vsel %vm1049_vm4, %v6829_v4, %v1046_v37  ;;  %v1053_v51 = vmul.f32 %v6831_v21, %v1052_v26  ;;  %v1029_v55 = vpop.xlane.xlu0 %1028 }
 0x69d   :  { %v1081_v3 = vmul.f32 %v1050_v43, %v8258_v6  ;;  %v1035_v59 = vmul.f32 %v1029_v55, %v8134_v5  ;;  %v8501_v55 = vld [vmem:[%s11735_s2 + $0xf0] sm:$0xff] }
 0x69e   :  { %v1054_v33 = vmul.f32 0.5, %v1053_v51 }
 0x69f   :  { %v1086_v63 = vmul.f32 %v8387_v56, %v1081_v3  ;;  %v1039_v62 = vadd.f32 1e-05, %v1035_v59  ;;  %v7054_v59 = vld [vmem:[%s11735_s2 + $0x68] sm:$0xff] }
 0x6a0   :  { %v1055_v8 = vsub.f32 1.5, %v1054_v33  ;;  %v7055_v33 = vld [vmem:[%s11735_s2 + $0x60] sm:$0xff] }
 0x6a1   :  { %6832 = vrsqrt.f32 %v1039_v62  ;;  %v8398_v0 = vadd.f32 %v1090_v14, %v1086_v63  ;;  %vm1067_vm9 = vweird.f32 %v1039_v62 }
 0x6a2   :  { %v1056_v6 = vmul.f32 %v6831_v21, %v1055_v8 }
 0x6a3   :  { %1095 = vst.msk [vmem:[%s11741_s9] sm:$0xff] %vm144_vm0, %v8398_v0  ;;  %6158 = vmatmul.msk.f32.vlgmr.msra.gmra.mxu3 %vm144_vm0, %v8398_v0  ;;  %6166 = vmatmul.msk.f32.vlgmr.msrb.gmra.mxu0 %vm144_vm0, %v8398_v0 }
 0x6a4   :  { %v1060_v32 = vsel %vm1059_vm7, %v6831_v21, %v1056_v6  ;;  %6174 = vmatmul.msk.f32.vlgmr.msra.gmra.mxu1 %vm144_vm0, %v8398_v0  ;;  %v1032_v31 = vpop.xlane.xlu1 %1031  ;;  %1629 = vmatpush.msrb.mxu0 %v8094_v60  ;;  %v8521_v6 = vld [vmem:[%s11735_s2 + $0xe8] sm:$0xff] }
 0x6a5   :  { %v1082_v53 = vmul.f32 %v1060_v32, %v8264_v58  ;;  %v1036_v27 = vmul.f32 %v1032_v31, %v8134_v5  ;;  %v7057_v31 = vld [vmem:[%s11735_s2 + $0x58] sm:$0xff] }
 0x6a7   :  { %v6833_v49 = vpop.eup %6832  ;;  %v1087_v12 = vmul.f32 %v8387_v56, %v1082_v53  ;;  %v1040_v7 = vadd.f32 1e-05, %v1036_v27  ;;  %v7058_v27 = vld [vmem:[%s11735_s2 + $0x50] sm:$0xff] }
 0x6a8   :  { %v1062_v40 = vmul.f32 %v6833_v49, %v1039_v62  ;;  %vm1068_vm8 = vweird.f32 %v6833_v49 }
 0x6a9   :  { %6834 = vrsqrt.f32 %v1040_v7  ;;  %v8415_v48 = vadd.f32 %v1090_v14, %v1087_v12  ;;  %vm1069_vm10 = vmor %vm1067_vm9, %vm1068_vm8  ;;  %vm1077_vm12 = vweird.f32 %v1040_v7 }
 0x6aa   :  { %v1063_v16 = vmul.f32 %v6833_v49, %v1062_v40 }
 0x6ab   :  { %1096 = vst.msk [vmem:[%s11741_s9 + $0x8] sm:$0xff] %vm144_vm0, %v8415_v48  ;;  %6159 = vmatmul.msk.f32.gmra.mxu3 %vm144_vm0, %v8415_v48  ;;  %6167 = vmatmul.msk.f32.gmra.mxu0 %vm144_vm0, %v8415_v48 }
 0x6ac   :  { %v1064_v60 = vmul.f32 0.5, %v1063_v16  ;;  %6175 = vmatmul.msk.f32.gmra.mxu1 %vm144_vm0, %v8415_v48  ;;  %v7060_v16 = vld [vmem:[%s11735_s2 + $0x48] sm:$0xff] }
 0x6ae   :  { %v1065_v58 = vsub.f32 1.5, %v1064_v60 }
 0x6af   :  { %v6835_v61 = vpop.eup %6834 }
 0x6b0   :  { %v1066_v22 = vmul.f32 %v6833_v49, %v1065_v58  ;;  %v1072_v20 = vmul.f32 %v6835_v61, %v1040_v7  ;;  %vm1078_vm11 = vweird.f32 %v6835_v61  ;;  %v8539_v7 = vld [vmem:[%s11735_s2 + $0xe0] sm:$0xff] }
 0x6b1   :  { %vm1079_vm13 = vmor %vm1077_vm12, %vm1078_vm11  ;;  %v7061_v58 = vld [vmem:[%s11735_s2 + $0x40] sm:$0xff] }
 0x6b2   :  { %v1070_v17 = vsel %vm1069_vm10, %v6833_v49, %v1066_v22  ;;  %v1073_v45 = vmul.f32 %v6835_v61, %v1072_v20  ;;  %v8557_v20 = vld [vmem:[%s11735_s2 + $0xd8] sm:$0xff] }
 0x6b3   :  { %v1083_v57 = vmul.f32 %v1070_v17, %v8270_v11 }
 0x6b4   :  { %v1074_v19 = vmul.f32 0.5, %v1073_v45  ;;  %v7063_v45 = vld [vmem:[%s11735_s2 + $0x38] sm:$0xff] }
 0x6b5   :  { %v1088_v18 = vmul.f32 %v8387_v56, %v1083_v57 }
 0x6b6   :  { %v1075_v24 = vsub.f32 1.5, %v1074_v19  ;;  %v7064_v19 = vld [vmem:[%s11735_s2 + $0x30] sm:$0xff] }
 0x6b7   :  { %v8430_v34 = vadd.f32 %v1090_v14, %v1088_v18 }
 0x6b8   :  { %v1076_v23 = vmul.f32 %v6835_v61, %v1075_v24 }
 0x6b9   :  { %1097 = vst.msk [vmem:[%s11741_s9 + $0x10] sm:$0xff] %vm144_vm0, %v8430_v34  ;;  %6160 = vmatmul.msk.f32.gmra.mxu3 %vm144_vm0, %v8430_v34  ;;  %6168 = vmatmul.msk.f32.gmra.mxu0 %vm144_vm0, %v8430_v34 }
 0x6ba   :  { %v1080_v11 = vsel %vm1079_vm13, %v6835_v61, %v1076_v23  ;;  %6176 = vmatmul.msk.f32.gmra.mxu1 %vm144_vm0, %v8430_v34  ;;  %v8575_v23 = vld [vmem:[%s11735_s2 + $0xd0] sm:$0xff] }
 0x6bb   :  { %v1084_v38 = vmul.f32 %v1080_v11, %v8276_v1 }
 0x6bd   :  { %v1089_v25 = vmul.f32 %v8387_v56, %v1084_v38  ;;  %v7066_v38 = vld [vmem:[%s11735_s2 + $0x28] sm:$0xff] }
 0x6bf   :  { %v8445_v42 = vadd.f32 %v1090_v14, %v1089_v25 }
 0x6c1   :  { %1098 = vst.msk [vmem:[%s11741_s9 + $0x18] sm:$0xff] %vm144_vm0, %v8445_v42  ;;  %6161 = vmatmul.msk.f32.gmra.mxu3 %vm144_vm0, %v8445_v42  ;;  %6169 = vmatmul.msk.f32.gmra.mxu0 %vm144_vm0, %v8445_v42 }
 0x6c2   :  { %6177 = vmatmul.msk.f32.gmra.mxu1 %vm144_vm0, %v8445_v42 }
 0x720   :  { %v1220_v1 = vpop.f32.mrf.mxu0 }
 0x721   :  { %v1262_v46 = vpop.f32.mrf.mxu1  ;;  %v8515_v62 = vadd.f32 %v1220_v1, %v1190_v29  ;;  %v7067_v1 = vld [vmem:[%s11735_s2 + $0x20] sm:$0xff] }
 0x722   :  { %v8489_v26 = vadd.f32 %v1262_v46, %v1232_v39 }
 0x723   :  { %v1286_v12 = vmul.f32 %v7055_v33, %v8515_v62  ;;  %v1302_v40 = vmul.f32 %v8539_v7, %v8515_v62 }
 0x724   :  { %v1318_v63 = vmul.f32 %v7055_v33, %v8489_v26  ;;  %v1314_v61 = vmul.f32 %v7061_v58, %v8489_v26  ;;  %v1310_v46 = vmul.f32 %v7067_v1, %v8489_v26  ;;  %v8639_v33 = vld [vmem:[%s11735_s2 + $0xb0] sm:$0xff] }
 0x728   :  { %v1223_v30 = vpop.f32.mrf.mxu0 }
 0x729   :  { %v1265_v15 = vpop.f32.mrf.mxu1  ;;  %v8495_v43 = vadd.f32 %v1223_v30, %v1190_v29 }
 0x72a   :  { %v8484_v21 = vadd.f32 %v1265_v15, %v1232_v39  ;;  %v8593_v15 = vld [vmem:[%s11735_s2 + $0xc8] sm:$0xff] }
 0x72b   :  { %v1287_v8 = vmul.f32 %v7054_v59, %v8495_v43  ;;  %v1303_v32 = vmul.f32 %v8521_v6, %v8495_v43  ;;  %v1283_v30 = vmul.f32 %v7060_v16, %v8495_v43 }
 0x72c   :  { %v1319_v14 = vmul.f32 %v7054_v59, %v8484_v21  ;;  %v1315_v60 = vmul.f32 %v7060_v16, %v8484_v21  ;;  %v1311_v25 = vmul.f32 %v7066_v38, %v8484_v21 }
 0x736   :  { %v1226_v44 = vpop.f32.mrf.mxu0 }
 0x737   :  { %v1268_v50 = vpop.f32.mrf.mxu1  ;;  %v8471_v13 = vadd.f32 %v1226_v44, %v1190_v29  ;;  %v1299_v44 = vmul.f32 %v8593_v15, %v8495_v43 }
 0x738   :  { %v8467_v10 = vadd.f32 %v1268_v50, %v1232_v39  ;;  %v7069_v50 = vld [vmem:[%s11735_s2 + $0x18] sm:$0xff] }
 0x739   :  { %v1288_v51 = vmul.f32 %v7052_v2, %v8471_v13  ;;  %v1304_v3 = vmul.f32 %v8501_v55, %v8471_v13  ;;  %v1284_v24 = vmul.f32 %v7058_v27, %v8471_v13  ;;  %v1300_v11 = vmul.f32 %v8575_v23, %v8471_v13 }
 0x73a   :  { %v1320_v56 = vmul.f32 %v7052_v2, %v8467_v10  ;;  %v1316_v49 = vmul.f32 %v7058_v27, %v8467_v10  ;;  %v1312_v18 = vmul.f32 %v7064_v19, %v8467_v10  ;;  %v7073_v2 = vld [vmem:[%s11735_s2] sm:$0xff] }
 0x73b   :  { %v7077_v27 = vld [vmem:[%s11735_s2 + $0xa0] sm:$0xff] }
 0x73e   :  { %v1229_v54 = vpop.f32.mrf.mxu0 }
 0x73f   :  { %v8465_v9 = vadd.f32 %v1229_v54, %v1190_v29  ;;  %v1271_v4 = vpop.f32.mrf.mxu1 }
 0x740   :  { %v8469_v47 = vadd.f32 %v1271_v4, %v1232_v39  ;;  %v7070_v39 = vld [vmem:[%s11735_s2 + $0x10] sm:$0xff]  ;;  %v1282_v4 = vmul.f32 %v7061_v58, %v8515_v62 }
 0x741   :  { %v1289_v52 = vmul.f32 %v7050_v41, %v8465_v9  ;;  %v1305_v28 = vmul.f32 %v8480_v36, %v8465_v9  ;;  %v1285_v22 = vmul.f32 %v7057_v31, %v8465_v9  ;;  %v1301_v17 = vmul.f32 %v8557_v20, %v8465_v9  ;;  %v7079_v58 = vld [vmem:[%s11735_s2 + $0x90] sm:$0xff] }
 0x742   :  { %v1321_v37 = vmul.f32 %v7050_v41, %v8469_v47  ;;  %v1317_v53 = vmul.f32 %v7057_v31, %v8469_v47  ;;  %v1313_v57 = vmul.f32 %v7063_v45, %v8469_v47  ;;  %v1309_v29 = vmul.f32 %v7069_v50, %v8469_v47  ;;  %v8611_v41 = vld [vmem:[%s11735_s2 + $0xc0] sm:$0xff] }
 0x743   :  { %6178 = vmatpush.xpose.msk.msrb.mxu2 %vm144_vm0, %v1289_v52  ;;  %6198 = vmatpush.xpose.msk.msrb.mxu3 %vm144_vm0, %v1305_v28  ;;  %v1308_v54 = vmul.f32 %v7070_v39, %v8467_v10  ;;  %v1298_v52 = vmul.f32 %v8611_v41, %v8515_v62  ;;  %v7072_v28 = vld [vmem:[%s11735_s2 + $0x8] sm:$0xff] }
 0x744   :  { %1643 = vmatpush.msra.mxu1 %v1321_v37  ;;  %v1307_v37 = vmul.f32 %v7072_v28, %v8484_v21 }
 0x746   :  { %1644 = vmatpush.msra.mxu1 %v1320_v56  ;;  %v1306_v56 = vmul.f32 %v7073_v2, %v8489_v26 }
 0x747   :  { %6179 = vmatpush.xpose.msk.msrb.mxu2 %vm144_vm0, %v1288_v51  ;;  %6199 = vmatpush.xpose.msk.msrb.mxu3 %vm144_vm0, %v1304_v3  ;;  %v1281_v51 = vmul.f32 %v7063_v45, %v8465_v9  ;;  %v8629_v3 = vld [vmem:[%s11735_s2 + $0xb8] sm:$0xff] }
 0x748   :  { %1645 = vmatpush.msra.mxu1 %v1319_v14  ;;  %v1297_v59 = vmul.f32 %v8629_v3, %v8465_v9  ;;  %v1280_v14 = vmul.f32 %v7064_v19, %v8471_v13  ;;  %v7081_v19 = vld [vmem:[%s11735_s2 + $0x80] sm:$0xff] }
 0x74a   :  { %1646 = vmatpush.msra.mxu1 %v1318_v63  ;;  %v1296_v63 = vmul.f32 %v8639_v33, %v8471_v13 }
 0x74b   :  { %6180 = vmatpush.xpose.msk.msrb.mxu2 %vm144_vm0, %v1287_v8  ;;  %6200 = vmatpush.xpose.msk.msrb.mxu3 %vm144_vm0, %v1303_v32  ;;  %v1279_v8 = vmul.f32 %v7066_v38, %v8495_v43  ;;  %v7076_v32 = vld [vmem:[%s11735_s2 + $0xa8] sm:$0xff] }
 0x74c   :  { %1647 = vmatpush.msra.mxu1 %v1317_v53  ;;  %v1295_v31 = vmul.f32 %v7076_v32, %v8495_v43  ;;  %v1278_v53 = vmul.f32 %v7067_v1, %v8515_v62 }
 0x74e   :  { %1648 = vmatpush.msra.mxu1 %v1316_v49  ;;  %v1294_v49 = vmul.f32 %v7077_v27, %v8515_v62 }
 0x74f   :  { %6181 = vmatpush.xpose.msk.msrb.mxu2 %vm144_vm0, %v1286_v12  ;;  %6201 = vmatpush.xpose.msk.msrb.mxu3 %vm144_vm0, %v1302_v40  ;;  %v1277_v12 = vmul.f32 %v7069_v50, %v8465_v9  ;;  %v7078_v40 = vld [vmem:[%s11735_s2 + $0x98] sm:$0xff]  ;;  %v1326_v50 = vmul.f32 %v7077_v27, %v8489_v26 }
 0x750   :  { %1649 = vmatpush.msra.mxu1 %v1315_v60  ;;  %v1293_v16 = vmul.f32 %v7078_v40, %v8465_v9  ;;  %v1276_v60 = vmul.f32 %v7070_v39, %v8471_v13  ;;  %v7080_v9 = vld [vmem:[%s11735_s2 + $0x88] sm:$0xff] }
 0x751   :  { %v1291_v45 = vmul.f32 %v7080_v9, %v8495_v43 }
 0x752   :  { %1650 = vmatpush.msra.mxu1 %v1314_v61  ;;  %v1292_v61 = vmul.f32 %v7079_v58, %v8471_v13  ;;  %v1274_v13 = vmul.f32 %v7073_v2, %v8515_v62 }
 0x753   :  { %6182 = vmatpush.xpose.msk.msrb.mxu2 %vm144_vm0, %v1285_v22  ;;  %6202 = vmatpush.xpose.msk.msrb.mxu3 %vm144_vm0, %v1301_v17  ;;  %v1178_v22 = vpop.f32.mrf.mxu3  ;;  %v1275_v17 = vmul.f32 %v7072_v28, %v8495_v43 }
 0x754   :  { %1651 = vmatpush.msra.mxu1 %v1313_v57  ;;  %v1136_v57 = vperm.slane %v8461_v35, 0 }
 0x756   :  { %1652 = vmatpush.msra.mxu1 %v1312_v18  ;;  %v1290_v18 = vmul.f32 %v7081_v19, %v8515_v62  ;;  %v1179_v43 = vadd.f32 %v1178_v22, %v1136_v57  ;;  %v1335_v62 = vmul.f32 %v8521_v6, %v8484_v21  ;;  %v1331_v6 = vmul.f32 %v8593_v15, %v8484_v21 }
 0x757   :  { %6183 = vmatpush.xpose.msk.msrb.mxu2 %vm144_vm0, %v1284_v24  ;;  %6203 = vmatpush.xpose.msk.msrb.mxu3 %vm144_vm0, %v1300_v11  ;;  %v1337_v24 = vmul.f32 %v8480_v36, %v8469_v47  ;;  %v1336_v11 = vmul.f32 %v8501_v55, %v8467_v10  ;;  %v1334_v36 = vmul.f32 %v8539_v7, %v8489_v26 }
 0x758   :  { %1653 = vmatpush.msra.mxu1 %v1311_v25  ;;  %v1333_v25 = vmul.f32 %v8557_v20, %v8469_v47  ;;  %v1332_v55 = vmul.f32 %v8575_v23, %v8467_v10  ;;  %v1330_v7 = vmul.f32 %v8611_v41, %v8489_v26  ;;  %v1329_v20 = vmul.f32 %v8629_v3, %v8469_v47 }
 0x759   :  { %v1328_v23 = vmul.f32 %v8639_v33, %v8467_v10  ;;  %v1327_v15 = vmul.f32 %v7076_v32, %v8484_v21  ;;  %v1322_v41 = vmul.f32 %v7081_v19, %v8489_v26  ;;  %v7084_v26 = vld [vmem:[%s11736_s1 + $0x10] sm:$0xff]  ;;  %v7086_v32 = vld [vmem:[%s11736_s1 + $0x20] sm:$0xff] }
 0x75a   :  { %1654 = vmatpush.msra.mxu1 %v1310_v46 }
 0x75b   :  { %6184 = vmatpush.xpose.msk.msrb.mxu2 %vm144_vm0, %v1283_v30  ;;  %6204 = vmatpush.xpose.msk.msrb.mxu3 %vm144_vm0, %v1299_v44  ;;  %v1181_v38 = vpop.f32.mrf.mxu3 }
 0x75c   :  { %1655 = vmatpush.msra.mxu1 %v1309_v29  ;;  %v1182_v1 = vadd.f32 %v1181_v38, %v1136_v57  ;;  %v1325_v29 = vmul.f32 %v7078_v40, %v8469_v47  ;;  %v7082_v47 = vld [vmem:[%s11736_s1] sm:$0xff] }
 0x75e   :  { %1656 = vmatpush.msra.mxu1 %v1308_v54  ;;  %v1324_v54 = vmul.f32 %v7079_v58, %v8467_v10  ;;  %v7083_v10 = vld [vmem:[%s11736_s1 + $0x8] sm:$0xff]  ;;  %v7089_v58 = vld [vmem:[%s11736_s1 + $0x38] sm:$0xff] }
 0x75f   :  { %6185 = vmatpush.xpose.msk.msrb.mxu2 %vm144_vm0, %v1282_v4  ;;  %6205 = vmatpush.xpose.msk.msrb.mxu3 %vm144_vm0, %v1298_v52  ;;  %v1323_v4 = vmul.f32 %v7080_v9, %v8484_v21 }
 0x760   :  { %1657 = vmatpush.msra.mxu1 %v1307_v37 }
 0x762   :  { %1658 = vmatpush.msra.mxu1 %v1306_v56 }
 0x763   :  { %6186 = vmatpush.xpose.msk.msrb.mxu2 %vm144_vm0, %v1281_v51  ;;  %6206 = vmatpush.xpose.msk.msrb.mxu3 %vm144_vm0, %v1297_v59  ;;  %v1184_v46 = vpop.f32.mrf.mxu3  ;;  %v7085_v59 = vld [vmem:[%s11736_s1 + $0x18] sm:$0xff] }
 0x764   :  { %v1185_v30 = vadd.f32 %v1184_v46, %v1136_v57 }
 0x767   :  { %6187 = vmatpush.xpose.msk.msrb.mxu2 %vm144_vm0, %v1280_v14  ;;  %6207 = vmatpush.xpose.msk.msrb.mxu3 %vm144_vm0, %v1296_v63 }
 0x76b   :  { %6188 = vmatpush.xpose.msk.msrb.mxu2 %vm144_vm0, %v1279_v8  ;;  %6208 = vmatpush.xpose.msk.msrb.mxu3 %vm144_vm0, %v1295_v31  ;;  %v1187_v44 = vpop.f32.mrf.mxu3 }
 0x76c   :  { %v1188_v39 = vadd.f32 %v1187_v44, %v1136_v57 }
 0x76f   :  { %6189 = vmatpush.xpose.msk.msrb.mxu2 %vm144_vm0, %v1278_v53  ;;  %6209 = vmatpush.xpose.msk.msrb.mxu3 %vm144_vm0, %v1294_v49  ;;  %v7087_v53 = vld [vmem:[%s11736_s1 + $0x28] sm:$0xff] }
 0x773   :  { %6190 = vmatpush.xpose.msk.msrb.mxu2 %vm144_vm0, %v1277_v12  ;;  %6210 = vmatpush.xpose.msk.msrb.mxu3 %vm144_vm0, %v1293_v16  ;;  %v7088_v16 = vld [vmem:[%s11736_s1 + $0x30] sm:$0xff] }
 0x777   :  { %6191 = vmatpush.xpose.msk.msrb.mxu2 %vm144_vm0, %v1276_v60  ;;  %6211 = vmatpush.xpose.msk.msrb.mxu3 %vm144_vm0, %v1292_v61 }
 0x77b   :  { %6192 = vmatpush.xpose.msk.msrb.mxu2 %vm144_vm0, %v1275_v17  ;;  %6212 = vmatpush.xpose.msk.msrb.mxu3 %vm144_vm0, %v1291_v45 }
 0x77f   :  { %6193 = vmatpush.xpose.msk.msrb.mxu2 %vm144_vm0, %v1274_v13  ;;  %6213 = vmatpush.xpose.msk.msrb.mxu3 %vm144_vm0, %v1290_v18 }
 0x782   :  { %6194 = vmatmul.msk.f32.vlgmr.msrb.gmra.mxu2 %vm144_vm0, %v1179_v43  ;;  %6214 = vmatmul.msk.f32.vlgmr.msrb.gmra.mxu3 %vm144_vm0, %v1179_v43 }
 0x783   :  { %1672 = vmatpush.msra.mxu2 %v1337_v24 }
 0x785   :  { %1673 = vmatpush.msra.mxu2 %v1336_v11 }
 0x787   :  { %1674 = vmatpush.msra.mxu2 %v1335_v62 }
 0x789   :  { %1675 = vmatpush.msra.mxu2 %v1334_v36 }
 0x78a   :  { %6195 = vmatmul.msk.f32.gmra.mxu2 %vm144_vm0, %v1182_v1  ;;  %6215 = vmatmul.msk.f32.gmra.mxu3 %vm144_vm0, %v1182_v1 }
 0x78b   :  { %1676 = vmatpush.msra.mxu2 %v1333_v25 }
 0x78d   :  { %1677 = vmatpush.msra.mxu2 %v1332_v55 }
 0x78f   :  { %1678 = vmatpush.msra.mxu2 %v1331_v6 }
 0x791   :  { %1679 = vmatpush.msra.mxu2 %v1330_v7 }
 0x792   :  { %6196 = vmatmul.msk.f32.gmra.mxu2 %vm144_vm0, %v1185_v30  ;;  %6216 = vmatmul.msk.f32.gmra.mxu3 %vm144_vm0, %v1185_v30 }
 0x793   :  { %1680 = vmatpush.msra.mxu2 %v1329_v20 }
 0x795   :  { %1681 = vmatpush.msra.mxu2 %v1328_v23 }
 0x797   :  { %1682 = vmatpush.msra.mxu2 %v1327_v15 }
 0x799   :  { %1683 = vmatpush.msra.mxu2 %v1326_v50 }
 0x79a   :  { %6197 = vmatmul.msk.f32.gmra.mxu2 %vm144_vm0, %v1188_v39  ;;  %6217 = vmatmul.msk.f32.gmra.mxu3 %vm144_vm0, %v1188_v39 }
 0x79b   :  { %1684 = vmatpush.msra.mxu2 %v1325_v29 }
 0x79d   :  { %1685 = vmatpush.msra.mxu2 %v1324_v54 }
 0x79f   :  { %1686 = vmatpush.msra.mxu2 %v1323_v4 }
 0x7a1   :  { %1687 = vmatpush.msra.mxu2 %v1322_v41 }
 0x805   :  { %v1463_v52 = vpop.f32.mrf.mxu2  ;;  %v1492_v28 = vpop.f32.mrf.mxu3 }
 0x806   :  { %v1464_v37 = vadd.f32 %v7082_v47, %v1463_v52  ;;  %v1493_v2 = vadd.f32 %v7083_v10, %v1492_v28 }
 0x808   :  { %v1504_v56 = vmax.f32 %v1464_v37, %v1493_v2 }
 0x80a   :  { %1505 = vmax.xlane.f32.xlu2 %v1504_v56 }
 0x80d   :  { %v1466_v51 = vpop.f32.mrf.mxu2  ;;  %v1495_v21 = vpop.f32.mrf.mxu3 }
 0x80e   :  { %v1467_v3 = vadd.f32 %v7084_v26, %v1466_v51  ;;  %v1496_v14 = vadd.f32 %v7085_v59, %v1495_v21 }
 0x810   :  { %v1507_v33 = vmax.f32 %v1467_v3, %v1496_v14 }
 0x812   :  { %1508 = vmax.xlane.f32.xlu0 %v1507_v33  ;;  %v6135_v33 = vld [vmem:[%s11732_s5 + $0xf8] sm:$0xff] }
 0x813   :  { %6222 = vmatpush.xpose.msk.msra.mxu3 %vm144_vm0, %v6135_v33 }
 0x815   :  { %v1469_v63 = vpop.f32.mrf.mxu2  ;;  %v1498_v8 = vpop.f32.mrf.mxu3 }
 0x816   :  { %v1470_v31 = vadd.f32 %v7086_v32, %v1469_v63  ;;  %v1499_v27 = vadd.f32 %v7087_v53, %v1498_v8  ;;  %v6134_v63 = vld [vmem:[%s11732_s5 + $0xf0] sm:$0xff]  ;;  %v6133_v8 = vld [vmem:[%s11732_s5 + $0xe8] sm:$0xff] }
 0x817   :  { %6223 = vmatpush.xpose.msk.msra.mxu3 %vm144_vm0, %v6134_v63  ;;  %v6142_v63 = vld [vmem:[%s11739_s6 + $0xb0] sm:$0xff] }
 0x818   :  { %v1510_v49 = vmax.f32 %v1470_v31, %v1499_v27 }
 0x81a   :  { %1511 = vmax.xlane.f32.xlu1 %v1510_v49 }
 0x81b   :  { %6224 = vmatpush.xpose.msk.msra.mxu3 %vm144_vm0, %v6133_v8  ;;  %v6141_v8 = vld [vmem:[%s11739_s6 + $0xa8] sm:$0xff] }
 0x81d   :  { %v1472_v12 = vpop.f32.mrf.mxu2  ;;  %v1501_v40 = vpop.f32.mrf.mxu3 }
 0x81e   :  { %v1473_v60 = vadd.f32 %v7088_v16, %v1472_v12  ;;  %v1502_v61 = vadd.f32 %v7089_v58, %v1501_v40 }
 0x820   :  { %v1513_v22 = vmax.f32 %v1473_v60, %v1502_v61 }
 0x822   :  { %1514 = vmax.xlane.f32.xlu2 %v1513_v22 }
 0x87d   :  { %v1506_v17 = vpop.xlane.xlu2 %1505 }
 0x87e   :  { %v1516_v9 = vsub.f32 %v1464_v37, %v1506_v17  ;;  %v1517_v45 = vsub.f32 %v1493_v2, %v1506_v17 }
 0x880   :  { %v1524_v57 = vmul.f32 1.442695, %v1516_v9  ;;  %v1526_v13 = vmul.f32 1.442695, %v1517_v45 }
 0x882   :  { %6836 = vpow2.f32 %v1524_v57 }
 0x883   :  { %6838 = vpow2.f32 %v1526_v13 }
 0x885   :  { %v1509_v19 = vpop.xlane.xlu0 %1508 }
 0x886   :  { %v1518_v18 = vsub.f32 %v1467_v3, %v1509_v19  ;;  %v1519_v24 = vsub.f32 %v1496_v14, %v1509_v19 }
 0x888   :  { %v6837_v43 = vpop.eup %6836  ;;  %v1528_v11 = vmul.f32 1.442695, %v1518_v18  ;;  %v1530_v38 = vmul.f32 1.442695, %v1519_v24 }
 0x889   :  { %v6839_v62 = vpop.eup %6838  ;;  %1556 = vmatmul.f32.vlgmr.msra.gmra.mxu0 %v6837_v43 }
 0x88a   :  { %6840 = vpow2.f32 %v1528_v11  ;;  %1585 = vmatmul.f32.vlgmr.msrb.gmra.mxu1 %v6839_v62  ;;  %1688 = vmatmul.f32.vlgmr.msra.gmra.mxu2 %v6839_v62 }
 0x88b   :  { %6842 = vpow2.f32 %v1530_v38  ;;  %v1705_v38 = vperm.slane %v8461_v35, 3 }
 0x88d   :  { %v1512_v36 = vpop.xlane.xlu1 %1511 }
 0x88e   :  { %v1520_v25 = vsub.f32 %v1470_v31, %v1512_v36  ;;  %v1521_v1 = vsub.f32 %v1499_v27, %v1512_v36  ;;  %v6132_v31 = vld [vmem:[%s11732_s5 + $0xe0] sm:$0xff] }
 0x88f   :  { %6225 = vmatpush.xpose.msk.msra.mxu3 %vm144_vm0, %v6132_v31  ;;  %v6139_v31 = vld [vmem:[%s11739_s6 + $0x98] sm:$0xff] }
 0x890   :  { %v6841_v55 = vpop.eup %6840  ;;  %v1532_v46 = vmul.f32 1.442695, %v1520_v25  ;;  %v1534_v6 = vmul.f32 1.442695, %v1521_v1 }
 0x891   :  { %v6843_v7 = vpop.eup %6842  ;;  %1559 = vmatmul.f32.gmra.mxu0 %v6841_v55 }
 0x892   :  { %6844 = vpow2.f32 %v1532_v46  ;;  %1588 = vmatmul.f32.gmra.mxu1 %v6843_v7  ;;  %1691 = vmatmul.f32.gmra.mxu2 %v6843_v7 }
 0x893   :  { %6846 = vpow2.f32 %v1534_v6 }
 0x895   :  { %v1515_v20 = vpop.xlane.xlu2 %1514 }
 0x896   :  { %v1522_v30 = vsub.f32 %v1473_v60, %v1515_v20  ;;  %v1523_v23 = vsub.f32 %v1502_v61, %v1515_v20 }
 0x898   :  { %v6845_v15 = vpop.eup %6844  ;;  %v1536_v44 = vmul.f32 1.442695, %v1522_v30  ;;  %v1538_v50 = vmul.f32 1.442695, %v1523_v23 }
 0x899   :  { %v6847_v29 = vpop.eup %6846  ;;  %1562 = vmatmul.f32.gmra.mxu0 %v6845_v15 }
 0x89a   :  { %6848 = vpow2.f32 %v1536_v44  ;;  %1591 = vmatmul.f32.gmra.mxu1 %v6847_v29  ;;  %1694 = vmatmul.f32.gmra.mxu2 %v6847_v29 }
 0x89b   :  { %6850 = vpow2.f32 %v1538_v50 }
 0x8a0   :  { %v6849_v39 = vpop.eup %6848 }
 0x8a1   :  { %v6851_v54 = vpop.eup %6850  ;;  %1565 = vmatmul.f32.gmra.mxu0 %v6849_v39 }
 0x8a2   :  { %1594 = vmatmul.f32.gmra.mxu1 %v6851_v54  ;;  %1697 = vmatmul.f32.gmra.mxu2 %v6851_v54 }
 0x8aa   :  { %1659 = vmatmul.f32.vlgmr.msra.gmra.mxu1 %v6837_v43 }
 0x8b2   :  { %1662 = vmatmul.f32.gmra.mxu1 %v6841_v55 }
 0x8ba   :  { %1665 = vmatmul.f32.gmra.mxu1 %v6845_v15 }
 0x8c2   :  { %1668 = vmatmul.f32.gmra.mxu1 %v6849_v39 }
 0x906   :  { %v1557_v4 = vpop.f32.mrf.mxu0 }
 0x907   :  { %v1586_v41 = vpop.f32.mrf.mxu1 }
 0x908   :  { %v1587_v52 = vadd.f32 %v1586_v41, %v1557_v4 }
 0x90a   :  { %6852 = vrcp.f32 %v1587_v52 }
 0x90d   :  { %v1689_v27 = vpop.f32.mrf.mxu2 }
 0x90e   :  { %v1560_v28 = vpop.f32.mrf.mxu0 }
 0x90f   :  { %v1589_v47 = vpop.f32.mrf.mxu1 }
 0x910   :  { %v6853_v37 = vpop.eup %6852  ;;  %v1590_v10 = vadd.f32 %v1589_v47, %v1560_v28 }
 0x911   :  { %6218 = vmatmul.msk.f32.vlgmr.msrb.gmra.mxu0 %vm610_vm1, %v6853_v37 }
 0x912   :  { %6854 = vrcp.f32 %v1590_v10 }
 0x915   :  { %v1692_v60 = vpop.f32.mrf.mxu2 }
 0x916   :  { %v1563_v2 = vpop.f32.mrf.mxu0 }
 0x917   :  { %v1592_v56 = vpop.f32.mrf.mxu1 }
 0x918   :  { %v6855_v51 = vpop.eup %6854  ;;  %v1593_v21 = vadd.f32 %v1592_v56, %v1563_v2 }
 0x919   :  { %6219 = vmatmul.msk.f32.gmra.mxu0 %vm610_vm1, %v6855_v51 }
 0x91a   :  { %6856 = vrcp.f32 %v1593_v21 }
 0x91d   :  { %v1695_v9 = vpop.f32.mrf.mxu2 }
 0x91e   :  { %v1566_v26 = vpop.f32.mrf.mxu0 }
 0x91f   :  { %v1595_v3 = vpop.f32.mrf.mxu1 }
 0x920   :  { %v6857_v59 = vpop.eup %6856  ;;  %v1596_v14 = vadd.f32 %v1595_v3, %v1566_v26 }
 0x921   :  { %6220 = vmatmul.msk.f32.gmra.mxu0 %vm610_vm1, %v6857_v59 }
 0x922   :  { %6858 = vrcp.f32 %v1596_v14 }
 0x925   :  { %v1698_v18 = vpop.f32.mrf.mxu2 }
 0x927   :  { %v1660_v53 = vpop.f32.mrf.mxu1 }
 0x928   :  { %v6859_v32 = vpop.eup %6858  ;;  %v1690_v49 = vadd.f32 %v1689_v27, %v1660_v53  ;;  %v6138_v53 = vld [vmem:[%s11739_s6 + $0x90] sm:$0xff]  ;;  %v6137_v27 = vld [vmem:[%s11739_s6 + $0x88] sm:$0xff] }
 0x929   :  { %6221 = vmatmul.msk.f32.gmra.mxu0 %vm610_vm1, %v6859_v32  ;;  %v6140_v32 = vld [vmem:[%s11739_s6 + $0xa0] sm:$0xff] }
 0x92f   :  { %v1663_v12 = vpop.f32.mrf.mxu1 }
 0x930   :  { %v1693_v58 = vadd.f32 %v1692_v60, %v1663_v12 }
 0x937   :  { %v1666_v17 = vpop.f32.mrf.mxu1 }
 0x938   :  { %v1696_v45 = vadd.f32 %v1695_v9, %v1666_v17 }
 0x93f   :  { %v1669_v19 = vpop.f32.mrf.mxu1 }
 0x940   :  { %v1699_v24 = vadd.f32 %v1698_v18, %v1669_v19 }
 0x98e   :  { %v1631_v40 = vpop.f32.mrf.mxu0 }
 0x98f   :  { %v1701_v16 = vmul.f32 %v1690_v49, %v1631_v40  ;;  %v6136_v49 = vld [vmem:[%s11739_s6 + $0x80] sm:$0xff] }
 0x991   :  { %6226 = vmatmul.msk.f32.vlgmr.msra.gmra.mxu3 %vm144_vm0, %v1701_v16 }
 0x996   :  { %v1634_v61 = vpop.f32.mrf.mxu0 }
 0x997   :  { %v1702_v22 = vmul.f32 %v1693_v58, %v1634_v61 }
 0x999   :  { %6227 = vmatmul.msk.f32.gmra.mxu3 %vm144_vm0, %v1702_v22 }
 0x99e   :  { %v1637_v57 = vpop.f32.mrf.mxu0 }
 0x99f   :  { %v1703_v13 = vmul.f32 %v1696_v45, %v1637_v57 }
 0x9a1   :  { %6228 = vmatmul.msk.f32.gmra.mxu3 %vm144_vm0, %v1703_v13 }
 0x9a6   :  { %v1640_v43 = vpop.f32.mrf.mxu0 }
 0x9a7   :  { %v1704_v11 = vmul.f32 %v1699_v24, %v1640_v43 }
 0x9a9   :  { %6229 = vmatmul.msk.f32.gmra.mxu3 %vm144_vm0, %v1704_v11 }
 0xa14   :  { %v1747_v62 = vpop.f32.mrf.mxu3 }
 0xa15   :  { %v1748_v36 = vadd.f32 %v1747_v62, %v1705_v38  ;;  %v6151_v62 = vld [vmem:[%s11739_s6 + $0xf8] sm:$0xff] }
 0xa16   :  { %1956 = vmatpush.msrb.mxu1 %v6151_v62 }
 0xa17   :  { %v1759_v25 = vadd.f32 %v1748_v36, %v8398_v0  ;;  %v6150_v36 = vld [vmem:[%s11739_s6 + $0xf0] sm:$0xff] }
 0xa18   :  { %1957 = vmatpush.msrb.mxu1 %v6150_v36 }
 0xa19   :  { %v1763_v1 = vsel %vm144_vm0, %v1759_v25, 0.0 }
 0xa1a   :  { %1764 = vadd.xlane.f32.xlu0 %v1763_v1 }
 0xa1c   :  { %v1750_v55 = vpop.f32.mrf.mxu3 }
 0xa1d   :  { %v1751_v46 = vadd.f32 %v1750_v55, %v1705_v38 }
 0xa1f   :  { %v1760_v6 = vadd.f32 %v1751_v46, %v8415_v48  ;;  %v6143_v48 = vld [vmem:[%s11739_s6 + $0xb8] sm:$0xff]  ;;  %v1856_v46 = vperm.slane %v8461_v35, 6 }
 0xa20   :  { %6231 = vmatpush.xpose.msk.msra.mxu0 %vm144_vm0, %v6143_v48 }
 0xa21   :  { %v1766_v7 = vsel %vm144_vm0, %v1760_v6, 0.0 }
 0xa22   :  { %1767 = vadd.xlane.f32.xlu1 %v1766_v7 }
 0xa24   :  { %v1753_v20 = vpop.f32.mrf.mxu3  ;;  %6232 = vmatpush.xpose.msk.msra.mxu0 %vm144_vm0, %v6142_v63 }
 0xa25   :  { %v1754_v30 = vadd.f32 %v1753_v20, %v1705_v38 }
 0xa27   :  { %v1761_v23 = vadd.f32 %v1754_v30, %v8430_v34 }
 0xa28   :  { %6233 = vmatpush.xpose.msk.msra.mxu0 %vm144_vm0, %v6141_v8 }
 0xa29   :  { %v1769_v15 = vsel %vm144_vm0, %v1761_v23, 0.0 }
 0xa2a   :  { %1770 = vadd.xlane.f32.xlu2 %v1769_v15  ;;  %v6148_v15 = vld [vmem:[%s11739_s6 + $0xe0] sm:$0xff] }
 0xa2c   :  { %v1756_v44 = vpop.f32.mrf.mxu3  ;;  %6234 = vmatpush.xpose.msk.msra.mxu0 %vm144_vm0, %v6140_v32 }
 0xa2d   :  { %v1757_v50 = vadd.f32 %v1756_v44, %v1705_v38  ;;  %v8839_v38 = vperm.slane %v8461_v35, 5 }
 0xa2f   :  { %v1762_v0 = vadd.f32 %v1757_v50, %v8445_v42 }
 0xa30   :  { %6235 = vmatpush.xpose.msk.msra.mxu0 %vm144_vm0, %v6139_v31 }
 0xa31   :  { %v1772_v29 = vsel %vm144_vm0, %v1762_v0, 0.0 }
 0xa32   :  { %1773 = vadd.xlane.f32.xlu0 %v1772_v29 }
 0xa34   :  { %6236 = vmatpush.xpose.msk.msra.mxu0 %vm144_vm0, %v6138_v53 }
 0xa38   :  { %6237 = vmatpush.xpose.msk.msra.mxu0 %vm144_vm0, %v6137_v27 }
 0xa3c   :  { %6238 = vmatpush.xpose.msk.msra.mxu0 %vm144_vm0, %v6136_v49 }
 0xa8d   :  { %v1765_v39 = vpop.xlane.xlu0 %1764 }
 0xa8e   :  { %v1775_v54 = vmul.f32 %v1765_v39, %v8134_v5  ;;  %v6147_v39 = vld [vmem:[%s11739_s6 + $0xd8] sm:$0xff] }
 0xa90   :  { %v8784_v34 = vsub.f32 %v1759_v25, %v1775_v54 }
 0xa92   :  { %v1783_v4 = vmul.f32 %v8784_v34, %v8784_v34 }
 0xa94   :  { %v1787_v41 = vsel %vm144_vm0, %v1783_v4, 0.0 }
 0xa95   :  { %1788 = vadd.xlane.f32.xlu1 %v1787_v41  ;;  %v1768_v42 = vpop.xlane.xlu1 %1767 }
 0xa96   :  { %v1776_v52 = vmul.f32 %v1768_v42, %v8134_v5 }
 0xa98   :  { %v8790_v28 = vsub.f32 %v1760_v6, %v1776_v52  ;;  %v6149_v6 = vld [vmem:[%s11739_s6 + $0xe8] sm:$0xff] }
 0xa99   :  { %1958 = vmatpush.msrb.mxu1 %v6149_v6  ;;  %v6145_v52 = vld [vmem:[%s11739_s6 + $0xc8] sm:$0xff] }
 0xa9a   :  { %v1784_v47 = vmul.f32 %v8790_v28, %v8790_v28 }
 0xa9b   :  { %1959 = vmatpush.msrb.mxu1 %v6148_v15 }
 0xa9c   :  { %v1790_v37 = vsel %vm144_vm0, %v1784_v47, 0.0 }
 0xa9d   :  { %1791 = vadd.xlane.f32.xlu2 %v1790_v37  ;;  %v1771_v10 = vpop.xlane.xlu2 %1770  ;;  %1960 = vmatpush.msrb.mxu1 %v6147_v39 }
 0xa9e   :  { %v1777_v2 = vmul.f32 %v1771_v10, %v8134_v5 }
 0xaa0   :  { %v8796_v56 = vsub.f32 %v1761_v23, %v1777_v2 }
 0xaa2   :  { %v1785_v51 = vmul.f32 %v8796_v56, %v8796_v56 }
 0xaa4   :  { %v1793_v21 = vsel %vm144_vm0, %v1785_v51, 0.0 }
 0xaa5   :  { %1794 = vadd.xlane.f32.xlu0 %v1793_v21  ;;  %v1774_v26 = vpop.xlane.xlu0 %1773 }
 0xaa6   :  { %v1778_v3 = vmul.f32 %v1774_v26, %v8134_v5 }
 0xaa8   :  { %v8802_v59 = vsub.f32 %v1762_v0, %v1778_v3 }
 0xaaa   :  { %v1786_v14 = vmul.f32 %v8802_v59, %v8802_v59 }
 0xaac   :  { %v1796_v33 = vsel %vm144_vm0, %v1786_v14, 0.0 }
 0xaad   :  { %1797 = vadd.xlane.f32.xlu1 %v1796_v33 }
 0xb08   :  { %v1789_v12 = vpop.xlane.xlu1 %1788 }
 0xb09   :  { %v1799_v40 = vmul.f32 %v1789_v12, %v8134_v5 }
 0xb0b   :  { %v1803_v16 = vadd.f32 1e-05, %v1799_v40  ;;  %v6789_v40 = vld [vmem:[%s11740_s8 + $0x1] ss:$0 sm:$0xff] }
 0xb0d   :  { %6860 = vrsqrt.f32 %v1803_v16  ;;  %vm1813_vm2 = vweird.f32 %v1803_v16 }
 0xb10   :  { %v1792_v60 = vpop.xlane.xlu2 %1791 }
 0xb11   :  { %v1800_v58 = vmul.f32 %v1792_v60, %v8134_v5 }
 0xb13   :  { %v6861_v61 = vpop.eup %6860  ;;  %v1804_v22 = vadd.f32 1e-05, %v1800_v58 }
 0xb14   :  { %v1808_v17 = vmul.f32 %v6861_v61, %v1803_v16  ;;  %vm1814_vm14 = vweird.f32 %v6861_v61 }
 0xb15   :  { %6862 = vrsqrt.f32 %v1804_v22  ;;  %vm1815_vm3 = vmor %vm1813_vm2, %vm1814_vm14  ;;  %vm1823_vm5 = vweird.f32 %v1804_v22 }
 0xb16   :  { %v1809_v9 = vmul.f32 %v6861_v61, %v1808_v17 }
 0xb18   :  { %v1810_v45 = vmul.f32 0.5, %v1809_v9  ;;  %v1795_v57 = vpop.xlane.xlu0 %1794 }
 0xb19   :  { %v1801_v13 = vmul.f32 %v1795_v57, %v8134_v5 }
 0xb1a   :  { %v1811_v19 = vsub.f32 1.5, %v1810_v45 }
 0xb1b   :  { %v6863_v18 = vpop.eup %6862  ;;  %v1805_v24 = vadd.f32 1e-05, %v1801_v13 }
 0xb1c   :  { %v1812_v43 = vmul.f32 %v6861_v61, %v1811_v19  ;;  %v1818_v11 = vmul.f32 %v6863_v18, %v1804_v22  ;;  %vm1824_vm4 = vweird.f32 %v6863_v18 }
 0xb1d   :  { %6864 = vrsqrt.f32 %v1805_v24  ;;  %vm1825_vm6 = vmor %vm1823_vm5, %vm1824_vm4  ;;  %vm1833_vm8 = vweird.f32 %v1805_v24 }
 0xb1e   :  { %v1816_v25 = vsel %vm1815_vm3, %v6861_v61, %v1812_v43  ;;  %v1819_v1 = vmul.f32 %v6863_v18, %v1818_v11 }
 0xb1f   :  { %v1847_v55 = vmul.f32 %v1816_v25, %v8784_v34  ;;  %v6146_v34 = vld [vmem:[%s11739_s6 + $0xd0] sm:$0xff] }
 0xb20   :  { %v1820_v7 = vmul.f32 0.5, %v1819_v1  ;;  %v1798_v20 = vpop.xlane.xlu1 %1797  ;;  %1961 = vmatpush.msrb.mxu1 %v6146_v34 }
 0xb21   :  { %v1852_v30 = vmul.f32 %v8839_v38, %v1847_v55  ;;  %v1802_v23 = vmul.f32 %v1798_v20, %v8134_v5 }
 0xb22   :  { %v1821_v44 = vsub.f32 1.5, %v1820_v7  ;;  %1962 = vmatpush.msrb.mxu1 %v6145_v52 }
 0xb23   :  { %v6865_v50 = vpop.eup %6864  ;;  %v1806_v0 = vadd.f32 1e-05, %v1802_v23  ;;  %v8857_v29 = vadd.f32 %v1856_v46, %v1852_v30 }
 0xb24   :  { %v1822_v48 = vmul.f32 %v6863_v18, %v1821_v44  ;;  %v1828_v54 = vmul.f32 %v6865_v50, %v1805_v24  ;;  %vm1834_vm7 = vweird.f32 %v6865_v50  ;;  %v6258_v44 = vld [vmem:[%s11732_s5 + $0x138] sm:$0xff] }
 0xb25   :  { %6866 = vrsqrt.f32 %v1806_v0  ;;  %6239 = vmatmul.msk.f32.vlgmr.msra.gmra.mxu0 %vm144_vm0, %v8857_v29  ;;  %vm1835_vm9 = vmor %vm1833_vm8, %vm1834_vm7  ;;  %vm1843_vm11 = vweird.f32 %v1806_v0  ;;  %6293 = vmatpush.xpose.msk.msrb.mxu3 %vm144_vm0, %v6258_v44 }
 0xb26   :  { %v1826_v4 = vsel %vm1825_vm6, %v6863_v18, %v1822_v48  ;;  %v1829_v41 = vmul.f32 %v6865_v50, %v1828_v54  ;;  %v1935_v18 = vperm.slane %v8461_v35, 4 }
 0xb27   :  { %v1848_v42 = vmul.f32 %v1826_v4, %v8790_v28 }
 0xb28   :  { %v1830_v47 = vmul.f32 0.5, %v1829_v41 }
 0xb29   :  { %v1853_v37 = vmul.f32 %v8839_v38, %v1848_v42 }
 0xb2a   :  { %v1831_v10 = vsub.f32 1.5, %v1830_v47 }
 0xb2b   :  { %v6867_v2 = vpop.eup %6866  ;;  %v1858_v51 = vadd.f32 %v1856_v46, %v1853_v37 }
 0xb2c   :  { %v1832_v21 = vmul.f32 %v6865_v50, %v1831_v10  ;;  %v1838_v26 = vmul.f32 %v6867_v2, %v1806_v0  ;;  %vm1844_vm10 = vweird.f32 %v6867_v2 }
 0xb2d   :  { %6240 = vmatmul.msk.f32.gmra.mxu0 %vm144_vm0, %v1858_v51  ;;  %vm1845_vm12 = vmor %vm1843_vm11, %vm1844_vm10 }
 0xb2e   :  { %v1836_v28 = vsel %vm1835_vm9, %v6865_v50, %v1832_v21  ;;  %v1839_v3 = vmul.f32 %v6867_v2, %v1838_v26 }
 0xb2f   :  { %v1849_v14 = vmul.f32 %v1836_v28, %v8796_v56  ;;  %v6144_v56 = vld [vmem:[%s11739_s6 + $0xc0] sm:$0xff] }
 0xb30   :  { %v1840_v33 = vmul.f32 0.5, %v1839_v3  ;;  %1963 = vmatpush.msrb.mxu1 %v6144_v56  ;;  %v6254_v3 = vld [vmem:[%s11732_s5 + $0x118] sm:$0xff] }
 0xb31   :  { %v1854_v63 = vmul.f32 %v8839_v38, %v1849_v14  ;;  %v6262_v14 = vld [vmem:[%s11732_s5 + $0x158] sm:$0xff]  ;;  %6285 = vmatpush.xpose.msk.msrb.mxu2 %vm144_vm0, %v6254_v3 }
 0xb32   :  { %v1841_v8 = vsub.f32 1.5, %v1840_v33  ;;  %6301 = vmatpush.xpose.msk.msrb.mxu0 %vm144_vm0, %v6262_v14  ;;  %v6257_v33 = vld [vmem:[%s11732_s5 + $0x130] sm:$0xff]  ;;  %v7090_v56 = vld [vmem:[%s11737_s3 + $0x78] sm:$0xff] }
 0xb33   :  { %v1859_v32 = vadd.f32 %v1856_v46, %v1854_v63  ;;  %v6253_v63 = vld [vmem:[%s11732_s5 + $0x110] sm:$0xff]  ;;  %6294 = vmatpush.xpose.msk.msrb.mxu3 %vm144_vm0, %v6257_v33  ;;  %v7116_v14 = vld [vmem:[%s11737_s3 + $0x98] sm:$0xff] }
 0xb34   :  { %v1842_v31 = vmul.f32 %v6867_v2, %v1841_v8  ;;  %v6261_v8 = vld [vmem:[%s11732_s5 + $0x150] sm:$0xff] }
 0xb35   :  { %6241 = vmatmul.msk.f32.gmra.mxu0 %vm144_vm0, %v1859_v32  ;;  %6286 = vmatpush.xpose.msk.msrb.mxu2 %vm144_vm0, %v6253_v63 }
 0xb36   :  { %v1846_v53 = vsel %vm1845_vm12, %v6867_v2, %v1842_v31  ;;  %6302 = vmatpush.xpose.msk.msrb.mxu0 %vm144_vm0, %v6261_v8  ;;  %v6252_v31 = vld [vmem:[%s11732_s5 + $0x108] sm:$0xff]  ;;  %v7117_v8 = vld [vmem:[%s11737_s3 + $0x10] sm:$0xff] }
 0xb37   :  { %v1850_v27 = vmul.f32 %v1846_v53, %v8802_v59  ;;  %v6260_v53 = vld [vmem:[%s11732_s5 + $0x148] sm:$0xff] }
 0xb39   :  { %v1855_v49 = vmul.f32 %v8839_v38, %v1850_v27  ;;  %6287 = vmatpush.xpose.msk.msrb.mxu2 %vm144_vm0, %v6252_v31  ;;  %v6255_v27 = vld [vmem:[%s11732_s5 + $0x120] sm:$0xff] }
 0xb3a   :  { %6303 = vmatpush.xpose.msk.msrb.mxu0 %vm144_vm0, %v6260_v53 }
 0xb3b   :  { %v1860_v12 = vadd.f32 %v1856_v46, %v1855_v49  ;;  %v6251_v49 = vld [vmem:[%s11732_s5 + $0x100] sm:$0xff] }
 0xb3d   :  { %6242 = vmatmul.msk.f32.gmra.mxu0 %vm144_vm0, %v1860_v12  ;;  %6288 = vmatpush.xpose.msk.msrb.mxu2 %vm144_vm0, %v6251_v49 }
 0xba2   :  { %v1919_v16 = vpop.f32.mrf.mxu0 }
 0xba3   :  { %v1920_v60 = vadd.f32 %v6789_v40, %v1919_v16 }
 0xba5   :  { %v1931_v58 = vmax.f32 %v1920_v60, 0.0  ;;  %v7092_v60 = vld [vmem:[%s11737_s3 + $0x70] sm:$0xff] }
 0xba7   :  { %6243 = vmatmul.msk.f32.vlgmr.msrb.gmra.mxu1 %vm951_vm15, %v1931_v58 }
 0xbaa   :  { %v1922_v59 = vpop.f32.mrf.mxu0 }
 0xbab   :  { %v1923_v61 = vadd.f32 %v6789_v40, %v1922_v59  ;;  %v7093_v59 = vld [vmem:[%s11737_s3 + $0xf0] sm:$0xff] }
 0xbad   :  { %v1932_v22 = vmax.f32 %v1923_v61, 0.0  ;;  %v7094_v61 = vld [vmem:[%s11737_s3 + $0x68] sm:$0xff] }
 0xbaf   :  { %6244 = vmatmul.msk.f32.gmra.mxu1 %vm951_vm15, %v1932_v22 }
 0xbb2   :  { %v1925_v17 = vpop.f32.mrf.mxu0 }
 0xbb3   :  { %v1926_v9 = vadd.f32 %v6789_v40, %v1925_v17  ;;  %v7095_v17 = vld [vmem:[%s11737_s3 + $0xe8] sm:$0xff] }
 0xbb5   :  { %v1933_v45 = vmax.f32 %v1926_v9, 0.0  ;;  %v7096_v9 = vld [vmem:[%s11737_s3 + $0x60] sm:$0xff] }
 0xbb7   :  { %6245 = vmatmul.msk.f32.gmra.mxu1 %vm951_vm15, %v1933_v45  ;;  %v7097_v45 = vld [vmem:[%s11737_s3 + $0xe0] sm:$0xff] }
 0xbba   :  { %v1928_v57 = vpop.f32.mrf.mxu0 }
 0xbbb   :  { %v1929_v13 = vadd.f32 %v6789_v40, %v1928_v57  ;;  %v7091_v40 = vld [vmem:[%s11737_s3 + $0xf8] sm:$0xff] }
 0xbbc   :  { %v7098_v57 = vld [vmem:[%s11737_s3 + $0x58] sm:$0xff] }
 0xbbd   :  { %v1934_v19 = vmax.f32 %v1929_v13, 0.0  ;;  %v7099_v13 = vld [vmem:[%s11737_s3 + $0xd8] sm:$0xff] }
 0xbbf   :  { %6246 = vmatmul.msk.f32.gmra.mxu1 %vm951_vm15, %v1934_v19 }
 0xc24   :  { %v1965_v24 = vpop.f32.mrf.mxu1 }
 0xc25   :  { %v1966_v43 = vadd.f32 %v1965_v24, %v1935_v18 }
 0xc27   :  { %v1977_v11 = vadd.f32 %v1966_v43, %v8857_v29  ;;  %v7101_v43 = vld [vmem:[%s11737_s3 + $0xd0] sm:$0xff] }
 0xc29   :  { %v1981_v38 = vsel %vm144_vm0, %v1977_v11, 0.0 }
 0xc2a   :  { %1982 = vadd.xlane.f32.xlu2 %v1981_v38 }
 0xc2c   :  { %v1968_v62 = vpop.f32.mrf.mxu1 }
 0xc2d   :  { %v1969_v36 = vadd.f32 %v1968_v62, %v1935_v18 }
 0xc2f   :  { %v1978_v25 = vadd.f32 %v1969_v36, %v1858_v51  ;;  %v7103_v36 = vld [vmem:[%s11737_s3 + $0xc8] sm:$0xff] }
 0xc31   :  { %v1984_v1 = vsel %vm144_vm0, %v1978_v25, 0.0 }
 0xc32   :  { %1985 = vadd.xlane.f32.xlu0 %v1984_v1  ;;  %v7104_v1 = vld [vmem:[%s11737_s3 + $0x40] sm:$0xff] }
 0xc34   :  { %v1971_v55 = vpop.f32.mrf.mxu1 }
 0xc35   :  { %v1972_v46 = vadd.f32 %v1971_v55, %v1935_v18  ;;  %v7105_v55 = vld [vmem:[%s11737_s3 + $0xc0] sm:$0xff] }
 0xc37   :  { %v1979_v6 = vadd.f32 %v1972_v46, %v1859_v32  ;;  %v6256_v32 = vld [vmem:[%s11732_s5 + $0x128] sm:$0xff] }
 0xc38   :  { %6295 = vmatpush.xpose.msk.msrb.mxu3 %vm144_vm0, %v6256_v32 }
 0xc39   :  { %v1987_v7 = vsel %vm144_vm0, %v1979_v6, 0.0 }
 0xc3a   :  { %1988 = vadd.xlane.f32.xlu1 %v1987_v7  ;;  %v7107_v7 = vld [vmem:[%s11737_s3 + $0xb8] sm:$0xff] }
 0xc3c   :  { %v1974_v35 = vpop.f32.mrf.mxu1  ;;  %6296 = vmatpush.xpose.msk.msrb.mxu3 %vm144_vm0, %v6255_v27  ;;  %v7119_v27 = vld [vmem:[%s11737_s3 + $0x8] sm:$0xff] }
 0xc3d   :  { %v1975_v20 = vadd.f32 %v1974_v35, %v1935_v18  ;;  %v7100_v18 = vld [vmem:[%s11737_s3 + $0x50] sm:$0xff] }
 0xc3f   :  { %v1980_v30 = vadd.f32 %v1975_v20, %v1860_v12  ;;  %v6259_v12 = vld [vmem:[%s11732_s5 + $0x140] sm:$0xff] }
 0xc40   :  { %6304 = vmatpush.xpose.msk.msrb.mxu0 %vm144_vm0, %v6259_v12  ;;  %2525 = vmatpush.msra.mxu3 %v7090_v56 }
 0xc41   :  { %v1990_v23 = vsel %vm144_vm0, %v1980_v30, 0.0 }
 0xc42   :  { %1991 = vadd.xlane.f32.xlu2 %v1990_v23  ;;  %2526 = vmatpush.msra.mxu3 %v7092_v60 }
 0xc44   :  { %2554 = vmatpush.msra.mxu0 %v7091_v40  ;;  %2527 = vmatpush.msra.mxu3 %v7094_v61  ;;  %v7120_v40 = vld [vmem:[%s11737_s3 + $0x88] sm:$0xff] }
 0xc46   :  { %2555 = vmatpush.msra.mxu0 %v7093_v59  ;;  %2528 = vmatpush.msra.mxu3 %v7096_v9  ;;  %v7123_v9 = vld [vmem:[%s11737_s3 + $0x80] sm:$0xff] }
 0xc48   :  { %2556 = vmatpush.msra.mxu0 %v7095_v17  ;;  %2529 = vmatpush.msra.mxu3 %v7098_v57 }
 0xc4a   :  { %2557 = vmatpush.msra.mxu0 %v7097_v45  ;;  %2530 = vmatpush.msra.mxu3 %v7100_v18 }
 0xc4c   :  { %2558 = vmatpush.msra.mxu0 %v7099_v13 }
 0xc4e   :  { %2559 = vmatpush.msra.mxu0 %v7101_v43 }
 0xc50   :  { %2560 = vmatpush.msra.mxu0 %v7103_v36 }
 0xc52   :  { %2561 = vmatpush.msra.mxu0 %v7105_v55 }
 0xc54   :  { %2562 = vmatpush.msra.mxu0 %v7107_v7 }
 0xc9d   :  { %v1983_v15 = vpop.xlane.xlu2 %1982 }
 0xc9e   :  { %v1993_v50 = vmul.f32 %v1983_v15, %v8134_v5  ;;  %v7109_v15 = vld [vmem:[%s11737_s3 + $0xb0] sm:$0xff] }
 0xc9f   :  { %2563 = vmatpush.msra.mxu0 %v7109_v15  ;;  %v9158_v15 = vld [vmem:[%s11734_s7 + $0x20] sm:$0xff] }
 0xca0   :  { %v8900_v0 = vsub.f32 %v1977_v11, %v1993_v50  ;;  %v7102_v11 = vld [vmem:[%s11737_s3 + $0x48] sm:$0xff] }
 0xca1   :  { %2531 = vmatpush.msra.mxu3 %v7102_v11  ;;  %v7110_v50 = vld [vmem:[%s11737_s3 + $0x28] sm:$0xff] }
 0xca2   :  { %v2001_v29 = vmul.f32 %v8900_v0, %v8900_v0 }
 0xca3   :  { %2532 = vmatpush.msra.mxu3 %v7104_v1 }
 0xca4   :  { %v2005_v39 = vsel %vm144_vm0, %v2001_v29, 0.0 }
 0xca5   :  { %2006 = vadd.xlane.f32.xlu0 %v2005_v39  ;;  %v1986_v48 = vpop.xlane.xlu0 %1985 }
 0xca6   :  { %v1994_v54 = vmul.f32 %v1986_v48, %v8134_v5  ;;  %v7111_v48 = vld [vmem:[%s11737_s3 + $0xa8] sm:$0xff] }
 0xca7   :  { %2564 = vmatpush.msra.mxu0 %v7111_v48 }
 0xca8   :  { %v8906_v34 = vsub.f32 %v1978_v25, %v1994_v54  ;;  %v6153_v54 = vld [vmem:[%s11734_s7 + $0x18] sm:$0xff] }
 0xcaa   :  { %v2002_v4 = vmul.f32 %v8906_v34, %v8906_v34 }
 0xcac   :  { %v2008_v41 = vsel %vm144_vm0, %v2002_v4, 0.0 }
 0xcad   :  { %v1989_v42 = vpop.xlane.xlu1 %1988  ;;  %2009 = vadd.xlane.f32.xlu1 %v2008_v41 }
 0xcae   :  { %v1995_v52 = vmul.f32 %v1989_v42, %v8134_v5  ;;  %v7112_v42 = vld [vmem:[%s11737_s3 + $0x20] sm:$0xff] }
 0xcb0   :  { %v8912_v47 = vsub.f32 %v1979_v6, %v1995_v52  ;;  %v7106_v6 = vld [vmem:[%s11737_s3 + $0x38] sm:$0xff]  ;;  %v7113_v52 = vld [vmem:[%s11734_s7 + $0x10] sm:$0xff] }
 0xcb1   :  { %2533 = vmatpush.msra.mxu3 %v7106_v6 }
 0xcb2   :  { %v2003_v37 = vmul.f32 %v8912_v47, %v8912_v47 }
 0xcb4   :  { %v2011_v10 = vsel %vm144_vm0, %v2003_v37, 0.0  ;;  %v9051_v37 = vperm.slane %v7113_v52, 7 }
 0xcb5   :  { %v1992_v2 = vpop.xlane.xlu2 %1991  ;;  %2012 = vadd.xlane.f32.xlu2 %v2011_v10  ;;  %v7114_v10 = vld [vmem:[%s11737_s3 + $0xa0] sm:$0xff] }
 0xcb6   :  { %v1996_v51 = vmul.f32 %v1992_v2, %v8134_v5  ;;  %2565 = vmatpush.msra.mxu0 %v7114_v10  ;;  %v7125_v10 = vld [vmem:[%s11735_s2 + $0x70] sm:$0xff] }
 0xcb8   :  { %v8918_v21 = vsub.f32 %v1980_v30, %v1996_v51  ;;  %v7108_v30 = vld [vmem:[%s11737_s3 + $0x30] sm:$0xff]  ;;  %2566 = vmatpush.msra.mxu0 %v7116_v14 }
 0xcb9   :  { %2534 = vmatpush.msra.mxu3 %v7108_v30 }
 0xcba   :  { %v2004_v26 = vmul.f32 %v8918_v21, %v8918_v21 }
 0xcbb   :  { %2535 = vmatpush.msra.mxu3 %v7110_v50  ;;  %v2217_v50 = vperm.slane %v9158_v15, 2 }
 0xcbc   :  { %v2014_v28 = vsel %vm144_vm0, %v2004_v26, 0.0  ;;  %v7115_v26 = vld [vmem:[%s11737_s3 + $0x18] sm:$0xff] }
 0xcbd   :  { %2015 = vadd.xlane.f32.xlu0 %v2014_v28  ;;  %2536 = vmatpush.msra.mxu3 %v7112_v42  ;;  %v9061_v28 = vperm.slane %v6153_v54, 0  ;;  %v2175_v42 = vperm.slane %v9158_v15, 1 }
 0xcbf   :  { %2537 = vmatpush.msra.mxu3 %v7115_v26  ;;  %v7126_v26 = vld [vmem:[%s11735_s2 + $0x68] sm:$0xff] }
 0xcc1   :  { %2538 = vmatpush.msra.mxu3 %v7117_v8  ;;  %v7128_v8 = vld [vmem:[%s11735_s2 + $0x60] sm:$0xff] }
 0xcc3   :  { %2539 = vmatpush.msra.mxu3 %v7119_v27 }
 0xd18   :  { %v2007_v16 = vpop.xlane.xlu0 %2006 }
 0xd19   :  { %v2017_v58 = vmul.f32 %v2007_v16, %v8134_v5 }
 0xd1b   :  { %v2021_v22 = vadd.f32 1e-05, %v2017_v58  ;;  %v7121_v58 = vld [vmem:[%s11737_s3] sm:$0xff] }
 0xd1c   :  { %2540 = vmatpush.msra.mxu3 %v7121_v58 }
 0xd1d   :  { %6868 = vrsqrt.f32 %v2021_v22  ;;  %vm2031_vm14 = vweird.f32 %v2021_v22 }
 0xd20   :  { %v2010_v19 = vpop.xlane.xlu1 %2009 }
 0xd21   :  { %v2018_v24 = vmul.f32 %v2010_v19, %v8134_v5 }
 0xd23   :  { %v6869_v38 = vpop.eup %6868  ;;  %v9008_v62 = vadd.f32 1e-05, %v2018_v24 }
 0xd24   :  { %v2026_v25 = vmul.f32 %v6869_v38, %v2021_v22  ;;  %vm2032_vm13 = vweird.f32 %v6869_v38  ;;  %v7122_v22 = vld [vmem:[%s11738_s4] sm:$0xff] }
 0xd25   :  { %6870 = vrsqrt.f32 %v9008_v62  ;;  %vm2033_vm2 = vmor %vm2031_vm14, %vm2032_vm13  ;;  %vm2041_vm4 = vweird.f32 %v9008_v62 }
 0xd26   :  { %v2027_v46 = vmul.f32 %v6869_v38, %v2026_v25 }
 0xd28   :  { %v2028_v35 = vmul.f32 0.5, %v2027_v46  ;;  %v2013_v20 = vpop.xlane.xlu2 %2012 }
 0xd29   :  { %v2019_v23 = vmul.f32 %v2013_v20, %v8134_v5 }
 0xd2a   :  { %v2029_v44 = vsub.f32 1.5, %v2028_v35 }
 0xd2b   :  { %v6871_v29 = vpop.eup %6870  ;;  %v9036_v39 = vadd.f32 1e-05, %v2019_v23 }
 0xd2c   :  { %v2030_v4 = vmul.f32 %v6869_v38, %v2029_v44  ;;  %v2036_v41 = vmul.f32 %v6871_v29, %v9008_v62  ;;  %vm2042_vm3 = vweird.f32 %v6871_v29 }
 0xd2d   :  { %6872 = vrsqrt.f32 %v9036_v39  ;;  %vm2043_vm5 = vmor %vm2041_vm4, %vm2042_vm3  ;;  %vm2051_vm7 = vweird.f32 %v9036_v39 }
 0xd2e   :  { %v2034_v2 = vsel %vm2033_vm2, %v6869_v38, %v2030_v4  ;;  %v2037_v51 = vmul.f32 %v6871_v29, %v2036_v41  ;;  %v7124_v4 = vld [vmem:[%s11735_s2 + $0x78] sm:$0xff] }
 0xd2f   :  { %v2065_v3 = vmul.f32 %v2034_v2, %v8900_v0  ;;  %v7118_v0 = vld [vmem:[%s11737_s3 + $0x90] sm:$0xff] }
 0xd30   :  { %v2038_v33 = vmul.f32 0.5, %v2037_v51  ;;  %v2016_v63 = vpop.xlane.xlu0 %2015  ;;  %2567 = vmatpush.msra.mxu0 %v7118_v0 }
 0xd31   :  { %v2070_v32 = vmul.f32 %v9051_v37, %v2065_v3  ;;  %v2020_v31 = vmul.f32 %v2016_v63, %v8134_v5 }
 0xd32   :  { %v2039_v53 = vsub.f32 1.5, %v2038_v33  ;;  %2568 = vmatpush.msra.mxu0 %v7120_v40  ;;  %v9190_v33 = vld [vmem:[%s11735_s2 + $0xf8] sm:$0xff]  ;;  %v7131_v40 = vld [vmem:[%s11735_s2 + $0x50] sm:$0xff] }
 0xd33   :  { %v6873_v49 = vpop.eup %6872  ;;  %v9079_v12 = vadd.f32 %v9061_v28, %v2070_v32  ;;  %v2024_v56 = vadd.f32 1e-05, %v2020_v31  ;;  %v7129_v31 = vld [vmem:[%s11735_s2 + $0x58] sm:$0xff] }
 0xd34   :  { %v2040_v16 = vmul.f32 %v6871_v29, %v2039_v53  ;;  %v2046_v60 = vmul.f32 %v6873_v49, %v9036_v39  ;;  %2569 = vmatpush.msra.mxu0 %v7123_v9  ;;  %vm2052_vm6 = vweird.f32 %v6873_v49  ;;  %v7134_v9 = vld [vmem:[%s11735_s2 + $0x40] sm:$0xff] }
 0xd35   :  { %6247 = vst.msk [vmem:[%s11741_s9 + $0x20] sm:$0xff] %vm144_vm0, %v9079_v12  ;;  %6874 = vrsqrt.f32 %v2024_v56  ;;  %6289 = vmatmul.msk.f32.vlgmr.msrb.gmra.mxu2 %vm144_vm0, %v9079_v12  ;;  %6297 = vmatmul.msk.f32.vlgmr.msrb.gmra.mxu3 %vm144_vm0, %v9079_v12  ;;  %vm2053_vm8 = vmor %vm2051_vm7, %vm2052_vm6  ;;  %vm2061_vm10 = vweird.f32 %v2024_v56 }
 0xd36   :  { %v2044_v59 = vsel %vm2043_vm5, %v6871_v29, %v2040_v16  ;;  %v2047_v61 = vmul.f32 %v6873_v49, %v2046_v60  ;;  %6305 = vmatmul.msk.f32.vlgmr.msrb.gmra.mxu0 %vm144_vm0, %v9079_v12  ;;  %2614 = vmatpush.msrb.mxu3 %v7122_v22  ;;  %v7132_v60 = vld [vmem:[%s11735_s2 + $0x48] sm:$0xff] }
 0xd37   :  { %v2066_v17 = vmul.f32 %v2044_v59, %v8906_v34  ;;  %v9230_v22 = vld [vmem:[%s11735_s2 + $0xe8] sm:$0xff] }
 0xd38   :  { %v2048_v45 = vmul.f32 0.5, %v2047_v61 }
 0xd39   :  { %v2071_v57 = vmul.f32 %v9051_v37, %v2066_v17 }
 0xd3a   :  { %v2049_v13 = vsub.f32 1.5, %v2048_v45 }
 0xd3b   :  { %v6875_v19 = vpop.eup %6874  ;;  %v9109_v18 = vadd.f32 %v9061_v28, %v2071_v57  ;;  %v7135_v57 = vld [vmem:[%s11735_s2 + $0x38] sm:$0xff] }
 0xd3c   :  { %v2050_v24 = vmul.f32 %v6873_v49, %v2049_v13  ;;  %v2056_v43 = vmul.f32 %v6875_v19, %v2024_v56  ;;  %vm2062_vm9 = vweird.f32 %v6875_v19 }
 0xd3d   :  { %6248 = vst.msk [vmem:[%s11741_s9 + $0x28] sm:$0xff] %vm144_vm0, %v9109_v18  ;;  %6290 = vmatmul.msk.f32.gmra.mxu2 %vm144_vm0, %v9109_v18  ;;  %6298 = vmatmul.msk.f32.gmra.mxu3 %vm144_vm0, %v9109_v18  ;;  %vm2063_vm11 = vmor %vm2061_vm10, %vm2062_vm9 }
 0xd3e   :  { %v2054_v34 = vsel %vm2053_vm8, %v6873_v49, %v2050_v24  ;;  %v2057_v11 = vmul.f32 %v6875_v19, %v2056_v43  ;;  %6306 = vmatmul.msk.f32.gmra.mxu0 %vm144_vm0, %v9109_v18  ;;  %v9210_v49 = vld [vmem:[%s11735_s2 + $0xf0] sm:$0xff]  ;;  %v9248_v24 = vld [vmem:[%s11735_s2 + $0xe0] sm:$0xff] }
 0xd3f   :  { %v2067_v38 = vmul.f32 %v2054_v34, %v8912_v47  ;;  %v7137_v34 = vld [vmem:[%s11735_s2 + $0x30] sm:$0xff] }
 0xd40   :  { %v2058_v62 = vmul.f32 0.5, %v2057_v11 }
 0xd41   :  { %v2072_v36 = vmul.f32 %v9051_v37, %v2067_v38  ;;  %v7138_v38 = vld [vmem:[%s11735_s2 + $0x28] sm:$0xff] }
 0xd42   :  { %v2059_v25 = vsub.f32 1.5, %v2058_v62 }
 0xd43   :  { %v9126_v1 = vadd.f32 %v9061_v28, %v2072_v36 }
 0xd44   :  { %v2060_v55 = vmul.f32 %v6875_v19, %v2059_v25  ;;  %v9266_v25 = vld [vmem:[%s11735_s2 + $0xd8] sm:$0xff] }
 0xd45   :  { %6249 = vst.msk [vmem:[%s11741_s9 + $0x30] sm:$0xff] %vm144_vm0, %v9126_v1  ;;  %6291 = vmatmul.msk.f32.gmra.mxu2 %vm144_vm0, %v9126_v1  ;;  %6299 = vmatmul.msk.f32.gmra.mxu3 %vm144_vm0, %v9126_v1 }
 0xd46   :  { %v2064_v47 = vsel %vm2063_vm11, %v6875_v19, %v2060_v55  ;;  %6307 = vmatmul.msk.f32.gmra.mxu0 %vm144_vm0, %v9126_v1 }
 0xd47   :  { %v2068_v46 = vmul.f32 %v2064_v47, %v8918_v21  ;;  %v7140_v47 = vld [vmem:[%s11735_s2 + $0x20] sm:$0xff] }
 0xd49   :  { %v2073_v6 = vmul.f32 %v9051_v37, %v2068_v46 }
 0xd4b   :  { %v9142_v7 = vadd.f32 %v9061_v28, %v2073_v6  ;;  %v7141_v6 = vld [vmem:[%s11735_s2 + $0x18] sm:$0xff] }
 0xd4d   :  { %6250 = vst.msk [vmem:[%s11741_s9 + $0x38] sm:$0xff] %vm144_vm0, %v9142_v7  ;;  %6292 = vmatmul.msk.f32.gmra.mxu2 %vm144_vm0, %v9142_v7  ;;  %6300 = vmatmul.msk.f32.gmra.mxu3 %vm144_vm0, %v9142_v7 }
 0xd4e   :  { %6308 = vmatmul.msk.f32.gmra.mxu0 %vm144_vm0, %v9142_v7 }
 0xdb3   :  { %v2247_v21 = vpop.f32.mrf.mxu0 }
 0xdb4   :  { %v9172_v52 = vadd.f32 %v2247_v21, %v2217_v50 }
 0xdb6   :  { %v2303_v32 = vmul.f32 %v7128_v8, %v9172_v52  ;;  %v2299_v45 = vmul.f32 %v7134_v9, %v9172_v52  ;;  %v2295_v46 = vmul.f32 %v7140_v47, %v9172_v52 }
 0xdb8   :  { %v2205_v35 = vpop.f32.mrf.mxu3 }
 0xdb9   :  { %v9224_v59 = vadd.f32 %v2205_v35, %v2175_v42 }
 0xdbb   :  { %v2250_v20 = vpop.f32.mrf.mxu0  ;;  %v2271_v19 = vmul.f32 %v7128_v8, %v9224_v59  ;;  %v2287_v43 = vmul.f32 %v9248_v24, %v9224_v59 }
 0xdbc   :  { %v9165_v54 = vadd.f32 %v2250_v20, %v2217_v50  ;;  %v9284_v20 = vld [vmem:[%s11735_s2 + $0xd0] sm:$0xff] }
 0xdbe   :  { %v2304_v28 = vmul.f32 %v7126_v26, %v9165_v54  ;;  %v2300_v58 = vmul.f32 %v7132_v60, %v9165_v54  ;;  %v2296_v62 = vmul.f32 %v7138_v38, %v9165_v54 }
 0xdc0   :  { %v2208_v30 = vpop.f32.mrf.mxu3 }
 0xdc1   :  { %v9204_v53 = vadd.f32 %v2208_v30, %v2175_v42 }
 0xdc3   :  { %v2253_v23 = vpop.f32.mrf.mxu0  ;;  %v2272_v61 = vmul.f32 %v7126_v26, %v9204_v53  ;;  %v2288_v17 = vmul.f32 %v9230_v22, %v9204_v53  ;;  %v9316_v26 = vld [vmem:[%s11735_s2 + $0xc0] sm:$0xff] }
 0xdc4   :  { %v9161_v39 = vadd.f32 %v2253_v23, %v2217_v50  ;;  %v7143_v23 = vld [vmem:[%s11735_s2 + $0x10] sm:$0xff] }
 0xdc6   :  { %v2305_v2 = vmul.f32 %v7125_v10, %v9161_v39  ;;  %v2301_v16 = vmul.f32 %v7131_v40, %v9161_v39  ;;  %v2297_v11 = vmul.f32 %v7137_v34, %v9161_v39 }
 0xdc8   :  { %v2211_v44 = vpop.f32.mrf.mxu3 }
 0xdc9   :  { %v9184_v3 = vadd.f32 %v2211_v44, %v2175_v42  ;;  %v2293_v44 = vmul.f32 %v7143_v23, %v9161_v39 }
 0xdcb   :  { %v2256_v29 = vpop.f32.mrf.mxu0  ;;  %v2273_v27 = vmul.f32 %v7125_v10, %v9184_v3  ;;  %v2289_v56 = vmul.f32 %v9210_v49, %v9184_v3  ;;  %v2269_v35 = vmul.f32 %v7131_v40, %v9184_v3  ;;  %v2285_v30 = vmul.f32 %v9284_v20, %v9184_v3 }
 0xdcc   :  { %v9163_v48 = vadd.f32 %v2256_v29, %v2217_v50  ;;  %v7144_v50 = vld [vmem:[%s11735_s2 + $0x8] sm:$0xff] }
 0xdcd   :  { %v2292_v29 = vmul.f32 %v7144_v50, %v9165_v54 }
 0xdce   :  { %v2306_v41 = vmul.f32 %v7124_v4, %v9163_v48  ;;  %v2302_v0 = vmul.f32 %v7129_v31, %v9163_v48  ;;  %v2298_v13 = vmul.f32 %v7135_v57, %v9163_v48  ;;  %v2294_v21 = vmul.f32 %v7141_v6, %v9163_v48 }
 0xdd0   :  { %2628 = vmatpush.msrb.mxu0 %v2306_v41  ;;  %v2214_v37 = vpop.f32.mrf.mxu3  ;;  %v9302_v41 = vld [vmem:[%s11735_s2 + $0xc8] sm:$0xff] }
 0xdd1   :  { %v9178_v51 = vadd.f32 %v2214_v37, %v2175_v42  ;;  %v2284_v42 = vmul.f32 %v9302_v41, %v9204_v53  ;;  %v7146_v37 = vld [vmem:[%s11735_s2] sm:$0xff] }
 0xdd2   :  { %2629 = vmatpush.msrb.mxu0 %v2305_v2  ;;  %v2291_v10 = vmul.f32 %v7146_v37, %v9172_v52  ;;  %v2267_v2 = vmul.f32 %v7134_v9, %v9224_v59 }
 0xdd3   :  { %v2274_v14 = vmul.f32 %v7124_v4, %v9178_v51  ;;  %v2290_v63 = vmul.f32 %v9190_v33, %v9178_v51  ;;  %v2270_v36 = vmul.f32 %v7129_v31, %v9178_v51  ;;  %v2286_v55 = vmul.f32 %v9266_v25, %v9178_v51  ;;  %v9336_v31 = vld [vmem:[%s11735_s2 + $0xb0] sm:$0xff] }
 0xdd4   :  { %2630 = vmatpush.msrb.mxu0 %v2304_v28  ;;  %v2268_v4 = vmul.f32 %v7132_v60, %v9204_v53  ;;  %v2283_v28 = vmul.f32 %v9316_v26, %v9224_v59  ;;  %v7151_v60 = vld [vmem:[%s11735_s2 + $0xa0] sm:$0xff] }
 0xdd5   :  { %6309 = vmatpush.xpose.msk.msra.mxu1 %vm144_vm0, %v2274_v14  ;;  %6329 = vmatpush.xpose.msk.msra.mxu2 %vm144_vm0, %v2290_v63  ;;  %v2266_v14 = vmul.f32 %v7135_v57, %v9178_v51  ;;  %v9326_v63 = vld [vmem:[%s11735_s2 + $0xb8] sm:$0xff]  ;;  %v7153_v57 = vld [vmem:[%s11735_s2 + $0x90] sm:$0xff] }
 0xdd6   :  { %2631 = vmatpush.msrb.mxu0 %v2303_v32  ;;  %v2282_v8 = vmul.f32 %v9326_v63, %v9178_v51  ;;  %v2265_v32 = vmul.f32 %v7137_v34, %v9184_v3 }
 0xdd8   :  { %2632 = vmatpush.msrb.mxu0 %v2302_v0  ;;  %v2281_v0 = vmul.f32 %v9336_v31, %v9184_v3 }
 0xdd9   :  { %6310 = vmatpush.xpose.msk.msra.mxu1 %vm144_vm0, %v2273_v27  ;;  %6330 = vmatpush.xpose.msk.msra.mxu2 %vm144_vm0, %v2289_v56  ;;  %v2264_v27 = vmul.f32 %v7138_v38, %v9204_v53  ;;  %v7150_v56 = vld [vmem:[%s11735_s2 + $0xa8] sm:$0xff]  ;;  %v7155_v38 = vld [vmem:[%s11735_s2 + $0x80] sm:$0xff] }
 0xdda   :  { %2633 = vmatpush.msrb.mxu0 %v2301_v16  ;;  %v2280_v40 = vmul.f32 %v7150_v56, %v9204_v53  ;;  %v2263_v16 = vmul.f32 %v7140_v47, %v9224_v59  ;;  %v2321_v47 = vmul.f32 %v9210_v49, %v9161_v39  ;;  %v2317_v49 = vmul.f32 %v9284_v20, %v9161_v39 }
 0xddb   :  { %v2313_v20 = vmul.f32 %v9336_v31, %v9161_v39 }
 0xddc   :  { %2634 = vmatpush.msrb.mxu0 %v2300_v58  ;;  %v2279_v58 = vmul.f32 %v7151_v60, %v9224_v59 }
 0xddd   :  { %6311 = vmatpush.xpose.msk.msra.mxu1 %vm144_vm0, %v2272_v61  ;;  %6331 = vmatpush.xpose.msk.msra.mxu2 %vm144_vm0, %v2288_v17  ;;  %v2262_v61 = vmul.f32 %v7141_v6, %v9178_v51  ;;  %v7152_v17 = vld [vmem:[%s11735_s2 + $0x98] sm:$0xff] }
 0xdde   :  { %2635 = vmatpush.msrb.mxu0 %v2299_v45  ;;  %v2278_v9 = vmul.f32 %v7152_v17, %v9178_v51  ;;  %v2261_v45 = vmul.f32 %v7143_v23, %v9184_v3  ;;  %v7154_v51 = vld [vmem:[%s11735_s2 + $0x88] sm:$0xff] }
 0xddf   :  { %v2276_v34 = vmul.f32 %v7154_v51, %v9204_v53 }
 0xde0   :  { %2636 = vmatpush.msrb.mxu0 %v2298_v13  ;;  %v2277_v13 = vmul.f32 %v7153_v57, %v9184_v3  ;;  %v2259_v3 = vmul.f32 %v7146_v37, %v9224_v59 }
 0xde1   :  { %6312 = vmatpush.xpose.msk.msra.mxu1 %vm144_vm0, %v2271_v19  ;;  %6332 = vmatpush.xpose.msk.msra.mxu2 %vm144_vm0, %v2287_v43  ;;  %v2163_v19 = vpop.f32.mrf.mxu2  ;;  %v2260_v43 = vmul.f32 %v7144_v50, %v9204_v53  ;;  %v2310_v50 = vmul.f32 %v7152_v17, %v9163_v48 }
 0xde2   :  { %2637 = vmatpush.msrb.mxu0 %v2297_v11  ;;  %v2121_v11 = vperm.slane %v9158_v15, 0 }
 0xde4   :  { %2638 = vmatpush.msrb.mxu0 %v2296_v62  ;;  %v2275_v62 = vmul.f32 %v7155_v38, %v9224_v59  ;;  %v2164_v53 = vadd.f32 %v2163_v19, %v2121_v11  ;;  %v2320_v59 = vmul.f32 %v9230_v22, %v9165_v54  ;;  %v2316_v22 = vmul.f32 %v9302_v41, %v9165_v54 }
 0xde5   :  { %6313 = vmatpush.xpose.msk.msra.mxu1 %vm144_vm0, %v2270_v36  ;;  %6333 = vmatpush.xpose.msk.msra.mxu2 %vm144_vm0, %v2286_v55  ;;  %v2322_v36 = vmul.f32 %v9190_v33, %v9163_v48  ;;  %v2319_v33 = vmul.f32 %v9248_v24, %v9172_v52  ;;  %v2315_v24 = vmul.f32 %v9316_v26, %v9172_v52 }
 0xde6   :  { %2639 = vmatpush.msrb.mxu0 %v2295_v46  ;;  %v2318_v46 = vmul.f32 %v9266_v25, %v9163_v48  ;;  %v2314_v25 = vmul.f32 %v9326_v63, %v9163_v48  ;;  %v2308_v41 = vmul.f32 %v7154_v51, %v9165_v54  ;;  %v7156_v48 = vld [vmem:[%s11736_s1] sm:$0xff] }
 0xde8   :  { %2640 = vmatpush.msrb.mxu0 %v2294_v21 }
 0xde9   :  { %6314 = vmatpush.xpose.msk.msra.mxu1 %vm144_vm0, %v2269_v35  ;;  %6334 = vmatpush.xpose.msk.msra.mxu2 %vm144_vm0, %v2285_v30  ;;  %v2166_v55 = vpop.f32.mrf.mxu2  ;;  %v2312_v30 = vmul.f32 %v7150_v56, %v9165_v54  ;;  %v7160_v56 = vld [vmem:[%s11736_s1 + $0x20] sm:$0xff] }
 0xdea   :  { %2641 = vmatpush.msrb.mxu0 %v2293_v44  ;;  %v2167_v6 = vadd.f32 %v2166_v55, %v2121_v11  ;;  %v2311_v44 = vmul.f32 %v7151_v60, %v9172_v52 }
 0xdec   :  { %2642 = vmatpush.msrb.mxu0 %v2292_v29 }
 0xded   :  { %6315 = vmatpush.xpose.msk.msra.mxu1 %vm144_vm0, %v2268_v4  ;;  %6335 = vmatpush.xpose.msk.msra.mxu2 %vm144_vm0, %v2284_v42  ;;  %v2309_v4 = vmul.f32 %v7153_v57, %v9161_v39  ;;  %v2307_v42 = vmul.f32 %v7155_v38, %v9172_v52  ;;  %v7157_v39 = vld [vmem:[%s11736_s1 + $0x8] sm:$0xff]  ;;  %v7158_v52 = vld [vmem:[%s11736_s1 + $0x10] sm:$0xff]  ;;  %v7163_v57 = vld [vmem:[%s11736_s1 + $0x38] sm:$0xff] }
 0xdee   :  { %2643 = vmatpush.msrb.mxu0 %v2291_v10 }
 0xdf1   :  { %6316 = vmatpush.xpose.msk.msra.mxu1 %vm144_vm0, %v2267_v2  ;;  %6336 = vmatpush.xpose.msk.msra.mxu2 %vm144_vm0, %v2283_v28  ;;  %v2169_v21 = vpop.f32.mrf.mxu2 }
 0xdf2   :  { %v2170_v35 = vadd.f32 %v2169_v21, %v2121_v11 }
 0xdf5   :  { %6317 = vmatpush.xpose.msk.msra.mxu1 %vm144_vm0, %v2266_v14  ;;  %6337 = vmatpush.xpose.msk.msra.mxu2 %vm144_vm0, %v2282_v8  ;;  %v7159_v8 = vld [vmem:[%s11736_s1 + $0x18] sm:$0xff] }
 0xdf9   :  { %6318 = vmatpush.xpose.msk.msra.mxu1 %vm144_vm0, %v2265_v32  ;;  %6338 = vmatpush.xpose.msk.msra.mxu2 %vm144_vm0, %v2281_v0  ;;  %v2172_v23 = vpop.f32.mrf.mxu2 }
 0xdfa   :  { %v2173_v29 = vadd.f32 %v2172_v23, %v2121_v11 }
 0xdfd   :  { %6319 = vmatpush.xpose.msk.msra.mxu1 %vm144_vm0, %v2264_v27  ;;  %6339 = vmatpush.xpose.msk.msra.mxu2 %vm144_vm0, %v2280_v40 }
 0xe01   :  { %6320 = vmatpush.xpose.msk.msra.mxu1 %vm144_vm0, %v2263_v16  ;;  %6340 = vmatpush.xpose.msk.msra.mxu2 %vm144_vm0, %v2279_v58  ;;  %v7161_v16 = vld [vmem:[%s11736_s1 + $0x28] sm:$0xff] }
 0xe05   :  { %6321 = vmatpush.xpose.msk.msra.mxu1 %vm144_vm0, %v2262_v61  ;;  %6341 = vmatpush.xpose.msk.msra.mxu2 %vm144_vm0, %v2278_v9  ;;  %v7162_v9 = vld [vmem:[%s11736_s1 + $0x30] sm:$0xff] }
 0xe09   :  { %6322 = vmatpush.xpose.msk.msra.mxu1 %vm144_vm0, %v2261_v45  ;;  %6342 = vmatpush.xpose.msk.msra.mxu2 %vm144_vm0, %v2277_v13 }
 0xe0d   :  { %6323 = vmatpush.xpose.msk.msra.mxu1 %vm144_vm0, %v2260_v43  ;;  %6343 = vmatpush.xpose.msk.msra.mxu2 %vm144_vm0, %v2276_v34 }
 0xe11   :  { %6324 = vmatpush.xpose.msk.msra.mxu1 %vm144_vm0, %v2259_v3  ;;  %6344 = vmatpush.xpose.msk.msra.mxu2 %vm144_vm0, %v2275_v62 }
 0xe14   :  { %6325 = vmatmul.msk.f32.vlgmr.msra.gmra.mxu1 %vm144_vm0, %v2164_v53  ;;  %6345 = vmatmul.msk.f32.vlgmr.msra.gmra.mxu2 %vm144_vm0, %v2164_v53 }
 0xe15   :  { %2657 = vmatpush.msrb.mxu1 %v2322_v36 }
 0xe17   :  { %2658 = vmatpush.msrb.mxu1 %v2321_v47 }
 0xe19   :  { %2659 = vmatpush.msrb.mxu1 %v2320_v59 }
 0xe1b   :  { %2660 = vmatpush.msrb.mxu1 %v2319_v33 }
 0xe1c   :  { %6326 = vmatmul.msk.f32.gmra.mxu1 %vm144_vm0, %v2167_v6  ;;  %6346 = vmatmul.msk.f32.gmra.mxu2 %vm144_vm0, %v2167_v6 }
 0xe1d   :  { %2661 = vmatpush.msrb.mxu1 %v2318_v46 }
 0xe1f   :  { %2662 = vmatpush.msrb.mxu1 %v2317_v49 }
 0xe21   :  { %2663 = vmatpush.msrb.mxu1 %v2316_v22 }
 0xe23   :  { %2664 = vmatpush.msrb.mxu1 %v2315_v24 }
 0xe24   :  { %6327 = vmatmul.msk.f32.gmra.mxu1 %vm144_vm0, %v2170_v35  ;;  %6347 = vmatmul.msk.f32.gmra.mxu2 %vm144_vm0, %v2170_v35 }
 0xe25   :  { %2665 = vmatpush.msrb.mxu1 %v2314_v25 }
 0xe27   :  { %2666 = vmatpush.msrb.mxu1 %v2313_v20 }
 0xe29   :  { %2667 = vmatpush.msrb.mxu1 %v2312_v30 }
 0xe2b   :  { %2668 = vmatpush.msrb.mxu1 %v2311_v44 }
 0xe2c   :  { %6328 = vmatmul.msk.f32.gmra.mxu1 %vm144_vm0, %v2173_v29  ;;  %6348 = vmatmul.msk.f32.gmra.mxu2 %vm144_vm0, %v2173_v29 }
 0xe2d   :  { %2669 = vmatpush.msrb.mxu1 %v2310_v50 }
 0xe2f   :  { %2670 = vmatpush.msrb.mxu1 %v2309_v4 }
 0xe31   :  { %2671 = vmatpush.msrb.mxu1 %v2308_v41 }
 0xe33   :  { %2672 = vmatpush.msrb.mxu1 %v2307_v42 }
 0xe91   :  { %v2448_v37 = vpop.f32.mrf.mxu1 }
 0xe92   :  { %v2449_v2 = vadd.f32 %v7156_v48, %v2448_v37 }
 0xe97   :  { %v2477_v10 = vpop.f32.mrf.mxu2 }
 0xe98   :  { %v2478_v26 = vadd.f32 %v7157_v39, %v2477_v10 }
 0xe99   :  { %v2451_v28 = vpop.f32.mrf.mxu1 }
 0xe9a   :  { %v2489_v14 = vmax.f32 %v2449_v2, %v2478_v26  ;;  %v2452_v63 = vadd.f32 %v7158_v52, %v2451_v28  ;;  %v6266_v52 = vld [vmem:[%s11732_s5 + $0x178] sm:$0xff] }
 0xe9b   :  { %6353 = vmatpush.xpose.msk.msrb.mxu2 %vm144_vm0, %v6266_v52 }
 0xe9c   :  { %2490 = vmax.xlane.f32.xlu1 %v2489_v14 }
 0xe9f   :  { %v2480_v54 = vpop.f32.mrf.mxu2 }
 0xea0   :  { %v2481_v32 = vadd.f32 %v7159_v8, %v2480_v54 }
 0xea1   :  { %v2454_v0 = vpop.f32.mrf.mxu1 }
 0xea2   :  { %v2492_v31 = vmax.f32 %v2452_v63, %v2481_v32  ;;  %v2455_v40 = vadd.f32 %v7160_v56, %v2454_v0  ;;  %v6263_v56 = vld [vmem:[%s11732_s5 + $0x160] sm:$0xff] }
 0xea4   :  { %2493 = vmax.xlane.f32.xlu2 %v2492_v31 }
 0xea7   :  { %v2483_v27 = vpop.f32.mrf.mxu2 }
 0xea8   :  { %v2484_v60 = vadd.f32 %v7161_v16, %v2483_v27  ;;  %v6264_v27 = vld [vmem:[%s11732_s5 + $0x168] sm:$0xff] }
 0xea9   :  { %v2457_v61 = vpop.f32.mrf.mxu1 }
 0xeaa   :  { %v2495_v58 = vmax.f32 %v2455_v40, %v2484_v60  ;;  %v2458_v45 = vadd.f32 %v7162_v9, %v2457_v61 }
 0xeac   :  { %2496 = vmax.xlane.f32.xlu0 %v2495_v58 }
 0xeaf   :  { %v2486_v17 = vpop.f32.mrf.mxu2 }
 0xeb0   :  { %v2487_v13 = vadd.f32 %v7163_v57, %v2486_v17 }
 0xeb2   :  { %v2498_v19 = vmax.f32 %v2458_v45, %v2487_v13 }
 0xeb4   :  { %2499 = vmax.xlane.f32.xlu1 %v2498_v19 }
 0xf0f   :  { %v2491_v43 = vpop.xlane.xlu1 %2490 }
 0xf10   :  { %v2501_v51 = vsub.f32 %v2449_v2, %v2491_v43  ;;  %v2502_v34 = vsub.f32 %v2478_v26, %v2491_v43 }
 0xf12   :  { %v2509_v11 = vmul.f32 1.442695, %v2501_v51  ;;  %v2511_v3 = vmul.f32 1.442695, %v2502_v34 }
 0xf14   :  { %6876 = vpow2.f32 %v2509_v11 }
 0xf15   :  { %6878 = vpow2.f32 %v2511_v3 }
 0xf17   :  { %v2494_v38 = vpop.xlane.xlu2 %2493 }
 0xf18   :  { %v2503_v62 = vsub.f32 %v2452_v63, %v2494_v38  ;;  %v2504_v36 = vsub.f32 %v2481_v32, %v2494_v38  ;;  %v6265_v63 = vld [vmem:[%s11732_s5 + $0x170] sm:$0xff] }
 0xf19   :  { %6354 = vmatpush.xpose.msk.msrb.mxu2 %vm144_vm0, %v6265_v63 }
 0xf1a   :  { %v6877_v53 = vpop.eup %6876  ;;  %v2513_v55 = vmul.f32 1.442695, %v2503_v62  ;;  %v2515_v47 = vmul.f32 1.442695, %v2504_v36 }
 0xf1b   :  { %v6879_v59 = vpop.eup %6878  ;;  %2541 = vmatmul.f32.vlgmr.msra.gmra.mxu3 %v6877_v53 }
 0xf1c   :  { %6880 = vpow2.f32 %v2513_v55  ;;  %2570 = vmatmul.f32.vlgmr.msra.gmra.mxu0 %v6879_v59  ;;  %2673 = vmatmul.f32.vlgmr.msrb.gmra.mxu1 %v6879_v59 }
 0xf1d   :  { %6882 = vpow2.f32 %v2515_v47  ;;  %6355 = vmatpush.xpose.msk.msrb.mxu2 %vm144_vm0, %v6264_v27  ;;  %v2690_v47 = vperm.slane %v9158_v15, 3  ;;  %v6272_v27 = vld [vmem:[%s11739_s6 + $0x128] sm:$0xff] }
 0xf1f   :  { %v2497_v33 = vpop.xlane.xlu0 %2496 }
 0xf20   :  { %v2505_v46 = vsub.f32 %v2455_v40, %v2497_v33  ;;  %v2506_v6 = vsub.f32 %v2484_v60, %v2497_v33 }
 0xf21   :  { %6356 = vmatpush.xpose.msk.msrb.mxu2 %vm144_vm0, %v6263_v56  ;;  %v6271_v56 = vld [vmem:[%s11739_s6 + $0x120] sm:$0xff] }
 0xf22   :  { %v6881_v49 = vpop.eup %6880  ;;  %v2517_v21 = vmul.f32 1.442695, %v2505_v46  ;;  %v2519_v22 = vmul.f32 1.442695, %v2506_v6 }
 0xf23   :  { %v6883_v24 = vpop.eup %6882  ;;  %2544 = vmatmul.f32.gmra.mxu3 %v6881_v49 }
 0xf24   :  { %6884 = vpow2.f32 %v2517_v21  ;;  %2573 = vmatmul.f32.gmra.mxu0 %v6883_v24  ;;  %2676 = vmatmul.f32.gmra.mxu1 %v6883_v24 }
 0xf25   :  { %6886 = vpow2.f32 %v2519_v22 }
 0xf27   :  { %v2500_v25 = vpop.xlane.xlu1 %2499 }
 0xf28   :  { %v2507_v35 = vsub.f32 %v2458_v45, %v2500_v25  ;;  %v2508_v20 = vsub.f32 %v2487_v13, %v2500_v25 }
 0xf2a   :  { %v6885_v30 = vpop.eup %6884  ;;  %v2521_v23 = vmul.f32 1.442695, %v2507_v35  ;;  %v2523_v44 = vmul.f32 1.442695, %v2508_v20 }
 0xf2b   :  { %v6887_v50 = vpop.eup %6886  ;;  %2547 = vmatmul.f32.gmra.mxu3 %v6885_v30 }
 0xf2c   :  { %6888 = vpow2.f32 %v2521_v23  ;;  %2576 = vmatmul.f32.gmra.mxu0 %v6887_v50  ;;  %2679 = vmatmul.f32.gmra.mxu1 %v6887_v50 }
 0xf2d   :  { %6890 = vpow2.f32 %v2523_v44 }
 0xf32   :  { %v6889_v29 = vpop.eup %6888 }
 0xf33   :  { %v6891_v4 = vpop.eup %6890  ;;  %2550 = vmatmul.f32.gmra.mxu3 %v6889_v29 }
 0xf34   :  { %2579 = vmatmul.f32.gmra.mxu0 %v6891_v4  ;;  %2682 = vmatmul.f32.gmra.mxu1 %v6891_v4 }
 0xf3c   :  { %2644 = vmatmul.f32.vlgmr.msrb.gmra.mxu0 %v6877_v53 }
 0xf44   :  { %2647 = vmatmul.f32.gmra.mxu0 %v6881_v49 }
 0xf4c   :  { %2650 = vmatmul.f32.gmra.mxu0 %v6885_v30 }
 0xf54   :  { %2653 = vmatmul.f32.gmra.mxu0 %v6889_v29 }
 0xf99   :  { %v2571_v41 = vpop.f32.mrf.mxu0  ;;  %v2674_v60 = vpop.f32.mrf.mxu1 }
 0xf9e   :  { %v2542_v42 = vpop.f32.mrf.mxu3 }
 0xf9f   :  { %v2572_v37 = vadd.f32 %v2571_v41, %v2542_v42 }
 0xfa1   :  { %6892 = vrcp.f32 %v2572_v37  ;;  %v2574_v10 = vpop.f32.mrf.mxu0  ;;  %v2677_v45 = vpop.f32.mrf.mxu1 }
 0xfa6   :  { %v2545_v48 = vpop.f32.mrf.mxu3 }
 0xfa7   :  { %v6893_v2 = vpop.eup %6892  ;;  %v2575_v39 = vadd.f32 %v2574_v10, %v2545_v48 }
 0xfa8   :  { %6349 = vmatmul.msk.f32.vlgmr.msrb.gmra.mxu3 %vm610_vm1, %v6893_v2 }
 0xfa9   :  { %6894 = vrcp.f32 %v2575_v39  ;;  %v2577_v26 = vpop.f32.mrf.mxu0  ;;  %v2680_v51 = vpop.f32.mrf.mxu1 }
 0xfae   :  { %v2548_v28 = vpop.f32.mrf.mxu3 }
 0xfaf   :  { %v6895_v14 = vpop.eup %6894  ;;  %v2578_v54 = vadd.f32 %v2577_v26, %v2548_v28 }
 0xfb0   :  { %6350 = vmatmul.msk.f32.gmra.mxu3 %vm610_vm1, %v6895_v14 }
 0xfb1   :  { %6896 = vrcp.f32 %v2578_v54  ;;  %v2580_v8 = vpop.f32.mrf.mxu0  ;;  %v2683_v62 = vpop.f32.mrf.mxu1 }
 0xfb6   :  { %v2551_v32 = vpop.f32.mrf.mxu3 }
 0xfb7   :  { %v6897_v31 = vpop.eup %6896  ;;  %v2581_v0 = vadd.f32 %v2580_v8, %v2551_v32 }
 0xfb8   :  { %6351 = vmatmul.msk.f32.gmra.mxu3 %vm610_vm1, %v6897_v31 }
 0xfb9   :  { %6898 = vrcp.f32 %v2581_v0  ;;  %v2645_v16 = vpop.f32.mrf.mxu0  ;;  %v6273_v0 = vld [vmem:[%s11739_s6 + $0x130] sm:$0xff] }
 0xfba   :  { %v2675_v58 = vadd.f32 %v2674_v60, %v2645_v16  ;;  %v6269_v16 = vld [vmem:[%s11739_s6 + $0x110] sm:$0xff]  ;;  %v6268_v60 = vld [vmem:[%s11739_s6 + $0x108] sm:$0xff] }
 0xfbf   :  { %v6899_v40 = vpop.eup %6898 }
 0xfc0   :  { %6352 = vmatmul.msk.f32.gmra.mxu3 %vm610_vm1, %v6899_v40  ;;  %v6270_v40 = vld [vmem:[%s11739_s6 + $0x118] sm:$0xff] }
 0xfc1   :  { %v2648_v61 = vpop.f32.mrf.mxu0 }
 0xfc2   :  { %v2678_v57 = vadd.f32 %v2677_v45, %v2648_v61 }
 0xfc9   :  { %v2651_v43 = vpop.f32.mrf.mxu0 }
 0xfca   :  { %v2681_v34 = vadd.f32 %v2680_v51, %v2651_v43 }
 0xfd1   :  { %v2654_v38 = vpop.f32.mrf.mxu0 }
 0xfd2   :  { %v2684_v36 = vadd.f32 %v2683_v62, %v2654_v38 }
0x102b   :  { %v2616_v17 = vpop.f32.mrf.mxu3 }
0x102c   :  { %v2686_v9 = vmul.f32 %v2675_v58, %v2616_v17  ;;  %v6267_v58 = vld [vmem:[%s11739_s6 + $0x100] sm:$0xff] }
0x102e   :  { %6357 = vmatmul.msk.f32.vlgmr.msrb.gmra.mxu2 %vm144_vm0, %v2686_v9 }
0x1033   :  { %v2619_v13 = vpop.f32.mrf.mxu3 }
0x1034   :  { %v2687_v19 = vmul.f32 %v2678_v57, %v2619_v13 }
0x1036   :  { %6358 = vmatmul.msk.f32.gmra.mxu2 %vm144_vm0, %v2687_v19 }
0x103b   :  { %v2622_v11 = vpop.f32.mrf.mxu3 }
0x103c   :  { %v2688_v3 = vmul.f32 %v2681_v34, %v2622_v11 }
0x103e   :  { %6359 = vmatmul.msk.f32.gmra.mxu2 %vm144_vm0, %v2688_v3 }
0x1043   :  { %v2625_v53 = vpop.f32.mrf.mxu3 }
0x1044   :  { %v2689_v55 = vmul.f32 %v2684_v36, %v2625_v53 }
0x1046   :  { %6360 = vmatmul.msk.f32.gmra.mxu2 %vm144_vm0, %v2689_v55 }
0x10b1   :  { %v2732_v59 = vpop.f32.mrf.mxu2 }
0x10b2   :  { %v2733_v33 = vadd.f32 %v2732_v59, %v2690_v47  ;;  %v6282_v59 = vld [vmem:[%s11739_s6 + $0x178] sm:$0xff] }
0x10b3   :  { %2941 = vmatpush.msra.mxu0 %v6282_v59 }
0x10b4   :  { %v2744_v46 = vadd.f32 %v2733_v33, %v9079_v12  ;;  %v6281_v33 = vld [vmem:[%s11739_s6 + $0x170] sm:$0xff] }
0x10b5   :  { %2942 = vmatpush.msra.mxu0 %v6281_v33 }
0x10b6   :  { %v2748_v6 = vsel %vm144_vm0, %v2744_v46, 0.0 }
0x10b7   :  { %2749 = vadd.xlane.f32.xlu2 %v2748_v6 }
0x10b9   :  { %v2735_v49 = vpop.f32.mrf.mxu2 }
0x10ba   :  { %v2736_v21 = vadd.f32 %v2735_v49, %v2690_v47  ;;  %v2841_v49 = vperm.slane %v9158_v15, 6 }
0x10bc   :  { %v2745_v22 = vadd.f32 %v2736_v21, %v9109_v18  ;;  %v6274_v18 = vld [vmem:[%s11739_s6 + $0x138] sm:$0xff] }
0x10bd   :  { %6362 = vmatpush.xpose.msk.msra.mxu3 %vm144_vm0, %v6274_v18 }
0x10be   :  { %v2751_v24 = vsel %vm144_vm0, %v2745_v22, 0.0 }
0x10bf   :  { %2752 = vadd.xlane.f32.xlu0 %v2751_v24 }
0x10c1   :  { %v2738_v25 = vpop.f32.mrf.mxu2  ;;  %6363 = vmatpush.xpose.msk.msra.mxu3 %vm144_vm0, %v6273_v0 }
0x10c2   :  { %v2739_v35 = vadd.f32 %v2738_v25, %v2690_v47 }
0x10c4   :  { %v2746_v20 = vadd.f32 %v2739_v35, %v9126_v1 }
0x10c5   :  { %6364 = vmatpush.xpose.msk.msra.mxu3 %vm144_vm0, %v6272_v27 }
0x10c6   :  { %v2754_v30 = vsel %vm144_vm0, %v2746_v20, 0.0 }
0x10c7   :  { %2755 = vadd.xlane.f32.xlu1 %v2754_v30  ;;  %v6279_v30 = vld [vmem:[%s11739_s6 + $0x160] sm:$0xff] }
0x10c9   :  { %v2741_v23 = vpop.f32.mrf.mxu2  ;;  %6365 = vmatpush.xpose.msk.msra.mxu3 %vm144_vm0, %v6271_v56 }
0x10ca   :  { %v2742_v44 = vadd.f32 %v2741_v23, %v2690_v47  ;;  %v9536_v47 = vperm.slane %v9158_v15, 5 }
0x10cc   :  { %v2747_v12 = vadd.f32 %v2742_v44, %v9142_v7 }
0x10cd   :  { %6366 = vmatpush.xpose.msk.msra.mxu3 %vm144_vm0, %v6270_v40 }
0x10ce   :  { %v2757_v50 = vsel %vm144_vm0, %v2747_v12, 0.0 }
0x10cf   :  { %2758 = vadd.xlane.f32.xlu2 %v2757_v50 }
0x10d1   :  { %6367 = vmatpush.xpose.msk.msra.mxu3 %vm144_vm0, %v6269_v16 }
0x10d5   :  { %6368 = vmatpush.xpose.msk.msra.mxu3 %vm144_vm0, %v6268_v60 }
0x10d9   :  { %6369 = vmatpush.xpose.msk.msra.mxu3 %vm144_vm0, %v6267_v58 }
0x112a   :  { %v2750_v29 = vpop.xlane.xlu2 %2749 }
0x112b   :  { %v2760_v4 = vmul.f32 %v2750_v29, %v8134_v5  ;;  %v6278_v29 = vld [vmem:[%s11739_s6 + $0x158] sm:$0xff] }
0x112d   :  { %v9481_v1 = vsub.f32 %v2744_v46, %v2760_v4 }
0x112f   :  { %v2768_v41 = vmul.f32 %v9481_v1, %v9481_v1 }
0x1131   :  { %v2772_v42 = vsel %vm144_vm0, %v2768_v41, 0.0 }
0x1132   :  { %2773 = vadd.xlane.f32.xlu0 %v2772_v42  ;;  %v2753_v7 = vpop.xlane.xlu0 %2752 }
0x1133   :  { %v2761_v37 = vmul.f32 %v2753_v7, %v8134_v5 }
0x1135   :  { %v9487_v10 = vsub.f32 %v2745_v22, %v2761_v37  ;;  %v6280_v22 = vld [vmem:[%s11739_s6 + $0x168] sm:$0xff] }
0x1136   :  { %2943 = vmatpush.msra.mxu0 %v6280_v22  ;;  %v6276_v37 = vld [vmem:[%s11739_s6 + $0x148] sm:$0xff] }
0x1137   :  { %v2769_v48 = vmul.f32 %v9487_v10, %v9487_v10 }
0x1138   :  { %2944 = vmatpush.msra.mxu0 %v6279_v30 }
0x1139   :  { %v2775_v2 = vsel %vm144_vm0, %v2769_v48, 0.0 }
0x113a   :  { %2776 = vadd.xlane.f32.xlu1 %v2775_v2  ;;  %v2756_v39 = vpop.xlane.xlu1 %2755  ;;  %2945 = vmatpush.msra.mxu0 %v6278_v29 }
0x113b   :  { %v2762_v26 = vmul.f32 %v2756_v39, %v8134_v5 }
0x113d   :  { %v9493_v28 = vsub.f32 %v2746_v20, %v2762_v26 }
0x113f   :  { %v2770_v14 = vmul.f32 %v9493_v28, %v9493_v28 }
0x1141   :  { %v2778_v54 = vsel %vm144_vm0, %v2770_v14, 0.0 }
0x1142   :  { %2779 = vadd.xlane.f32.xlu2 %v2778_v54  ;;  %v2759_v52 = vpop.xlane.xlu2 %2758 }
0x1143   :  { %v2763_v63 = vmul.f32 %v2759_v52, %v8134_v5 }
0x1145   :  { %v9499_v8 = vsub.f32 %v2747_v12, %v2763_v63 }
0x1147   :  { %v2771_v32 = vmul.f32 %v9499_v8, %v9499_v8 }
0x1149   :  { %v2781_v31 = vsel %vm144_vm0, %v2771_v32, 0.0 }
0x114a   :  { %2782 = vadd.xlane.f32.xlu0 %v2781_v31 }
0x11a5   :  { %v2774_v61 = vpop.xlane.xlu0 %2773 }
0x11a6   :  { %v2784_v17 = vmul.f32 %v2774_v61, %v8134_v5 }
0x11a8   :  { %v2788_v9 = vadd.f32 1e-05, %v2784_v17  ;;  %v6790_v17 = vld [vmem:[%s11740_s8 + $0x2] ss:$0 sm:$0xff] }
0x11aa   :  { %6900 = vrsqrt.f32 %v2788_v9  ;;  %vm2798_vm13 = vweird.f32 %v2788_v9 }
0x11ad   :  { %v2777_v45 = vpop.xlane.xlu1 %2776 }
0x11ae   :  { %v2785_v57 = vmul.f32 %v2777_v45, %v8134_v5 }
0x11b0   :  { %v6901_v13 = vpop.eup %6900  ;;  %v2789_v19 = vadd.f32 1e-05, %v2785_v57 }
0x11b1   :  { %v2793_v43 = vmul.f32 %v6901_v13, %v2788_v9  ;;  %vm2799_vm12 = vweird.f32 %v6901_v13 }
0x11b2   :  { %6902 = vrsqrt.f32 %v2789_v19  ;;  %vm2800_vm14 = vmor %vm2798_vm13, %vm2799_vm12  ;;  %vm2808_vm3 = vweird.f32 %v2789_v19 }
0x11b3   :  { %v2794_v51 = vmul.f32 %v6901_v13, %v2793_v43 }
0x11b5   :  { %v2795_v34 = vmul.f32 0.5, %v2794_v51  ;;  %v2780_v11 = vpop.xlane.xlu2 %2779 }
0x11b6   :  { %v2786_v3 = vmul.f32 %v2780_v11, %v8134_v5 }
0x11b7   :  { %v2796_v38 = vsub.f32 1.5, %v2795_v34 }
0x11b8   :  { %v6903_v62 = vpop.eup %6902  ;;  %v2790_v36 = vadd.f32 1e-05, %v2786_v3 }
0x11b9   :  { %v2797_v53 = vmul.f32 %v6901_v13, %v2796_v38  ;;  %v2803_v55 = vmul.f32 %v6903_v62, %v2789_v19  ;;  %vm2809_vm2 = vweird.f32 %v6903_v62 }
0x11ba   :  { %6904 = vrsqrt.f32 %v2790_v36  ;;  %vm2810_vm4 = vmor %vm2808_vm3, %vm2809_vm2  ;;  %vm2818_vm6 = vweird.f32 %v2790_v36 }
0x11bb   :  { %v2801_v46 = vsel %vm2800_vm14, %v6901_v13, %v2797_v53  ;;  %v2804_v6 = vmul.f32 %v6903_v62, %v2803_v55 }
0x11bc   :  { %v2832_v21 = vmul.f32 %v2801_v46, %v9481_v1  ;;  %v6277_v1 = vld [vmem:[%s11739_s6 + $0x150] sm:$0xff] }
0x11bd   :  { %v2805_v24 = vmul.f32 0.5, %v2804_v6  ;;  %v2783_v25 = vpop.xlane.xlu0 %2782  ;;  %2946 = vmatpush.msra.mxu0 %v6277_v1 }
0x11be   :  { %v2837_v35 = vmul.f32 %v9536_v47, %v2832_v21  ;;  %v2787_v20 = vmul.f32 %v2783_v25, %v8134_v5 }
0x11bf   :  { %v2806_v23 = vsub.f32 1.5, %v2805_v24  ;;  %2947 = vmatpush.msra.mxu0 %v6276_v37 }
0x11c0   :  { %v6905_v44 = vpop.eup %6904  ;;  %v9554_v12 = vadd.f32 %v2841_v49, %v2837_v35  ;;  %v2791_v50 = vadd.f32 1e-05, %v2787_v20 }
0x11c1   :  { %v2807_v18 = vmul.f32 %v6903_v62, %v2806_v23  ;;  %v2813_v4 = vmul.f32 %v6905_v44, %v2790_v36  ;;  %vm2819_vm5 = vweird.f32 %v6905_v44  ;;  %v6389_v23 = vld [vmem:[%s11732_s5 + $0x1b8] sm:$0xff] }
0x11c2   :  { %6906 = vrsqrt.f32 %v2791_v50  ;;  %6370 = vmatmul.msk.f32.vlgmr.msra.gmra.mxu3 %vm144_vm0, %v9554_v12  ;;  %vm2820_vm7 = vmor %vm2818_vm6, %vm2819_vm5  ;;  %vm2828_vm9 = vweird.f32 %v2791_v50  ;;  %6424 = vmatpush.xpose.msk.msra.mxu2 %vm144_vm0, %v6389_v23 }
0x11c3   :  { %v2811_v41 = vsel %vm2810_vm4, %v6903_v62, %v2807_v18  ;;  %v2814_v42 = vmul.f32 %v6905_v44, %v2813_v4  ;;  %v2920_v62 = vperm.slane %v9158_v15, 4 }
0x11c4   :  { %v2833_v7 = vmul.f32 %v2811_v41, %v9487_v10 }
0x11c5   :  { %v2815_v48 = vmul.f32 0.5, %v2814_v42 }
0x11c6   :  { %v2838_v2 = vmul.f32 %v9536_v47, %v2833_v7 }
0x11c7   :  { %v2816_v39 = vsub.f32 1.5, %v2815_v48 }
0x11c8   :  { %v6907_v26 = vpop.eup %6906  ;;  %v2843_v14 = vadd.f32 %v2841_v49, %v2838_v2 }
0x11c9   :  { %v2817_v54 = vmul.f32 %v6905_v44, %v2816_v39  ;;  %v2823_v52 = vmul.f32 %v6907_v26, %v2791_v50  ;;  %vm2829_vm8 = vweird.f32 %v6907_v26 }
0x11ca   :  { %6371 = vmatmul.msk.f32.gmra.mxu3 %vm144_vm0, %v2843_v14  ;;  %vm2830_vm10 = vmor %vm2828_vm9, %vm2829_vm8 }
0x11cb   :  { %v2821_v10 = vsel %vm2820_vm7, %v6905_v44, %v2817_v54  ;;  %v2824_v63 = vmul.f32 %v6907_v26, %v2823_v52 }
0x11cc   :  { %v2834_v32 = vmul.f32 %v2821_v10, %v9493_v28  ;;  %v6275_v28 = vld [vmem:[%s11739_s6 + $0x140] sm:$0xff] }
0x11cd   :  { %v2825_v31 = vmul.f32 0.5, %v2824_v63  ;;  %2948 = vmatpush.msra.mxu0 %v6275_v28  ;;  %v6385_v63 = vld [vmem:[%s11732_s5 + $0x198] sm:$0xff] }
0x11ce   :  { %v2839_v0 = vmul.f32 %v9536_v47, %v2834_v32  ;;  %v6393_v32 = vld [vmem:[%s11732_s5 + $0x1d8] sm:$0xff]  ;;  %6416 = vmatpush.xpose.msk.msra.mxu1 %vm144_vm0, %v6385_v63 }
0x11cf   :  { %v2826_v27 = vsub.f32 1.5, %v2825_v31  ;;  %6432 = vmatpush.xpose.msk.msrb.mxu3 %vm144_vm0, %v6393_v32  ;;  %v6388_v31 = vld [vmem:[%s11732_s5 + $0x1b0] sm:$0xff]  ;;  %v7164_v28 = vld [vmem:[%s11737_s3 + $0x78] sm:$0xff] }
0x11d0   :  { %v2844_v56 = vadd.f32 %v2841_v49, %v2839_v0  ;;  %v6384_v0 = vld [vmem:[%s11732_s5 + $0x190] sm:$0xff]  ;;  %6425 = vmatpush.xpose.msk.msra.mxu2 %vm144_vm0, %v6388_v31  ;;  %v7190_v32 = vld [vmem:[%s11737_s3 + $0x98] sm:$0xff] }
0x11d1   :  { %v2827_v40 = vmul.f32 %v6907_v26, %v2826_v27  ;;  %v6392_v27 = vld [vmem:[%s11732_s5 + $0x1d0] sm:$0xff] }
0x11d2   :  { %6372 = vmatmul.msk.f32.gmra.mxu3 %vm144_vm0, %v2844_v56  ;;  %6417 = vmatpush.xpose.msk.msra.mxu1 %vm144_vm0, %v6384_v0 }
0x11d3   :  { %v2831_v16 = vsel %vm2830_vm10, %v6907_v26, %v2827_v40  ;;  %6433 = vmatpush.xpose.msk.msrb.mxu3 %vm144_vm0, %v6392_v27  ;;  %v6383_v40 = vld [vmem:[%s11732_s5 + $0x188] sm:$0xff]  ;;  %v7191_v27 = vld [vmem:[%s11737_s3 + $0x10] sm:$0xff] }
0x11d4   :  { %v2835_v60 = vmul.f32 %v2831_v16, %v9499_v8  ;;  %v6391_v16 = vld [vmem:[%s11732_s5 + $0x1c8] sm:$0xff] }
0x11d6   :  { %v2840_v58 = vmul.f32 %v9536_v47, %v2835_v60  ;;  %6418 = vmatpush.xpose.msk.msra.mxu1 %vm144_vm0, %v6383_v40  ;;  %v6386_v60 = vld [vmem:[%s11732_s5 + $0x1a0] sm:$0xff] }
0x11d7   :  { %6434 = vmatpush.xpose.msk.msrb.mxu3 %vm144_vm0, %v6391_v16 }
0x11d8   :  { %v2845_v61 = vadd.f32 %v2841_v49, %v2840_v58  ;;  %v6382_v58 = vld [vmem:[%s11732_s5 + $0x180] sm:$0xff] }
0x11da   :  { %6373 = vmatmul.msk.f32.gmra.mxu3 %vm144_vm0, %v2845_v61  ;;  %6419 = vmatpush.xpose.msk.msra.mxu1 %vm144_vm0, %v6382_v58 }
0x1245   :  { %v2904_v9 = vpop.f32.mrf.mxu3 }
0x1246   :  { %v2905_v45 = vadd.f32 %v6790_v17, %v2904_v9 }
0x1248   :  { %v2916_v57 = vmax.f32 %v2905_v45, 0.0  ;;  %v7166_v45 = vld [vmem:[%s11737_s3 + $0x70] sm:$0xff] }
0x124a   :  { %6374 = vmatmul.msk.f32.vlgmr.msra.gmra.mxu0 %vm951_vm15, %v2916_v57 }
0x124d   :  { %v2907_v8 = vpop.f32.mrf.mxu3 }
0x124e   :  { %v2908_v13 = vadd.f32 %v6790_v17, %v2907_v8  ;;  %v7167_v8 = vld [vmem:[%s11737_s3 + $0xf0] sm:$0xff] }
0x1250   :  { %v2917_v19 = vmax.f32 %v2908_v13, 0.0  ;;  %v7168_v13 = vld [vmem:[%s11737_s3 + $0x68] sm:$0xff] }
0x1252   :  { %6375 = vmatmul.msk.f32.gmra.mxu0 %vm951_vm15, %v2917_v19 }
0x1255   :  { %v2910_v43 = vpop.f32.mrf.mxu3 }
0x1256   :  { %v2911_v51 = vadd.f32 %v6790_v17, %v2910_v43  ;;  %v7169_v43 = vld [vmem:[%s11737_s3 + $0xe8] sm:$0xff] }
0x1258   :  { %v2918_v34 = vmax.f32 %v2911_v51, 0.0  ;;  %v7170_v51 = vld [vmem:[%s11737_s3 + $0x60] sm:$0xff] }
0x125a   :  { %6376 = vmatmul.msk.f32.gmra.mxu0 %vm951_vm15, %v2918_v34  ;;  %v7171_v34 = vld [vmem:[%s11737_s3 + $0xe0] sm:$0xff] }
0x125d   :  { %v2913_v11 = vpop.f32.mrf.mxu3 }
0x125e   :  { %v2914_v3 = vadd.f32 %v6790_v17, %v2913_v11  ;;  %v7165_v17 = vld [vmem:[%s11737_s3 + $0xf8] sm:$0xff] }
0x125f   :  { %v7172_v11 = vld [vmem:[%s11737_s3 + $0x58] sm:$0xff] }
0x1260   :  { %v2919_v38 = vmax.f32 %v2914_v3, 0.0  ;;  %v7173_v3 = vld [vmem:[%s11737_s3 + $0xd8] sm:$0xff] }
0x1262   :  { %6377 = vmatmul.msk.f32.gmra.mxu0 %vm951_vm15, %v2919_v38 }
0x12c7   :  { %v2950_v36 = vpop.f32.mrf.mxu0 }
0x12c8   :  { %v2951_v53 = vadd.f32 %v2950_v36, %v2920_v62 }
0x12ca   :  { %v2962_v55 = vadd.f32 %v2951_v53, %v9554_v12  ;;  %v7175_v53 = vld [vmem:[%s11737_s3 + $0xd0] sm:$0xff] }
0x12cc   :  { %v2966_v47 = vsel %vm144_vm0, %v2962_v55, 0.0 }
0x12cd   :  { %2967 = vadd.xlane.f32.xlu1 %v2966_v47 }
0x12cf   :  { %v2953_v59 = vpop.f32.mrf.mxu0 }
0x12d0   :  { %v2954_v33 = vadd.f32 %v2953_v59, %v2920_v62 }
0x12d2   :  { %v2963_v46 = vadd.f32 %v2954_v33, %v2843_v14  ;;  %v7177_v33 = vld [vmem:[%s11737_s3 + $0xc8] sm:$0xff] }
0x12d4   :  { %v2969_v6 = vsel %vm144_vm0, %v2963_v46, 0.0 }
0x12d5   :  { %2970 = vadd.xlane.f32.xlu2 %v2969_v6  ;;  %v7178_v6 = vld [vmem:[%s11737_s3 + $0x40] sm:$0xff] }
0x12d7   :  { %v2956_v49 = vpop.f32.mrf.mxu0 }
0x12d8   :  { %v2957_v21 = vadd.f32 %v2956_v49, %v2920_v62  ;;  %v7179_v49 = vld [vmem:[%s11737_s3 + $0xc0] sm:$0xff] }
0x12da   :  { %v2964_v22 = vadd.f32 %v2957_v21, %v2844_v56  ;;  %v6387_v56 = vld [vmem:[%s11732_s5 + $0x1a8] sm:$0xff] }
0x12db   :  { %6426 = vmatpush.xpose.msk.msra.mxu2 %vm144_vm0, %v6387_v56 }
0x12dc   :  { %v2972_v24 = vsel %vm144_vm0, %v2964_v22, 0.0 }
0x12dd   :  { %2973 = vadd.xlane.f32.xlu0 %v2972_v24  ;;  %v7181_v24 = vld [vmem:[%s11737_s3 + $0xb8] sm:$0xff] }
0x12df   :  { %v2959_v15 = vpop.f32.mrf.mxu0  ;;  %6427 = vmatpush.xpose.msk.msra.mxu2 %vm144_vm0, %v6386_v60  ;;  %v7193_v60 = vld [vmem:[%s11737_s3 + $0x8] sm:$0xff] }
0x12e0   :  { %v2960_v25 = vadd.f32 %v2959_v15, %v2920_v62  ;;  %v7174_v62 = vld [vmem:[%s11737_s3 + $0x50] sm:$0xff] }
0x12e2   :  { %v2965_v35 = vadd.f32 %v2960_v25, %v2845_v61  ;;  %v6390_v61 = vld [vmem:[%s11732_s5 + $0x1c0] sm:$0xff] }
0x12e3   :  { %6435 = vmatpush.xpose.msk.msrb.mxu3 %vm144_vm0, %v6390_v61  ;;  %3510 = vmatpush.msrb.mxu2 %v7164_v28 }
0x12e4   :  { %v2975_v20 = vsel %vm144_vm0, %v2965_v35, 0.0 }
0x12e5   :  { %2976 = vadd.xlane.f32.xlu1 %v2975_v20  ;;  %3511 = vmatpush.msrb.mxu2 %v7166_v45 }
0x12e7   :  { %3539 = vmatpush.msra.mxu3 %v7165_v17  ;;  %3512 = vmatpush.msrb.mxu2 %v7168_v13  ;;  %v7194_v17 = vld [vmem:[%s11737_s3 + $0x88] sm:$0xff] }
0x12e9   :  { %3540 = vmatpush.msra.mxu3 %v7167_v8  ;;  %3513 = vmatpush.msrb.mxu2 %v7170_v51  ;;  %v7197_v51 = vld [vmem:[%s11737_s3 + $0x80] sm:$0xff] }
0x12eb   :  { %3541 = vmatpush.msra.mxu3 %v7169_v43  ;;  %3514 = vmatpush.msrb.mxu2 %v7172_v11 }
0x12ed   :  { %3542 = vmatpush.msra.mxu3 %v7171_v34  ;;  %3515 = vmatpush.msrb.mxu2 %v7174_v62 }
0x12ef   :  { %3543 = vmatpush.msra.mxu3 %v7173_v3 }
0x12f1   :  { %3544 = vmatpush.msra.mxu3 %v7175_v53 }
0x12f3   :  { %3545 = vmatpush.msra.mxu3 %v7177_v33 }
0x12f5   :  { %3546 = vmatpush.msra.mxu3 %v7179_v49 }
0x12f7   :  { %3547 = vmatpush.msra.mxu3 %v7181_v24 }
0x1340   :  { %v2968_v30 = vpop.xlane.xlu1 %2967 }
0x1341   :  { %v2978_v44 = vmul.f32 %v2968_v30, %v8134_v5  ;;  %v7183_v30 = vld [vmem:[%s11737_s3 + $0xb0] sm:$0xff] }
0x1342   :  { %3548 = vmatpush.msra.mxu3 %v7183_v30 }
0x1343   :  { %v9597_v12 = vsub.f32 %v2962_v55, %v2978_v44  ;;  %v7176_v55 = vld [vmem:[%s11737_s3 + $0x48] sm:$0xff] }
0x1344   :  { %3516 = vmatpush.msrb.mxu2 %v7176_v55  ;;  %v7184_v44 = vld [vmem:[%s11737_s3 + $0x28] sm:$0xff] }
0x1345   :  { %v2986_v50 = vmul.f32 %v9597_v12, %v9597_v12 }
0x1346   :  { %3517 = vmatpush.msrb.mxu2 %v7178_v6 }
0x1347   :  { %v2990_v29 = vsel %vm144_vm0, %v2986_v50, 0.0 }
0x1348   :  { %2991 = vadd.xlane.f32.xlu2 %v2990_v29  ;;  %v2971_v18 = vpop.xlane.xlu2 %2970 }
0x1349   :  { %v2979_v4 = vmul.f32 %v2971_v18, %v8134_v5  ;;  %v7185_v18 = vld [vmem:[%s11737_s3 + $0xa8] sm:$0xff] }
0x134a   :  { %3549 = vmatpush.msra.mxu3 %v7185_v18 }
0x134b   :  { %v9603_v1 = vsub.f32 %v2963_v46, %v2979_v4  ;;  %v6284_v4 = vld [vmem:[%s11734_s7 + $0x28] sm:$0xff] }
0x134d   :  { %v2987_v41 = vmul.f32 %v9603_v1, %v9603_v1 }
0x134f   :  { %v2993_v42 = vsel %vm144_vm0, %v2987_v41, 0.0 }
0x1350   :  { %v2974_v7 = vpop.xlane.xlu0 %2973  ;;  %2994 = vadd.xlane.f32.xlu0 %v2993_v42 }
0x1351   :  { %v2980_v37 = vmul.f32 %v2974_v7, %v8134_v5  ;;  %v7186_v7 = vld [vmem:[%s11737_s3 + $0x20] sm:$0xff] }
0x1353   :  { %v9609_v48 = vsub.f32 %v2964_v22, %v2980_v37  ;;  %v7180_v22 = vld [vmem:[%s11737_s3 + $0x38] sm:$0xff]  ;;  %v7187_v37 = vld [vmem:[%s11734_s7 + $0x20] sm:$0xff] }
0x1354   :  { %3518 = vmatpush.msrb.mxu2 %v7180_v22 }
0x1355   :  { %v2988_v2 = vmul.f32 %v9609_v48, %v9609_v48 }
0x1357   :  { %v2996_v39 = vsel %vm144_vm0, %v2988_v2, 0.0  ;;  %v9748_v2 = vperm.slane %v7187_v37, 7  ;;  %v7198_v37 = vld [vmem:[%s11735_s2 + $0x78] sm:$0xff] }
0x1358   :  { %v2977_v26 = vpop.xlane.xlu1 %2976  ;;  %2997 = vadd.xlane.f32.xlu1 %v2996_v39  ;;  %v7188_v39 = vld [vmem:[%s11737_s3 + $0xa0] sm:$0xff] }
0x1359   :  { %v2981_v14 = vmul.f32 %v2977_v26, %v8134_v5  ;;  %3550 = vmatpush.msra.mxu3 %v7188_v39  ;;  %v9874_v39 = vld [vmem:[%s11735_s2 + $0xf8] sm:$0xff] }
0x135b   :  { %v9615_v54 = vsub.f32 %v2965_v35, %v2981_v14  ;;  %v7182_v35 = vld [vmem:[%s11737_s3 + $0x30] sm:$0xff]  ;;  %3551 = vmatpush.msra.mxu3 %v7190_v32 }
0x135c   :  { %3519 = vmatpush.msrb.mxu2 %v7182_v35 }
0x135d   :  { %v2989_v52 = vmul.f32 %v9615_v54, %v9615_v54 }
0x135e   :  { %3520 = vmatpush.msrb.mxu2 %v7184_v44 }
0x135f   :  { %v2999_v10 = vsel %vm144_vm0, %v2989_v52, 0.0  ;;  %v7189_v52 = vld [vmem:[%s11737_s3 + $0x18] sm:$0xff] }
0x1360   :  { %3000 = vadd.xlane.f32.xlu2 %v2999_v10  ;;  %3521 = vmatpush.msrb.mxu2 %v7186_v7  ;;  %v9758_v10 = vperm.slane %v6284_v4, 0 }
0x1362   :  { %3522 = vmatpush.msrb.mxu2 %v7189_v52 }
0x1364   :  { %3523 = vmatpush.msrb.mxu2 %v7191_v27  ;;  %v9895_v27 = vld [vmem:[%s11735_s2 + $0xf0] sm:$0xff] }
0x1366   :  { %3524 = vmatpush.msrb.mxu2 %v7193_v60 }
0x13bb   :  { %v2992_v9 = vpop.xlane.xlu2 %2991 }
0x13bc   :  { %v3002_v57 = vmul.f32 %v2992_v9, %v8134_v5 }
0x13be   :  { %v3006_v19 = vadd.f32 1e-05, %v3002_v57  ;;  %v7195_v57 = vld [vmem:[%s11737_s3] sm:$0xff] }
0x13bf   :  { %3525 = vmatpush.msrb.mxu2 %v7195_v57 }
0x13c0   :  { %6908 = vrsqrt.f32 %v3006_v19  ;;  %vm3016_vm12 = vweird.f32 %v3006_v19 }
0x13c3   :  { %v2995_v38 = vpop.xlane.xlu0 %2994 }
0x13c4   :  { %v3003_v36 = vmul.f32 %v2995_v38, %v8134_v5 }
0x13c6   :  { %v6909_v47 = vpop.eup %6908  ;;  %v9705_v59 = vadd.f32 1e-05, %v3003_v36 }
0x13c7   :  { %v3011_v46 = vmul.f32 %v6909_v47, %v3006_v19  ;;  %vm3017_vm11 = vweird.f32 %v6909_v47  ;;  %v7196_v19 = vld [vmem:[%s11738_s4] sm:$0xff] }
0x13c8   :  { %6910 = vrsqrt.f32 %v9705_v59  ;;  %vm3018_vm13 = vmor %vm3016_vm12, %vm3017_vm11  ;;  %vm3026_vm2 = vweird.f32 %v9705_v59 }
0x13c9   :  { %v3012_v21 = vmul.f32 %v6909_v47, %v3011_v46 }
0x13cb   :  { %v3013_v15 = vmul.f32 0.5, %v3012_v21  ;;  %v2998_v25 = vpop.xlane.xlu1 %2997 }
0x13cc   :  { %v3004_v20 = vmul.f32 %v2998_v25, %v8134_v5 }
0x13cd   :  { %v3014_v23 = vsub.f32 1.5, %v3013_v15 }
0x13ce   :  { %v6911_v50 = vpop.eup %6910  ;;  %v9733_v29 = vadd.f32 1e-05, %v3004_v20 }
0x13cf   :  { %v3015_v41 = vmul.f32 %v6909_v47, %v3014_v23  ;;  %v3021_v42 = vmul.f32 %v6911_v50, %v9705_v59  ;;  %vm3027_vm14 = vweird.f32 %v6911_v50  ;;  %v9855_v23 = vld [vmem:[%s11734_s7 + $0x30] sm:$0xff] }
0x13d0   :  { %6912 = vrsqrt.f32 %v9733_v29  ;;  %vm3028_vm3 = vmor %vm3026_vm2, %vm3027_vm14  ;;  %vm3036_vm5 = vweird.f32 %v9733_v29  ;;  %v3160_v44 = vperm.slane %v9855_v23, 1 }
0x13d1   :  { %v3019_v26 = vsel %vm3018_vm13, %v6909_v47, %v3015_v41  ;;  %v3022_v14 = vmul.f32 %v6911_v50, %v3021_v42 }
0x13d2   :  { %v3050_v63 = vmul.f32 %v3019_v26, %v9597_v12  ;;  %v7192_v12 = vld [vmem:[%s11737_s3 + $0x90] sm:$0xff] }
0x13d3   :  { %v3023_v31 = vmul.f32 0.5, %v3022_v14  ;;  %v3001_v0 = vpop.xlane.xlu2 %3000  ;;  %3552 = vmatpush.msra.mxu3 %v7192_v12 }
0x13d4   :  { %v3055_v56 = vmul.f32 %v9748_v2, %v3050_v63  ;;  %v3005_v40 = vmul.f32 %v3001_v0, %v8134_v5  ;;  %v7200_v63 = vld [vmem:[%s11735_s2 + $0x70] sm:$0xff] }
0x13d5   :  { %v3024_v16 = vsub.f32 1.5, %v3023_v31  ;;  %3553 = vmatpush.msra.mxu3 %v7194_v17  ;;  %v9915_v17 = vld [vmem:[%s11735_s2 + $0xe8] sm:$0xff] }
0x13d6   :  { %v6913_v58 = vpop.eup %6912  ;;  %v9776_v61 = vadd.f32 %v9758_v10, %v3055_v56  ;;  %v3009_v28 = vadd.f32 1e-05, %v3005_v40  ;;  %v7202_v40 = vld [vmem:[%s11735_s2 + $0x68] sm:$0xff] }
0x13d7   :  { %v3025_v9 = vmul.f32 %v6911_v50, %v3024_v16  ;;  %v3031_v45 = vmul.f32 %v6913_v58, %v9733_v29  ;;  %3554 = vmatpush.msra.mxu3 %v7197_v51  ;;  %vm3037_vm4 = vweird.f32 %v6913_v58  ;;  %v7203_v16 = vld [vmem:[%s11735_s2 + $0x60] sm:$0xff] }
0x13d8   :  { %6378 = vst.msk [vmem:[%s11741_s9 + $0x40] sm:$0xff] %vm144_vm0, %v9776_v61  ;;  %6914 = vrsqrt.f32 %v3009_v28  ;;  %6420 = vmatmul.msk.f32.vlgmr.msra.gmra.mxu1 %vm144_vm0, %v9776_v61  ;;  %6428 = vmatmul.msk.f32.vlgmr.msra.gmra.mxu2 %vm144_vm0, %v9776_v61  ;;  %vm3038_vm6 = vmor %vm3036_vm5, %vm3037_vm4  ;;  %vm3046_vm8 = vweird.f32 %v3009_v28 }
0x13d9   :  { %v3029_v8 = vsel %vm3028_vm3, %v6911_v50, %v3025_v9  ;;  %v3032_v13 = vmul.f32 %v6913_v58, %v3031_v45  ;;  %6436 = vmatmul.msk.f32.vlgmr.msrb.gmra.mxu3 %vm144_vm0, %v9776_v61  ;;  %3599 = vmatpush.msra.mxu2 %v7196_v19  ;;  %v3202_v50 = vperm.slane %v9855_v23, 2  ;;  %v7205_v45 = vld [vmem:[%s11735_s2 + $0x58] sm:$0xff] }
0x13da   :  { %v3051_v43 = vmul.f32 %v3029_v8, %v9603_v1  ;;  %v7206_v8 = vld [vmem:[%s11735_s2 + $0x50] sm:$0xff] }
0x13db   :  { %v3033_v34 = vmul.f32 0.5, %v3032_v13 }
0x13dc   :  { %v3056_v11 = vmul.f32 %v9748_v2, %v3051_v43  ;;  %v9933_v43 = vld [vmem:[%s11735_s2 + $0xe0] sm:$0xff] }
0x13dd   :  { %v3034_v3 = vsub.f32 1.5, %v3033_v34  ;;  %v7208_v34 = vld [vmem:[%s11735_s2 + $0x48] sm:$0xff] }
0x13de   :  { %v6915_v38 = vpop.eup %6914  ;;  %v9806_v62 = vadd.f32 %v9758_v10, %v3056_v11 }
0x13df   :  { %v3035_v36 = vmul.f32 %v6913_v58, %v3034_v3  ;;  %v3041_v53 = vmul.f32 %v6915_v38, %v3009_v28  ;;  %vm3047_vm7 = vweird.f32 %v6915_v38  ;;  %v7209_v3 = vld [vmem:[%s11735_s2 + $0x40] sm:$0xff] }
0x13e0   :  { %6379 = vst.msk [vmem:[%s11741_s9 + $0x48] sm:$0xff] %vm144_vm0, %v9806_v62  ;;  %6421 = vmatmul.msk.f32.gmra.mxu1 %vm144_vm0, %v9806_v62  ;;  %6429 = vmatmul.msk.f32.gmra.mxu2 %vm144_vm0, %v9806_v62  ;;  %vm3048_vm9 = vmor %vm3046_vm8, %vm3047_vm7 }
0x13e1   :  { %v3039_v1 = vsel %vm3038_vm6, %v6913_v58, %v3035_v36  ;;  %v3042_v55 = vmul.f32 %v6915_v38, %v3041_v53  ;;  %6437 = vmatmul.msk.f32.gmra.mxu3 %vm144_vm0, %v9806_v62  ;;  %v9951_v53 = vld [vmem:[%s11735_s2 + $0xd8] sm:$0xff] }
0x13e2   :  { %v3052_v47 = vmul.f32 %v3039_v1, %v9609_v48 }
0x13e3   :  { %v3043_v59 = vmul.f32 0.5, %v3042_v55  ;;  %v7211_v55 = vld [vmem:[%s11735_s2 + $0x38] sm:$0xff] }
0x13e4   :  { %v3057_v33 = vmul.f32 %v9748_v2, %v3052_v47 }
0x13e5   :  { %v3044_v46 = vsub.f32 1.5, %v3043_v59  ;;  %v7212_v59 = vld [vmem:[%s11735_s2 + $0x30] sm:$0xff] }
0x13e6   :  { %v9823_v6 = vadd.f32 %v9758_v10, %v3057_v33 }
0x13e7   :  { %v3045_v49 = vmul.f32 %v6915_v38, %v3044_v46 }
0x13e8   :  { %6380 = vst.msk [vmem:[%s11741_s9 + $0x50] sm:$0xff] %vm144_vm0, %v9823_v6  ;;  %6422 = vmatmul.msk.f32.gmra.mxu1 %vm144_vm0, %v9823_v6  ;;  %6430 = vmatmul.msk.f32.gmra.mxu2 %vm144_vm0, %v9823_v6 }
0x13e9   :  { %v3049_v48 = vsel %vm3048_vm9, %v6915_v38, %v3045_v49  ;;  %6438 = vmatmul.msk.f32.gmra.mxu3 %vm144_vm0, %v9823_v6  ;;  %v9969_v49 = vld [vmem:[%s11735_s2 + $0xd0] sm:$0xff] }
0x13ea   :  { %v3053_v21 = vmul.f32 %v3049_v48, %v9615_v54 }
0x13ec   :  { %v3058_v22 = vmul.f32 %v9748_v2, %v3053_v21  ;;  %v7214_v21 = vld [vmem:[%s11735_s2 + $0x28] sm:$0xff] }
0x13ee   :  { %v9839_v24 = vadd.f32 %v9758_v10, %v3058_v22 }
0x13f0   :  { %6381 = vst.msk [vmem:[%s11741_s9 + $0x58] sm:$0xff] %vm144_vm0, %v9839_v24  ;;  %6423 = vmatmul.msk.f32.gmra.mxu1 %vm144_vm0, %v9839_v24  ;;  %6431 = vmatmul.msk.f32.gmra.mxu2 %vm144_vm0, %v9839_v24 }
0x13f1   :  { %6439 = vmatmul.msk.f32.gmra.mxu3 %vm144_vm0, %v9839_v24 }
0x145b   :  { %v3190_v54 = vpop.f32.mrf.mxu2 }
0x145c   :  { %v3232_v15 = vpop.f32.mrf.mxu3  ;;  %v9909_v58 = vadd.f32 %v3190_v54, %v3160_v44  ;;  %v7215_v54 = vld [vmem:[%s11735_s2 + $0x20] sm:$0xff] }
0x145d   :  { %v9883_v10 = vadd.f32 %v3232_v15, %v3202_v50 }
0x145e   :  { %v3256_v19 = vmul.f32 %v7203_v16, %v9909_v58  ;;  %v3272_v51 = vmul.f32 %v9933_v43, %v9909_v58 }
0x145f   :  { %v3288_v60 = vmul.f32 %v7203_v16, %v9883_v10  ;;  %v3284_v38 = vmul.f32 %v7209_v3, %v9883_v10  ;;  %v3280_v15 = vmul.f32 %v7215_v54, %v9883_v10  ;;  %v10033_v16 = vld [vmem:[%s11735_s2 + $0xb0] sm:$0xff] }
0x1463   :  { %v3193_v25 = vpop.f32.mrf.mxu2 }
0x1464   :  { %v3235_v35 = vpop.f32.mrf.mxu3  ;;  %v9889_v31 = vadd.f32 %v3193_v25, %v3160_v44 }
0x1465   :  { %v9878_v14 = vadd.f32 %v3235_v35, %v3202_v50  ;;  %v9987_v35 = vld [vmem:[%s11735_s2 + $0xc8] sm:$0xff] }
0x1466   :  { %v3257_v28 = vmul.f32 %v7202_v40, %v9889_v31  ;;  %v3273_v9 = vmul.f32 %v9915_v17, %v9889_v31  ;;  %v3253_v25 = vmul.f32 %v7208_v34, %v9889_v31 }
0x1467   :  { %v3289_v12 = vmul.f32 %v7202_v40, %v9878_v14  ;;  %v3285_v11 = vmul.f32 %v7208_v34, %v9878_v14  ;;  %v3281_v22 = vmul.f32 %v7214_v21, %v9878_v14 }
0x146b   :  { %v3196_v20 = vpop.f32.mrf.mxu2 }
0x146c   :  { %v3238_v30 = vpop.f32.mrf.mxu3  ;;  %v9865_v7 = vadd.f32 %v3196_v20, %v3160_v44  ;;  %v3269_v20 = vmul.f32 %v9987_v35, %v9889_v31 }
0x146d   :  { %v9861_v41 = vadd.f32 %v3238_v30, %v3202_v50  ;;  %v7217_v30 = vld [vmem:[%s11735_s2 + $0x18] sm:$0xff] }
0x146e   :  { %v3258_v0 = vmul.f32 %v7200_v63, %v9865_v7  ;;  %v3274_v56 = vmul.f32 %v9895_v27, %v9865_v7  ;;  %v3254_v46 = vmul.f32 %v7206_v8, %v9865_v7  ;;  %v3270_v48 = vmul.f32 %v9969_v49, %v9865_v7 }
0x146f   :  { %v3290_v32 = vmul.f32 %v7200_v63, %v9861_v41  ;;  %v3286_v13 = vmul.f32 %v7206_v8, %v9861_v41  ;;  %v3282_v33 = vmul.f32 %v7212_v59, %v9861_v41  ;;  %v7221_v63 = vld [vmem:[%s11735_s2] sm:$0xff] }
0x1470   :  { %v7225_v8 = vld [vmem:[%s11735_s2 + $0xa0] sm:$0xff] }
0x1473   :  { %v3199_v29 = vpop.f32.mrf.mxu2 }
0x1474   :  { %v9859_v18 = vadd.f32 %v3199_v29, %v3160_v44  ;;  %v3241_v4 = vpop.f32.mrf.mxu3 }
0x1475   :  { %v9863_v42 = vadd.f32 %v3241_v4, %v3202_v50  ;;  %v7218_v50 = vld [vmem:[%s11735_s2 + $0x10] sm:$0xff]  ;;  %v3252_v4 = vmul.f32 %v7209_v3, %v9909_v58 }
0x1476   :  { %v3259_v2 = vmul.f32 %v7198_v37, %v9859_v18  ;;  %v3275_v26 = vmul.f32 %v9874_v39, %v9859_v18  ;;  %v3255_v36 = vmul.f32 %v7205_v45, %v9859_v18  ;;  %v3271_v1 = vmul.f32 %v9951_v53, %v9859_v18  ;;  %v7227_v3 = vld [vmem:[%s11735_s2 + $0x90] sm:$0xff] }
0x1477   :  { %v3291_v52 = vmul.f32 %v7198_v37, %v9863_v42  ;;  %v3287_v57 = vmul.f32 %v7205_v45, %v9863_v42  ;;  %v3283_v47 = vmul.f32 %v7211_v55, %v9863_v42  ;;  %v3279_v44 = vmul.f32 %v7217_v30, %v9863_v42  ;;  %v10005_v37 = vld [vmem:[%s11735_s2 + $0xc0] sm:$0xff] }
0x1478   :  { %6440 = vmatpush.xpose.msk.msrb.mxu0 %vm144_vm0, %v3259_v2  ;;  %6460 = vmatpush.xpose.msk.msrb.mxu1 %vm144_vm0, %v3275_v26  ;;  %v3278_v29 = vmul.f32 %v7218_v50, %v9861_v41  ;;  %v3268_v2 = vmul.f32 %v10005_v37, %v9909_v58  ;;  %v7220_v26 = vld [vmem:[%s11735_s2 + $0x8] sm:$0xff] }
0x1479   :  { %3613 = vmatpush.msrb.mxu3 %v3291_v52  ;;  %v3277_v52 = vmul.f32 %v7220_v26, %v9878_v14 }
0x147b   :  { %3614 = vmatpush.msrb.mxu3 %v3290_v32  ;;  %v3276_v32 = vmul.f32 %v7221_v63, %v9883_v10 }
0x147c   :  { %6441 = vmatpush.xpose.msk.msrb.mxu0 %vm144_vm0, %v3258_v0  ;;  %6461 = vmatpush.xpose.msk.msrb.mxu1 %vm144_vm0, %v3274_v56  ;;  %v3251_v0 = vmul.f32 %v7211_v55, %v9859_v18  ;;  %v10023_v56 = vld [vmem:[%s11735_s2 + $0xb8] sm:$0xff] }
0x147d   :  { %3615 = vmatpush.msrb.mxu3 %v3289_v12  ;;  %v3267_v40 = vmul.f32 %v10023_v56, %v9859_v18  ;;  %v3250_v12 = vmul.f32 %v7212_v59, %v9865_v7  ;;  %v7229_v59 = vld [vmem:[%s11735_s2 + $0x80] sm:$0xff] }
0x147f   :  { %3616 = vmatpush.msrb.mxu3 %v3288_v60  ;;  %v3266_v60 = vmul.f32 %v10033_v16, %v9865_v7 }
0x1480   :  { %6442 = vmatpush.xpose.msk.msrb.mxu0 %vm144_vm0, %v3257_v28  ;;  %6462 = vmatpush.xpose.msk.msrb.mxu1 %vm144_vm0, %v3273_v9  ;;  %v3249_v28 = vmul.f32 %v7214_v21, %v9889_v31  ;;  %v7224_v9 = vld [vmem:[%s11735_s2 + $0xa8] sm:$0xff]  ;;  %v3306_v21 = vmul.f32 %v9895_v27, %v9861_v41  ;;  %v3302_v27 = vmul.f32 %v9969_v49, %v9861_v41 }
0x1481   :  { %3617 = vmatpush.msrb.mxu3 %v3287_v57  ;;  %v3265_v45 = vmul.f32 %v7224_v9, %v9889_v31  ;;  %v3248_v57 = vmul.f32 %v7215_v54, %v9909_v58  ;;  %v3298_v49 = vmul.f32 %v10033_v16, %v9861_v41 }
0x1483   :  { %3618 = vmatpush.msrb.mxu3 %v3286_v13  ;;  %v3264_v13 = vmul.f32 %v7225_v8, %v9909_v58 }
0x1484   :  { %6443 = vmatpush.xpose.msk.msrb.mxu0 %vm144_vm0, %v3256_v19  ;;  %6463 = vmatpush.xpose.msk.msrb.mxu1 %vm144_vm0, %v3272_v51  ;;  %v3247_v19 = vmul.f32 %v7217_v30, %v9859_v18  ;;  %v7226_v51 = vld [vmem:[%s11735_s2 + $0x98] sm:$0xff]  ;;  %v3296_v30 = vmul.f32 %v7225_v8, %v9883_v10 }
0x1485   :  { %3619 = vmatpush.msrb.mxu3 %v3285_v11  ;;  %v3263_v34 = vmul.f32 %v7226_v51, %v9859_v18  ;;  %v3246_v11 = vmul.f32 %v7218_v50, %v9865_v7  ;;  %v7228_v18 = vld [vmem:[%s11735_s2 + $0x88] sm:$0xff] }
0x1486   :  { %v3261_v55 = vmul.f32 %v7228_v18, %v9889_v31 }
0x1487   :  { %3620 = vmatpush.msrb.mxu3 %v3284_v38  ;;  %v3262_v38 = vmul.f32 %v7227_v3, %v9865_v7  ;;  %v3244_v7 = vmul.f32 %v7221_v63, %v9909_v58 }
0x1488   :  { %6444 = vmatpush.xpose.msk.msrb.mxu0 %vm144_vm0, %v3255_v36  ;;  %6464 = vmatpush.xpose.msk.msrb.mxu1 %vm144_vm0, %v3271_v1  ;;  %v3148_v36 = vpop.f32.mrf.mxu1  ;;  %v3245_v1 = vmul.f32 %v7220_v26, %v9889_v31 }
0x1489   :  { %3621 = vmatpush.msrb.mxu3 %v3283_v47  ;;  %v3106_v47 = vperm.slane %v9855_v23, 0 }
0x148b   :  { %3622 = vmatpush.msrb.mxu3 %v3282_v33  ;;  %v3260_v33 = vmul.f32 %v7229_v59, %v9909_v58  ;;  %v3149_v31 = vadd.f32 %v3148_v36, %v3106_v47  ;;  %v3305_v58 = vmul.f32 %v9915_v17, %v9878_v14  ;;  %v3301_v17 = vmul.f32 %v9987_v35, %v9878_v14 }
0x148c   :  { %6445 = vmatpush.xpose.msk.msrb.mxu0 %vm144_vm0, %v3254_v46  ;;  %6465 = vmatpush.xpose.msk.msrb.mxu1 %vm144_vm0, %v3270_v48  ;;  %v3307_v46 = vmul.f32 %v9874_v39, %v9863_v42  ;;  %v3304_v39 = vmul.f32 %v9933_v43, %v9883_v10  ;;  %v3300_v43 = vmul.f32 %v10005_v37, %v9883_v10 }
0x148d   :  { %3623 = vmatpush.msrb.mxu3 %v3281_v22  ;;  %v3303_v22 = vmul.f32 %v9951_v53, %v9863_v42  ;;  %v3299_v53 = vmul.f32 %v10023_v56, %v9863_v42  ;;  %v3297_v35 = vmul.f32 %v7224_v9, %v9878_v14  ;;  %v3292_v37 = vmul.f32 %v7229_v59, %v9883_v10  ;;  %v7232_v10 = vld [vmem:[%s11736_s1 + $0x10] sm:$0xff]  ;;  %v7234_v9 = vld [vmem:[%s11736_s1 + $0x20] sm:$0xff] }
0x148f   :  { %3624 = vmatpush.msrb.mxu3 %v3280_v15 }
0x1490   :  { %6446 = vmatpush.xpose.msk.msrb.mxu0 %vm144_vm0, %v3253_v25  ;;  %6466 = vmatpush.xpose.msk.msrb.mxu1 %vm144_vm0, %v3269_v20  ;;  %v3151_v48 = vpop.f32.mrf.mxu1 }
0x1491   :  { %3625 = vmatpush.msrb.mxu3 %v3279_v44  ;;  %v3152_v54 = vadd.f32 %v3151_v48, %v3106_v47  ;;  %v3295_v44 = vmul.f32 %v7226_v51, %v9863_v42  ;;  %v7230_v42 = vld [vmem:[%s11736_s1] sm:$0xff] }
0x1493   :  { %3626 = vmatpush.msrb.mxu3 %v3278_v29  ;;  %v3294_v29 = vmul.f32 %v7227_v3, %v9861_v41  ;;  %v7231_v41 = vld [vmem:[%s11736_s1 + $0x8] sm:$0xff]  ;;  %v7237_v3 = vld [vmem:[%s11736_s1 + $0x38] sm:$0xff] }
0x1494   :  { %6447 = vmatpush.xpose.msk.msrb.mxu0 %vm144_vm0, %v3252_v4  ;;  %6467 = vmatpush.xpose.msk.msrb.mxu1 %vm144_vm0, %v3268_v2  ;;  %v3293_v4 = vmul.f32 %v7228_v18, %v9878_v14 }
0x1495   :  { %3627 = vmatpush.msrb.mxu3 %v3277_v52 }
0x1497   :  { %3628 = vmatpush.msrb.mxu3 %v3276_v32 }
0x1498   :  { %6448 = vmatpush.xpose.msk.msrb.mxu0 %vm144_vm0, %v3251_v0  ;;  %6468 = vmatpush.xpose.msk.msrb.mxu1 %vm144_vm0, %v3267_v40  ;;  %v3154_v15 = vpop.f32.mrf.mxu1  ;;  %v7233_v40 = vld [vmem:[%s11736_s1 + $0x18] sm:$0xff] }
0x1499   :  { %v3155_v25 = vadd.f32 %v3154_v15, %v3106_v47 }
0x149c   :  { %6449 = vmatpush.xpose.msk.msrb.mxu0 %vm144_vm0, %v3250_v12  ;;  %6469 = vmatpush.xpose.msk.msrb.mxu1 %vm144_vm0, %v3266_v60 }
0x14a0   :  { %6450 = vmatpush.xpose.msk.msrb.mxu0 %vm144_vm0, %v3249_v28  ;;  %6470 = vmatpush.xpose.msk.msrb.mxu1 %vm144_vm0, %v3265_v45  ;;  %v3157_v20 = vpop.f32.mrf.mxu1 }
0x14a1   :  { %v3158_v50 = vadd.f32 %v3157_v20, %v3106_v47 }
0x14a4   :  { %6451 = vmatpush.xpose.msk.msrb.mxu0 %vm144_vm0, %v3248_v57  ;;  %6471 = vmatpush.xpose.msk.msrb.mxu1 %vm144_vm0, %v3264_v13  ;;  %v7235_v57 = vld [vmem:[%s11736_s1 + $0x28] sm:$0xff] }
0x14a8   :  { %6452 = vmatpush.xpose.msk.msrb.mxu0 %vm144_vm0, %v3247_v19  ;;  %6472 = vmatpush.xpose.msk.msrb.mxu1 %vm144_vm0, %v3263_v34  ;;  %v7236_v34 = vld [vmem:[%s11736_s1 + $0x30] sm:$0xff] }
0x14ac   :  { %6453 = vmatpush.xpose.msk.msrb.mxu0 %vm144_vm0, %v3246_v11  ;;  %6473 = vmatpush.xpose.msk.msrb.mxu1 %vm144_vm0, %v3262_v38 }
0x14b0   :  { %6454 = vmatpush.xpose.msk.msrb.mxu0 %vm144_vm0, %v3245_v1  ;;  %6474 = vmatpush.xpose.msk.msrb.mxu1 %vm144_vm0, %v3261_v55 }
0x14b4   :  { %6455 = vmatpush.xpose.msk.msrb.mxu0 %vm144_vm0, %v3244_v7  ;;  %6475 = vmatpush.xpose.msk.msrb.mxu1 %vm144_vm0, %v3260_v33 }
0x14b7   :  { %6456 = vmatmul.msk.f32.vlgmr.msrb.gmra.mxu0 %vm144_vm0, %v3149_v31  ;;  %6476 = vmatmul.msk.f32.vlgmr.msrb.gmra.mxu1 %vm144_vm0, %v3149_v31 }
0x14b8   :  { %3642 = vmatpush.msra.mxu0 %v3307_v46 }
0x14ba   :  { %3643 = vmatpush.msra.mxu0 %v3306_v21 }
0x14bc   :  { %3644 = vmatpush.msra.mxu0 %v3305_v58 }
0x14be   :  { %3645 = vmatpush.msra.mxu0 %v3304_v39 }
0x14bf   :  { %6457 = vmatmul.msk.f32.gmra.mxu0 %vm144_vm0, %v3152_v54  ;;  %6477 = vmatmul.msk.f32.gmra.mxu1 %vm144_vm0, %v3152_v54 }
0x14c0   :  { %3646 = vmatpush.msra.mxu0 %v3303_v22 }
0x14c2   :  { %3647 = vmatpush.msra.mxu0 %v3302_v27 }
0x14c4   :  { %3648 = vmatpush.msra.mxu0 %v3301_v17 }
0x14c6   :  { %3649 = vmatpush.msra.mxu0 %v3300_v43 }
0x14c7   :  { %6458 = vmatmul.msk.f32.gmra.mxu0 %vm144_vm0, %v3155_v25  ;;  %6478 = vmatmul.msk.f32.gmra.mxu1 %vm144_vm0, %v3155_v25 }
0x14c8   :  { %3650 = vmatpush.msra.mxu0 %v3299_v53 }
0x14ca   :  { %3651 = vmatpush.msra.mxu0 %v3298_v49 }
0x14cc   :  { %3652 = vmatpush.msra.mxu0 %v3297_v35 }
0x14ce   :  { %3653 = vmatpush.msra.mxu0 %v3296_v30 }
0x14cf   :  { %6459 = vmatmul.msk.f32.gmra.mxu0 %vm144_vm0, %v3158_v50  ;;  %6479 = vmatmul.msk.f32.gmra.mxu1 %vm144_vm0, %v3158_v50 }
0x14d0   :  { %3654 = vmatpush.msra.mxu0 %v3295_v44 }
0x14d2   :  { %3655 = vmatpush.msra.mxu0 %v3294_v29 }
0x14d4   :  { %3656 = vmatpush.msra.mxu0 %v3293_v4 }
0x14d6   :  { %3657 = vmatpush.msra.mxu0 %v3292_v37 }
0x1534   :  { %v3433_v2 = vpop.f32.mrf.mxu0  ;;  %v3462_v26 = vpop.f32.mrf.mxu1 }
0x1535   :  { %v3434_v52 = vadd.f32 %v7230_v42, %v3433_v2  ;;  %v3463_v63 = vadd.f32 %v7231_v41, %v3462_v26 }
0x1537   :  { %v3474_v32 = vmax.f32 %v3434_v52, %v3463_v63 }
0x1539   :  { %3475 = vmax.xlane.f32.xlu0 %v3474_v32 }
0x153c   :  { %v3436_v0 = vpop.f32.mrf.mxu0  ;;  %v3465_v14 = vpop.f32.mrf.mxu1 }
0x153d   :  { %v3437_v56 = vadd.f32 %v7232_v10, %v3436_v0  ;;  %v3466_v12 = vadd.f32 %v7233_v40, %v3465_v14 }
0x153f   :  { %v3477_v16 = vmax.f32 %v3437_v56, %v3466_v12 }
0x1541   :  { %3478 = vmax.xlane.f32.xlu1 %v3477_v16  ;;  %v6397_v16 = vld [vmem:[%s11732_s5 + $0x1f8] sm:$0xff] }
0x1542   :  { %6484 = vmatpush.xpose.msk.msra.mxu1 %vm144_vm0, %v6397_v16 }
0x1544   :  { %v3439_v60 = vpop.f32.mrf.mxu0  ;;  %v3468_v28 = vpop.f32.mrf.mxu1 }
0x1545   :  { %v3440_v45 = vadd.f32 %v7234_v9, %v3439_v60  ;;  %v3469_v8 = vadd.f32 %v7235_v57, %v3468_v28  ;;  %v6396_v60 = vld [vmem:[%s11732_s5 + $0x1f0] sm:$0xff]  ;;  %v6395_v28 = vld [vmem:[%s11732_s5 + $0x1e8] sm:$0xff] }
0x1546   :  { %6485 = vmatpush.xpose.msk.msra.mxu1 %vm144_vm0, %v6396_v60  ;;  %v6404_v60 = vld [vmem:[%s11739_s6 + $0x1b0] sm:$0xff] }
0x1547   :  { %v3480_v13 = vmax.f32 %v3440_v45, %v3469_v8 }
0x1549   :  { %3481 = vmax.xlane.f32.xlu2 %v3480_v13 }
0x154a   :  { %6486 = vmatpush.xpose.msk.msra.mxu1 %vm144_vm0, %v6395_v28  ;;  %v6403_v28 = vld [vmem:[%s11739_s6 + $0x1a8] sm:$0xff] }
0x154c   :  { %v3442_v19 = vpop.f32.mrf.mxu0  ;;  %v3471_v51 = vpop.f32.mrf.mxu1 }
0x154d   :  { %v3443_v11 = vadd.f32 %v7236_v34, %v3442_v19  ;;  %v3472_v38 = vadd.f32 %v7237_v3, %v3471_v51 }
0x154f   :  { %v3483_v36 = vmax.f32 %v3443_v11, %v3472_v38 }
0x1551   :  { %3484 = vmax.xlane.f32.xlu0 %v3483_v36 }
0x15ac   :  { %v3476_v1 = vpop.xlane.xlu0 %3475 }
0x15ad   :  { %v3486_v18 = vsub.f32 %v3434_v52, %v3476_v1  ;;  %v3487_v55 = vsub.f32 %v3463_v63, %v3476_v1 }
0x15af   :  { %v3494_v47 = vmul.f32 1.442695, %v3486_v18  ;;  %v3496_v7 = vmul.f32 1.442695, %v3487_v55 }
0x15b1   :  { %6916 = vpow2.f32 %v3494_v47 }
0x15b2   :  { %6918 = vpow2.f32 %v3496_v7 }
0x15b4   :  { %v3479_v59 = vpop.xlane.xlu1 %3478 }
0x15b5   :  { %v3488_v33 = vsub.f32 %v3437_v56, %v3479_v59  ;;  %v3489_v46 = vsub.f32 %v3466_v12, %v3479_v59 }
0x15b7   :  { %v6917_v31 = vpop.eup %6916  ;;  %v3498_v48 = vmul.f32 1.442695, %v3488_v33  ;;  %v3500_v21 = vmul.f32 1.442695, %v3489_v46 }
0x15b8   :  { %v6919_v58 = vpop.eup %6918  ;;  %3526 = vmatmul.f32.vlgmr.msrb.gmra.mxu2 %v6917_v31 }
0x15b9   :  { %6920 = vpow2.f32 %v3498_v48  ;;  %3555 = vmatmul.f32.vlgmr.msra.gmra.mxu3 %v6919_v58  ;;  %3658 = vmatmul.f32.vlgmr.msra.gmra.mxu0 %v6919_v58 }
0x15ba   :  { %6922 = vpow2.f32 %v3500_v21  ;;  %v3675_v21 = vperm.slane %v9855_v23, 3 }
0x15bc   :  { %v3482_v39 = vpop.xlane.xlu2 %3481 }
0x15bd   :  { %v3490_v22 = vsub.f32 %v3440_v45, %v3482_v39  ;;  %v3491_v54 = vsub.f32 %v3469_v8, %v3482_v39  ;;  %v6394_v45 = vld [vmem:[%s11732_s5 + $0x1e0] sm:$0xff] }
0x15be   :  { %6487 = vmatpush.xpose.msk.msra.mxu1 %vm144_vm0, %v6394_v45  ;;  %v6401_v45 = vld [vmem:[%s11739_s6 + $0x198] sm:$0xff] }
0x15bf   :  { %v6921_v27 = vpop.eup %6920  ;;  %v3502_v15 = vmul.f32 1.442695, %v3490_v22  ;;  %v3504_v17 = vmul.f32 1.442695, %v3491_v54 }
0x15c0   :  { %v6923_v43 = vpop.eup %6922  ;;  %3529 = vmatmul.f32.gmra.mxu2 %v6921_v27 }
0x15c1   :  { %6924 = vpow2.f32 %v3502_v15  ;;  %3558 = vmatmul.f32.gmra.mxu3 %v6923_v43  ;;  %3661 = vmatmul.f32.gmra.mxu0 %v6923_v43 }
0x15c2   :  { %6926 = vpow2.f32 %v3504_v17 }
0x15c4   :  { %v3485_v53 = vpop.xlane.xlu0 %3484 }
0x15c5   :  { %v3492_v25 = vsub.f32 %v3443_v11, %v3485_v53  ;;  %v3493_v49 = vsub.f32 %v3472_v38, %v3485_v53 }
0x15c7   :  { %v6925_v35 = vpop.eup %6924  ;;  %v3506_v20 = vmul.f32 1.442695, %v3492_v25  ;;  %v3508_v30 = vmul.f32 1.442695, %v3493_v49 }
0x15c8   :  { %v6927_v44 = vpop.eup %6926  ;;  %3532 = vmatmul.f32.gmra.mxu2 %v6925_v35 }
0x15c9   :  { %6928 = vpow2.f32 %v3506_v20  ;;  %3561 = vmatmul.f32.gmra.mxu3 %v6927_v44  ;;  %3664 = vmatmul.f32.gmra.mxu0 %v6927_v44 }
0x15ca   :  { %6930 = vpow2.f32 %v3508_v30 }
0x15cf   :  { %v6929_v50 = vpop.eup %6928 }
0x15d0   :  { %v6931_v29 = vpop.eup %6930  ;;  %3535 = vmatmul.f32.gmra.mxu2 %v6929_v50 }
0x15d1   :  { %3564 = vmatmul.f32.gmra.mxu3 %v6931_v29  ;;  %3667 = vmatmul.f32.gmra.mxu0 %v6931_v29 }
0x15d9   :  { %3629 = vmatmul.f32.vlgmr.msrb.gmra.mxu3 %v6917_v31 }
0x15e1   :  { %3632 = vmatmul.f32.gmra.mxu3 %v6921_v27 }
0x15e9   :  { %3635 = vmatmul.f32.gmra.mxu3 %v6925_v35 }
0x15f1   :  { %3638 = vmatmul.f32.gmra.mxu3 %v6929_v50 }
0x1636   :  { %v3659_v8 = vpop.f32.mrf.mxu0 }
0x163b   :  { %v3527_v4 = vpop.f32.mrf.mxu2 }
0x163c   :  { %v3556_v37 = vpop.f32.mrf.mxu3 }
0x163d   :  { %v3557_v2 = vadd.f32 %v3556_v37, %v3527_v4 }
0x163e   :  { %v3662_v11 = vpop.f32.mrf.mxu0 }
0x163f   :  { %6932 = vrcp.f32 %v3557_v2 }
0x1643   :  { %v3530_v26 = vpop.f32.mrf.mxu2 }
0x1644   :  { %v3559_v42 = vpop.f32.mrf.mxu3 }
0x1645   :  { %v6933_v52 = vpop.eup %6932  ;;  %v3560_v41 = vadd.f32 %v3559_v42, %v3530_v26 }
0x1646   :  { %6480 = vmatmul.msk.f32.vlgmr.msra.gmra.mxu2 %vm610_vm1, %v6933_v52  ;;  %v3665_v18 = vpop.f32.mrf.mxu0 }
0x1647   :  { %6934 = vrcp.f32 %v3560_v41 }
0x164b   :  { %v3533_v63 = vpop.f32.mrf.mxu2 }
0x164c   :  { %v3562_v32 = vpop.f32.mrf.mxu3 }
0x164d   :  { %v6935_v0 = vpop.eup %6934  ;;  %v3563_v14 = vadd.f32 %v3562_v32, %v3533_v63 }
0x164e   :  { %6481 = vmatmul.msk.f32.gmra.mxu2 %vm610_vm1, %v6935_v0  ;;  %v3668_v33 = vpop.f32.mrf.mxu0 }
0x164f   :  { %6936 = vrcp.f32 %v3563_v14 }
0x1653   :  { %v3536_v10 = vpop.f32.mrf.mxu2 }
0x1654   :  { %v3565_v56 = vpop.f32.mrf.mxu3 }
0x1655   :  { %v6937_v40 = vpop.eup %6936  ;;  %v3566_v12 = vadd.f32 %v3565_v56, %v3536_v10 }
0x1656   :  { %6482 = vmatmul.msk.f32.gmra.mxu2 %vm610_vm1, %v6937_v40 }
0x1657   :  { %6938 = vrcp.f32 %v3566_v12 }
0x165c   :  { %v3630_v57 = vpop.f32.mrf.mxu3 }
0x165d   :  { %v6939_v9 = vpop.eup %6938  ;;  %v3660_v13 = vadd.f32 %v3659_v8, %v3630_v57  ;;  %v6400_v57 = vld [vmem:[%s11739_s6 + $0x190] sm:$0xff]  ;;  %v6399_v8 = vld [vmem:[%s11739_s6 + $0x188] sm:$0xff] }
0x165e   :  { %6483 = vmatmul.msk.f32.gmra.mxu2 %vm610_vm1, %v6939_v9  ;;  %v6402_v9 = vld [vmem:[%s11739_s6 + $0x1a0] sm:$0xff] }
0x1664   :  { %v3633_v19 = vpop.f32.mrf.mxu3 }
0x1665   :  { %v3663_v3 = vadd.f32 %v3662_v11, %v3633_v19 }
0x166c   :  { %v3636_v1 = vpop.f32.mrf.mxu3 }
0x166d   :  { %v3666_v55 = vadd.f32 %v3665_v18, %v3636_v1 }
0x1674   :  { %v3639_v59 = vpop.f32.mrf.mxu3 }
0x1675   :  { %v3669_v46 = vadd.f32 %v3668_v33, %v3639_v59 }
0x16c9   :  { %v3601_v51 = vpop.f32.mrf.mxu2 }
0x16ca   :  { %v3671_v34 = vmul.f32 %v3660_v13, %v3601_v51  ;;  %v6398_v13 = vld [vmem:[%s11739_s6 + $0x180] sm:$0xff] }
0x16cc   :  { %6488 = vmatmul.msk.f32.vlgmr.msra.gmra.mxu1 %vm144_vm0, %v3671_v34 }
0x16d1   :  { %v3604_v38 = vpop.f32.mrf.mxu2 }
0x16d2   :  { %v3672_v36 = vmul.f32 %v3663_v3, %v3604_v38 }
0x16d4   :  { %6489 = vmatmul.msk.f32.gmra.mxu1 %vm144_vm0, %v3672_v36 }
0x16d9   :  { %v3607_v47 = vpop.f32.mrf.mxu2 }
0x16da   :  { %v3673_v7 = vmul.f32 %v3666_v55, %v3607_v47 }
0x16dc   :  { %6490 = vmatmul.msk.f32.gmra.mxu1 %vm144_vm0, %v3673_v7 }
0x16e1   :  { %v3610_v31 = vpop.f32.mrf.mxu2 }
0x16e2   :  { %v3674_v48 = vmul.f32 %v3669_v46, %v3610_v31 }
0x16e4   :  { %6491 = vmatmul.msk.f32.gmra.mxu1 %vm144_vm0, %v3674_v48 }
0x1749   :  { %v3717_v58 = vpop.f32.mrf.mxu1 }
0x174a   :  { %v3718_v39 = vadd.f32 %v3717_v58, %v3675_v21  ;;  %v6413_v58 = vld [vmem:[%s11739_s6 + $0x1f8] sm:$0xff] }
0x174b   :  { %3926 = vmatpush.msra.mxu3 %v6413_v58 }
0x174c   :  { %v3729_v22 = vadd.f32 %v3718_v39, %v9776_v61  ;;  %v6412_v39 = vld [vmem:[%s11739_s6 + $0x1f0] sm:$0xff] }
0x174d   :  { %3927 = vmatpush.msra.mxu3 %v6412_v39 }
0x174e   :  { %v3733_v54 = vsel %vm144_vm0, %v3729_v22, 0.0 }
0x174f   :  { %3734 = vadd.xlane.f32.xlu1 %v3733_v54 }
0x1751   :  { %v3720_v27 = vpop.f32.mrf.mxu1 }
0x1752   :  { %v3721_v15 = vadd.f32 %v3720_v27, %v3675_v21  ;;  %v3826_v27 = vperm.slane %v9855_v23, 6 }
0x1754   :  { %v3730_v17 = vadd.f32 %v3721_v15, %v9806_v62  ;;  %v6405_v62 = vld [vmem:[%s11739_s6 + $0x1b8] sm:$0xff] }
0x1755   :  { %6493 = vmatpush.xpose.msk.msrb.mxu2 %vm144_vm0, %v6405_v62 }
0x1756   :  { %v3736_v43 = vsel %vm144_vm0, %v3730_v17, 0.0 }
0x1757   :  { %3737 = vadd.xlane.f32.xlu2 %v3736_v43 }
0x1759   :  { %v3723_v53 = vpop.f32.mrf.mxu1  ;;  %6494 = vmatpush.xpose.msk.msrb.mxu2 %vm144_vm0, %v6404_v60 }
0x175a   :  { %v3724_v25 = vadd.f32 %v3723_v53, %v3675_v21 }
0x175c   :  { %v3731_v49 = vadd.f32 %v3724_v25, %v9823_v6 }
0x175d   :  { %6495 = vmatpush.xpose.msk.msrb.mxu2 %vm144_vm0, %v6403_v28 }
0x175e   :  { %v3739_v35 = vsel %vm144_vm0, %v3731_v49, 0.0 }
0x175f   :  { %3740 = vadd.xlane.f32.xlu0 %v3739_v35  ;;  %v6410_v35 = vld [vmem:[%s11739_s6 + $0x1e0] sm:$0xff] }
0x1761   :  { %v3726_v20 = vpop.f32.mrf.mxu1  ;;  %6496 = vmatpush.xpose.msk.msrb.mxu2 %vm144_vm0, %v6402_v9 }
0x1762   :  { %v3727_v30 = vadd.f32 %v3726_v20, %v3675_v21  ;;  %v10233_v21 = vperm.slane %v9855_v23, 5 }
0x1764   :  { %v3732_v61 = vadd.f32 %v3727_v30, %v9839_v24 }
0x1765   :  { %6497 = vmatpush.xpose.msk.msrb.mxu2 %vm144_vm0, %v6401_v45 }
0x1766   :  { %v3742_v44 = vsel %vm144_vm0, %v3732_v61, 0.0 }
0x1767   :  { %3743 = vadd.xlane.f32.xlu1 %v3742_v44 }
0x1769   :  { %6498 = vmatpush.xpose.msk.msrb.mxu2 %vm144_vm0, %v6400_v57 }
0x176d   :  { %6499 = vmatpush.xpose.msk.msrb.mxu2 %vm144_vm0, %v6399_v8 }
0x1771   :  { %6500 = vmatpush.xpose.msk.msrb.mxu2 %vm144_vm0, %v6398_v13 }
0x17c2   :  { %v3735_v50 = vpop.xlane.xlu1 %3734 }
0x17c3   :  { %v3745_v29 = vmul.f32 %v3735_v50, %v8134_v5  ;;  %v6409_v50 = vld [vmem:[%s11739_s6 + $0x1d8] sm:$0xff] }
0x17c5   :  { %v10178_v6 = vsub.f32 %v3729_v22, %v3745_v29 }
0x17c7   :  { %v3753_v4 = vmul.f32 %v10178_v6, %v10178_v6 }
0x17c9   :  { %v3757_v37 = vsel %vm144_vm0, %v3753_v4, 0.0 }
0x17ca   :  { %3758 = vadd.xlane.f32.xlu2 %v3757_v37  ;;  %v3738_v24 = vpop.xlane.xlu2 %3737 }
0x17cb   :  { %v3746_v2 = vmul.f32 %v3738_v24, %v8134_v5 }
0x17cd   :  { %v10184_v26 = vsub.f32 %v3730_v17, %v3746_v2  ;;  %v6411_v17 = vld [vmem:[%s11739_s6 + $0x1e8] sm:$0xff] }
0x17ce   :  { %3928 = vmatpush.msra.mxu3 %v6411_v17  ;;  %v6407_v2 = vld [vmem:[%s11739_s6 + $0x1c8] sm:$0xff] }
0x17cf   :  { %v3754_v42 = vmul.f32 %v10184_v26, %v10184_v26 }
0x17d0   :  { %3929 = vmatpush.msra.mxu3 %v6410_v35 }
0x17d1   :  { %v3760_v52 = vsel %vm144_vm0, %v3754_v42, 0.0 }
0x17d2   :  { %3761 = vadd.xlane.f32.xlu0 %v3760_v52  ;;  %v3741_v41 = vpop.xlane.xlu0 %3740  ;;  %3930 = vmatpush.msra.mxu3 %v6409_v50 }
0x17d3   :  { %v3747_v63 = vmul.f32 %v3741_v41, %v8134_v5 }
0x17d5   :  { %v10190_v32 = vsub.f32 %v3731_v49, %v3747_v63 }
0x17d7   :  { %v3755_v0 = vmul.f32 %v10190_v32, %v10190_v32 }
0x17d9   :  { %v3763_v14 = vsel %vm144_vm0, %v3755_v0, 0.0 }
0x17da   :  { %3764 = vadd.xlane.f32.xlu1 %v3763_v14  ;;  %v3744_v10 = vpop.xlane.xlu1 %3743 }
0x17db   :  { %v3748_v56 = vmul.f32 %v3744_v10, %v8134_v5 }
0x17dd   :  { %v10196_v40 = vsub.f32 %v3732_v61, %v3748_v56 }
0x17df   :  { %v3756_v12 = vmul.f32 %v10196_v40, %v10196_v40 }
0x17e1   :  { %v3766_v16 = vsel %vm144_vm0, %v3756_v12, 0.0 }
0x17e2   :  { %3767 = vadd.xlane.f32.xlu2 %v3766_v16 }
0x183d   :  { %v3759_v19 = vpop.xlane.xlu2 %3758 }
0x183e   :  { %v3769_v51 = vmul.f32 %v3759_v19, %v8134_v5 }
0x1840   :  { %v3773_v34 = vadd.f32 1e-05, %v3769_v51  ;;  %v6791_v51 = vld [vmem:[%s11740_s8 + $0x3] ss:$0 sm:$0xff] }
0x1842   :  { %6940 = vrsqrt.f32 %v3773_v34  ;;  %vm3783_vm11 = vweird.f32 %v3773_v34 }
0x1845   :  { %v3762_v11 = vpop.xlane.xlu0 %3761 }
0x1846   :  { %v3770_v3 = vmul.f32 %v3762_v11, %v8134_v5 }
0x1848   :  { %v6941_v38 = vpop.eup %6940  ;;  %v3774_v36 = vadd.f32 1e-05, %v3770_v3 }
0x1849   :  { %v3778_v1 = vmul.f32 %v6941_v38, %v3773_v34  ;;  %vm3784_vm10 = vweird.f32 %v6941_v38 }
0x184a   :  { %6942 = vrsqrt.f32 %v3774_v36  ;;  %vm3785_vm12 = vmor %vm3783_vm11, %vm3784_vm10  ;;  %vm3793_vm14 = vweird.f32 %v3774_v36 }
0x184b   :  { %v3779_v18 = vmul.f32 %v6941_v38, %v3778_v1 }
0x184d   :  { %v3780_v55 = vmul.f32 0.5, %v3779_v18  ;;  %v3765_v47 = vpop.xlane.xlu1 %3764 }
0x184e   :  { %v3771_v7 = vmul.f32 %v3765_v47, %v8134_v5 }
0x184f   :  { %v3781_v59 = vsub.f32 1.5, %v3780_v55 }
0x1850   :  { %v6943_v33 = vpop.eup %6942  ;;  %v3775_v46 = vadd.f32 1e-05, %v3771_v7 }
0x1851   :  { %v3782_v31 = vmul.f32 %v6941_v38, %v3781_v59  ;;  %v3788_v48 = vmul.f32 %v6943_v33, %v3774_v36  ;;  %vm3794_vm13 = vweird.f32 %v6943_v33 }
0x1852   :  { %6944 = vrsqrt.f32 %v3775_v46  ;;  %vm3795_vm2 = vmor %vm3793_vm14, %vm3794_vm13  ;;  %vm3803_vm4 = vweird.f32 %v3775_v46 }
0x1853   :  { %v3786_v22 = vsel %vm3785_vm12, %v6941_v38, %v3782_v31  ;;  %v3789_v54 = vmul.f32 %v6943_v33, %v3788_v48 }
0x1854   :  { %v3817_v15 = vmul.f32 %v3786_v22, %v10178_v6  ;;  %v6408_v6 = vld [vmem:[%s11739_s6 + $0x1d0] sm:$0xff] }
0x1855   :  { %v3790_v43 = vmul.f32 0.5, %v3789_v54  ;;  %v3768_v53 = vpop.xlane.xlu2 %3767  ;;  %3931 = vmatpush.msra.mxu3 %v6408_v6 }
0x1856   :  { %v3822_v25 = vmul.f32 %v10233_v21, %v3817_v15  ;;  %v3772_v49 = vmul.f32 %v3768_v53, %v8134_v5 }
0x1857   :  { %v3791_v20 = vsub.f32 1.5, %v3790_v43  ;;  %3932 = vmatpush.msra.mxu3 %v6407_v2 }
0x1858   :  { %v6945_v30 = vpop.eup %6944  ;;  %v10251_v61 = vadd.f32 %v3826_v27, %v3822_v25  ;;  %v3776_v44 = vadd.f32 1e-05, %v3772_v49 }
0x1859   :  { %v3792_v62 = vmul.f32 %v6943_v33, %v3791_v20  ;;  %v3798_v29 = vmul.f32 %v6945_v30, %v3775_v46  ;;  %vm3804_vm3 = vweird.f32 %v6945_v30  ;;  %v6520_v20 = vld [vmem:[%s11732_s5 + $0x238] sm:$0xff] }
0x185a   :  { %6946 = vrsqrt.f32 %v3776_v44  ;;  %6501 = vmatmul.msk.f32.vlgmr.msrb.gmra.mxu2 %vm144_vm0, %v10251_v61  ;;  %vm3805_vm5 = vmor %vm3803_vm4, %vm3804_vm3  ;;  %vm3813_vm7 = vweird.f32 %v3776_v44  ;;  %6555 = vmatpush.xpose.msk.msrb.mxu1 %vm144_vm0, %v6520_v20 }
0x185b   :  { %v3796_v4 = vsel %vm3795_vm2, %v6943_v33, %v3792_v62  ;;  %v3799_v37 = vmul.f32 %v6945_v30, %v3798_v29  ;;  %v3905_v33 = vperm.slane %v9855_v23, 4 }
0x185c   :  { %v3818_v24 = vmul.f32 %v3796_v4, %v10184_v26 }
0x185d   :  { %v3800_v42 = vmul.f32 0.5, %v3799_v37 }
0x185e   :  { %v3823_v52 = vmul.f32 %v10233_v21, %v3818_v24 }
0x185f   :  { %v3801_v41 = vsub.f32 1.5, %v3800_v42 }
0x1860   :  { %v6947_v63 = vpop.eup %6946  ;;  %v3828_v0 = vadd.f32 %v3826_v27, %v3823_v52 }
0x1861   :  { %v3802_v14 = vmul.f32 %v6945_v30, %v3801_v41  ;;  %v3808_v10 = vmul.f32 %v6947_v63, %v3776_v44  ;;  %vm3814_vm6 = vweird.f32 %v6947_v63 }
0x1862   :  { %6502 = vmatmul.msk.f32.gmra.mxu2 %vm144_vm0, %v3828_v0  ;;  %vm3815_vm8 = vmor %vm3813_vm7, %vm3814_vm6 }
0x1863   :  { %v3806_v26 = vsel %vm3805_vm5, %v6945_v30, %v3802_v14  ;;  %v3809_v56 = vmul.f32 %v6947_v63, %v3808_v10 }
0x1864   :  { %v3819_v12 = vmul.f32 %v3806_v26, %v10190_v32  ;;  %v6406_v32 = vld [vmem:[%s11739_s6 + $0x1c0] sm:$0xff] }
0x1865   :  { %v3810_v16 = vmul.f32 0.5, %v3809_v56  ;;  %3933 = vmatpush.msra.mxu3 %v6406_v32  ;;  %v6516_v56 = vld [vmem:[%s11732_s5 + $0x218] sm:$0xff] }
0x1866   :  { %v3824_v60 = vmul.f32 %v10233_v21, %v3819_v12  ;;  %v6524_v12 = vld [vmem:[%s11732_s5 + $0x258] sm:$0xff]  ;;  %6547 = vmatpush.xpose.msk.msrb.mxu0 %vm144_vm0, %v6516_v56 }
0x1867   :  { %v3811_v28 = vsub.f32 1.5, %v3810_v16  ;;  %6563 = vmatpush.xpose.msk.msra.mxu2 %vm144_vm0, %v6524_v12  ;;  %v6519_v16 = vld [vmem:[%s11732_s5 + $0x230] sm:$0xff]  ;;  %v7238_v32 = vld [vmem:[%s11737_s3 + $0x78] sm:$0xff] }
0x1868   :  { %v3829_v9 = vadd.f32 %v3826_v27, %v3824_v60  ;;  %v6515_v60 = vld [vmem:[%s11732_s5 + $0x210] sm:$0xff]  ;;  %6556 = vmatpush.xpose.msk.msrb.mxu1 %vm144_vm0, %v6519_v16  ;;  %v7264_v12 = vld [vmem:[%s11737_s3 + $0x98] sm:$0xff] }
0x1869   :  { %v3812_v45 = vmul.f32 %v6947_v63, %v3811_v28  ;;  %v6523_v28 = vld [vmem:[%s11732_s5 + $0x250] sm:$0xff] }
0x186a   :  { %6503 = vmatmul.msk.f32.gmra.mxu2 %vm144_vm0, %v3829_v9  ;;  %6548 = vmatpush.xpose.msk.msrb.mxu0 %vm144_vm0, %v6515_v60 }
0x186b   :  { %v3816_v57 = vsel %vm3815_vm8, %v6947_v63, %v3812_v45  ;;  %6564 = vmatpush.xpose.msk.msra.mxu2 %vm144_vm0, %v6523_v28  ;;  %v6514_v45 = vld [vmem:[%s11732_s5 + $0x208] sm:$0xff]  ;;  %v7265_v28 = vld [vmem:[%s11737_s3 + $0x10] sm:$0xff] }
0x186c   :  { %v3820_v8 = vmul.f32 %v3816_v57, %v10196_v40  ;;  %v6522_v57 = vld [vmem:[%s11732_s5 + $0x248] sm:$0xff] }
0x186e   :  { %v3825_v13 = vmul.f32 %v10233_v21, %v3820_v8  ;;  %6549 = vmatpush.xpose.msk.msrb.mxu0 %vm144_vm0, %v6514_v45  ;;  %v6517_v8 = vld [vmem:[%s11732_s5 + $0x220] sm:$0xff] }
0x186f   :  { %6565 = vmatpush.xpose.msk.msra.mxu2 %vm144_vm0, %v6522_v57 }
0x1870   :  { %v3830_v19 = vadd.f32 %v3826_v27, %v3825_v13  ;;  %v6513_v13 = vld [vmem:[%s11732_s5 + $0x200] sm:$0xff] }
0x1872   :  { %6504 = vmatmul.msk.f32.gmra.mxu2 %vm144_vm0, %v3830_v19  ;;  %6550 = vmatpush.xpose.msk.msrb.mxu0 %vm144_vm0, %v6513_v13 }
0x18dd   :  { %v3889_v34 = vpop.f32.mrf.mxu2 }
0x18de   :  { %v3890_v11 = vadd.f32 %v6791_v51, %v3889_v34 }
0x18e0   :  { %v3901_v3 = vmax.f32 %v3890_v11, 0.0  ;;  %v7240_v11 = vld [vmem:[%s11737_s3 + $0x70] sm:$0xff] }
0x18e2   :  { %6505 = vmatmul.msk.f32.vlgmr.msra.gmra.mxu3 %vm951_vm15, %v3901_v3 }
0x18e5   :  { %v3892_v40 = vpop.f32.mrf.mxu2 }
0x18e6   :  { %v3893_v38 = vadd.f32 %v6791_v51, %v3892_v40  ;;  %v7241_v40 = vld [vmem:[%s11737_s3 + $0xf0] sm:$0xff] }
0x18e8   :  { %v3902_v36 = vmax.f32 %v3893_v38, 0.0  ;;  %v7242_v38 = vld [vmem:[%s11737_s3 + $0x68] sm:$0xff] }
0x18ea   :  { %6506 = vmatmul.msk.f32.gmra.mxu3 %vm951_vm15, %v3902_v36 }
0x18ed   :  { %v3895_v1 = vpop.f32.mrf.mxu2 }
0x18ee   :  { %v3896_v18 = vadd.f32 %v6791_v51, %v3895_v1  ;;  %v7243_v1 = vld [vmem:[%s11737_s3 + $0xe8] sm:$0xff] }
0x18f0   :  { %v3903_v55 = vmax.f32 %v3896_v18, 0.0  ;;  %v7244_v18 = vld [vmem:[%s11737_s3 + $0x60] sm:$0xff] }
0x18f2   :  { %6507 = vmatmul.msk.f32.gmra.mxu3 %vm951_vm15, %v3903_v55  ;;  %v7245_v55 = vld [vmem:[%s11737_s3 + $0xe0] sm:$0xff] }
0x18f5   :  { %v3898_v47 = vpop.f32.mrf.mxu2 }
0x18f6   :  { %v3899_v7 = vadd.f32 %v6791_v51, %v3898_v47  ;;  %v7239_v51 = vld [vmem:[%s11737_s3 + $0xf8] sm:$0xff] }
0x18f7   :  { %v7246_v47 = vld [vmem:[%s11737_s3 + $0x58] sm:$0xff] }
0x18f8   :  { %v3904_v59 = vmax.f32 %v3899_v7, 0.0  ;;  %v7247_v7 = vld [vmem:[%s11737_s3 + $0xd8] sm:$0xff] }
0x18fa   :  { %6508 = vmatmul.msk.f32.gmra.mxu3 %vm951_vm15, %v3904_v59 }
0x1965   :  { %v3935_v46 = vpop.f32.mrf.mxu3 }
0x1966   :  { %v3936_v31 = vadd.f32 %v3935_v46, %v3905_v33 }
0x1968   :  { %v3947_v48 = vadd.f32 %v3936_v31, %v10251_v61  ;;  %v7249_v31 = vld [vmem:[%s11737_s3 + $0xd0] sm:$0xff] }
0x196a   :  { %v3951_v21 = vsel %vm144_vm0, %v3947_v48, 0.0 }
0x196b   :  { %3952 = vadd.xlane.f32.xlu0 %v3951_v21 }
0x196d   :  { %v3938_v58 = vpop.f32.mrf.mxu3 }
0x196e   :  { %v3939_v39 = vadd.f32 %v3938_v58, %v3905_v33 }
0x1970   :  { %v3948_v22 = vadd.f32 %v3939_v39, %v3828_v0  ;;  %v7251_v39 = vld [vmem:[%s11737_s3 + $0xc8] sm:$0xff] }
0x1972   :  { %v3954_v54 = vsel %vm144_vm0, %v3948_v22, 0.0 }
0x1973   :  { %3955 = vadd.xlane.f32.xlu1 %v3954_v54  ;;  %v7252_v54 = vld [vmem:[%s11737_s3 + $0x40] sm:$0xff] }
0x1975   :  { %v3941_v27 = vpop.f32.mrf.mxu3 }
0x1976   :  { %v3942_v15 = vadd.f32 %v3941_v27, %v3905_v33  ;;  %v7253_v27 = vld [vmem:[%s11737_s3 + $0xc0] sm:$0xff] }
0x1978   :  { %v3949_v17 = vadd.f32 %v3942_v15, %v3829_v9  ;;  %v6518_v9 = vld [vmem:[%s11732_s5 + $0x228] sm:$0xff] }
0x1979   :  { %6557 = vmatpush.xpose.msk.msrb.mxu1 %vm144_vm0, %v6518_v9 }
0x197a   :  { %v3957_v43 = vsel %vm144_vm0, %v3949_v17, 0.0 }
0x197b   :  { %3958 = vadd.xlane.f32.xlu2 %v3957_v43  ;;  %v7255_v43 = vld [vmem:[%s11737_s3 + $0xb8] sm:$0xff] }
0x197d   :  { %v3944_v23 = vpop.f32.mrf.mxu3  ;;  %6558 = vmatpush.xpose.msk.msrb.mxu1 %vm144_vm0, %v6517_v8  ;;  %v7267_v8 = vld [vmem:[%s11737_s3 + $0x8] sm:$0xff] }
0x197e   :  { %v3945_v53 = vadd.f32 %v3944_v23, %v3905_v33  ;;  %v7248_v33 = vld [vmem:[%s11737_s3 + $0x50] sm:$0xff] }
0x1980   :  { %v3950_v25 = vadd.f32 %v3945_v53, %v3830_v19  ;;  %v6521_v19 = vld [vmem:[%s11732_s5 + $0x240] sm:$0xff] }
0x1981   :  { %6566 = vmatpush.xpose.msk.msra.mxu2 %vm144_vm0, %v6521_v19  ;;  %4495 = vmatpush.msra.mxu1 %v7238_v32 }
0x1982   :  { %v3960_v49 = vsel %vm144_vm0, %v3950_v25, 0.0 }
0x1983   :  { %3961 = vadd.xlane.f32.xlu0 %v3960_v49  ;;  %4496 = vmatpush.msra.mxu1 %v7240_v11 }
0x1985   :  { %4524 = vmatpush.msrb.mxu2 %v7239_v51  ;;  %4497 = vmatpush.msra.mxu1 %v7242_v38  ;;  %v7268_v51 = vld [vmem:[%s11737_s3 + $0x88] sm:$0xff] }
0x1987   :  { %4525 = vmatpush.msrb.mxu2 %v7241_v40  ;;  %4498 = vmatpush.msra.mxu1 %v7244_v18  ;;  %v7271_v18 = vld [vmem:[%s11737_s3 + $0x80] sm:$0xff] }
0x1989   :  { %4526 = vmatpush.msrb.mxu2 %v7243_v1  ;;  %4499 = vmatpush.msra.mxu1 %v7246_v47 }
0x198b   :  { %4527 = vmatpush.msrb.mxu2 %v7245_v55  ;;  %4500 = vmatpush.msra.mxu1 %v7248_v33 }
0x198d   :  { %4528 = vmatpush.msrb.mxu2 %v7247_v7 }
0x198f   :  { %4529 = vmatpush.msrb.mxu2 %v7249_v31 }
0x1991   :  { %4530 = vmatpush.msrb.mxu2 %v7251_v39 }
0x1993   :  { %4531 = vmatpush.msrb.mxu2 %v7253_v27 }
0x1995   :  { %4532 = vmatpush.msrb.mxu2 %v7255_v43 }
0x19de   :  { %v3953_v35 = vpop.xlane.xlu0 %3952 }
0x19df   :  { %v3963_v30 = vmul.f32 %v3953_v35, %v8134_v5  ;;  %v7257_v35 = vld [vmem:[%s11737_s3 + $0xb0] sm:$0xff] }
0x19e0   :  { %4533 = vmatpush.msrb.mxu2 %v7257_v35  ;;  %v10552_v35 = vld [vmem:[%s11734_s7 + $0x40] sm:$0xff] }
0x19e1   :  { %v10294_v61 = vsub.f32 %v3947_v48, %v3963_v30  ;;  %v7250_v48 = vld [vmem:[%s11737_s3 + $0x48] sm:$0xff] }
0x19e2   :  { %4501 = vmatpush.msra.mxu1 %v7250_v48  ;;  %v7258_v30 = vld [vmem:[%s11737_s3 + $0x28] sm:$0xff] }
0x19e3   :  { %v3971_v44 = vmul.f32 %v10294_v61, %v10294_v61 }
0x19e4   :  { %4502 = vmatpush.msra.mxu1 %v7252_v54 }
0x19e5   :  { %v3975_v50 = vsel %vm144_vm0, %v3971_v44, 0.0 }
0x19e6   :  { %3976 = vadd.xlane.f32.xlu1 %v3975_v50  ;;  %v3956_v62 = vpop.xlane.xlu1 %3955 }
0x19e7   :  { %v3964_v29 = vmul.f32 %v3956_v62, %v8134_v5  ;;  %v7259_v62 = vld [vmem:[%s11737_s3 + $0xa8] sm:$0xff] }
0x19e8   :  { %4534 = vmatpush.msrb.mxu2 %v7259_v62 }
0x19e9   :  { %v10300_v6 = vsub.f32 %v3948_v22, %v3964_v29  ;;  %v6415_v29 = vld [vmem:[%s11734_s7 + $0x38] sm:$0xff] }
0x19eb   :  { %v3972_v4 = vmul.f32 %v10300_v6, %v10300_v6 }
0x19ed   :  { %v3978_v37 = vsel %vm144_vm0, %v3972_v4, 0.0 }
0x19ee   :  { %v3959_v24 = vpop.xlane.xlu2 %3958  ;;  %3979 = vadd.xlane.f32.xlu2 %v3978_v37 }
0x19ef   :  { %v3965_v2 = vmul.f32 %v3959_v24, %v8134_v5  ;;  %v7260_v24 = vld [vmem:[%s11737_s3 + $0x20] sm:$0xff] }
0x19f1   :  { %v10306_v42 = vsub.f32 %v3949_v17, %v3965_v2  ;;  %v7254_v17 = vld [vmem:[%s11737_s3 + $0x38] sm:$0xff]  ;;  %v7261_v2 = vld [vmem:[%s11734_s7 + $0x30] sm:$0xff] }
0x19f2   :  { %4503 = vmatpush.msra.mxu1 %v7254_v17 }
0x19f3   :  { %v3973_v52 = vmul.f32 %v10306_v42, %v10306_v42 }
0x19f5   :  { %v3981_v41 = vsel %vm144_vm0, %v3973_v52, 0.0  ;;  %v10445_v52 = vperm.slane %v7261_v2, 7  ;;  %v4187_v2 = vperm.slane %v10552_v35, 2 }
0x19f6   :  { %v3962_v63 = vpop.xlane.xlu0 %3961  ;;  %3982 = vadd.xlane.f32.xlu0 %v3981_v41  ;;  %v7262_v41 = vld [vmem:[%s11737_s3 + $0xa0] sm:$0xff] }
0x19f7   :  { %v3966_v0 = vmul.f32 %v3962_v63, %v8134_v5  ;;  %4535 = vmatpush.msrb.mxu2 %v7262_v41 }
0x19f9   :  { %v10312_v14 = vsub.f32 %v3950_v25, %v3966_v0  ;;  %v7256_v25 = vld [vmem:[%s11737_s3 + $0x30] sm:$0xff]  ;;  %4536 = vmatpush.msrb.mxu2 %v7264_v12 }
0x19fa   :  { %4504 = vmatpush.msra.mxu1 %v7256_v25 }
0x19fb   :  { %v3974_v10 = vmul.f32 %v10312_v14, %v10312_v14 }
0x19fc   :  { %4505 = vmatpush.msra.mxu1 %v7258_v30 }
0x19fd   :  { %v3984_v26 = vsel %vm144_vm0, %v3974_v10, 0.0  ;;  %v7263_v10 = vld [vmem:[%s11737_s3 + $0x18] sm:$0xff] }
0x19fe   :  { %3985 = vadd.xlane.f32.xlu1 %v3984_v26  ;;  %4506 = vmatpush.msra.mxu1 %v7260_v24  ;;  %v10455_v26 = vperm.slane %v6415_v29, 0  ;;  %v7272_v29 = vld [vmem:[%s11735_s2 + $0x78] sm:$0xff] }
0x1a00   :  { %4507 = vmatpush.msra.mxu1 %v7263_v10  ;;  %v10582_v10 = vld [vmem:[%s11735_s2 + $0xf0] sm:$0xff] }
0x1a02   :  { %4508 = vmatpush.msra.mxu1 %v7265_v28 }
0x1a04   :  { %4509 = vmatpush.msra.mxu1 %v7267_v8 }
0x1a59   :  { %v3977_v34 = vpop.xlane.xlu1 %3976 }
0x1a5a   :  { %v3987_v3 = vmul.f32 %v3977_v34, %v8134_v5 }
0x1a5c   :  { %v3991_v36 = vadd.f32 1e-05, %v3987_v3  ;;  %v7269_v3 = vld [vmem:[%s11737_s3] sm:$0xff] }
0x1a5d   :  { %4510 = vmatpush.msra.mxu1 %v7269_v3 }
0x1a5e   :  { %6948 = vrsqrt.f32 %v3991_v36  ;;  %vm4001_vm10 = vweird.f32 %v3991_v36 }
0x1a61   :  { %v3980_v59 = vpop.xlane.xlu2 %3979 }
0x1a62   :  { %v3988_v46 = vmul.f32 %v3980_v59, %v8134_v5 }
0x1a64   :  { %v6949_v21 = vpop.eup %6948  ;;  %v10402_v58 = vadd.f32 1e-05, %v3988_v46 }
0x1a65   :  { %v3996_v22 = vmul.f32 %v6949_v21, %v3991_v36  ;;  %vm4002_vm9 = vweird.f32 %v6949_v21  ;;  %v7270_v36 = vld [vmem:[%s11738_s4] sm:$0xff] }
0x1a66   :  { %6950 = vrsqrt.f32 %v10402_v58  ;;  %vm4003_vm11 = vmor %vm4001_vm10, %vm4002_vm9  ;;  %vm4011_vm13 = vweird.f32 %v10402_v58 }
0x1a67   :  { %v3997_v15 = vmul.f32 %v6949_v21, %v3996_v22 }
0x1a69   :  { %v3998_v23 = vmul.f32 0.5, %v3997_v15  ;;  %v3983_v53 = vpop.xlane.xlu0 %3982 }
0x1a6a   :  { %v3989_v49 = vmul.f32 %v3983_v53, %v8134_v5 }
0x1a6b   :  { %v3999_v20 = vsub.f32 1.5, %v3998_v23 }
0x1a6c   :  { %v6951_v44 = vpop.eup %6950  ;;  %v10430_v50 = vadd.f32 1e-05, %v3989_v49 }
0x1a6d   :  { %v4000_v4 = vmul.f32 %v6949_v21, %v3999_v20  ;;  %v4006_v37 = vmul.f32 %v6951_v44, %v10402_v58  ;;  %vm4012_vm12 = vweird.f32 %v6951_v44  ;;  %v4145_v20 = vperm.slane %v10552_v35, 1 }
0x1a6e   :  { %6952 = vrsqrt.f32 %v10430_v50  ;;  %vm4013_vm14 = vmor %vm4011_vm13, %vm4012_vm12  ;;  %vm4021_vm3 = vweird.f32 %v10430_v50 }
0x1a6f   :  { %v4004_v63 = vsel %vm4003_vm11, %v6949_v21, %v4000_v4  ;;  %v4007_v0 = vmul.f32 %v6951_v44, %v4006_v37  ;;  %v10566_v37 = vld [vmem:[%s11735_s2 + $0xf8] sm:$0xff] }
0x1a70   :  { %v4035_v56 = vmul.f32 %v4004_v63, %v10294_v61  ;;  %v7266_v61 = vld [vmem:[%s11737_s3 + $0x90] sm:$0xff] }
0x1a71   :  { %v4008_v16 = vmul.f32 0.5, %v4007_v0  ;;  %v3986_v60 = vpop.xlane.xlu1 %3985  ;;  %4537 = vmatpush.msrb.mxu2 %v7266_v61  ;;  %v7274_v63 = vld [vmem:[%s11735_s2 + $0x70] sm:$0xff]  ;;  %v10604_v61 = vld [vmem:[%s11735_s2 + $0xe8] sm:$0xff] }
0x1a72   :  { %v4040_v9 = vmul.f32 %v10445_v52, %v4035_v56  ;;  %v3990_v45 = vmul.f32 %v3986_v60, %v8134_v5 }
0x1a73   :  { %v4009_v57 = vsub.f32 1.5, %v4008_v16  ;;  %4538 = vmatpush.msrb.mxu2 %v7268_v51  ;;  %v7278_v51 = vld [vmem:[%s11735_s2 + $0x60] sm:$0xff] }
0x1a74   :  { %v6953_v13 = vpop.eup %6952  ;;  %v10473_v19 = vadd.f32 %v10455_v26, %v4040_v9  ;;  %v3994_v32 = vadd.f32 1e-05, %v3990_v45  ;;  %v7276_v9 = vld [vmem:[%s11735_s2 + $0x68] sm:$0xff] }
0x1a75   :  { %v4010_v34 = vmul.f32 %v6951_v44, %v4009_v57  ;;  %v4016_v11 = vmul.f32 %v6953_v13, %v10430_v50  ;;  %4539 = vmatpush.msrb.mxu2 %v7271_v18  ;;  %vm4022_vm2 = vweird.f32 %v6953_v13  ;;  %v10636_v18 = vld [vmem:[%s11735_s2 + $0xd8] sm:$0xff] }
0x1a76   :  { %6509 = vst.msk [vmem:[%s11741_s9 + $0x60] sm:$0xff] %vm144_vm0, %v10473_v19  ;;  %6954 = vrsqrt.f32 %v3994_v32  ;;  %6551 = vmatmul.msk.f32.vlgmr.msrb.gmra.mxu0 %vm144_vm0, %v10473_v19  ;;  %6559 = vmatmul.msk.f32.vlgmr.msrb.gmra.mxu1 %vm144_vm0, %v10473_v19  ;;  %vm4023_vm4 = vmor %vm4021_vm3, %vm4022_vm2  ;;  %vm4031_vm6 = vweird.f32 %v3994_v32 }
0x1a77   :  { %v4014_v40 = vsel %vm4013_vm14, %v6951_v44, %v4010_v34  ;;  %v4017_v38 = vmul.f32 %v6953_v13, %v4016_v11  ;;  %6567 = vmatmul.msk.f32.vlgmr.msra.gmra.mxu2 %vm144_vm0, %v10473_v19  ;;  %4584 = vmatpush.msrb.mxu1 %v7270_v36  ;;  %v10621_v11 = vld [vmem:[%s11735_s2 + $0xe0] sm:$0xff] }
0x1a78   :  { %v4036_v1 = vmul.f32 %v4014_v40, %v10300_v6 }
0x1a79   :  { %v4018_v55 = vmul.f32 0.5, %v4017_v38  ;;  %v7280_v38 = vld [vmem:[%s11735_s2 + $0x58] sm:$0xff] }
0x1a7a   :  { %v4041_v47 = vmul.f32 %v10445_v52, %v4036_v1 }
0x1a7b   :  { %v4019_v7 = vsub.f32 1.5, %v4018_v55 }
0x1a7c   :  { %v6955_v59 = vpop.eup %6954  ;;  %v10503_v33 = vadd.f32 %v10455_v26, %v4041_v47  ;;  %v7282_v47 = vld [vmem:[%s11735_s2 + $0x50] sm:$0xff] }
0x1a7d   :  { %v4020_v46 = vmul.f32 %v6953_v13, %v4019_v7  ;;  %v4026_v31 = vmul.f32 %v6955_v59, %v3994_v32  ;;  %vm4032_vm5 = vweird.f32 %v6955_v59 }
0x1a7e   :  { %6510 = vst.msk [vmem:[%s11741_s9 + $0x68] sm:$0xff] %vm144_vm0, %v10503_v33  ;;  %6552 = vmatmul.msk.f32.gmra.mxu0 %vm144_vm0, %v10503_v33  ;;  %6560 = vmatmul.msk.f32.gmra.mxu1 %vm144_vm0, %v10503_v33  ;;  %vm4033_vm7 = vmor %vm4031_vm6, %vm4032_vm5 }
0x1a7f   :  { %v4024_v6 = vsel %vm4023_vm4, %v6953_v13, %v4020_v46  ;;  %v4027_v48 = vmul.f32 %v6955_v59, %v4026_v31  ;;  %6568 = vmatmul.msk.f32.gmra.mxu2 %vm144_vm0, %v10503_v33 }
0x1a80   :  { %v4037_v21 = vmul.f32 %v4024_v6, %v10306_v42  ;;  %v10654_v6 = vld [vmem:[%s11735_s2 + $0xd0] sm:$0xff] }
0x1a81   :  { %v4028_v58 = vmul.f32 0.5, %v4027_v48 }
0x1a82   :  { %v4042_v39 = vmul.f32 %v10445_v52, %v4037_v21  ;;  %v7285_v21 = vld [vmem:[%s11735_s2 + $0x40] sm:$0xff] }
0x1a83   :  { %v4029_v22 = vsub.f32 1.5, %v4028_v58 }
0x1a84   :  { %v10520_v54 = vadd.f32 %v10455_v26, %v4042_v39  ;;  %v7286_v39 = vld [vmem:[%s11735_s2 + $0x38] sm:$0xff] }
0x1a85   :  { %v4030_v27 = vmul.f32 %v6955_v59, %v4029_v22 }
0x1a86   :  { %6511 = vst.msk [vmem:[%s11741_s9 + $0x70] sm:$0xff] %vm144_vm0, %v10520_v54  ;;  %6553 = vmatmul.msk.f32.gmra.mxu0 %vm144_vm0, %v10520_v54  ;;  %6561 = vmatmul.msk.f32.gmra.mxu1 %vm144_vm0, %v10520_v54 }
0x1a87   :  { %v4034_v42 = vsel %vm4033_vm7, %v6955_v59, %v4030_v27  ;;  %6569 = vmatmul.msk.f32.gmra.mxu2 %vm144_vm0, %v10520_v54  ;;  %v7283_v59 = vld [vmem:[%s11735_s2 + $0x48] sm:$0xff] }
0x1a88   :  { %v4038_v15 = vmul.f32 %v4034_v42, %v10312_v14  ;;  %v10672_v42 = vld [vmem:[%s11735_s2 + $0xc8] sm:$0xff] }
0x1a8a   :  { %v4043_v17 = vmul.f32 %v10445_v52, %v4038_v15 }
0x1a8c   :  { %v10536_v43 = vadd.f32 %v10455_v26, %v4043_v17  ;;  %v7288_v17 = vld [vmem:[%s11735_s2 + $0x30] sm:$0xff] }
0x1a8e   :  { %6512 = vst.msk [vmem:[%s11741_s9 + $0x78] sm:$0xff] %vm144_vm0, %v10536_v43  ;;  %6554 = vmatmul.msk.f32.gmra.mxu0 %vm144_vm0, %v10536_v43  ;;  %6562 = vmatmul.msk.f32.gmra.mxu1 %vm144_vm0, %v10536_v43 }
0x1a8f   :  { %6570 = vmatmul.msk.f32.gmra.mxu2 %vm144_vm0, %v10536_v43 }
0x1af3   :  { %v4175_v14 = vpop.f32.mrf.mxu1 }
0x1af4   :  { %v10595_v28 = vadd.f32 %v4175_v14, %v4145_v20 }
0x1af6   :  { %v4241_v34 = vmul.f32 %v7278_v51, %v10595_v28  ;;  %v4257_v3 = vmul.f32 %v10621_v11, %v10595_v28 }
0x1afa   :  { %v4217_v23 = vpop.f32.mrf.mxu2 }
0x1afb   :  { %v4178_v53 = vpop.f32.mrf.mxu1  ;;  %v10608_v8 = vadd.f32 %v4217_v23, %v4187_v2  ;;  %v7289_v23 = vld [vmem:[%s11735_s2 + $0x28] sm:$0xff] }
0x1afc   :  { %v10573_v52 = vadd.f32 %v4178_v53, %v4145_v20 }
0x1afd   :  { %v4273_v40 = vmul.f32 %v7278_v51, %v10608_v8  ;;  %v4269_v58 = vmul.f32 %v7285_v21, %v10608_v8 }
0x1afe   :  { %v4242_v45 = vmul.f32 %v7276_v9, %v10573_v52  ;;  %v4258_v57 = vmul.f32 %v10604_v61, %v10573_v52  ;;  %v4238_v27 = vmul.f32 %v7283_v59, %v10573_v52  ;;  %v4254_v15 = vmul.f32 %v10672_v42, %v10573_v52 }
0x1aff   :  { %v4234_v51 = vmul.f32 %v7289_v23, %v10573_v52 }
0x1b02   :  { %v4220_v25 = vpop.f32.mrf.mxu2 }
0x1b03   :  { %v4181_v49 = vpop.f32.mrf.mxu1  ;;  %v10592_v16 = vadd.f32 %v4220_v25, %v4187_v2  ;;  %v4237_v25 = vmul.f32 %v7285_v21, %v10595_v28 }
0x1b04   :  { %v10557_v62 = vadd.f32 %v4181_v49, %v4145_v20  ;;  %v10690_v49 = vld [vmem:[%s11735_s2 + $0xc0] sm:$0xff] }
0x1b05   :  { %v4274_v32 = vmul.f32 %v7276_v9, %v10592_v16  ;;  %v4270_v46 = vmul.f32 %v7283_v59, %v10592_v16  ;;  %v4266_v53 = vmul.f32 %v7289_v23, %v10592_v16  ;;  %v7301_v59 = vld [vmem:[%s11735_s2 + $0x90] sm:$0xff] }
0x1b06   :  { %v4243_v0 = vmul.f32 %v7274_v63, %v10557_v62  ;;  %v4259_v26 = vmul.f32 %v10582_v10, %v10557_v62  ;;  %v4239_v31 = vmul.f32 %v7282_v47, %v10557_v62  ;;  %v4255_v48 = vmul.f32 %v10654_v6, %v10557_v62 }
0x1b07   :  { %v4235_v9 = vmul.f32 %v7288_v17, %v10557_v62 }
0x1b0a   :  { %v4223_v30 = vpop.f32.mrf.mxu2 }
0x1b0b   :  { %v4184_v44 = vpop.f32.mrf.mxu1  ;;  %v10586_v56 = vadd.f32 %v4223_v30, %v4187_v2  ;;  %v7291_v30 = vld [vmem:[%s11735_s2 + $0x20] sm:$0xff] }
0x1b0c   :  { %v10555_v50 = vadd.f32 %v4184_v44, %v4145_v20  ;;  %v4253_v20 = vmul.f32 %v10690_v49, %v10595_v28  ;;  %v4265_v44 = vmul.f32 %v7291_v30, %v10608_v8 }
0x1b0d   :  { %v4275_v13 = vmul.f32 %v7274_v63, %v10586_v56  ;;  %v4271_v7 = vmul.f32 %v7282_v47, %v10586_v56  ;;  %v4267_v14 = vmul.f32 %v7288_v17, %v10586_v56  ;;  %v7294_v63 = vld [vmem:[%s11735_s2 + $0x10] sm:$0xff]  ;;  %v4291_v17 = vmul.f32 %v10582_v10, %v10586_v56 }
0x1b0e   :  { %v4244_v4 = vmul.f32 %v7272_v29, %v10555_v50  ;;  %v4260_v24 = vmul.f32 %v10566_v37, %v10555_v50  ;;  %v4240_v1 = vmul.f32 %v7280_v38, %v10555_v50  ;;  %v4256_v55 = vmul.f32 %v10636_v18, %v10555_v50 }
0x1b0f   :  { %v4287_v10 = vmul.f32 %v10654_v6, %v10586_v56 }
0x1b10   :  { %6571 = vmatpush.xpose.msk.msrb.mxu3 %vm144_vm0, %v4244_v4  ;;  %6591 = vmatpush.xpose.msk.msra.mxu0 %vm144_vm0, %v4260_v24  ;;  %v4236_v24 = vmul.f32 %v7286_v39, %v10555_v50 }
0x1b12   :  { %v4226_v41 = vpop.f32.mrf.mxu2 }
0x1b13   :  { %v10588_v12 = vadd.f32 %v4226_v41, %v4187_v2  ;;  %v10708_v2 = vld [vmem:[%s11735_s2 + $0xb8] sm:$0xff] }
0x1b14   :  { %6572 = vmatpush.xpose.msk.msrb.mxu3 %vm144_vm0, %v4243_v0  ;;  %6592 = vmatpush.xpose.msk.msra.mxu0 %vm144_vm0, %v4259_v26  ;;  %v4252_v41 = vmul.f32 %v10708_v2, %v10555_v50  ;;  %v4263_v0 = vmul.f32 %v7294_v63, %v10586_v56  ;;  %v7295_v26 = vld [vmem:[%s11735_s2 + $0x8] sm:$0xff] }
0x1b15   :  { %v4276_v60 = vmul.f32 %v7272_v29, %v10588_v12  ;;  %v4272_v36 = vmul.f32 %v7280_v38, %v10588_v12  ;;  %v4268_v22 = vmul.f32 %v7286_v39, %v10588_v12  ;;  %v7292_v29 = vld [vmem:[%s11735_s2 + $0x18] sm:$0xff]  ;;  %v7299_v38 = vld [vmem:[%s11735_s2 + $0xa0] sm:$0xff] }
0x1b16   :  { %v4264_v4 = vmul.f32 %v7292_v29, %v10588_v12  ;;  %v7303_v39 = vld [vmem:[%s11735_s2 + $0x80] sm:$0xff] }
0x1b17   :  { %4598 = vmatpush.msra.mxu2 %v4276_v60  ;;  %v4262_v60 = vmul.f32 %v7295_v26, %v10592_v16 }
0x1b18   :  { %6573 = vmatpush.xpose.msk.msrb.mxu3 %vm144_vm0, %v4242_v45  ;;  %6593 = vmatpush.xpose.msk.msra.mxu0 %vm144_vm0, %v4258_v57  ;;  %v10726_v45 = vld [vmem:[%s11735_s2 + $0xb0] sm:$0xff] }
0x1b19   :  { %4599 = vmatpush.msra.mxu2 %v4275_v13  ;;  %v4251_v57 = vmul.f32 %v10726_v45, %v10557_v62  ;;  %v7297_v13 = vld [vmem:[%s11735_s2] sm:$0xff]  ;;  %v4283_v6 = vmul.f32 %v10726_v45, %v10586_v56  ;;  %v7307_v45 = vld [vmem:[%s11736_s1 + $0x10] sm:$0xff] }
0x1b1b   :  { %4600 = vmatpush.msra.mxu2 %v4274_v32  ;;  %v4261_v32 = vmul.f32 %v7297_v13, %v10608_v8 }
0x1b1c   :  { %6574 = vmatpush.xpose.msk.msrb.mxu3 %vm144_vm0, %v4241_v34  ;;  %6594 = vmatpush.xpose.msk.msra.mxu0 %vm144_vm0, %v4257_v3  ;;  %v7298_v34 = vld [vmem:[%s11735_s2 + $0xa8] sm:$0xff] }
0x1b1d   :  { %4601 = vmatpush.msra.mxu2 %v4273_v40  ;;  %v4250_v3 = vmul.f32 %v7298_v34, %v10573_v52  ;;  %v4233_v40 = vmul.f32 %v7291_v30, %v10595_v28 }
0x1b1f   :  { %4602 = vmatpush.msra.mxu2 %v4272_v36  ;;  %v4249_v36 = vmul.f32 %v7299_v38, %v10595_v28 }
0x1b20   :  { %6575 = vmatpush.xpose.msk.msrb.mxu3 %vm144_vm0, %v4240_v1  ;;  %6595 = vmatpush.xpose.msk.msra.mxu0 %vm144_vm0, %v4256_v55  ;;  %v4232_v1 = vmul.f32 %v7292_v29, %v10555_v50  ;;  %v7300_v55 = vld [vmem:[%s11735_s2 + $0x98] sm:$0xff]  ;;  %v4279_v29 = vmul.f32 %v7301_v59, %v10586_v56  ;;  %v7305_v56 = vld [vmem:[%s11736_s1] sm:$0xff] }
0x1b21   :  { %4603 = vmatpush.msra.mxu2 %v4271_v7  ;;  %v4248_v47 = vmul.f32 %v7300_v55, %v10555_v50  ;;  %v4231_v7 = vmul.f32 %v7294_v63, %v10557_v62  ;;  %v7302_v50 = vld [vmem:[%s11735_s2 + $0x88] sm:$0xff]  ;;  %v4280_v30 = vmul.f32 %v7300_v55, %v10588_v12 }
0x1b22   :  { %v4246_v21 = vmul.f32 %v7302_v50, %v10573_v52 }
0x1b23   :  { %4604 = vmatpush.msra.mxu2 %v4270_v46  ;;  %v4247_v46 = vmul.f32 %v7301_v59, %v10557_v62  ;;  %v4229_v62 = vmul.f32 %v7297_v13, %v10595_v28  ;;  %v7311_v59 = vld [vmem:[%s11736_s1 + $0x30] sm:$0xff] }
0x1b24   :  { %6576 = vmatpush.xpose.msk.msrb.mxu3 %vm144_vm0, %v4239_v31  ;;  %6596 = vmatpush.xpose.msk.msra.mxu0 %vm144_vm0, %v4255_v48  ;;  %v4133_v31 = vpop.f32.mrf.mxu0  ;;  %v4230_v48 = vmul.f32 %v7295_v26, %v10573_v52 }
0x1b25   :  { %4605 = vmatpush.msra.mxu2 %v4269_v58  ;;  %v4091_v58 = vperm.slane %v10552_v35, 0 }
0x1b27   :  { %4606 = vmatpush.msra.mxu2 %v4268_v22  ;;  %v4245_v22 = vmul.f32 %v7303_v39, %v10595_v28  ;;  %v4134_v52 = vadd.f32 %v4133_v31, %v4091_v58  ;;  %v4290_v28 = vmul.f32 %v10604_v61, %v10592_v16  ;;  %v4286_v61 = vmul.f32 %v10672_v42, %v10592_v16 }
0x1b28   :  { %6577 = vmatpush.xpose.msk.msrb.mxu3 %vm144_vm0, %v4238_v27  ;;  %6597 = vmatpush.xpose.msk.msra.mxu0 %vm144_vm0, %v4254_v15  ;;  %v4292_v27 = vmul.f32 %v10566_v37, %v10588_v12  ;;  %v4289_v37 = vmul.f32 %v10621_v11, %v10608_v8  ;;  %v4285_v11 = vmul.f32 %v10690_v49, %v10608_v8 }
0x1b29   :  { %4607 = vmatpush.msra.mxu2 %v4267_v14  ;;  %v4288_v14 = vmul.f32 %v10636_v18, %v10588_v12  ;;  %v4284_v18 = vmul.f32 %v10708_v2, %v10588_v12  ;;  %v4282_v42 = vmul.f32 %v7298_v34, %v10592_v16  ;;  %v4281_v49 = vmul.f32 %v7299_v38, %v10608_v8  ;;  %v7304_v12 = vld [vmem:[%s11736_s1 + $0x8] sm:$0xff] }
0x1b2a   :  { %v7308_v34 = vld [vmem:[%s11736_s1 + $0x28] sm:$0xff] }
0x1b2b   :  { %4608 = vmatpush.msra.mxu2 %v4266_v53 }
0x1b2c   :  { %6578 = vmatpush.xpose.msk.msrb.mxu3 %vm144_vm0, %v4237_v25  ;;  %6598 = vmatpush.xpose.msk.msra.mxu0 %vm144_vm0, %v4253_v20  ;;  %v4136_v15 = vpop.f32.mrf.mxu0 }
0x1b2d   :  { %4609 = vmatpush.msra.mxu2 %v4265_v44  ;;  %v4137_v23 = vadd.f32 %v4136_v15, %v4091_v58 }
0x1b2f   :  { %4610 = vmatpush.msra.mxu2 %v4264_v4  ;;  %v4278_v4 = vmul.f32 %v7302_v50, %v10592_v16 }
0x1b30   :  { %6579 = vmatpush.xpose.msk.msrb.mxu3 %vm144_vm0, %v4236_v24  ;;  %6599 = vmatpush.xpose.msk.msra.mxu0 %vm144_vm0, %v4252_v41  ;;  %v4277_v24 = vmul.f32 %v7303_v39, %v10608_v8  ;;  %v7306_v8 = vld [vmem:[%s11736_s1 + $0x18] sm:$0xff] }
0x1b31   :  { %4611 = vmatpush.msra.mxu2 %v4263_v0 }
0x1b33   :  { %4612 = vmatpush.msra.mxu2 %v4262_v60 }
0x1b34   :  { %6580 = vmatpush.xpose.msk.msrb.mxu3 %vm144_vm0, %v4235_v9  ;;  %6600 = vmatpush.xpose.msk.msra.mxu0 %vm144_vm0, %v4251_v57  ;;  %v4139_v53 = vpop.f32.mrf.mxu0 }
0x1b35   :  { %4613 = vmatpush.msra.mxu2 %v4261_v32  ;;  %v4140_v25 = vadd.f32 %v4139_v53, %v4091_v58 }
0x1b38   :  { %6581 = vmatpush.xpose.msk.msrb.mxu3 %vm144_vm0, %v4234_v51  ;;  %6601 = vmatpush.xpose.msk.msra.mxu0 %vm144_vm0, %v4250_v3 }
0x1b3c   :  { %6582 = vmatpush.xpose.msk.msrb.mxu3 %vm144_vm0, %v4233_v40  ;;  %6602 = vmatpush.xpose.msk.msra.mxu0 %vm144_vm0, %v4249_v36  ;;  %v4142_v20 = vpop.f32.mrf.mxu0  ;;  %v7309_v40 = vld [vmem:[%s11736_s1 + $0x20] sm:$0xff] }
0x1b3d   :  { %v4143_v44 = vadd.f32 %v4142_v20, %v4091_v58 }
0x1b40   :  { %6583 = vmatpush.xpose.msk.msrb.mxu3 %vm144_vm0, %v4232_v1  ;;  %6603 = vmatpush.xpose.msk.msra.mxu0 %vm144_vm0, %v4248_v47  ;;  %v7310_v47 = vld [vmem:[%s11736_s1 + $0x38] sm:$0xff] }
0x1b44   :  { %6584 = vmatpush.xpose.msk.msrb.mxu3 %vm144_vm0, %v4231_v7  ;;  %6604 = vmatpush.xpose.msk.msra.mxu0 %vm144_vm0, %v4247_v46 }
0x1b48   :  { %6585 = vmatpush.xpose.msk.msrb.mxu3 %vm144_vm0, %v4230_v48  ;;  %6605 = vmatpush.xpose.msk.msra.mxu0 %vm144_vm0, %v4246_v21 }
0x1b4c   :  { %6586 = vmatpush.xpose.msk.msrb.mxu3 %vm144_vm0, %v4229_v62  ;;  %6606 = vmatpush.xpose.msk.msra.mxu0 %vm144_vm0, %v4245_v22 }
0x1b4f   :  { %6587 = vmatmul.msk.f32.vlgmr.msrb.gmra.mxu3 %vm144_vm0, %v4134_v52  ;;  %6607 = vmatmul.msk.f32.vlgmr.msra.gmra.mxu0 %vm144_vm0, %v4134_v52 }
0x1b50   :  { %4627 = vmatpush.msra.mxu3 %v4292_v27 }
0x1b52   :  { %4628 = vmatpush.msra.mxu3 %v4291_v17 }
0x1b54   :  { %4629 = vmatpush.msra.mxu3 %v4290_v28 }
0x1b56   :  { %4630 = vmatpush.msra.mxu3 %v4289_v37 }
0x1b57   :  { %6588 = vmatmul.msk.f32.gmra.mxu3 %vm144_vm0, %v4137_v23  ;;  %6608 = vmatmul.msk.f32.gmra.mxu0 %vm144_vm0, %v4137_v23 }
0x1b58   :  { %4631 = vmatpush.msra.mxu3 %v4288_v14 }
0x1b5a   :  { %4632 = vmatpush.msra.mxu3 %v4287_v10 }
0x1b5c   :  { %4633 = vmatpush.msra.mxu3 %v4286_v61 }
0x1b5e   :  { %4634 = vmatpush.msra.mxu3 %v4285_v11 }
0x1b5f   :  { %6589 = vmatmul.msk.f32.gmra.mxu3 %vm144_vm0, %v4140_v25  ;;  %6609 = vmatmul.msk.f32.gmra.mxu0 %vm144_vm0, %v4140_v25 }
0x1b60   :  { %4635 = vmatpush.msra.mxu3 %v4284_v18 }
0x1b62   :  { %4636 = vmatpush.msra.mxu3 %v4283_v6 }
0x1b64   :  { %4637 = vmatpush.msra.mxu3 %v4282_v42 }
0x1b66   :  { %4638 = vmatpush.msra.mxu3 %v4281_v49 }
0x1b67   :  { %6590 = vmatmul.msk.f32.gmra.mxu3 %vm144_vm0, %v4143_v44  ;;  %6610 = vmatmul.msk.f32.gmra.mxu0 %vm144_vm0, %v4143_v44 }
0x1b68   :  { %4639 = vmatpush.msra.mxu3 %v4280_v30 }
0x1b6a   :  { %4640 = vmatpush.msra.mxu3 %v4279_v29 }
0x1b6c   :  { %4641 = vmatpush.msra.mxu3 %v4278_v4 }
0x1b6e   :  { %4642 = vmatpush.msra.mxu3 %v4277_v24 }
0x1bcc   :  { %v4447_v2 = vpop.f32.mrf.mxu0 }
0x1bcd   :  { %v4448_v63 = vadd.f32 %v7304_v12, %v4447_v2 }
0x1bd2   :  { %v4418_v41 = vpop.f32.mrf.mxu3 }
0x1bd3   :  { %v4419_v0 = vadd.f32 %v7305_v56, %v4418_v41 }
0x1bd4   :  { %v4450_v26 = vpop.f32.mrf.mxu0 }
0x1bd5   :  { %v4459_v60 = vmax.f32 %v4419_v0, %v4448_v63  ;;  %v4451_v9 = vadd.f32 %v7306_v8, %v4450_v26 }
0x1bd7   :  { %4460 = vmax.xlane.f32.xlu2 %v4459_v60 }
0x1bda   :  { %v4421_v16 = vpop.f32.mrf.mxu3 }
0x1bdb   :  { %v4422_v57 = vadd.f32 %v7307_v45, %v4421_v16 }
0x1bdc   :  { %v4453_v32 = vpop.f32.mrf.mxu0 }
0x1bdd   :  { %v4462_v13 = vmax.f32 %v4422_v57, %v4451_v9  ;;  %v4454_v3 = vadd.f32 %v7308_v34, %v4453_v32  ;;  %v6527_v32 = vld [vmem:[%s11732_s5 + $0x270] sm:$0xff] }
0x1bdf   :  { %4463 = vmax.xlane.f32.xlu0 %v4462_v13  ;;  %v6528_v13 = vld [vmem:[%s11732_s5 + $0x278] sm:$0xff] }
0x1be0   :  { %6615 = vmatpush.xpose.msk.msrb.mxu0 %vm144_vm0, %v6528_v13 }
0x1be2   :  { %v4424_v51 = vpop.f32.mrf.mxu3 }
0x1be3   :  { %v4425_v38 = vadd.f32 %v7309_v40, %v4424_v51  ;;  %v6526_v51 = vld [vmem:[%s11732_s5 + $0x268] sm:$0xff] }
0x1be4   :  { %v4456_v1 = vpop.f32.mrf.mxu0  ;;  %6616 = vmatpush.xpose.msk.msrb.mxu0 %vm144_vm0, %v6527_v32  ;;  %v6535_v32 = vld [vmem:[%s11739_s6 + $0x230] sm:$0xff] }
0x1be5   :  { %v4465_v36 = vmax.f32 %v4425_v38, %v4454_v3  ;;  %v4457_v7 = vadd.f32 %v7310_v47, %v4456_v1 }
0x1be7   :  { %4466 = vmax.xlane.f32.xlu1 %v4465_v36 }
0x1be8   :  { %6617 = vmatpush.xpose.msk.msrb.mxu0 %vm144_vm0, %v6526_v51  ;;  %v6534_v51 = vld [vmem:[%s11739_s6 + $0x228] sm:$0xff] }
0x1bea   :  { %v4427_v55 = vpop.f32.mrf.mxu3 }
0x1beb   :  { %v4428_v46 = vadd.f32 %v7311_v59, %v4427_v55 }
0x1bed   :  { %v4468_v31 = vmax.f32 %v4428_v46, %v4457_v7 }
0x1bef   :  { %4469 = vmax.xlane.f32.xlu2 %v4468_v31 }
0x1c4a   :  { %v4461_v48 = vpop.xlane.xlu2 %4460 }
0x1c4b   :  { %v4471_v50 = vsub.f32 %v4419_v0, %v4461_v48  ;;  %v4472_v21 = vsub.f32 %v4448_v63, %v4461_v48 }
0x1c4d   :  { %v4479_v58 = vmul.f32 1.442695, %v4471_v50  ;;  %v4481_v62 = vmul.f32 1.442695, %v4472_v21 }
0x1c4f   :  { %6956 = vpow2.f32 %v4479_v58 }
0x1c50   :  { %6958 = vpow2.f32 %v4481_v62 }
0x1c52   :  { %v4464_v39 = vpop.xlane.xlu0 %4463 }
0x1c53   :  { %v4473_v22 = vsub.f32 %v4422_v57, %v4464_v39  ;;  %v4474_v27 = vsub.f32 %v4451_v9, %v4464_v39 }
0x1c55   :  { %v6957_v52 = vpop.eup %6956  ;;  %v4483_v15 = vmul.f32 1.442695, %v4473_v22  ;;  %v4485_v17 = vmul.f32 1.442695, %v4474_v27 }
0x1c56   :  { %v6959_v28 = vpop.eup %6958  ;;  %4511 = vmatmul.f32.vlgmr.msra.gmra.mxu1 %v6957_v52 }
0x1c57   :  { %6960 = vpow2.f32 %v4483_v15  ;;  %4540 = vmatmul.f32.vlgmr.msrb.gmra.mxu2 %v6959_v28  ;;  %4643 = vmatmul.f32.vlgmr.msra.gmra.mxu3 %v6959_v28 }
0x1c58   :  { %6962 = vpow2.f32 %v4485_v17  ;;  %v4660_v17 = vperm.slane %v10552_v35, 3 }
0x1c5a   :  { %v4467_v37 = vpop.xlane.xlu1 %4466 }
0x1c5b   :  { %v4475_v14 = vsub.f32 %v4425_v38, %v4467_v37  ;;  %v4476_v23 = vsub.f32 %v4454_v3, %v4467_v37  ;;  %v6525_v3 = vld [vmem:[%s11732_s5 + $0x260] sm:$0xff] }
0x1c5c   :  { %6618 = vmatpush.xpose.msk.msrb.mxu0 %vm144_vm0, %v6525_v3  ;;  %v6532_v3 = vld [vmem:[%s11739_s6 + $0x218] sm:$0xff] }
0x1c5d   :  { %v6961_v10 = vpop.eup %6960  ;;  %v4487_v53 = vmul.f32 1.442695, %v4475_v14  ;;  %v4489_v61 = vmul.f32 1.442695, %v4476_v23 }
0x1c5e   :  { %v6963_v11 = vpop.eup %6962  ;;  %4514 = vmatmul.f32.gmra.mxu1 %v6961_v10 }
0x1c5f   :  { %6964 = vpow2.f32 %v4487_v53  ;;  %4543 = vmatmul.f32.gmra.mxu2 %v6963_v11  ;;  %4646 = vmatmul.f32.gmra.mxu3 %v6963_v11 }
0x1c60   :  { %6966 = vpow2.f32 %v4489_v61 }
0x1c62   :  { %v4470_v18 = vpop.xlane.xlu2 %4469 }
0x1c63   :  { %v4477_v25 = vsub.f32 %v4428_v46, %v4470_v18  ;;  %v4478_v6 = vsub.f32 %v4457_v7, %v4470_v18 }
0x1c65   :  { %v6965_v42 = vpop.eup %6964  ;;  %v4491_v20 = vmul.f32 1.442695, %v4477_v25  ;;  %v4493_v49 = vmul.f32 1.442695, %v4478_v6 }
0x1c66   :  { %v6967_v30 = vpop.eup %6966  ;;  %4517 = vmatmul.f32.gmra.mxu1 %v6965_v42 }
0x1c67   :  { %6968 = vpow2.f32 %v4491_v20  ;;  %4546 = vmatmul.f32.gmra.mxu2 %v6967_v30  ;;  %4649 = vmatmul.f32.gmra.mxu3 %v6967_v30 }
0x1c68   :  { %6970 = vpow2.f32 %v4493_v49 }
0x1c6d   :  { %v6969_v44 = vpop.eup %6968 }
0x1c6e   :  { %v6971_v29 = vpop.eup %6970  ;;  %4520 = vmatmul.f32.gmra.mxu1 %v6969_v44 }
0x1c6f   :  { %4549 = vmatmul.f32.gmra.mxu2 %v6971_v29  ;;  %4652 = vmatmul.f32.gmra.mxu3 %v6971_v29 }
0x1c77   :  { %4614 = vmatmul.f32.vlgmr.msra.gmra.mxu2 %v6957_v52 }
0x1c7f   :  { %4617 = vmatmul.f32.gmra.mxu2 %v6961_v10 }
0x1c87   :  { %4620 = vmatmul.f32.gmra.mxu2 %v6965_v42 }
0x1c8f   :  { %4623 = vmatmul.f32.gmra.mxu2 %v6969_v44 }
0x1cd3   :  { %v4512_v4 = vpop.f32.mrf.mxu1 }
0x1cda   :  { %v4541_v24 = vpop.f32.mrf.mxu2  ;;  %v4644_v38 = vpop.f32.mrf.mxu3 }
0x1cdb   :  { %v4542_v2 = vadd.f32 %v4541_v24, %v4512_v4  ;;  %v4515_v41 = vpop.f32.mrf.mxu1 }
0x1cdd   :  { %6972 = vrcp.f32 %v4542_v2 }
0x1ce2   :  { %v4544_v12 = vpop.f32.mrf.mxu2  ;;  %v4647_v7 = vpop.f32.mrf.mxu3 }
0x1ce3   :  { %v6973_v63 = vpop.eup %6972  ;;  %v4545_v56 = vadd.f32 %v4544_v12, %v4515_v41  ;;  %v4518_v0 = vpop.f32.mrf.mxu1 }
0x1ce4   :  { %6611 = vmatmul.msk.f32.vlgmr.msrb.gmra.mxu1 %vm610_vm1, %v6973_v63 }
0x1ce5   :  { %6974 = vrcp.f32 %v4545_v56 }
0x1cea   :  { %v4547_v26 = vpop.f32.mrf.mxu2  ;;  %v4650_v50 = vpop.f32.mrf.mxu3 }
0x1ceb   :  { %v6975_v60 = vpop.eup %6974  ;;  %v4548_v16 = vadd.f32 %v4547_v26, %v4518_v0  ;;  %v4521_v8 = vpop.f32.mrf.mxu1 }
0x1cec   :  { %6612 = vmatmul.msk.f32.gmra.mxu1 %vm610_vm1, %v6975_v60 }
0x1ced   :  { %6976 = vrcp.f32 %v4548_v16 }
0x1cf2   :  { %v4550_v9 = vpop.f32.mrf.mxu2  ;;  %v4653_v22 = vpop.f32.mrf.mxu3 }
0x1cf3   :  { %v6977_v45 = vpop.eup %6976  ;;  %v4551_v57 = vadd.f32 %v4550_v9, %v4521_v8 }
0x1cf4   :  { %6613 = vmatmul.msk.f32.gmra.mxu1 %vm610_vm1, %v6977_v45 }
0x1cf5   :  { %6978 = vrcp.f32 %v4551_v57 }
0x1cfa   :  { %v4615_v40 = vpop.f32.mrf.mxu2 }
0x1cfb   :  { %v6979_v34 = vpop.eup %6978  ;;  %v4645_v36 = vadd.f32 %v4644_v38, %v4615_v40  ;;  %v6531_v40 = vld [vmem:[%s11739_s6 + $0x210] sm:$0xff]  ;;  %v6530_v38 = vld [vmem:[%s11739_s6 + $0x208] sm:$0xff] }
0x1cfc   :  { %6614 = vmatmul.msk.f32.gmra.mxu1 %vm610_vm1, %v6979_v34  ;;  %v6533_v34 = vld [vmem:[%s11739_s6 + $0x220] sm:$0xff] }
0x1d02   :  { %v4618_v1 = vpop.f32.mrf.mxu2 }
0x1d03   :  { %v4648_v59 = vadd.f32 %v4647_v7, %v4618_v1 }
0x1d0a   :  { %v4621_v48 = vpop.f32.mrf.mxu2 }
0x1d0b   :  { %v4651_v21 = vadd.f32 %v4650_v50, %v4621_v48 }
0x1d12   :  { %v4624_v39 = vpop.f32.mrf.mxu2 }
0x1d13   :  { %v4654_v27 = vadd.f32 %v4653_v22, %v4624_v39 }
0x1d61   :  { %v4586_v55 = vpop.f32.mrf.mxu1 }
0x1d62   :  { %v4656_v47 = vmul.f32 %v4645_v36, %v4586_v55  ;;  %v6529_v36 = vld [vmem:[%s11739_s6 + $0x200] sm:$0xff] }
0x1d64   :  { %6619 = vmatmul.msk.f32.vlgmr.msrb.gmra.mxu0 %vm144_vm0, %v4656_v47 }
0x1d69   :  { %v4589_v46 = vpop.f32.mrf.mxu1 }
0x1d6a   :  { %v4657_v31 = vmul.f32 %v4648_v59, %v4589_v46 }
0x1d6c   :  { %6620 = vmatmul.msk.f32.gmra.mxu0 %vm144_vm0, %v4657_v31 }
0x1d71   :  { %v4592_v58 = vpop.f32.mrf.mxu1 }
0x1d72   :  { %v4658_v62 = vmul.f32 %v4651_v21, %v4592_v58 }
0x1d74   :  { %6621 = vmatmul.msk.f32.gmra.mxu0 %vm144_vm0, %v4658_v62 }
0x1d79   :  { %v4595_v52 = vpop.f32.mrf.mxu1 }
0x1d7a   :  { %v4659_v15 = vmul.f32 %v4654_v27, %v4595_v52 }
0x1d7c   :  { %6622 = vmatmul.msk.f32.gmra.mxu0 %vm144_vm0, %v4659_v15 }
0x1de1   :  { %v4702_v28 = vpop.f32.mrf.mxu0 }
0x1de2   :  { %v4703_v37 = vadd.f32 %v4702_v28, %v4660_v17  ;;  %v6544_v28 = vld [vmem:[%s11739_s6 + $0x278] sm:$0xff] }
0x1de3   :  { %4911 = vmatpush.msrb.mxu2 %v6544_v28 }
0x1de4   :  { %v4714_v14 = vadd.f32 %v4703_v37, %v10473_v19  ;;  %v6543_v37 = vld [vmem:[%s11739_s6 + $0x270] sm:$0xff] }
0x1de5   :  { %4912 = vmatpush.msrb.mxu2 %v6543_v37 }
0x1de6   :  { %v4718_v23 = vsel %vm144_vm0, %v4714_v14, 0.0 }
0x1de7   :  { %4719 = vadd.xlane.f32.xlu0 %v4718_v23 }
0x1de9   :  { %v4705_v10 = vpop.f32.mrf.mxu0 }
0x1dea   :  { %v4706_v53 = vadd.f32 %v4705_v10, %v4660_v17  ;;  %v4811_v10 = vperm.slane %v10552_v35, 6 }
0x1dec   :  { %v4715_v61 = vadd.f32 %v4706_v53, %v10503_v33  ;;  %v6536_v33 = vld [vmem:[%s11739_s6 + $0x238] sm:$0xff] }
0x1ded   :  { %6624 = vmatpush.xpose.msk.msra.mxu1 %vm144_vm0, %v6536_v33 }
0x1dee   :  { %v4721_v11 = vsel %vm144_vm0, %v4715_v61, 0.0 }
0x1def   :  { %4722 = vadd.xlane.f32.xlu1 %v4721_v11 }
0x1df1   :  { %v4708_v18 = vpop.f32.mrf.mxu0  ;;  %6625 = vmatpush.xpose.msk.msra.mxu1 %vm144_vm0, %v6535_v32 }
0x1df2   :  { %v4709_v25 = vadd.f32 %v4708_v18, %v4660_v17 }
0x1df4   :  { %v4716_v6 = vadd.f32 %v4709_v25, %v10520_v54 }
0x1df5   :  { %6626 = vmatpush.xpose.msk.msra.mxu1 %vm144_vm0, %v6534_v51 }
0x1df6   :  { %v4724_v42 = vsel %vm144_vm0, %v4716_v6, 0.0 }
0x1df7   :  { %4725 = vadd.xlane.f32.xlu2 %v4724_v42  ;;  %v6541_v42 = vld [vmem:[%s11739_s6 + $0x260] sm:$0xff] }
0x1df9   :  { %v4711_v20 = vpop.f32.mrf.mxu0  ;;  %6627 = vmatpush.xpose.msk.msra.mxu1 %vm144_vm0, %v6533_v34 }
0x1dfa   :  { %v4712_v49 = vadd.f32 %v4711_v20, %v4660_v17  ;;  %v10930_v17 = vperm.slane %v10552_v35, 5 }
0x1dfc   :  { %v4717_v19 = vadd.f32 %v4712_v49, %v10536_v43 }
0x1dfd   :  { %6628 = vmatpush.xpose.msk.msra.mxu1 %vm144_vm0, %v6532_v3 }
0x1dfe   :  { %v4727_v30 = vsel %vm144_vm0, %v4717_v19, 0.0 }
0x1dff   :  { %4728 = vadd.xlane.f32.xlu0 %v4727_v30 }
0x1e01   :  { %6629 = vmatpush.xpose.msk.msra.mxu1 %vm144_vm0, %v6531_v40 }
0x1e05   :  { %6630 = vmatpush.xpose.msk.msra.mxu1 %vm144_vm0, %v6530_v38 }
0x1e09   :  { %6631 = vmatpush.xpose.msk.msra.mxu1 %vm144_vm0, %v6529_v36 }
0x1e5a   :  { %v4720_v44 = vpop.xlane.xlu0 %4719 }
0x1e5b   :  { %v4730_v29 = vmul.f32 %v4720_v44, %v8134_v5  ;;  %v6540_v44 = vld [vmem:[%s11739_s6 + $0x258] sm:$0xff] }
0x1e5d   :  { %v10875_v54 = vsub.f32 %v4714_v14, %v4730_v29 }
0x1e5f   :  { %v4738_v4 = vmul.f32 %v10875_v54, %v10875_v54 }
0x1e61   :  { %v4742_v24 = vsel %vm144_vm0, %v4738_v4, 0.0 }
0x1e62   :  { %4743 = vadd.xlane.f32.xlu1 %v4742_v24  ;;  %v4723_v43 = vpop.xlane.xlu1 %4722 }
0x1e63   :  { %v4731_v2 = vmul.f32 %v4723_v43, %v8134_v5 }
0x1e65   :  { %v10881_v41 = vsub.f32 %v4715_v61, %v4731_v2  ;;  %v6542_v61 = vld [vmem:[%s11739_s6 + $0x268] sm:$0xff] }
0x1e66   :  { %4913 = vmatpush.msrb.mxu2 %v6542_v61  ;;  %v6538_v2 = vld [vmem:[%s11739_s6 + $0x248] sm:$0xff] }
0x1e67   :  { %v4739_v12 = vmul.f32 %v10881_v41, %v10881_v41 }
0x1e68   :  { %4914 = vmatpush.msrb.mxu2 %v6541_v42 }
0x1e69   :  { %v4745_v63 = vsel %vm144_vm0, %v4739_v12, 0.0 }
0x1e6a   :  { %4746 = vadd.xlane.f32.xlu2 %v4745_v63  ;;  %v4726_v56 = vpop.xlane.xlu2 %4725  ;;  %4915 = vmatpush.msrb.mxu2 %v6540_v44 }
0x1e6b   :  { %v4732_v0 = vmul.f32 %v4726_v56, %v8134_v5 }
0x1e6d   :  { %v10887_v26 = vsub.f32 %v4716_v6, %v4732_v0 }
0x1e6f   :  { %v4740_v60 = vmul.f32 %v10887_v26, %v10887_v26 }
0x1e71   :  { %v4748_v16 = vsel %vm144_vm0, %v4740_v60, 0.0 }
0x1e72   :  { %4749 = vadd.xlane.f32.xlu0 %v4748_v16  ;;  %v4729_v8 = vpop.xlane.xlu0 %4728 }
0x1e73   :  { %v4733_v9 = vmul.f32 %v4729_v8, %v8134_v5 }
0x1e75   :  { %v10893_v45 = vsub.f32 %v4717_v19, %v4733_v9 }
0x1e77   :  { %v4741_v57 = vmul.f32 %v10893_v45, %v10893_v45 }
0x1e79   :  { %v4751_v13 = vsel %vm144_vm0, %v4741_v57, 0.0 }
0x1e7a   :  { %4752 = vadd.xlane.f32.xlu1 %v4751_v13 }
0x1ed5   :  { %v4744_v1 = vpop.xlane.xlu1 %4743 }
0x1ed6   :  { %v4754_v55 = vmul.f32 %v4744_v1, %v8134_v5 }
0x1ed8   :  { %v4758_v47 = vadd.f32 1e-05, %v4754_v55  ;;  %v6792_v55 = vld [vmem:[%s11740_s8 + $0x4] ss:$0 sm:$0xff] }
0x1eda   :  { %6980 = vrsqrt.f32 %v4758_v47  ;;  %vm4768_vm9 = vweird.f32 %v4758_v47 }
0x1edd   :  { %v4747_v7 = vpop.xlane.xlu2 %4746 }
0x1ede   :  { %v4755_v59 = vmul.f32 %v4747_v7, %v8134_v5 }
0x1ee0   :  { %v6981_v46 = vpop.eup %6980  ;;  %v4759_v31 = vadd.f32 1e-05, %v4755_v59 }
0x1ee1   :  { %v4763_v48 = vmul.f32 %v6981_v46, %v4758_v47  ;;  %vm4769_vm8 = vweird.f32 %v6981_v46 }
0x1ee2   :  { %6982 = vrsqrt.f32 %v4759_v31  ;;  %vm4770_vm10 = vmor %vm4768_vm9, %vm4769_vm8  ;;  %vm4778_vm12 = vweird.f32 %v4759_v31 }
0x1ee3   :  { %v4764_v50 = vmul.f32 %v6981_v46, %v4763_v48 }
0x1ee5   :  { %v4765_v21 = vmul.f32 0.5, %v4764_v50  ;;  %v4750_v58 = vpop.xlane.xlu0 %4749 }
0x1ee6   :  { %v4756_v62 = vmul.f32 %v4750_v58, %v8134_v5 }
0x1ee7   :  { %v4766_v39 = vsub.f32 1.5, %v4765_v21 }
0x1ee8   :  { %v6983_v22 = vpop.eup %6982  ;;  %v4760_v27 = vadd.f32 1e-05, %v4756_v62 }
0x1ee9   :  { %v4767_v52 = vmul.f32 %v6981_v46, %v4766_v39  ;;  %v4773_v15 = vmul.f32 %v6983_v22, %v4759_v31  ;;  %vm4779_vm11 = vweird.f32 %v6983_v22 }
0x1eea   :  { %6984 = vrsqrt.f32 %v4760_v27  ;;  %vm4780_vm13 = vmor %vm4778_vm12, %vm4779_vm11  ;;  %vm4788_vm2 = vweird.f32 %v4760_v27 }
0x1eeb   :  { %v4771_v14 = vsel %vm4770_vm10, %v6981_v46, %v4767_v52  ;;  %v4774_v23 = vmul.f32 %v6983_v22, %v4773_v15 }
0x1eec   :  { %v4802_v53 = vmul.f32 %v4771_v14, %v10875_v54  ;;  %v6539_v54 = vld [vmem:[%s11739_s6 + $0x250] sm:$0xff] }
0x1eed   :  { %v4775_v11 = vmul.f32 0.5, %v4774_v23  ;;  %v4753_v18 = vpop.xlane.xlu1 %4752  ;;  %4916 = vmatpush.msrb.mxu2 %v6539_v54 }
0x1eee   :  { %v4807_v25 = vmul.f32 %v10930_v17, %v4802_v53  ;;  %v4757_v6 = vmul.f32 %v4753_v18, %v8134_v5 }
0x1eef   :  { %v4776_v20 = vsub.f32 1.5, %v4775_v11  ;;  %4917 = vmatpush.msrb.mxu2 %v6538_v2 }
0x1ef0   :  { %v6985_v49 = vpop.eup %6984  ;;  %v10948_v19 = vadd.f32 %v4811_v10, %v4807_v25  ;;  %v4761_v30 = vadd.f32 1e-05, %v4757_v6 }
0x1ef1   :  { %v4777_v33 = vmul.f32 %v6983_v22, %v4776_v20  ;;  %v4783_v29 = vmul.f32 %v6985_v49, %v4760_v27  ;;  %vm4789_vm14 = vweird.f32 %v6985_v49  ;;  %v6651_v20 = vld [vmem:[%s11732_s5 + $0x2b8] sm:$0xff] }
0x1ef2   :  { %6986 = vrsqrt.f32 %v4761_v30  ;;  %6632 = vmatmul.msk.f32.vlgmr.msra.gmra.mxu1 %vm144_vm0, %v10948_v19  ;;  %vm4790_vm3 = vmor %vm4788_vm2, %vm4789_vm14  ;;  %vm4798_vm5 = vweird.f32 %v4761_v30  ;;  %6686 = vmatpush.xpose.msk.msra.mxu0 %vm144_vm0, %v6651_v20  ;;  %v7331_v20 = vld [vmem:[%s11737_s3 + $0xb0] sm:$0xff] }
0x1ef3   :  { %v4781_v4 = vsel %vm4780_vm13, %v6983_v22, %v4777_v33  ;;  %v4784_v24 = vmul.f32 %v6985_v49, %v4783_v29  ;;  %v4890_v22 = vperm.slane %v10552_v35, 4 }
0x1ef4   :  { %v4803_v43 = vmul.f32 %v4781_v4, %v10881_v41 }
0x1ef5   :  { %v4785_v12 = vmul.f32 0.5, %v4784_v24 }
0x1ef6   :  { %v4808_v63 = vmul.f32 %v10930_v17, %v4803_v43 }
0x1ef7   :  { %v4786_v56 = vsub.f32 1.5, %v4785_v12 }
0x1ef8   :  { %v6987_v0 = vpop.eup %6986  ;;  %v4813_v60 = vadd.f32 %v4811_v10, %v4808_v63 }
0x1ef9   :  { %v4787_v16 = vmul.f32 %v6985_v49, %v4786_v56  ;;  %v4793_v8 = vmul.f32 %v6987_v0, %v4761_v30  ;;  %vm4799_vm4 = vweird.f32 %v6987_v0 }
0x1efa   :  { %6633 = vmatmul.msk.f32.gmra.mxu1 %vm144_vm0, %v4813_v60  ;;  %vm4800_vm6 = vmor %vm4798_vm5, %vm4799_vm4 }
0x1efb   :  { %v4791_v41 = vsel %vm4790_vm3, %v6985_v49, %v4787_v16  ;;  %v4794_v9 = vmul.f32 %v6987_v0, %v4793_v8 }
0x1efc   :  { %v4804_v57 = vmul.f32 %v4791_v41, %v10887_v26  ;;  %v6537_v26 = vld [vmem:[%s11739_s6 + $0x240] sm:$0xff] }
0x1efd   :  { %v4795_v13 = vmul.f32 0.5, %v4794_v9  ;;  %4918 = vmatpush.msrb.mxu2 %v6537_v26  ;;  %v6647_v9 = vld [vmem:[%s11732_s5 + $0x298] sm:$0xff] }
0x1efe   :  { %v4809_v32 = vmul.f32 %v10930_v17, %v4804_v57  ;;  %v6655_v57 = vld [vmem:[%s11732_s5 + $0x2d8] sm:$0xff]  ;;  %6678 = vmatpush.xpose.msk.msrb.mxu3 %vm144_vm0, %v6647_v9 }
0x1eff   :  { %v4796_v51 = vsub.f32 1.5, %v4795_v13  ;;  %6694 = vmatpush.xpose.msk.msrb.mxu1 %vm144_vm0, %v6655_v57  ;;  %v6650_v13 = vld [vmem:[%s11732_s5 + $0x2b0] sm:$0xff]  ;;  %v7312_v26 = vld [vmem:[%s11737_s3 + $0x78] sm:$0xff] }
0x1f00   :  { %v4814_v34 = vadd.f32 %v4811_v10, %v4809_v32  ;;  %v6646_v32 = vld [vmem:[%s11732_s5 + $0x290] sm:$0xff]  ;;  %6687 = vmatpush.xpose.msk.msra.mxu0 %vm144_vm0, %v6650_v13  ;;  %v7337_v9 = vld [vmem:[%s11737_s3 + $0x18] sm:$0xff] }
0x1f01   :  { %v4797_v3 = vmul.f32 %v6987_v0, %v4796_v51  ;;  %v6654_v51 = vld [vmem:[%s11732_s5 + $0x2d0] sm:$0xff] }
0x1f02   :  { %6634 = vmatmul.msk.f32.gmra.mxu1 %vm144_vm0, %v4814_v34  ;;  %6679 = vmatpush.xpose.msk.msrb.mxu3 %vm144_vm0, %v6646_v32  ;;  %v7338_v32 = vld [vmem:[%s11737_s3 + $0x98] sm:$0xff] }
0x1f03   :  { %v4801_v40 = vsel %vm4800_vm6, %v6987_v0, %v4797_v3  ;;  %6695 = vmatpush.xpose.msk.msrb.mxu1 %vm144_vm0, %v6654_v51  ;;  %v6645_v3 = vld [vmem:[%s11732_s5 + $0x288] sm:$0xff] }
0x1f04   :  { %v4805_v38 = vmul.f32 %v4801_v40, %v10893_v45  ;;  %v6653_v40 = vld [vmem:[%s11732_s5 + $0x2c8] sm:$0xff] }
0x1f06   :  { %v4810_v36 = vmul.f32 %v10930_v17, %v4805_v38  ;;  %6680 = vmatpush.xpose.msk.msrb.mxu3 %vm144_vm0, %v6645_v3  ;;  %v6648_v38 = vld [vmem:[%s11732_s5 + $0x2a0] sm:$0xff] }
0x1f07   :  { %6696 = vmatpush.xpose.msk.msrb.mxu1 %vm144_vm0, %v6653_v40  ;;  %v7340_v40 = vld [vmem:[%s11737_s3 + $0x90] sm:$0xff] }
0x1f08   :  { %v4815_v1 = vadd.f32 %v4811_v10, %v4810_v36  ;;  %v6644_v36 = vld [vmem:[%s11732_s5 + $0x280] sm:$0xff] }
0x1f0a   :  { %6635 = vmatmul.msk.f32.gmra.mxu1 %vm144_vm0, %v4815_v1  ;;  %6681 = vmatpush.xpose.msk.msrb.mxu3 %vm144_vm0, %v6644_v36 }
0x1f6f   :  { %v4874_v47 = vpop.f32.mrf.mxu1 }
0x1f70   :  { %v4875_v7 = vadd.f32 %v6792_v55, %v4874_v47  ;;  %v7313_v47 = vld [vmem:[%s11737_s3 + $0xf8] sm:$0xff] }
0x1f72   :  { %v4886_v59 = vmax.f32 %v4875_v7, 0.0 }
0x1f74   :  { %6636 = vmatmul.msk.f32.vlgmr.msrb.gmra.mxu2 %vm951_vm15, %v4886_v59  ;;  %v7314_v59 = vld [vmem:[%s11737_s3 + $0x70] sm:$0xff] }
0x1f77   :  { %v4877_v45 = vpop.f32.mrf.mxu1 }
0x1f78   :  { %v4878_v46 = vadd.f32 %v6792_v55, %v4877_v45  ;;  %v7315_v45 = vld [vmem:[%s11737_s3 + $0xf0] sm:$0xff] }
0x1f7a   :  { %v4887_v31 = vmax.f32 %v4878_v46, 0.0 }
0x1f7c   :  { %6637 = vmatmul.msk.f32.gmra.mxu2 %vm951_vm15, %v4887_v31  ;;  %v7316_v31 = vld [vmem:[%s11737_s3 + $0x68] sm:$0xff] }
0x1f7f   :  { %v4880_v48 = vpop.f32.mrf.mxu1 }
0x1f80   :  { %v4881_v50 = vadd.f32 %v6792_v55, %v4880_v48  ;;  %v7317_v48 = vld [vmem:[%s11737_s3 + $0xe8] sm:$0xff] }
0x1f82   :  { %v4888_v21 = vmax.f32 %v4881_v50, 0.0  ;;  %v7318_v50 = vld [vmem:[%s11737_s3 + $0x60] sm:$0xff] }
0x1f84   :  { %6638 = vmatmul.msk.f32.gmra.mxu2 %vm951_vm15, %v4888_v21  ;;  %v7319_v21 = vld [vmem:[%s11737_s3 + $0xe0] sm:$0xff] }
0x1f87   :  { %v4883_v58 = vpop.f32.mrf.mxu1 }
0x1f88   :  { %v4884_v62 = vadd.f32 %v6792_v55, %v4883_v58  ;;  %v7320_v58 = vld [vmem:[%s11737_s3 + $0x58] sm:$0xff] }
0x1f8a   :  { %v4889_v39 = vmax.f32 %v4884_v62, 0.0 }
0x1f8c   :  { %6639 = vmatmul.msk.f32.gmra.mxu2 %vm951_vm15, %v4889_v39  ;;  %v7321_v39 = vld [vmem:[%s11737_s3 + $0xd8] sm:$0xff] }
0x1ff7   :  { %v4920_v27 = vpop.f32.mrf.mxu2 }
0x1ff8   :  { %v4921_v52 = vadd.f32 %v4920_v27, %v4890_v22  ;;  %v7322_v27 = vld [vmem:[%s11737_s3 + $0x50] sm:$0xff] }
0x1ffa   :  { %v4932_v15 = vadd.f32 %v4921_v52, %v10948_v19  ;;  %v7323_v52 = vld [vmem:[%s11737_s3 + $0xd0] sm:$0xff] }
0x1ffc   :  { %v4936_v17 = vsel %vm144_vm0, %v4932_v15, 0.0 }
0x1ffd   :  { %4937 = vadd.xlane.f32.xlu2 %v4936_v17 }
0x1fff   :  { %v4923_v28 = vpop.f32.mrf.mxu2 }
0x2000   :  { %v4924_v37 = vadd.f32 %v4923_v28, %v4890_v22  ;;  %v7324_v28 = vld [vmem:[%s11737_s3 + $0x48] sm:$0xff] }
0x2002   :  { %v4933_v14 = vadd.f32 %v4924_v37, %v4813_v60 }
0x2004   :  { %v4939_v23 = vsel %vm144_vm0, %v4933_v14, 0.0 }
0x2005   :  { %4940 = vadd.xlane.f32.xlu0 %v4939_v23  ;;  %v7326_v23 = vld [vmem:[%s11737_s3 + $0x40] sm:$0xff] }
0x2007   :  { %v4926_v10 = vpop.f32.mrf.mxu2 }
0x2008   :  { %v4927_v53 = vadd.f32 %v4926_v10, %v4890_v22 }
0x200a   :  { %v4934_v61 = vadd.f32 %v4927_v53, %v4814_v34  ;;  %v6649_v34 = vld [vmem:[%s11732_s5 + $0x2a8] sm:$0xff]  ;;  %v7327_v53 = vld [vmem:[%s11737_s3 + $0xc0] sm:$0xff] }
0x200b   :  { %6688 = vmatpush.xpose.msk.msra.mxu0 %vm144_vm0, %v6649_v34 }
0x200c   :  { %v4942_v11 = vsel %vm144_vm0, %v4934_v61, 0.0 }
0x200d   :  { %4943 = vadd.xlane.f32.xlu1 %v4942_v11 }
0x200f   :  { %v4929_v35 = vpop.f32.mrf.mxu2  ;;  %6689 = vmatpush.xpose.msk.msra.mxu0 %vm144_vm0, %v6648_v38 }
0x2010   :  { %v4930_v18 = vadd.f32 %v4929_v35, %v4890_v22 }
0x2012   :  { %v4935_v25 = vadd.f32 %v4930_v18, %v4815_v1  ;;  %v6652_v1 = vld [vmem:[%s11732_s5 + $0x2c0] sm:$0xff]  ;;  %v7329_v18 = vld [vmem:[%s11737_s3 + $0xb8] sm:$0xff] }
0x2013   :  { %6697 = vmatpush.xpose.msk.msrb.mxu1 %vm144_vm0, %v6652_v1  ;;  %5480 = vmatpush.msrb.mxu0 %v7312_v26  ;;  %v7341_v26 = vld [vmem:[%s11737_s3 + $0x8] sm:$0xff] }
0x2014   :  { %v4945_v6 = vsel %vm144_vm0, %v4935_v25, 0.0 }
0x2015   :  { %4946 = vadd.xlane.f32.xlu2 %v4945_v6  ;;  %5481 = vmatpush.msrb.mxu0 %v7314_v59  ;;  %v7330_v6 = vld [vmem:[%s11737_s3 + $0x30] sm:$0xff] }
0x2017   :  { %5509 = vmatpush.msra.mxu1 %v7313_v47  ;;  %5482 = vmatpush.msrb.mxu0 %v7316_v31 }
0x2019   :  { %5510 = vmatpush.msra.mxu1 %v7315_v45  ;;  %5483 = vmatpush.msrb.mxu0 %v7318_v50  ;;  %v7345_v50 = vld [vmem:[%s11738_s4] sm:$0xff] }
0x201b   :  { %5511 = vmatpush.msra.mxu1 %v7317_v48  ;;  %5484 = vmatpush.msrb.mxu0 %v7320_v58  ;;  %v7344_v48 = vld [vmem:[%s11737_s3 + $0x80] sm:$0xff] }
0x201d   :  { %5512 = vmatpush.msra.mxu1 %v7319_v21  ;;  %5485 = vmatpush.msrb.mxu0 %v7322_v27 }
0x201f   :  { %5513 = vmatpush.msra.mxu1 %v7321_v39  ;;  %5486 = vmatpush.msrb.mxu0 %v7324_v28 }
0x2021   :  { %5514 = vmatpush.msra.mxu1 %v7323_v52  ;;  %5487 = vmatpush.msrb.mxu0 %v7326_v23 }
0x2070   :  { %v4938_v42 = vpop.xlane.xlu2 %4937 }
0x2071   :  { %v4948_v49 = vmul.f32 %v4938_v42, %v8134_v5 }
0x2073   :  { %v10991_v19 = vsub.f32 %v4932_v15, %v4948_v49 }
0x2075   :  { %v4956_v30 = vmul.f32 %v10991_v19, %v10991_v19 }
0x2077   :  { %v4960_v44 = vsel %vm144_vm0, %v4956_v30, 0.0 }
0x2078   :  { %4961 = vadd.xlane.f32.xlu0 %v4960_v44  ;;  %v4941_v33 = vpop.xlane.xlu0 %4940  ;;  %v7332_v44 = vld [vmem:[%s11737_s3 + $0x28] sm:$0xff] }
0x2079   :  { %v4949_v29 = vmul.f32 %v4941_v33, %v8134_v5  ;;  %v6546_v33 = vld [vmem:[%s11734_s7 + $0x48] sm:$0xff] }
0x207b   :  { %v10997_v54 = vsub.f32 %v4933_v14, %v4949_v29  ;;  %v7325_v14 = vld [vmem:[%s11737_s3 + $0xc8] sm:$0xff] }
0x207c   :  { %5515 = vmatpush.msra.mxu1 %v7325_v14 }
0x207d   :  { %v4957_v4 = vmul.f32 %v10997_v54, %v10997_v54 }
0x207e   :  { %5516 = vmatpush.msra.mxu1 %v7327_v53 }
0x207f   :  { %v4963_v24 = vsel %vm144_vm0, %v4957_v4, 0.0 }
0x2080   :  { %v4944_v43 = vpop.xlane.xlu1 %4943  ;;  %4964 = vadd.xlane.f32.xlu1 %v4963_v24  ;;  %5517 = vmatpush.msra.mxu1 %v7329_v18  ;;  %v7333_v24 = vld [vmem:[%s11737_s3 + $0xa8] sm:$0xff] }
0x2081   :  { %v4950_v2 = vmul.f32 %v4944_v43, %v8134_v5  ;;  %v7334_v43 = vld [vmem:[%s11734_s7 + $0x40] sm:$0xff] }
0x2082   :  { %5518 = vmatpush.msra.mxu1 %v7331_v20  ;;  %v11249_v20 = vld [vmem:[%s11734_s7 + $0x50] sm:$0xff] }
0x2083   :  { %v11003_v12 = vsub.f32 %v4934_v61, %v4950_v2  ;;  %v7328_v61 = vld [vmem:[%s11737_s3 + $0x38] sm:$0xff]  ;;  %v11139_v2 = vperm.slane %v7334_v43, 7 }
0x2084   :  { %5488 = vmatpush.msrb.mxu0 %v7328_v61  ;;  %5519 = vmatpush.msra.mxu1 %v7333_v24 }
0x2085   :  { %v4958_v63 = vmul.f32 %v11003_v12, %v11003_v12 }
0x2086   :  { %5489 = vmatpush.msrb.mxu0 %v7330_v6 }
0x2087   :  { %v4966_v56 = vsel %vm144_vm0, %v4958_v63, 0.0  ;;  %v7335_v63 = vld [vmem:[%s11737_s3 + $0x20] sm:$0xff] }
0x2088   :  { %v4947_v0 = vpop.xlane.xlu2 %4946  ;;  %4967 = vadd.xlane.f32.xlu2 %v4966_v56  ;;  %5490 = vmatpush.msrb.mxu0 %v7332_v44 }
0x2089   :  { %v4951_v60 = vmul.f32 %v4947_v0, %v8134_v5 }
0x208a   :  { %5491 = vmatpush.msrb.mxu0 %v7335_v63 }
0x208b   :  { %v11009_v16 = vsub.f32 %v4935_v25, %v4951_v60  ;;  %v7336_v60 = vld [vmem:[%s11737_s3 + $0xa0] sm:$0xff] }
0x208c   :  { %5520 = vmatpush.msra.mxu1 %v7336_v60  ;;  %5492 = vmatpush.msrb.mxu0 %v7337_v9  ;;  %v7348_v9 = vld [vmem:[%s11735_s2 + $0x70] sm:$0xff] }
0x208d   :  { %v4959_v8 = vmul.f32 %v11009_v16, %v11009_v16 }
0x208e   :  { %5521 = vmatpush.msra.mxu1 %v7338_v32 }
0x208f   :  { %v4969_v41 = vsel %vm144_vm0, %v4959_v8, 0.0  ;;  %v11149_v8 = vperm.slane %v6546_v33, 0 }
0x2090   :  { %4970 = vadd.xlane.f32.xlu0 %v4969_v41  ;;  %5522 = vmatpush.msra.mxu1 %v7340_v40  ;;  %v7351_v40 = vld [vmem:[%s11735_s2 + $0x60] sm:$0xff] }
0x20eb   :  { %v4962_v55 = vpop.xlane.xlu0 %4961 }
0x20ec   :  { %v4972_v7 = vmul.f32 %v4962_v55, %v8134_v5 }
0x20ee   :  { %v4976_v46 = vadd.f32 1e-05, %v4972_v7  ;;  %v7342_v7 = vld [vmem:[%s11737_s3 + $0x88] sm:$0xff] }
0x20ef   :  { %5523 = vmatpush.msra.mxu1 %v7342_v7  ;;  %v7353_v7 = vld [vmem:[%s11735_s2 + $0x58] sm:$0xff] }
0x20f0   :  { %6988 = vrsqrt.f32 %v4976_v46  ;;  %vm4986_vm8 = vweird.f32 %v4976_v46 }
0x20f1   :  { %5524 = vmatpush.msra.mxu1 %v7344_v48  ;;  %v11327_v48 = vld [vmem:[%s11735_s2 + $0xe0] sm:$0xff] }
0x20f3   :  { %v4965_v62 = vpop.xlane.xlu1 %4964 }
0x20f4   :  { %v4973_v22 = vmul.f32 %v4965_v62, %v8134_v5 }
0x20f6   :  { %v6989_v15 = vpop.eup %6988  ;;  %v11096_v17 = vadd.f32 1e-05, %v4973_v22 }
0x20f7   :  { %v4981_v37 = vmul.f32 %v6989_v15, %v4976_v46  ;;  %vm4987_vm7 = vweird.f32 %v6989_v15  ;;  %v7343_v46 = vld [vmem:[%s11737_s3] sm:$0xff] }
0x20f8   :  { %6990 = vrsqrt.f32 %v11096_v17  ;;  %vm4988_vm9 = vmor %vm4986_vm8, %vm4987_vm7  ;;  %vm4996_vm11 = vweird.f32 %v11096_v17 }
0x20f9   :  { %v4982_v10 = vmul.f32 %v6989_v15, %v4981_v37 }
0x20fb   :  { %v4983_v11 = vmul.f32 0.5, %v4982_v10  ;;  %v4968_v35 = vpop.xlane.xlu2 %4967 }
0x20fc   :  { %v4974_v25 = vmul.f32 %v4968_v35, %v8134_v5 }
0x20fd   :  { %v4984_v42 = vsub.f32 1.5, %v4983_v11 }
0x20fe   :  { %v6991_v49 = vpop.eup %6990  ;;  %v11124_v30 = vadd.f32 1e-05, %v4974_v25 }
0x20ff   :  { %v4985_v29 = vmul.f32 %v6989_v15, %v4984_v42  ;;  %v4991_v4 = vmul.f32 %v6991_v49, %v11096_v17  ;;  %vm4997_vm10 = vweird.f32 %v6991_v49 }
0x2100   :  { %6992 = vrsqrt.f32 %v11124_v30  ;;  %vm4998_vm12 = vmor %vm4996_vm11, %vm4997_vm10  ;;  %vm5006_vm14 = vweird.f32 %v11124_v30 }
0x2101   :  { %v4989_v56 = vsel %vm4988_vm9, %v6989_v15, %v4985_v29  ;;  %v4992_v0 = vmul.f32 %v6991_v49, %v4991_v4 }
0x2102   :  { %v5020_v41 = vmul.f32 %v4989_v56, %v10991_v19  ;;  %v7339_v19 = vld [vmem:[%s11737_s3 + $0x10] sm:$0xff]  ;;  %v11268_v56 = vld [vmem:[%s11735_s2 + $0xf8] sm:$0xff] }
0x2103   :  { %v4993_v57 = vmul.f32 0.5, %v4992_v0  ;;  %v4971_v13 = vpop.xlane.xlu0 %4970  ;;  %5493 = vmatpush.msrb.mxu0 %v7339_v19  ;;  %v7350_v19 = vld [vmem:[%s11735_s2 + $0x68] sm:$0xff] }
0x2104   :  { %v5025_v51 = vmul.f32 %v11139_v2, %v5020_v41  ;;  %v4975_v34 = vmul.f32 %v4971_v13, %v8134_v5 }
0x2105   :  { %v4994_v3 = vsub.f32 1.5, %v4993_v57  ;;  %5494 = vmatpush.msrb.mxu0 %v7341_v26 }
0x2106   :  { %v6993_v38 = vpop.eup %6992  ;;  %v11167_v36 = vadd.f32 %v11149_v8, %v5025_v51  ;;  %v4979_v1 = vadd.f32 1e-05, %v4975_v34  ;;  %v11289_v51 = vld [vmem:[%s11735_s2 + $0xf0] sm:$0xff] }
0x2107   :  { %v4995_v55 = vmul.f32 %v6991_v49, %v4994_v3  ;;  %v5001_v47 = vmul.f32 %v6993_v38, %v11124_v30  ;;  %5495 = vmatpush.msrb.mxu0 %v7343_v46  ;;  %vm5007_vm13 = vweird.f32 %v6993_v38  ;;  %v5172_v30 = vperm.slane %v11249_v20, 2 }
0x2108   :  { %6640 = vst.msk [vmem:[%s11741_s9 + $0x80] sm:$0xff] %vm144_vm0, %v11167_v36  ;;  %6994 = vrsqrt.f32 %v4979_v1  ;;  %6682 = vmatmul.msk.f32.vlgmr.msrb.gmra.mxu3 %vm144_vm0, %v11167_v36  ;;  %6690 = vmatmul.msk.f32.vlgmr.msra.gmra.mxu0 %vm144_vm0, %v11167_v36  ;;  %vm5008_vm2 = vmor %vm5006_vm14, %vm5007_vm13  ;;  %vm5016_vm4 = vweird.f32 %v4979_v1 }
0x2109   :  { %v4999_v59 = vsel %vm4998_vm12, %v6991_v49, %v4995_v55  ;;  %v5002_v45 = vmul.f32 %v6993_v38, %v5001_v47  ;;  %6698 = vmatmul.msk.f32.vlgmr.msrb.gmra.mxu1 %vm144_vm0, %v11167_v36  ;;  %5569 = vmatpush.msra.mxu0 %v7345_v50  ;;  %v5130_v49 = vperm.slane %v11249_v20, 1  ;;  %v11309_v55 = vld [vmem:[%s11735_s2 + $0xe8] sm:$0xff] }
0x210a   :  { %v5021_v31 = vmul.f32 %v4999_v59, %v10997_v54 }
0x210b   :  { %v5003_v21 = vmul.f32 0.5, %v5002_v45  ;;  %v7354_v45 = vld [vmem:[%s11735_s2 + $0x50] sm:$0xff] }
0x210c   :  { %v5026_v58 = vmul.f32 %v11139_v2, %v5021_v31 }
0x210d   :  { %v5004_v62 = vsub.f32 1.5, %v5003_v21  ;;  %v7356_v21 = vld [vmem:[%s11735_s2 + $0x48] sm:$0xff] }
0x210e   :  { %v6995_v39 = vpop.eup %6994  ;;  %v11200_v22 = vadd.f32 %v11149_v8, %v5026_v58 }
0x210f   :  { %v5005_v54 = vmul.f32 %v6993_v38, %v5004_v62  ;;  %v5011_v27 = vmul.f32 %v6995_v39, %v4979_v1  ;;  %vm5017_vm3 = vweird.f32 %v6995_v39  ;;  %v7357_v62 = vld [vmem:[%s11735_s2 + $0x40] sm:$0xff] }
0x2110   :  { %6641 = vst.msk [vmem:[%s11741_s9 + $0x88] sm:$0xff] %vm144_vm0, %v11200_v22  ;;  %6683 = vmatmul.msk.f32.gmra.mxu3 %vm144_vm0, %v11200_v22  ;;  %6691 = vmatmul.msk.f32.gmra.mxu0 %vm144_vm0, %v11200_v22  ;;  %vm5018_vm5 = vmor %vm5016_vm4, %vm5017_vm3 }
0x2111   :  { %v5009_v52 = vsel %vm5008_vm2, %v6993_v38, %v5005_v54  ;;  %v5012_v15 = vmul.f32 %v6995_v39, %v5011_v27  ;;  %6699 = vmatmul.msk.f32.gmra.mxu1 %vm144_vm0, %v11200_v22  ;;  %v11345_v27 = vld [vmem:[%s11735_s2 + $0xd8] sm:$0xff] }
0x2112   :  { %v5022_v17 = vmul.f32 %v5009_v52, %v11003_v12 }
0x2113   :  { %v5013_v28 = vmul.f32 0.5, %v5012_v15  ;;  %v7359_v15 = vld [vmem:[%s11735_s2 + $0x38] sm:$0xff] }
0x2114   :  { %v5027_v37 = vmul.f32 %v11139_v2, %v5022_v17 }
0x2115   :  { %v5014_v14 = vsub.f32 1.5, %v5013_v28  ;;  %v7360_v28 = vld [vmem:[%s11735_s2 + $0x30] sm:$0xff] }
0x2116   :  { %v11217_v23 = vadd.f32 %v11149_v8, %v5027_v37 }
0x2117   :  { %v5015_v10 = vmul.f32 %v6995_v39, %v5014_v14 }
0x2118   :  { %6642 = vst.msk [vmem:[%s11741_s9 + $0x90] sm:$0xff] %vm144_vm0, %v11217_v23  ;;  %6684 = vmatmul.msk.f32.gmra.mxu3 %vm144_vm0, %v11217_v23  ;;  %6692 = vmatmul.msk.f32.gmra.mxu0 %vm144_vm0, %v11217_v23 }
0x2119   :  { %v5019_v12 = vsel %vm5018_vm5, %v6995_v39, %v5015_v10  ;;  %6700 = vmatmul.msk.f32.gmra.mxu1 %vm144_vm0, %v11217_v23  ;;  %v11363_v10 = vld [vmem:[%s11735_s2 + $0xd0] sm:$0xff] }
0x211a   :  { %v5023_v53 = vmul.f32 %v5019_v12, %v11009_v16 }
0x211c   :  { %v5028_v61 = vmul.f32 %v11139_v2, %v5023_v53  ;;  %v7346_v2 = vld [vmem:[%s11735_s2 + $0x78] sm:$0xff]  ;;  %v7362_v53 = vld [vmem:[%s11735_s2 + $0x28] sm:$0xff] }
0x211e   :  { %v11233_v11 = vadd.f32 %v11149_v8, %v5028_v61 }
0x2120   :  { %6643 = vst.msk [vmem:[%s11741_s9 + $0x98] sm:$0xff] %vm144_vm0, %v11233_v11  ;;  %6685 = vmatmul.msk.f32.gmra.mxu3 %vm144_vm0, %v11233_v11  ;;  %6693 = vmatmul.msk.f32.gmra.mxu0 %vm144_vm0, %v11233_v11 }
0x2121   :  { %6701 = vmatmul.msk.f32.gmra.mxu1 %vm144_vm0, %v11233_v11 }
0x2185   :  { %v5160_v16 = vpop.f32.mrf.mxu0 }
0x2186   :  { %v5202_v35 = vpop.f32.mrf.mxu1  ;;  %v11303_v1 = vadd.f32 %v5160_v16, %v5130_v49  ;;  %v7363_v16 = vld [vmem:[%s11735_s2 + $0x20] sm:$0xff] }
0x2187   :  { %v11277_v41 = vadd.f32 %v5202_v35, %v5172_v30 }
0x2188   :  { %v5226_v31 = vmul.f32 %v7351_v40, %v11303_v1  ;;  %v5242_v50 = vmul.f32 %v11327_v48, %v11303_v1 }
0x2189   :  { %v5258_v38 = vmul.f32 %v7351_v40, %v11277_v41  ;;  %v5254_v39 = vmul.f32 %v7357_v62, %v11277_v41  ;;  %v5250_v35 = vmul.f32 %v7363_v16, %v11277_v41  ;;  %v11427_v40 = vld [vmem:[%s11735_s2 + $0xb0] sm:$0xff] }
0x218d   :  { %v5163_v18 = vpop.f32.mrf.mxu0 }
0x218e   :  { %v5205_v25 = vpop.f32.mrf.mxu1  ;;  %v11283_v13 = vadd.f32 %v5163_v18, %v5130_v49 }
0x218f   :  { %v11272_v60 = vadd.f32 %v5205_v25, %v5172_v30  ;;  %v11381_v25 = vld [vmem:[%s11735_s2 + $0xc8] sm:$0xff] }
0x2190   :  { %v5227_v26 = vmul.f32 %v7350_v19, %v11283_v13  ;;  %v5243_v47 = vmul.f32 %v11309_v55, %v11283_v13  ;;  %v5223_v18 = vmul.f32 %v7356_v21, %v11283_v13 }
0x2191   :  { %v5259_v3 = vmul.f32 %v7350_v19, %v11272_v60  ;;  %v5255_v58 = vmul.f32 %v7356_v21, %v11272_v60  ;;  %v5251_v61 = vmul.f32 %v7362_v53, %v11272_v60 }
0x2195   :  { %v5166_v6 = vpop.f32.mrf.mxu0 }
0x2196   :  { %v5208_v42 = vpop.f32.mrf.mxu1  ;;  %v11259_v43 = vadd.f32 %v5166_v6, %v5130_v49  ;;  %v5239_v6 = vmul.f32 %v11381_v25, %v11283_v13 }
0x2197   :  { %v11255_v4 = vadd.f32 %v5208_v42, %v5172_v30  ;;  %v7365_v42 = vld [vmem:[%s11735_s2 + $0x18] sm:$0xff] }
0x2198   :  { %v5228_v32 = vmul.f32 %v7348_v9, %v11259_v43  ;;  %v5244_v34 = vmul.f32 %v11289_v51, %v11259_v43  ;;  %v5224_v14 = vmul.f32 %v7354_v45, %v11259_v43  ;;  %v5240_v12 = vmul.f32 %v11363_v10, %v11259_v43 }
0x2199   :  { %v5260_v57 = vmul.f32 %v7348_v9, %v11255_v4  ;;  %v5256_v46 = vmul.f32 %v7354_v45, %v11255_v4  ;;  %v5252_v37 = vmul.f32 %v7360_v28, %v11255_v4  ;;  %v7369_v9 = vld [vmem:[%s11735_s2] sm:$0xff] }
0x219a   :  { %v7373_v45 = vld [vmem:[%s11735_s2 + $0xa0] sm:$0xff] }
0x219d   :  { %v5169_v44 = vpop.f32.mrf.mxu0 }
0x219e   :  { %v11253_v33 = vadd.f32 %v5169_v44, %v5130_v49  ;;  %v5211_v29 = vpop.f32.mrf.mxu1 }
0x219f   :  { %v11257_v24 = vadd.f32 %v5211_v29, %v5172_v30  ;;  %v7366_v30 = vld [vmem:[%s11735_s2 + $0x10] sm:$0xff]  ;;  %v5222_v29 = vmul.f32 %v7357_v62, %v11303_v1 }
0x21a0   :  { %v5229_v63 = vmul.f32 %v7346_v2, %v11253_v33  ;;  %v5245_v0 = vmul.f32 %v11268_v56, %v11253_v33  ;;  %v5225_v54 = vmul.f32 %v7353_v7, %v11253_v33  ;;  %v5241_v52 = vmul.f32 %v11345_v27, %v11253_v33  ;;  %v7375_v62 = vld [vmem:[%s11735_s2 + $0x90] sm:$0xff] }
0x21a1   :  { %v5261_v8 = vmul.f32 %v7346_v2, %v11257_v24  ;;  %v5257_v59 = vmul.f32 %v7353_v7, %v11257_v24  ;;  %v5253_v17 = vmul.f32 %v7359_v15, %v11257_v24  ;;  %v5249_v49 = vmul.f32 %v7365_v42, %v11257_v24  ;;  %v11399_v2 = vld [vmem:[%s11735_s2 + $0xc0] sm:$0xff] }
0x21a2   :  { %6702 = vmatpush.xpose.msk.msra.mxu2 %vm144_vm0, %v5229_v63  ;;  %6722 = vmatpush.xpose.msk.msra.mxu3 %vm144_vm0, %v5245_v0  ;;  %v5248_v44 = vmul.f32 %v7366_v30, %v11255_v4  ;;  %v5238_v63 = vmul.f32 %v11399_v2, %v11303_v1  ;;  %v7368_v0 = vld [vmem:[%s11735_s2 + $0x8] sm:$0xff] }
0x21a3   :  { %5583 = vmatpush.msrb.mxu1 %v5261_v8  ;;  %v5247_v8 = vmul.f32 %v7368_v0, %v11272_v60 }
0x21a5   :  { %5584 = vmatpush.msrb.mxu1 %v5260_v57  ;;  %v5246_v57 = vmul.f32 %v7369_v9, %v11277_v41 }
0x21a6   :  { %6703 = vmatpush.xpose.msk.msra.mxu2 %vm144_vm0, %v5228_v32  ;;  %6723 = vmatpush.xpose.msk.msra.mxu3 %vm144_vm0, %v5244_v34  ;;  %v5221_v32 = vmul.f32 %v7359_v15, %v11253_v33  ;;  %v11417_v34 = vld [vmem:[%s11735_s2 + $0xb8] sm:$0xff] }
0x21a7   :  { %5585 = vmatpush.msrb.mxu1 %v5259_v3  ;;  %v5237_v19 = vmul.f32 %v11417_v34, %v11253_v33  ;;  %v5220_v3 = vmul.f32 %v7360_v28, %v11259_v43  ;;  %v7377_v28 = vld [vmem:[%s11735_s2 + $0x80] sm:$0xff] }
0x21a9   :  { %5586 = vmatpush.msrb.mxu1 %v5258_v38  ;;  %v5236_v38 = vmul.f32 %v11427_v40, %v11259_v43 }
0x21aa   :  { %6704 = vmatpush.xpose.msk.msra.mxu2 %vm144_vm0, %v5227_v26  ;;  %6724 = vmatpush.xpose.msk.msra.mxu3 %vm144_vm0, %v5243_v47  ;;  %v5219_v26 = vmul.f32 %v7362_v53, %v11283_v13  ;;  %v7372_v47 = vld [vmem:[%s11735_s2 + $0xa8] sm:$0xff]  ;;  %v5276_v53 = vmul.f32 %v11289_v51, %v11255_v4  ;;  %v5272_v51 = vmul.f32 %v11363_v10, %v11255_v4 }
0x21ab   :  { %5587 = vmatpush.msrb.mxu1 %v5257_v59  ;;  %v5235_v7 = vmul.f32 %v7372_v47, %v11283_v13  ;;  %v5218_v59 = vmul.f32 %v7363_v16, %v11303_v1  ;;  %v5268_v10 = vmul.f32 %v11427_v40, %v11255_v4 }
0x21ad   :  { %5588 = vmatpush.msrb.mxu1 %v5256_v46  ;;  %v5234_v46 = vmul.f32 %v7373_v45, %v11303_v1 }
0x21ae   :  { %6705 = vmatpush.xpose.msk.msra.mxu2 %vm144_vm0, %v5226_v31  ;;  %6725 = vmatpush.xpose.msk.msra.mxu3 %vm144_vm0, %v5242_v50  ;;  %v5217_v31 = vmul.f32 %v7365_v42, %v11253_v33  ;;  %v7374_v50 = vld [vmem:[%s11735_s2 + $0x98] sm:$0xff]  ;;  %v5266_v42 = vmul.f32 %v7373_v45, %v11277_v41 }
0x21af   :  { %5589 = vmatpush.msrb.mxu1 %v5255_v58  ;;  %v5233_v21 = vmul.f32 %v7374_v50, %v11253_v33  ;;  %v5216_v58 = vmul.f32 %v7366_v30, %v11259_v43  ;;  %v7376_v33 = vld [vmem:[%s11735_s2 + $0x88] sm:$0xff] }
0x21b0   :  { %v5231_v15 = vmul.f32 %v7376_v33, %v11283_v13 }
0x21b1   :  { %5590 = vmatpush.msrb.mxu1 %v5254_v39  ;;  %v5232_v39 = vmul.f32 %v7375_v62, %v11259_v43  ;;  %v5214_v43 = vmul.f32 %v7369_v9, %v11303_v1 }
0x21b2   :  { %6706 = vmatpush.xpose.msk.msra.mxu2 %vm144_vm0, %v5225_v54  ;;  %6726 = vmatpush.xpose.msk.msra.mxu3 %vm144_vm0, %v5241_v52  ;;  %v5118_v54 = vpop.f32.mrf.mxu3  ;;  %v5215_v52 = vmul.f32 %v7368_v0, %v11283_v13 }
0x21b3   :  { %5591 = vmatpush.msrb.mxu1 %v5253_v17  ;;  %v5076_v17 = vperm.slane %v11249_v20, 0 }
0x21b5   :  { %5592 = vmatpush.msrb.mxu1 %v5252_v37  ;;  %v5230_v37 = vmul.f32 %v7377_v28, %v11303_v1  ;;  %v5119_v13 = vadd.f32 %v5118_v54, %v5076_v17  ;;  %v5275_v1 = vmul.f32 %v11309_v55, %v11272_v60  ;;  %v5271_v55 = vmul.f32 %v11381_v25, %v11272_v60 }
0x21b6   :  { %6707 = vmatpush.xpose.msk.msra.mxu2 %vm144_vm0, %v5224_v14  ;;  %6727 = vmatpush.xpose.msk.msra.mxu3 %vm144_vm0, %v5240_v12  ;;  %v5277_v14 = vmul.f32 %v11268_v56, %v11257_v24  ;;  %v5274_v56 = vmul.f32 %v11327_v48, %v11277_v41  ;;  %v5270_v48 = vmul.f32 %v11399_v2, %v11277_v41 }
0x21b7   :  { %5593 = vmatpush.msrb.mxu1 %v5251_v61  ;;  %v5273_v61 = vmul.f32 %v11345_v27, %v11257_v24  ;;  %v5269_v27 = vmul.f32 %v11417_v34, %v11257_v24  ;;  %v5267_v25 = vmul.f32 %v7372_v47, %v11272_v60  ;;  %v5262_v2 = vmul.f32 %v7377_v28, %v11277_v41  ;;  %v7380_v41 = vld [vmem:[%s11736_s1 + $0x10] sm:$0xff]  ;;  %v7382_v47 = vld [vmem:[%s11736_s1 + $0x20] sm:$0xff] }
0x21b9   :  { %5594 = vmatpush.msrb.mxu1 %v5250_v35 }
0x21ba   :  { %6708 = vmatpush.xpose.msk.msra.mxu2 %vm144_vm0, %v5223_v18  ;;  %6728 = vmatpush.xpose.msk.msra.mxu3 %vm144_vm0, %v5239_v6  ;;  %v5121_v12 = vpop.f32.mrf.mxu3 }
0x21bb   :  { %5595 = vmatpush.msrb.mxu1 %v5249_v49  ;;  %v5122_v16 = vadd.f32 %v5121_v12, %v5076_v17  ;;  %v5265_v49 = vmul.f32 %v7374_v50, %v11257_v24  ;;  %v7378_v24 = vld [vmem:[%s11736_s1] sm:$0xff] }
0x21bd   :  { %5596 = vmatpush.msrb.mxu1 %v5248_v44  ;;  %v5264_v44 = vmul.f32 %v7375_v62, %v11255_v4  ;;  %v7379_v4 = vld [vmem:[%s11736_s1 + $0x8] sm:$0xff]  ;;  %v7385_v62 = vld [vmem:[%s11736_s1 + $0x38] sm:$0xff] }
0x21be   :  { %6709 = vmatpush.xpose.msk.msra.mxu2 %vm144_vm0, %v5222_v29  ;;  %6729 = vmatpush.xpose.msk.msra.mxu3 %vm144_vm0, %v5238_v63  ;;  %v5263_v29 = vmul.f32 %v7376_v33, %v11272_v60 }
0x21bf   :  { %5597 = vmatpush.msrb.mxu1 %v5247_v8 }
0x21c1   :  { %5598 = vmatpush.msrb.mxu1 %v5246_v57 }
0x21c2   :  { %6710 = vmatpush.xpose.msk.msra.mxu2 %vm144_vm0, %v5221_v32  ;;  %6730 = vmatpush.xpose.msk.msra.mxu3 %vm144_vm0, %v5237_v19  ;;  %v5124_v35 = vpop.f32.mrf.mxu3  ;;  %v7381_v19 = vld [vmem:[%s11736_s1 + $0x18] sm:$0xff] }
0x21c3   :  { %v5125_v18 = vadd.f32 %v5124_v35, %v5076_v17 }
0x21c6   :  { %6711 = vmatpush.xpose.msk.msra.mxu2 %vm144_vm0, %v5220_v3  ;;  %6731 = vmatpush.xpose.msk.msra.mxu3 %vm144_vm0, %v5236_v38 }
0x21ca   :  { %6712 = vmatpush.xpose.msk.msra.mxu2 %vm144_vm0, %v5219_v26  ;;  %6732 = vmatpush.xpose.msk.msra.mxu3 %vm144_vm0, %v5235_v7  ;;  %v5127_v6 = vpop.f32.mrf.mxu3 }
0x21cb   :  { %v5128_v30 = vadd.f32 %v5127_v6, %v5076_v17 }
0x21ce   :  { %6713 = vmatpush.xpose.msk.msra.mxu2 %vm144_vm0, %v5218_v59  ;;  %6733 = vmatpush.xpose.msk.msra.mxu3 %vm144_vm0, %v5234_v46  ;;  %v7383_v59 = vld [vmem:[%s11736_s1 + $0x28] sm:$0xff] }
0x21d2   :  { %6714 = vmatpush.xpose.msk.msra.mxu2 %vm144_vm0, %v5217_v31  ;;  %6734 = vmatpush.xpose.msk.msra.mxu3 %vm144_vm0, %v5233_v21  ;;  %v7384_v21 = vld [vmem:[%s11736_s1 + $0x30] sm:$0xff] }
0x21d6   :  { %6715 = vmatpush.xpose.msk.msra.mxu2 %vm144_vm0, %v5216_v58  ;;  %6735 = vmatpush.xpose.msk.msra.mxu3 %vm144_vm0, %v5232_v39 }
0x21da   :  { %6716 = vmatpush.xpose.msk.msra.mxu2 %vm144_vm0, %v5215_v52  ;;  %6736 = vmatpush.xpose.msk.msra.mxu3 %vm144_vm0, %v5231_v15 }
0x21de   :  { %6717 = vmatpush.xpose.msk.msra.mxu2 %vm144_vm0, %v5214_v43  ;;  %6737 = vmatpush.xpose.msk.msra.mxu3 %vm144_vm0, %v5230_v37 }
0x21e1   :  { %6718 = vmatmul.msk.f32.vlgmr.msra.gmra.mxu2 %vm144_vm0, %v5119_v13  ;;  %6738 = vmatmul.msk.f32.vlgmr.msra.gmra.mxu3 %vm144_vm0, %v5119_v13 }
0x21e2   :  { %5612 = vmatpush.msrb.mxu2 %v5277_v14 }
0x21e4   :  { %5613 = vmatpush.msrb.mxu2 %v5276_v53 }
0x21e6   :  { %5614 = vmatpush.msrb.mxu2 %v5275_v1 }
0x21e8   :  { %5615 = vmatpush.msrb.mxu2 %v5274_v56 }
0x21e9   :  { %6719 = vmatmul.msk.f32.gmra.mxu2 %vm144_vm0, %v5122_v16  ;;  %6739 = vmatmul.msk.f32.gmra.mxu3 %vm144_vm0, %v5122_v16 }
0x21ea   :  { %5616 = vmatpush.msrb.mxu2 %v5273_v61 }
0x21ec   :  { %5617 = vmatpush.msrb.mxu2 %v5272_v51 }
0x21ee   :  { %5618 = vmatpush.msrb.mxu2 %v5271_v55 }
0x21f0   :  { %5619 = vmatpush.msrb.mxu2 %v5270_v48 }
0x21f1   :  { %6720 = vmatmul.msk.f32.gmra.mxu2 %vm144_vm0, %v5125_v18  ;;  %6740 = vmatmul.msk.f32.gmra.mxu3 %vm144_vm0, %v5125_v18 }
0x21f2   :  { %5620 = vmatpush.msrb.mxu2 %v5269_v27 }
0x21f4   :  { %5621 = vmatpush.msrb.mxu2 %v5268_v10 }
0x21f6   :  { %5622 = vmatpush.msrb.mxu2 %v5267_v25 }
0x21f8   :  { %5623 = vmatpush.msrb.mxu2 %v5266_v42 }
0x21f9   :  { %6721 = vmatmul.msk.f32.gmra.mxu2 %vm144_vm0, %v5128_v30  ;;  %6741 = vmatmul.msk.f32.gmra.mxu3 %vm144_vm0, %v5128_v30 }
0x21fa   :  { %5624 = vmatpush.msrb.mxu2 %v5265_v49 }
0x21fc   :  { %5625 = vmatpush.msrb.mxu2 %v5264_v44 }
0x21fe   :  { %5626 = vmatpush.msrb.mxu2 %v5263_v29 }
0x2200   :  { %5627 = vmatpush.msrb.mxu2 %v5262_v2 }
0x2264   :  { %v5403_v63 = vpop.f32.mrf.mxu2  ;;  %v5432_v0 = vpop.f32.mrf.mxu3 }
0x2265   :  { %v5404_v8 = vadd.f32 %v7378_v24, %v5403_v63  ;;  %v5433_v9 = vadd.f32 %v7379_v4, %v5432_v0 }
0x2267   :  { %v5444_v57 = vmax.f32 %v5404_v8, %v5433_v9 }
0x2269   :  { %5445 = vmax.xlane.f32.xlu1 %v5444_v57 }
0x226c   :  { %v5406_v32 = vpop.f32.mrf.mxu2  ;;  %v5435_v60 = vpop.f32.mrf.mxu3 }
0x226d   :  { %v5407_v34 = vadd.f32 %v7380_v41, %v5406_v32  ;;  %v5436_v3 = vadd.f32 %v7381_v19, %v5435_v60 }
0x226f   :  { %v5447_v40 = vmax.f32 %v5407_v34, %v5436_v3 }
0x2271   :  { %5448 = vmax.xlane.f32.xlu2 %v5447_v40  ;;  %v6659_v40 = vld [vmem:[%s11732_s5 + $0x2f8] sm:$0xff] }
0x2272   :  { %6746 = vmatpush.xpose.msk.msrb.mxu3 %vm144_vm0, %v6659_v40 }
0x2274   :  { %v5409_v38 = vpop.f32.mrf.mxu2  ;;  %v5438_v26 = vpop.f32.mrf.mxu3 }
0x2275   :  { %v5410_v7 = vadd.f32 %v7382_v47, %v5409_v38  ;;  %v5439_v45 = vadd.f32 %v7383_v59, %v5438_v26  ;;  %v6658_v38 = vld [vmem:[%s11732_s5 + $0x2f0] sm:$0xff]  ;;  %v6657_v26 = vld [vmem:[%s11732_s5 + $0x2e8] sm:$0xff] }
0x2276   :  { %6747 = vmatpush.xpose.msk.msrb.mxu3 %vm144_vm0, %v6658_v38  ;;  %v6666_v38 = vld [vmem:[%s11739_s6 + $0x2b0] sm:$0xff] }
0x2277   :  { %v5450_v46 = vmax.f32 %v5410_v7, %v5439_v45 }
0x2279   :  { %5451 = vmax.xlane.f32.xlu0 %v5450_v46 }
0x227a   :  { %6748 = vmatpush.xpose.msk.msrb.mxu3 %vm144_vm0, %v6657_v26  ;;  %v6665_v26 = vld [vmem:[%s11739_s6 + $0x2a8] sm:$0xff] }
0x227c   :  { %v5412_v31 = vpop.f32.mrf.mxu2  ;;  %v5441_v50 = vpop.f32.mrf.mxu3 }
0x227d   :  { %v5413_v58 = vadd.f32 %v7384_v21, %v5412_v31  ;;  %v5442_v39 = vadd.f32 %v7385_v62, %v5441_v50 }
0x227f   :  { %v5453_v54 = vmax.f32 %v5413_v58, %v5442_v39 }
0x2281   :  { %5454 = vmax.xlane.f32.xlu1 %v5453_v54 }
0x22dc   :  { %v5446_v52 = vpop.xlane.xlu1 %5445 }
0x22dd   :  { %v5456_v33 = vsub.f32 %v5404_v8, %v5446_v52  ;;  %v5457_v15 = vsub.f32 %v5433_v9, %v5446_v52 }
0x22df   :  { %v5464_v17 = vmul.f32 1.442695, %v5456_v33  ;;  %v5466_v43 = vmul.f32 1.442695, %v5457_v15 }
0x22e1   :  { %6996 = vpow2.f32 %v5464_v17 }
0x22e2   :  { %6998 = vpow2.f32 %v5466_v43 }
0x22e4   :  { %v5449_v28 = vpop.xlane.xlu2 %5448 }
0x22e5   :  { %v5458_v37 = vsub.f32 %v5407_v34, %v5449_v28  ;;  %v5459_v14 = vsub.f32 %v5436_v3, %v5449_v28 }
0x22e7   :  { %v6997_v13 = vpop.eup %6996  ;;  %v5468_v12 = vmul.f32 1.442695, %v5458_v37  ;;  %v5470_v53 = vmul.f32 1.442695, %v5459_v14 }
0x22e8   :  { %v6999_v1 = vpop.eup %6998  ;;  %5496 = vmatmul.f32.vlgmr.msrb.gmra.mxu0 %v6997_v13 }
0x22e9   :  { %7000 = vpow2.f32 %v5468_v12  ;;  %5525 = vmatmul.f32.vlgmr.msra.gmra.mxu1 %v6999_v1  ;;  %5628 = vmatmul.f32.vlgmr.msrb.gmra.mxu2 %v6999_v1 }
0x22ea   :  { %7002 = vpow2.f32 %v5470_v53  ;;  %v5645_v53 = vperm.slane %v11249_v20, 3 }
0x22ec   :  { %v5452_v56 = vpop.xlane.xlu0 %5451 }
0x22ed   :  { %v5460_v61 = vsub.f32 %v5410_v7, %v5452_v56  ;;  %v5461_v16 = vsub.f32 %v5439_v45, %v5452_v56  ;;  %v6656_v7 = vld [vmem:[%s11732_s5 + $0x2e0] sm:$0xff] }
0x22ee   :  { %6749 = vmatpush.xpose.msk.msrb.mxu3 %vm144_vm0, %v6656_v7  ;;  %v6663_v7 = vld [vmem:[%s11739_s6 + $0x298] sm:$0xff] }
0x22ef   :  { %v7001_v51 = vpop.eup %7000  ;;  %v5472_v35 = vmul.f32 1.442695, %v5460_v61  ;;  %v5474_v55 = vmul.f32 1.442695, %v5461_v16 }
0x22f0   :  { %v7003_v48 = vpop.eup %7002  ;;  %5499 = vmatmul.f32.gmra.mxu0 %v7001_v51 }
0x22f1   :  { %7004 = vpow2.f32 %v5472_v35  ;;  %5528 = vmatmul.f32.gmra.mxu1 %v7003_v48  ;;  %5631 = vmatmul.f32.gmra.mxu2 %v7003_v48 }
0x22f2   :  { %7006 = vpow2.f32 %v5474_v55 }
0x22f4   :  { %v5455_v27 = vpop.xlane.xlu1 %5454 }
0x22f5   :  { %v5462_v18 = vsub.f32 %v5413_v58, %v5455_v27  ;;  %v5463_v10 = vsub.f32 %v5442_v39, %v5455_v27 }
0x22f7   :  { %v7005_v25 = vpop.eup %7004  ;;  %v5476_v6 = vmul.f32 1.442695, %v5462_v18  ;;  %v5478_v42 = vmul.f32 1.442695, %v5463_v10 }
0x22f8   :  { %v7007_v49 = vpop.eup %7006  ;;  %5502 = vmatmul.f32.gmra.mxu0 %v7005_v25 }
0x22f9   :  { %7008 = vpow2.f32 %v5476_v6  ;;  %5531 = vmatmul.f32.gmra.mxu1 %v7007_v49  ;;  %5634 = vmatmul.f32.gmra.mxu2 %v7007_v49 }
0x22fa   :  { %7010 = vpow2.f32 %v5478_v42 }
0x22ff   :  { %v7009_v30 = vpop.eup %7008 }
0x2300   :  { %v7011_v44 = vpop.eup %7010  ;;  %5505 = vmatmul.f32.gmra.mxu0 %v7009_v30 }
0x2301   :  { %5534 = vmatmul.f32.gmra.mxu1 %v7011_v44  ;;  %5637 = vmatmul.f32.gmra.mxu2 %v7011_v44 }
0x2309   :  { %5599 = vmatmul.f32.vlgmr.msrb.gmra.mxu1 %v6997_v13 }
0x2311   :  { %5602 = vmatmul.f32.gmra.mxu1 %v7001_v51 }
0x2319   :  { %5605 = vmatmul.f32.gmra.mxu1 %v7005_v25 }
0x2321   :  { %5608 = vmatmul.f32.gmra.mxu1 %v7009_v30 }
0x2365   :  { %v5497_v29 = vpop.f32.mrf.mxu0 }
0x2366   :  { %v5526_v2 = vpop.f32.mrf.mxu1 }
0x2367   :  { %v5527_v63 = vadd.f32 %v5526_v2, %v5497_v29 }
0x2369   :  { %7012 = vrcp.f32 %v5527_v63 }
0x236c   :  { %v5629_v45 = vpop.f32.mrf.mxu2 }
0x236d   :  { %v5500_v0 = vpop.f32.mrf.mxu0 }
0x236e   :  { %v5529_v24 = vpop.f32.mrf.mxu1 }
0x236f   :  { %v7013_v8 = vpop.eup %7012  ;;  %v5530_v4 = vadd.f32 %v5529_v24, %v5500_v0 }
0x2370   :  { %6742 = vmatmul.msk.f32.vlgmr.msra.gmra.mxu0 %vm610_vm1, %v7013_v8 }
0x2371   :  { %7014 = vrcp.f32 %v5530_v4 }
0x2374   :  { %v5632_v58 = vpop.f32.mrf.mxu2 }
0x2375   :  { %v5503_v9 = vpop.f32.mrf.mxu0 }
0x2376   :  { %v5532_v57 = vpop.f32.mrf.mxu1 }
0x2377   :  { %v7015_v32 = vpop.eup %7014  ;;  %v5533_v60 = vadd.f32 %v5532_v57, %v5503_v9 }
0x2378   :  { %6743 = vmatmul.msk.f32.gmra.mxu0 %vm610_vm1, %v7015_v32 }
0x2379   :  { %7016 = vrcp.f32 %v5533_v60 }
0x237c   :  { %v5635_v33 = vpop.f32.mrf.mxu2 }
0x237d   :  { %v5506_v41 = vpop.f32.mrf.mxu0 }
0x237e   :  { %v5535_v34 = vpop.f32.mrf.mxu1 }
0x237f   :  { %v7017_v19 = vpop.eup %7016  ;;  %v5536_v3 = vadd.f32 %v5535_v34, %v5506_v41 }
0x2380   :  { %6744 = vmatmul.msk.f32.gmra.mxu0 %vm610_vm1, %v7017_v19 }
0x2381   :  { %7018 = vrcp.f32 %v5536_v3 }
0x2384   :  { %v5638_v37 = vpop.f32.mrf.mxu2 }
0x2386   :  { %v5600_v59 = vpop.f32.mrf.mxu1 }
0x2387   :  { %v7019_v47 = vpop.eup %7018  ;;  %v5630_v46 = vadd.f32 %v5629_v45, %v5600_v59  ;;  %v6662_v59 = vld [vmem:[%s11739_s6 + $0x290] sm:$0xff]  ;;  %v6661_v45 = vld [vmem:[%s11739_s6 + $0x288] sm:$0xff] }
0x2388   :  { %6745 = vmatmul.msk.f32.gmra.mxu0 %vm610_vm1, %v7019_v47  ;;  %v6664_v47 = vld [vmem:[%s11739_s6 + $0x2a0] sm:$0xff] }
0x238e   :  { %v5603_v31 = vpop.f32.mrf.mxu1 }
0x238f   :  { %v5633_v62 = vadd.f32 %v5632_v58, %v5603_v31 }
0x2396   :  { %v5606_v52 = vpop.f32.mrf.mxu1 }
0x2397   :  { %v5636_v15 = vadd.f32 %v5635_v33, %v5606_v52 }
0x239e   :  { %v5609_v28 = vpop.f32.mrf.mxu1 }
0x239f   :  { %v5639_v14 = vadd.f32 %v5638_v37, %v5609_v28 }
0x23ed   :  { %v5571_v50 = vpop.f32.mrf.mxu0 }
0x23ee   :  { %v5641_v21 = vmul.f32 %v5630_v46, %v5571_v50  ;;  %v6660_v46 = vld [vmem:[%s11739_s6 + $0x280] sm:$0xff] }
0x23f0   :  { %6750 = vmatmul.msk.f32.vlgmr.msrb.gmra.mxu3 %vm144_vm0, %v5641_v21 }
0x23f5   :  { %v5574_v39 = vpop.f32.mrf.mxu0 }
0x23f6   :  { %v5642_v54 = vmul.f32 %v5633_v62, %v5574_v39 }
0x23f8   :  { %6751 = vmatmul.msk.f32.gmra.mxu3 %vm144_vm0, %v5642_v54 }
0x23fd   :  { %v5577_v17 = vpop.f32.mrf.mxu0 }
0x23fe   :  { %v5643_v43 = vmul.f32 %v5636_v15, %v5577_v17 }
0x2400   :  { %6752 = vmatmul.msk.f32.gmra.mxu3 %vm144_vm0, %v5643_v43 }
0x2405   :  { %v5580_v13 = vpop.f32.mrf.mxu0 }
0x2406   :  { %v5644_v12 = vmul.f32 %v5639_v14, %v5580_v13 }
0x2408   :  { %6753 = vmatmul.msk.f32.gmra.mxu3 %vm144_vm0, %v5644_v12 }
0x2473   :  { %v5687_v1 = vpop.f32.mrf.mxu3 }
0x2474   :  { %v5688_v56 = vadd.f32 %v5687_v1, %v5645_v53  ;;  %v6675_v1 = vld [vmem:[%s11739_s6 + $0x2f8] sm:$0xff] }
0x2475   :  { %6779 = vmatpush.msra.mxu1 %v6675_v1 }
0x2476   :  { %v5699_v61 = vadd.f32 %v5688_v56, %v11167_v36  ;;  %v6674_v56 = vld [vmem:[%s11739_s6 + $0x2f0] sm:$0xff] }
0x2477   :  { %6780 = vmatpush.msra.mxu1 %v6674_v56 }
0x2478   :  { %v5703_v16 = vsel %vm144_vm0, %v5699_v61, 0.0 }
0x2479   :  { %5704 = vadd.xlane.f32.xlu2 %v5703_v16 }
0x247b   :  { %v5690_v51 = vpop.f32.mrf.mxu3 }
0x247c   :  { %v5691_v35 = vadd.f32 %v5690_v51, %v5645_v53  ;;  %v5796_v51 = vperm.slane %v11249_v20, 6 }
0x247e   :  { %v5700_v55 = vadd.f32 %v5691_v35, %v11200_v22  ;;  %v6667_v22 = vld [vmem:[%s11739_s6 + $0x2b8] sm:$0xff] }
0x247f   :  { %6755 = vmatpush.xpose.msk.msrb.mxu0 %vm144_vm0, %v6667_v22 }
0x2480   :  { %v5706_v48 = vsel %vm144_vm0, %v5700_v55, 0.0 }
0x2481   :  { %5707 = vadd.xlane.f32.xlu0 %v5706_v48 }
0x2483   :  { %v5693_v27 = vpop.f32.mrf.mxu3  ;;  %6756 = vmatpush.xpose.msk.msrb.mxu0 %vm144_vm0, %v6666_v38 }
0x2484   :  { %v5694_v18 = vadd.f32 %v5693_v27, %v5645_v53 }
0x2486   :  { %v5701_v10 = vadd.f32 %v5694_v18, %v11217_v23 }
0x2487   :  { %6757 = vmatpush.xpose.msk.msrb.mxu0 %vm144_vm0, %v6665_v26 }
0x2488   :  { %v5709_v25 = vsel %vm144_vm0, %v5701_v10, 0.0 }
0x2489   :  { %5710 = vadd.xlane.f32.xlu1 %v5709_v25  ;;  %v6672_v25 = vld [vmem:[%s11739_s6 + $0x2e0] sm:$0xff] }
0x248b   :  { %v5696_v6 = vpop.f32.mrf.mxu3  ;;  %6758 = vmatpush.xpose.msk.msrb.mxu0 %vm144_vm0, %v6664_v47 }
0x248c   :  { %v5697_v42 = vadd.f32 %v5696_v6, %v5645_v53  ;;  %v11627_v53 = vperm.slane %v11249_v20, 5 }
0x248e   :  { %v5702_v36 = vadd.f32 %v5697_v42, %v11233_v11 }
0x248f   :  { %6759 = vmatpush.xpose.msk.msrb.mxu0 %vm144_vm0, %v6663_v7 }
0x2490   :  { %v5712_v49 = vsel %vm144_vm0, %v5702_v36, 0.0 }
0x2491   :  { %5713 = vadd.xlane.f32.xlu2 %v5712_v49 }
0x2493   :  { %6760 = vmatpush.xpose.msk.msrb.mxu0 %vm144_vm0, %v6662_v59 }
0x2497   :  { %6761 = vmatpush.xpose.msk.msrb.mxu0 %vm144_vm0, %v6661_v45 }
0x249b   :  { %6762 = vmatpush.xpose.msk.msrb.mxu0 %vm144_vm0, %v6660_v46  ;;  %v6669_v46 = vld [vmem:[%s11739_s6 + $0x2c8] sm:$0xff] }
0x249f   :  { %5896 = vmatpush.msra.mxu0 %v6675_v1 }
0x24a1   :  { %5897 = vmatpush.msra.mxu0 %v6674_v56 }
0x24ec   :  { %v5705_v30 = vpop.xlane.xlu2 %5704 }
0x24ed   :  { %v5715_v44 = vmul.f32 %v5705_v30, %v8134_v5  ;;  %v6671_v30 = vld [vmem:[%s11739_s6 + $0x2d8] sm:$0xff] }
0x24ef   :  { %v11572_v23 = vsub.f32 %v5699_v61, %v5715_v44 }
0x24f1   :  { %v5723_v29 = vmul.f32 %v11572_v23, %v11572_v23 }
0x24f3   :  { %v5727_v2 = vsel %vm144_vm0, %v5723_v29, 0.0 }
0x24f4   :  { %5728 = vadd.xlane.f32.xlu0 %v5727_v2  ;;  %v5708_v11 = vpop.xlane.xlu0 %5707 }
0x24f5   :  { %v5716_v63 = vmul.f32 %v5708_v11, %v8134_v5 }
0x24f7   :  { %v11578_v0 = vsub.f32 %v5700_v55, %v5716_v63  ;;  %v6673_v55 = vld [vmem:[%s11739_s6 + $0x2e8] sm:$0xff] }
0x24f8   :  { %6781 = vmatpush.msra.mxu1 %v6673_v55  ;;  %5898 = vmatpush.msra.mxu0 %v6673_v55 }
0x24f9   :  { %v5724_v24 = vmul.f32 %v11578_v0, %v11578_v0 }
0x24fa   :  { %6782 = vmatpush.msra.mxu1 %v6672_v25  ;;  %5899 = vmatpush.msra.mxu0 %v6672_v25 }
0x24fb   :  { %v5730_v8 = vsel %vm144_vm0, %v5724_v24, 0.0 }
0x24fc   :  { %5731 = vadd.xlane.f32.xlu1 %v5730_v8  ;;  %v5711_v4 = vpop.xlane.xlu1 %5710  ;;  %6783 = vmatpush.msra.mxu1 %v6671_v30 }
0x24fd   :  { %v5717_v9 = vmul.f32 %v5711_v4, %v8134_v5  ;;  %5900 = vmatpush.msra.mxu0 %v6671_v30 }
0x24ff   :  { %v11584_v57 = vsub.f32 %v5701_v10, %v5717_v9 }
0x2501   :  { %v5725_v32 = vmul.f32 %v11584_v57, %v11584_v57 }
0x2503   :  { %v5733_v60 = vsel %vm144_vm0, %v5725_v32, 0.0 }
0x2504   :  { %5734 = vadd.xlane.f32.xlu2 %v5733_v60  ;;  %v5714_v41 = vpop.xlane.xlu2 %5713 }
0x2505   :  { %v5718_v34 = vmul.f32 %v5714_v41, %v8134_v5 }
0x2507   :  { %v11590_v19 = vsub.f32 %v5702_v36, %v5718_v34 }
0x2509   :  { %v5726_v3 = vmul.f32 %v11590_v19, %v11590_v19 }
0x250b   :  { %v5736_v40 = vsel %vm144_vm0, %v5726_v3, 0.0 }
0x250c   :  { %5737 = vadd.xlane.f32.xlu0 %v5736_v40 }
0x2567   :  { %v5729_v31 = vpop.xlane.xlu0 %5728 }
0x2568   :  { %v5739_v50 = vmul.f32 %v5729_v31, %v8134_v5  ;;  %v6668_v31 = vld [vmem:[%s11739_s6 + $0x2c0] sm:$0xff] }
0x256a   :  { %v5743_v21 = vadd.f32 1e-05, %v5739_v50 }
0x256c   :  { %7020 = vrsqrt.f32 %v5743_v21  ;;  %vm5753_vm6 = vweird.f32 %v5743_v21 }
0x256f   :  { %v5732_v58 = vpop.xlane.xlu1 %5731 }
0x2570   :  { %v5740_v62 = vmul.f32 %v5732_v58, %v8134_v5 }
0x2572   :  { %v7021_v39 = vpop.eup %7020  ;;  %v5744_v54 = vadd.f32 1e-05, %v5740_v62 }
0x2573   :  { %v5748_v52 = vmul.f32 %v7021_v39, %v5743_v21  ;;  %vm5754_vm1 = vweird.f32 %v7021_v39 }
0x2574   :  { %7022 = vrsqrt.f32 %v5744_v54  ;;  %vm5755_vm7 = vmor %vm5753_vm6, %vm5754_vm1  ;;  %vm5763_vm9 = vweird.f32 %v5744_v54 }
0x2575   :  { %v5749_v33 = vmul.f32 %v7021_v39, %v5748_v52 }
0x2577   :  { %v5750_v15 = vmul.f32 0.5, %v5749_v33  ;;  %v5735_v17 = vpop.xlane.xlu2 %5734 }
0x2578   :  { %v5741_v43 = vmul.f32 %v5735_v17, %v8134_v5 }
0x2579   :  { %v5751_v28 = vsub.f32 1.5, %v5750_v15 }
0x257a   :  { %v7023_v37 = vpop.eup %7022  ;;  %v5745_v14 = vadd.f32 1e-05, %v5741_v43 }
0x257b   :  { %v5752_v13 = vmul.f32 %v7021_v39, %v5751_v28  ;;  %v5758_v12 = vmul.f32 %v7023_v37, %v5744_v54  ;;  %vm5764_vm8 = vweird.f32 %v7023_v37 }
0x257c   :  { %7024 = vrsqrt.f32 %v5745_v14  ;;  %vm5765_vm10 = vmor %vm5763_vm9, %vm5764_vm8  ;;  %vm5773_vm12 = vweird.f32 %v5745_v14 }
0x257d   :  { %v5756_v61 = vsel %vm5755_vm7, %v7021_v39, %v5752_v13  ;;  %v5759_v16 = vmul.f32 %v7023_v37, %v5758_v12 }
0x257e   :  { %v5787_v35 = vmul.f32 %v5756_v61, %v11572_v23 }
0x257f   :  { %v5760_v48 = vmul.f32 0.5, %v5759_v16  ;;  %v5738_v27 = vpop.xlane.xlu0 %5737 }
0x2580   :  { %v5792_v18 = vmul.f32 %v11627_v53, %v5787_v35  ;;  %v5742_v10 = vmul.f32 %v5738_v27, %v8134_v5 }
0x2581   :  { %v5761_v6 = vsub.f32 1.5, %v5760_v48 }
0x2582   :  { %v7025_v42 = vpop.eup %7024  ;;  %v11645_v36 = vadd.f32 %v5796_v51, %v5792_v18  ;;  %v5746_v49 = vadd.f32 1e-05, %v5742_v10 }
0x2583   :  { %v5762_v22 = vmul.f32 %v7023_v37, %v5761_v6  ;;  %v5768_v44 = vmul.f32 %v7025_v42, %v5745_v14  ;;  %vm5774_vm11 = vweird.f32 %v7025_v42 }
0x2584   :  { %7026 = vrsqrt.f32 %v5746_v49  ;;  %6763 = vmatmul.msk.f32.vlgmr.msrb.gmra.mxu0 %vm144_vm0, %v11645_v36  ;;  %vm5775_vm13 = vmor %vm5773_vm12, %vm5774_vm11  ;;  %vm5783_vm2 = vweird.f32 %v5746_v49 }
0x2585   :  { %v5766_v23 = vsel %vm5765_vm10, %v7023_v37, %v5762_v22  ;;  %v5769_v29 = vmul.f32 %v7025_v42, %v5768_v44  ;;  %v5875_v37 = vperm.slane %v11249_v20, 4 }
0x2586   :  { %v5788_v2 = vmul.f32 %v5766_v23, %v11578_v0 }
0x2587   :  { %v5770_v11 = vmul.f32 0.5, %v5769_v29 }
0x2588   :  { %v5793_v63 = vmul.f32 %v11627_v53, %v5788_v2 }
0x2589   :  { %v5771_v24 = vsub.f32 1.5, %v5770_v11 }
0x258a   :  { %v7027_v8 = vpop.eup %7026  ;;  %v5798_v4 = vadd.f32 %v5796_v51, %v5793_v63 }
0x258b   :  { %v5772_v9 = vmul.f32 %v7025_v42, %v5771_v24  ;;  %v5778_v32 = vmul.f32 %v7027_v8, %v5746_v49  ;;  %vm5784_vm14 = vweird.f32 %v7027_v8 }
0x258c   :  { %6764 = vmatmul.msk.f32.gmra.mxu0 %vm144_vm0, %v5798_v4  ;;  %vm5785_vm3 = vmor %vm5783_vm2, %vm5784_vm14 }
0x258d   :  { %v5776_v60 = vsel %vm5775_vm13, %v7025_v42, %v5772_v9  ;;  %v5779_v41 = vmul.f32 %v7027_v8, %v5778_v32 }
0x258e   :  { %v5789_v34 = vmul.f32 %v5776_v60, %v11584_v57  ;;  %v6670_v57 = vld [vmem:[%s11739_s6 + $0x2d0] sm:$0xff] }
0x258f   :  { %v5780_v3 = vmul.f32 0.5, %v5779_v41  ;;  %5901 = vmatpush.msra.mxu0 %v6670_v57  ;;  %6784 = vmatpush.msra.mxu1 %v6670_v57 }
0x2590   :  { %v5794_v0 = vmul.f32 %v11627_v53, %v5789_v34 }
0x2591   :  { %v5781_v40 = vsub.f32 1.5, %v5780_v3  ;;  %5902 = vmatpush.msra.mxu0 %v6669_v46  ;;  %6785 = vmatpush.msra.mxu1 %v6669_v46 }
0x2592   :  { %v5799_v38 = vadd.f32 %v5796_v51, %v5794_v0 }
0x2593   :  { %v5782_v26 = vmul.f32 %v7027_v8, %v5781_v40  ;;  %5903 = vmatpush.msra.mxu0 %v6668_v31  ;;  %6786 = vmatpush.msra.mxu1 %v6668_v31 }
0x2594   :  { %6765 = vmatmul.msk.f32.gmra.mxu0 %vm144_vm0, %v5799_v38 }
0x2595   :  { %v5786_v47 = vsel %vm5785_vm3, %v7027_v8, %v5782_v26 }
0x2596   :  { %v5790_v7 = vmul.f32 %v5786_v47, %v11590_v19  ;;  %v6793_v19 = vld [vmem:[%s11740_s8 + $0x5] ss:$0 sm:$0xff] }
0x2598   :  { %v5795_v59 = vmul.f32 %v11627_v53, %v5790_v7 }
0x259a   :  { %v5800_v45 = vadd.f32 %v5796_v51, %v5795_v59 }
0x259c   :  { %6766 = vmatmul.msk.f32.gmra.mxu0 %vm144_vm0, %v5800_v45 }
0x2601   :  { %v5859_v50 = vpop.f32.mrf.mxu0 }
0x2602   :  { %v5860_v21 = vadd.f32 %v6793_v19, %v5859_v50 }
0x2604   :  { %v5871_v58 = vmax.f32 %v5860_v21, 0.0  ;;  %v6677_v21 = vld [vmem:[%s11734_s7 + $0x58] sm:$0xff] }
0x2606   :  { %6767 = vmatmul.msk.f32.vlgmr.msra.gmra.mxu0 %vm951_vm15, %v5871_v58 }
0x2609   :  { %v5862_v62 = vpop.f32.mrf.mxu0 }
0x260a   :  { %v5863_v39 = vadd.f32 %v6793_v19, %v5862_v62 }
0x260c   :  { %v5872_v54 = vmax.f32 %v5863_v39, 0.0  ;;  %v7386_v39 = vld [vmem:[%s11734_s7 + $0x50] sm:$0xff] }
0x260e   :  { %6768 = vmatmul.msk.f32.vlgmr.msra.gmra.mxu1 %vm951_vm15, %v5872_v54  ;;  %v6009_v54 = vperm.slane %v7386_v39, 7 }
0x2611   :  { %v5865_v52 = vpop.f32.mrf.mxu0 }
0x2612   :  { %v5866_v33 = vadd.f32 %v6793_v19, %v5865_v52 }
0x2614   :  { %v5873_v15 = vmax.f32 %v5866_v33, 0.0 }
0x2616   :  { %6769 = vmatmul.msk.f32.gmra.mxu1 %vm951_vm15, %v5873_v15  ;;  %v6014_v15 = vperm.slane %v6677_v21, 0 }
0x2619   :  { %v5868_v17 = vpop.f32.mrf.mxu0 }
0x261a   :  { %v5869_v43 = vadd.f32 %v6793_v19, %v5868_v17 }
0x261c   :  { %v5874_v28 = vmax.f32 %v5869_v43, 0.0 }
0x261e   :  { %6770 = vmatmul.msk.f32.gmra.mxu1 %vm951_vm15, %v5874_v28 }
0x2683   :  { %v5905_v14 = vpop.f32.mrf.mxu0 }
0x2684   :  { %v5906_v13 = vadd.f32 %v5905_v14, %v5875_v37 }
0x2686   :  { %v5917_v12 = vadd.f32 %v5906_v13, %v11645_v36 }
0x2688   :  { %v5921_v53 = vsel %vm144_vm0, %v5917_v12, 0.0 }
0x2689   :  { %5922 = vadd.xlane.f32.xlu1 %v5921_v53 }
0x268b   :  { %v5908_v1 = vpop.f32.mrf.mxu1 }
0x268c   :  { %v5909_v56 = vadd.f32 %v5908_v1, %v5875_v37 }
0x268e   :  { %v5918_v61 = vadd.f32 %v5909_v56, %v5798_v4 }
0x2690   :  { %v5924_v16 = vsel %vm144_vm0, %v5918_v61, 0.0 }
0x2691   :  { %5925 = vadd.xlane.f32.xlu2 %v5924_v16 }
0x2693   :  { %v5911_v51 = vpop.f32.mrf.mxu1 }
0x2694   :  { %v5912_v35 = vadd.f32 %v5911_v51, %v5875_v37 }
0x2696   :  { %v5919_v55 = vadd.f32 %v5912_v35, %v5799_v38 }
0x2698   :  { %v5927_v48 = vsel %vm144_vm0, %v5919_v55, 0.0 }
0x2699   :  { %5928 = vadd.xlane.f32.xlu0 %v5927_v48 }
0x269b   :  { %v5914_v20 = vpop.f32.mrf.mxu1 }
0x269c   :  { %v5915_v27 = vadd.f32 %v5914_v20, %v5875_v37 }
0x269e   :  { %v5920_v18 = vadd.f32 %v5915_v27, %v5800_v45 }
0x26a0   :  { %v5930_v10 = vsel %vm144_vm0, %v5920_v18, 0.0 }
0x26a1   :  { %5931 = vadd.xlane.f32.xlu1 %v5930_v10 }
0x26fc   :  { %v5923_v25 = vpop.xlane.xlu1 %5922 }
0x26fd   :  { %v5933_v6 = vmul.f32 %v5923_v25, %v8134_v5 }
0x26ff   :  { %v5937_v42 = vsub.f32 %v5917_v12, %v5933_v6 }
0x2701   :  { %v5941_v36 = vmul.f32 %v5937_v42, %v5937_v42 }
0x2703   :  { %v5945_v49 = vsel %vm144_vm0, %v5941_v36, 0.0 }
0x2704   :  { %5946 = vadd.xlane.f32.xlu2 %v5945_v49  ;;  %v5926_v30 = vpop.xlane.xlu2 %5925 }
0x2705   :  { %v5934_v22 = vmul.f32 %v5926_v30, %v8134_v5 }
0x2707   :  { %v11686_v44 = vsub.f32 %v5918_v61, %v5934_v22 }
0x2709   :  { %v5942_v23 = vmul.f32 %v11686_v44, %v11686_v44 }
0x270b   :  { %v5948_v29 = vsel %vm144_vm0, %v5942_v23, 0.0 }
0x270c   :  { %v5929_v2 = vpop.xlane.xlu0 %5928  ;;  %5949 = vadd.xlane.f32.xlu0 %v5948_v29 }
0x270d   :  { %v5935_v11 = vmul.f32 %v5929_v2, %v8134_v5 }
0x270f   :  { %v11692_v63 = vsub.f32 %v5919_v55, %v5935_v11 }
0x2711   :  { %v5943_v24 = vmul.f32 %v11692_v63, %v11692_v63 }
0x2713   :  { %v5951_v8 = vsel %vm144_vm0, %v5943_v24, 0.0 }
0x2714   :  { %v5932_v4 = vpop.xlane.xlu1 %5931  ;;  %5952 = vadd.xlane.f32.xlu1 %v5951_v8 }
0x2715   :  { %v5936_v9 = vmul.f32 %v5932_v4, %v8134_v5 }
0x2717   :  { %v11698_v32 = vsub.f32 %v5920_v18, %v5936_v9 }
0x2719   :  { %v5944_v60 = vmul.f32 %v11698_v32, %v11698_v32 }
0x271b   :  { %v5954_v41 = vsel %vm144_vm0, %v5944_v60, 0.0 }
0x271c   :  { %5955 = vadd.xlane.f32.xlu2 %v5954_v41 }
0x2777   :  { %v5947_v34 = vpop.xlane.xlu2 %5946 }
0x2778   :  { %v5957_v3 = vmul.f32 %v5947_v34, %v8134_v5 }
0x277a   :  { %v5961_v0 = vadd.f32 1e-05, %v5957_v3 }
0x277c   :  { %7028 = vrsqrt.f32 %v5961_v0  ;;  %vm5971_vm4 = vweird.f32 %v5961_v0 }
0x277f   :  { %v5950_v40 = vpop.xlane.xlu0 %5949 }
0x2780   :  { %v5958_v38 = vmul.f32 %v5950_v40, %v8134_v5 }
0x2782   :  { %v7029_v26 = vpop.eup %7028  ;;  %v5962_v47 = vadd.f32 1e-05, %v5958_v38 }
0x2783   :  { %v5966_v7 = vmul.f32 %v7029_v26, %v5961_v0  ;;  %vm5972_vm15 = vweird.f32 %v7029_v26 }
0x2784   :  { %7030 = vrsqrt.f32 %v5962_v47  ;;  %vm5973_vm5 = vmor %vm5971_vm4, %vm5972_vm15  ;;  %vm5981_vm6 = vweird.f32 %v5962_v47 }
0x2785   :  { %v5967_v59 = vmul.f32 %v7029_v26, %v5966_v7 }
0x2787   :  { %v5968_v45 = vmul.f32 0.5, %v5967_v59  ;;  %v5953_v57 = vpop.xlane.xlu1 %5952 }
0x2788   :  { %v5959_v46 = vmul.f32 %v5953_v57, %v8134_v5 }
0x2789   :  { %v5969_v31 = vsub.f32 1.5, %v5968_v45 }
0x278a   :  { %v7031_v19 = vpop.eup %7030  ;;  %v5963_v50 = vadd.f32 1e-05, %v5959_v46 }
0x278b   :  { %v5970_v58 = vmul.f32 %v7029_v26, %v5969_v31  ;;  %v5976_v62 = vmul.f32 %v7031_v19, %v5962_v47  ;;  %vm5982_vm1 = vweird.f32 %v7031_v19 }
0x278c   :  { %7032 = vrsqrt.f32 %v5963_v50  ;;  %vm5983_vm7 = vmor %vm5981_vm6, %vm5982_vm1  ;;  %vm5991_vm9 = vweird.f32 %v5963_v50 }
0x278d   :  { %v5974_v52 = vsel %vm5973_vm5, %v7029_v26, %v5970_v58  ;;  %v5977_v33 = vmul.f32 %v7031_v19, %v5976_v62 }
0x278e   :  { %v6005_v17 = vmul.f32 %v5974_v52, %v5937_v42 }
0x278f   :  { %v5978_v43 = vmul.f32 0.5, %v5977_v33  ;;  %v5956_v28 = vpop.xlane.xlu2 %5955 }
0x2790   :  { %v6010_v37 = vmul.f32 %v6009_v54, %v6005_v17  ;;  %v5960_v14 = vmul.f32 %v5956_v28, %v8134_v5 }
0x2791   :  { %v5979_v13 = vsub.f32 1.5, %v5978_v43 }
0x2792   :  { %v7033_v12 = vpop.eup %7032  ;;  %v6015_v53 = vadd.f32 %v6014_v15, %v6010_v37  ;;  %v5964_v1 = vadd.f32 1e-05, %v5960_v14 }
0x2793   :  { %v5980_v56 = vmul.f32 %v7031_v19, %v5979_v13  ;;  %v5986_v61 = vmul.f32 %v7033_v12, %v5963_v50  ;;  %vm5992_vm8 = vweird.f32 %v7033_v12 }
0x2794   :  { %6771 = vst.msk [vmem:[%s11741_s9 + $0xa0] sm:$0xff] %vm144_vm0, %v6015_v53  ;;  %7034 = vrsqrt.f32 %v5964_v1  ;;  %vm5993_vm10 = vmor %vm5991_vm9, %vm5992_vm8  ;;  %vm6001_vm12 = vweird.f32 %v5964_v1 }
0x2795   :  { %v5984_v16 = vsel %vm5983_vm7, %v7031_v19, %v5980_v56  ;;  %v5987_v51 = vmul.f32 %v7033_v12, %v5986_v61 }
0x2796   :  { %v6006_v35 = vmul.f32 %v5984_v16, %v11686_v44 }
0x2797   :  { %v5988_v5 = vmul.f32 0.5, %v5987_v51 }
0x2798   :  { %v6011_v55 = vmul.f32 %v6009_v54, %v6006_v35 }
0x2799   :  { %v5989_v48 = vsub.f32 1.5, %v5988_v5 }
0x279a   :  { %v7035_v20 = vpop.eup %7034  ;;  %v6016_v27 = vadd.f32 %v6014_v15, %v6011_v55 }
0x279b   :  { %v5990_v18 = vmul.f32 %v7033_v12, %v5989_v48  ;;  %v5996_v10 = vmul.f32 %v7035_v20, %v5964_v1  ;;  %vm6002_vm11 = vweird.f32 %v7035_v20 }
0x279c   :  { %6772 = vst.msk [vmem:[%s11741_s9 + $0xa8] sm:$0xff] %vm144_vm0, %v6016_v27  ;;  %vm6003_vm13 = vmor %vm6001_vm12, %vm6002_vm11 }
0x279d   :  { %v5994_v25 = vsel %vm5993_vm10, %v7033_v12, %v5990_v18  ;;  %v5997_v6 = vmul.f32 %v7035_v20, %v5996_v10 }
0x279e   :  { %v6007_v42 = vmul.f32 %v5994_v25, %v11692_v63 }
0x279f   :  { %v5998_v36 = vmul.f32 0.5, %v5997_v6 }
0x27a0   :  { %v6012_v49 = vmul.f32 %v6009_v54, %v6007_v42 }
0x27a1   :  { %v5999_v30 = vsub.f32 1.5, %v5998_v36 }
0x27a2   :  { %v6017_v22 = vadd.f32 %v6014_v15, %v6012_v49 }
0x27a3   :  { %v6000_v44 = vmul.f32 %v7035_v20, %v5999_v30 }
0x27a4   :  { %6773 = vst.msk [vmem:[%s11741_s9 + $0xb0] sm:$0xff] %vm144_vm0, %v6017_v22 }
0x27a5   :  { %v6004_v23 = vsel %vm6003_vm13, %v7035_v20, %v6000_v44 }
0x27a6   :  { %v6008_v29 = vmul.f32 %v6004_v23, %v11698_v32 }
0x27a8   :  { %v6013_v2 = vmul.f32 %v6009_v54, %v6008_v29 }
0x27aa   :  { %v6018_v11 = vadd.f32 %v6014_v15, %v6013_v2 }
0x27ac   :  { %6774 = vst.msk [vmem:[%s11741_s9 + $0xb8] sm:$0xff] %vm144_vm0, %v6018_v11 }

</bundles_post_ra>
